<compile_context>
chip_gen: v5e
topology: v5e:2x2
jax: 0.10.0
libtpu: 0.0.40
codegen_flags: <defaults>
</compile_context>

<pallas_src>
import functools
import math

import jax
import jax.numpy as jnp
from jax.experimental import pallas as pl
from jax.experimental.pallas import tpu as pltpu

LANES = 128


# ----------------------------- Pallas kernels ------------------------------ #

def _conv_pool_kernel(x_ref, w_ref, b_ref, o_ref, *, ow):
    """Fused matmul + bias + 2x2 maxpool + ReLU.

    x_ref: (TM, K) bf16 im2col rows, row order = (batch, oh, ow), TM a multiple
           of 2*ow (whole pooling row-pair groups, groups never cross batches).
    w_ref: (K, N) bf16, b_ref: (1, N) f32, o_ref: (TM // 4, N) pooled rows with
           row order (batch, oh//2, ow//2).
    """
    y = jnp.dot(x_ref[...], w_ref[...], preferred_element_type=jnp.float32)
    y = y + b_ref[...]
    tm, n = y.shape
    g = tm // (2 * ow)                               # pooling row-pair groups
    y = y.reshape(g, 2 * ow, n)
    y = jnp.maximum(y[:, :ow, :], y[:, ow:, :])      # max over the H pair
    y = y.reshape((g * ow) // 2, 2, n)
    y = jnp.maximum(y[:, 0, :], y[:, 1, :])          # max over the W pair
    y = jnp.maximum(y, 0.0)                          # ReLU (commutes with max)
    o_ref[...] = y.astype(o_ref.dtype)


def _tail_kernel(x_ref, w3_ref, b3_ref, w4_ref, b4_ref, w5_ref, b5_ref, o_ref):
    """Fused conv3(as a matmul)+ReLU -> linear1+ReLU -> linear2."""
    h = jnp.dot(x_ref[...], w3_ref[...], preferred_element_type=jnp.float32)
    h = jnp.maximum(h + b3_ref[...], 0.0).astype(jnp.bfloat16)
    h = jnp.dot(h, w4_ref[...], preferred_element_type=jnp.float32)
    h = jnp.maximum(h + b4_ref[...], 0.0).astype(jnp.bfloat16)
    h = jnp.dot(h, w5_ref[...], preferred_element_type=jnp.float32)
    o_ref[...] = (h + b5_ref[...]).astype(o_ref.dtype)


# --------------------------- weight / data plumbing ------------------------- #

def _pad_last(a, n):
    pad = n - a.shape[-1]
    if pad <= 0:
        return a
    return jnp.pad(a, [(0, 0)] * (a.ndim - 1) + [(0, pad)])


def _conv_weight_matrix(w, c_act, n_pad):
    """(O, C, kh, kw) torch conv weight -> (kh*kw*c_act, n_pad) bf16 matrix
    whose row order matches the NHWC im2col column order (kh, kw, c).
    The (tiny) weight is permuted/padded; the big activation is never."""
    o, c, kh, kw = w.shape
    wm = jnp.transpose(w, (2, 3, 1, 0))              # (kh, kw, C, O)
    if c_act > c:
        wm = jnp.pad(wm, ((0, 0), (0, 0), (0, c_act - c), (0, 0)))
    wm = wm.reshape(kh * kw * c_act, o)
    return _pad_last(wm, n_pad).astype(jnp.bfloat16)


def _fc_weight_matrix(w, k_pad, n_pad):
    """(out, in) torch linear weight -> (k_pad, n_pad) bf16 (zero padded)."""
    m = w.T
    m = jnp.pad(m, ((0, k_pad - m.shape[0]), (0, n_pad - m.shape[1])))
    return m.astype(jnp.bfloat16)


def _bias_row(b, n_pad):
    return _pad_last(b.astype(jnp.float32), n_pad).reshape(1, n_pad)


def _im2col_nhwc(x, kh, kw):
    """NHWC im2col via last-axis concatenation only (no big transposes).
    x: (B, H, W, C) -> cols (B*OH*OW, kh*kw*C) with column order (kh, kw, c)."""
    b, h, w, c = x.shape
    oh, ow = h - kh + 1, w - kw + 1
    cols = jnp.concatenate(
        [x[:, i:i + oh, j:j + ow, :] for i in range(kh) for j in range(kw)],
        axis=-1)
    return cols.reshape(b * oh * ow, kh * kw * c), oh, ow


def _choose_row_tile(m_rows, ow, bytes_per_row):
    """Largest row tile that (a) holds whole 2x2-pool row groups, (b) keeps the
    pooled output tile sublane aligned (tm % 32 == 0), (c) divides M exactly,
    and (d) stays VMEM-friendly on every generation (~4 MiB double-buffered
    input tile, <= 1024 rows).  Falls back to the whole array."""
    unit = (2 * ow) * 32 // math.gcd(2 * ow, 32)     # lcm(2*ow, 32)
    target = min(1024, max(unit, (4 << 20) // max(bytes_per_row, 1)))
    best = None
    t = unit
    while t <= m_rows:
        if t <= target and m_rows % t == 0:
            best = t
        t += unit
    return best if best is not None else m_rows


# ------------------------------ Pallas wrappers ----------------------------- #

def conv_pool_pallas(x_nhwc, w, b):
    """Fused valid conv (stride 1) + bias + ReLU + maxpool(2,2), NHWC.
    x_nhwc: (B, H, W, C_act) -> (B, OH//2, OW//2, 128) bf16, channel padded."""
    bsz, _, _, c_act = x_nhwc.shape
    _, _, kh, kw = w.shape
    n_pad = LANES
    cols, oh, ow = _im2col_nhwc(x_nhwc.astype(jnp.bfloat16), kh, kw)
    m, k = cols.shape
    wm = _conv_weight_matrix(w, c_act, n_pad)        # (K, 128) bf16
    bp = _bias_row(b, n_pad)                         # (1, 128) f32
    tm = _choose_row_tile(m, ow, k * 2)
    out = pl.pallas_call(
        functools.partial(_conv_pool_kernel, ow=ow),
        out_shape=jax.ShapeDtypeStruct((m // 4, n_pad), jnp.bfloat16),
        grid=(m // tm,),
        in_specs=[
            pl.BlockSpec((tm, k), lambda t: (t, 0)),
            pl.BlockSpec((k, n_pad), lambda t: (0, 0)),
            pl.BlockSpec((1, n_pad), lambda t: (0, 0)),
        ],
        out_specs=pl.BlockSpec((tm // 4, n_pad), lambda t: (t, 0)),
        compiler_params=pltpu.CompilerParams(
            dimension_semantics=("parallel",)),
        cost_estimate=pl.CostEstimate(
            flops=2 * m * k * n_pad,
            transcendentals=0,
            bytes_accessed=m * k * 2 + k * n_pad * 2 + (m // 4) * n_pad * 2),
    )(cols, wm, bp)
    return out.reshape(bsz, oh // 2, ow // 2, n_pad)


def tail_pallas(x_nhwc, w3, b3, wl1, bl1, wl2, bl2):
    """Fused conv3 (5x5 on a 5x5 map) + ReLU + linear1 + ReLU + linear2.
    Returns (B, 128) f32; columns >= num_classes are zero padding."""
    bsz, h, wd, c_act = x_nhwc.shape
    n_pad = LANES
    k = h * wd * c_act
    xt = x_nhwc.reshape(bsz, k).astype(jnp.bfloat16)
    w3m = _conv_weight_matrix(w3, c_act, n_pad)      # (K, 128)
    w4m = _fc_weight_matrix(wl1, n_pad, n_pad)       # (128, 128)
    w5m = _fc_weight_matrix(wl2, n_pad, n_pad)       # (128, 128)
    b3p, b4p, b5p = _bias_row(b3, n_pad), _bias_row(bl1, n_pad), _bias_row(bl2, n_pad)

    tm = bsz                                          # tile batch rows if possible
    for t in range(8, min(bsz, 512) + 1, 8):
        if bsz % t == 0:
            tm = t
    out = pl.pallas_call(
        _tail_kernel,
        out_shape=jax.ShapeDtypeStruct((bsz, n_pad), jnp.float32),
        grid=(bsz // tm,),
        in_specs=[
            pl.BlockSpec((tm, k), lambda t: (t, 0)),
            pl.BlockSpec((k, n_pad), lambda t: (0, 0)),
            pl.BlockSpec((1, n_pad), lambda t: (0, 0)),
            pl.BlockSpec((n_pad, n_pad), lambda t: (0, 0)),
            pl.BlockSpec((1, n_pad), lambda t: (0, 0)),
            pl.BlockSpec((n_pad, n_pad), lambda t: (0, 0)),
            pl.BlockSpec((1, n_pad), lambda t: (0, 0)),
        ],
        out_specs=pl.BlockSpec((tm, n_pad), lambda t: (t, 0)),
        compiler_params=pltpu.CompilerParams(
            dimension_semantics=("parallel",)),
        cost_estimate=pl.CostEstimate(
            flops=2 * bsz * n_pad * (k + 2 * n_pad),
            transcendentals=0,
            bytes_accessed=bsz * k * 2 + (k + 2 * n_pad) * n_pad * 2
                           + bsz * n_pad * 4),
    )(xt, w3m, b3p, w4m, b4p, w5m, b5p)
    return out


# --------------------------------- LeNet ----------------------------------- #

def init_lenet_params(key, in_channel, num_classes):
    ks = jax.random.split(key, 10)
    s = 0.1
    return {
        "w1": jax.random.normal(ks[0], (6, in_channel, 5, 5), jnp.float32) * s,
        "b1": jax.random.normal(ks[1], (6,), jnp.float32) * s,
        "w2": jax.random.normal(ks[2], (16, 6, 5, 5), jnp.float32) * s,
        "b2": jax.random.normal(ks[3], (16,), jnp.float32) * s,
        "w3": jax.random.normal(ks[4], (120, 16, 5, 5), jnp.float32) * s,
        "b3": jax.random.normal(ks[5], (120,), jnp.float32) * s,
        "wl1": jax.random.normal(ks[6], (84, 120), jnp.float32) * s,   # torch (out,in)
        "bl1": jax.random.normal(ks[7], (84,), jnp.float32) * s,
        "wl2": jax.random.normal(ks[8], (num_classes, 84), jnp.float32) * s,
        "bl2": jax.random.normal(ks[9], (num_classes,), jnp.float32) * s,
    }


def lenet_forward(x_nchw, p):
    num_classes = p["wl2"].shape[0]
    x = jnp.transpose(x_nchw, (0, 2, 3, 1))          # single NCHW -> NHWC relayout
    x = conv_pool_pallas(x, p["w1"], p["b1"])        # (B, 14, 14, 128) bf16
    x = conv_pool_pallas(x, p["w2"], p["b2"])        # (B,  5,  5, 128) bf16
    y = tail_pallas(x, p["w3"], p["b3"],
                    p["wl1"], p["bl1"], p["wl2"], p["bl2"])
    return y[:, :num_classes]


# Pure-JAX f32 reference (no Pallas) for the correctness sanity check.
def lenet_reference(x, p):
    def conv(x, w, b):
        y = jax.lax.conv_general_dilated(
            x, w, window_strides=(1, 1), padding="VALID",
            dimension_numbers=("NCHW", "OIHW", "NCHW"))
        return y + b.reshape(1, -1, 1, 1)

    def pool(x):
        return jax.lax.reduce_window(
            x, -jnp.inf, jax.lax.max,
            window_dimensions=(1, 1, 2, 2), window_strides=(1, 1, 2, 2),
            padding="VALID")

    relu = lambda t: jnp.maximum(t, 0.0)
    x = pool(relu(conv(x, p["w1"], p["b1"])))
    x = pool(relu(conv(x, p["w2"], p["b2"])))
    x = relu(conv(x, p["w3"], p["b3"]))
    x = x.reshape(x.shape[0], -1)
    x = relu(x @ p["wl1"].T + p["bl1"])
    return x @ p["wl2"].T + p["bl2"]


if __name__ == "__main__":
    key = jax.random.PRNGKey(0)
    k_x, k_p = jax.random.split(key)

    B, in_channel, num_classes = 2, 3, 10
    # LeNet's conv stack requires 32x32 input so conv3 produces 1x1x120.
    x = jax.random.normal(k_x, (B, in_channel, 32, 32), jnp.float32)
    params = init_lenet_params(k_p, in_channel, num_classes)

    fwd = jax.jit(lenet_forward)
    out = jax.block_until_ready(fwd(x, params))
    assert out.shape == (B, num_classes), out.shape

    ref = jax.block_until_ready(lenet_reference(x, params))
    # bf16 MXU operands with f32 accumulation -> slightly looser tolerance
    # than the pure-f32 reference.
    max_err = float(jnp.max(jnp.abs(out - ref)))
    assert jnp.allclose(out, ref, rtol=2e-2, atol=2e-2), max_err

    print("KERNEL_OK")
</pallas_src>

<mosaic_0001>
module attributes {stable_mosaic.version = 11 : i64} {
  func.func @_conv_pool_kernel(%arg0: i32, %arg1: memref<224x75xbf16, #tpu.memory_space<vmem>>, %arg2: memref<75x128xbf16, #tpu.memory_space<vmem>>, %arg3: memref<1x128xf32, #tpu.memory_space<vmem>>, %arg4: memref<56x128xbf16, #tpu.memory_space<vmem>>) attributes {dimension_semantics = [#tpu.dimension_semantics<parallel>], iteration_bounds = array<i64: 7>, scalar_prefetch = 0 : i64, scratch_operands = 0 : i64, tpu.core_type = #tpu.core_type<tc>, window_params = [{transform_indices = @transform_0, window_bounds = array<i64: 224, 75>}, {pipeline_mode = #tpu.pipeline_mode<synchronous>, transform_indices = @transform_1, window_bounds = array<i64: 75, 128>}, {pipeline_mode = #tpu.pipeline_mode<synchronous>, transform_indices = @transform_2, window_bounds = array<i64: 1, 128>}, {transform_indices = @transform_3, window_bounds = array<i64: 56, 128>}]} {
    %c0 = arith.constant 0 : index
    %c0_0 = arith.constant 0 : index
    %0 = vector.load %arg1[%c0, %c0_0] : memref<224x75xbf16, #tpu.memory_space<vmem>>, vector<224x75xbf16>
    %c0_1 = arith.constant 0 : index
    %c0_2 = arith.constant 0 : index
    %1 = vector.load %arg2[%c0_1, %c0_2] : memref<75x128xbf16, #tpu.memory_space<vmem>>, vector<75x128xbf16>
    %cst = arith.constant dense<0.000000e+00> : vector<224x128xf32>
    %2 = tpu.matmul %0, %1, %cst {dimension_numbers = #tpu.dot_dimension_numbers<[1], [0], [0], [1], [0, 0, 1, 1], [], []>} : vector<224x75xbf16>, vector<75x128xbf16>, vector<224x128xf32> -> vector<224x128xf32>
    %c0_3 = arith.constant 0 : index
    %c0_4 = arith.constant 0 : index
    %3 = vector.load %arg3[%c0_3, %c0_4] : memref<1x128xf32, #tpu.memory_space<vmem>>, vector<1x128xf32>
    %4 = vector.broadcast %3 : vector<1x128xf32> to vector<224x128xf32>
    %5 = arith.addf %2, %4 : vector<224x128xf32>
    %6 = vector.shape_cast %5 : vector<224x128xf32> to vector<4x56x128xf32>
    %7 = vector.extract_strided_slice %6 {offsets = [0, 0, 0], sizes = [4, 28, 128], strides = [1, 1, 1]} : vector<4x56x128xf32> to vector<4x28x128xf32>
    %8 = vector.extract_strided_slice %6 {offsets = [0, 28, 0], sizes = [4, 28, 128], strides = [1, 1, 1]} : vector<4x56x128xf32> to vector<4x28x128xf32>
    %9 = arith.maximumf %7, %8 : vector<4x28x128xf32>
    %10 = vector.shape_cast %9 : vector<4x28x128xf32> to vector<56x2x128xf32>
    %11 = vector.extract_strided_slice %10 {offsets = [0, 0, 0], sizes = [56, 1, 128], strides = [1, 1, 1]} : vector<56x2x128xf32> to vector<56x1x128xf32>
    %12 = vector.shape_cast %11 : vector<56x1x128xf32> to vector<56x128xf32>
    %13 = vector.extract_strided_slice %10 {offsets = [0, 1, 0], sizes = [56, 1, 128], strides = [1, 1, 1]} : vector<56x2x128xf32> to vector<56x1x128xf32>
    %14 = vector.shape_cast %13 : vector<56x1x128xf32> to vector<56x128xf32>
    %15 = arith.maximumf %12, %14 : vector<56x128xf32>
    %cst_5 = arith.constant 0.000000e+00 : f32
    %16 = vector.broadcast %cst_5 : f32 to vector<56x128xf32>
    %17 = arith.maximumf %15, %16 : vector<56x128xf32>
    %18 = arith.truncf %17 : vector<56x128xf32> to vector<56x128xbf16>
    %c0_6 = arith.constant 0 : index
    %c0_7 = arith.constant 0 : index
    %19 = vector.load %arg4[%c0_6, %c0_7] : memref<56x128xbf16, #tpu.memory_space<vmem>>, vector<56x128xbf16>
    tpu.vector_store %arg4[%c0_6, %c0_7], %18 {strides = array<i32>} : memref<56x128xbf16, #tpu.memory_space<vmem>>, vector<56x128xbf16>,
    return
  }
  func.func @transform_0(%arg0: i32) -> (i32, i32) {
    %c0_i32 = arith.constant 0 : i32
    %c0_i32_0 = arith.constant 0 : i32
    return %arg0, %c0_i32 : i32, i32
  }
  func.func @transform_1(%arg0: i32) -> (i32, i32) {
    %c0_i32 = arith.constant 0 : i32
    %c0_i32_0 = arith.constant 0 : i32
    %c0_i32_1 = arith.constant 0 : i32
    return %c0_i32, %c0_i32_0 : i32, i32
  }
  func.func @transform_2(%arg0: i32) -> (i32, i32) {
    %c0_i32 = arith.constant 0 : i32
    %c0_i32_0 = arith.constant 0 : i32
    %c0_i32_1 = arith.constant 0 : i32
    return %c0_i32, %c0_i32_0 : i32, i32
  }
  func.func @transform_3(%arg0: i32) -> (i32, i32) {
    %c0_i32 = arith.constant 0 : i32
    %c0_i32_0 = arith.constant 0 : i32
    return %arg0, %c0_i32 : i32, i32
  }
}

module attributes {stable_mosaic.version = 11 : i64} {
  func.func @_conv_pool_kernel(%arg0: i32, %arg1: memref<200x3200xbf16, #tpu.memory_space<vmem>>, %arg2: memref<3200x128xbf16, #tpu.memory_space<vmem>>, %arg3: memref<1x128xf32, #tpu.memory_space<vmem>>, %arg4: memref<50x128xbf16, #tpu.memory_space<vmem>>) attributes {dimension_semantics = [#tpu.dimension_semantics<parallel>], iteration_bounds = array<i64: 1>, scalar_prefetch = 0 : i64, scratch_operands = 0 : i64, tpu.core_type = #tpu.core_type<tc>, window_params = [{transform_indices = @transform_0, window_bounds = array<i64: 200, 3200>}, {pipeline_mode = #tpu.pipeline_mode<synchronous>, transform_indices = @transform_1, window_bounds = array<i64: 3200, 128>}, {pipeline_mode = #tpu.pipeline_mode<synchronous>, transform_indices = @transform_2, window_bounds = array<i64: 1, 128>}, {transform_indices = @transform_3, window_bounds = array<i64: 50, 128>}]} {
    %c0 = arith.constant 0 : index
    %c0_0 = arith.constant 0 : index
    %0 = vector.load %arg1[%c0, %c0_0] : memref<200x3200xbf16, #tpu.memory_space<vmem>>, vector<200x3200xbf16>
    %c0_1 = arith.constant 0 : index
    %c0_2 = arith.constant 0 : index
    %1 = vector.load %arg2[%c0_1, %c0_2] : memref<3200x128xbf16, #tpu.memory_space<vmem>>, vector<3200x128xbf16>
    %cst = arith.constant dense<0.000000e+00> : vector<200x128xf32>
    %2 = tpu.matmul %0, %1, %cst {dimension_numbers = #tpu.dot_dimension_numbers<[1], [0], [0], [1], [0, 0, 1, 1], [], []>} : vector<200x3200xbf16>, vector<3200x128xbf16>, vector<200x128xf32> -> vector<200x128xf32>
    %c0_3 = arith.constant 0 : index
    %c0_4 = arith.constant 0 : index
    %3 = vector.load %arg3[%c0_3, %c0_4] : memref<1x128xf32, #tpu.memory_space<vmem>>, vector<1x128xf32>
    %4 = vector.broadcast %3 : vector<1x128xf32> to vector<200x128xf32>
    %5 = arith.addf %2, %4 : vector<200x128xf32>
    %6 = vector.shape_cast %5 : vector<200x128xf32> to vector<10x20x128xf32>
    %7 = vector.extract_strided_slice %6 {offsets = [0, 0, 0], sizes = [10, 10, 128], strides = [1, 1, 1]} : vector<10x20x128xf32> to vector<10x10x128xf32>
    %8 = vector.extract_strided_slice %6 {offsets = [0, 10, 0], sizes = [10, 10, 128], strides = [1, 1, 1]} : vector<10x20x128xf32> to vector<10x10x128xf32>
    %9 = arith.maximumf %7, %8 : vector<10x10x128xf32>
    %10 = vector.shape_cast %9 : vector<10x10x128xf32> to vector<50x2x128xf32>
    %11 = vector.extract_strided_slice %10 {offsets = [0, 0, 0], sizes = [50, 1, 128], strides = [1, 1, 1]} : vector<50x2x128xf32> to vector<50x1x128xf32>
    %12 = vector.shape_cast %11 : vector<50x1x128xf32> to vector<50x128xf32>
    %13 = vector.extract_strided_slice %10 {offsets = [0, 1, 0], sizes = [50, 1, 128], strides = [1, 1, 1]} : vector<50x2x128xf32> to vector<50x1x128xf32>
    %14 = vector.shape_cast %13 : vector<50x1x128xf32> to vector<50x128xf32>
    %15 = arith.maximumf %12, %14 : vector<50x128xf32>
    %cst_5 = arith.constant 0.000000e+00 : f32
    %16 = vector.broadcast %cst_5 : f32 to vector<50x128xf32>
    %17 = arith.maximumf %15, %16 : vector<50x128xf32>
    %18 = arith.truncf %17 : vector<50x128xf32> to vector<50x128xbf16>
    %c0_6 = arith.constant 0 : index
    %c0_7 = arith.constant 0 : index
    %19 = vector.load %arg4[%c0_6, %c0_7] : memref<50x128xbf16, #tpu.memory_space<vmem>>, vector<50x128xbf16>
    tpu.vector_store %arg4[%c0_6, %c0_7], %18 {strides = array<i32>} : memref<50x128xbf16, #tpu.memory_space<vmem>>, vector<50x128xbf16>,
    return
  }
  func.func @transform_0(%arg0: i32) -> (i32, i32) {
    %c0_i32 = arith.constant 0 : i32
    %c0_i32_0 = arith.constant 0 : i32
    return %arg0, %c0_i32 : i32, i32
  }
  func.func @transform_1(%arg0: i32) -> (i32, i32) {
    %c0_i32 = arith.constant 0 : i32
    %c0_i32_0 = arith.constant 0 : i32
    %c0_i32_1 = arith.constant 0 : i32
    return %c0_i32, %c0_i32_0 : i32, i32
  }
  func.func @transform_2(%arg0: i32) -> (i32, i32) {
    %c0_i32 = arith.constant 0 : i32
    %c0_i32_0 = arith.constant 0 : i32
    %c0_i32_1 = arith.constant 0 : i32
    return %c0_i32, %c0_i32_0 : i32, i32
  }
  func.func @transform_3(%arg0: i32) -> (i32, i32) {
    %c0_i32 = arith.constant 0 : i32
    %c0_i32_0 = arith.constant 0 : i32
    return %arg0, %c0_i32 : i32, i32
  }
}

module attributes {stable_mosaic.version = 11 : i64} {
  func.func @_tail_kernel(%arg0: i32, %arg1: memref<2x3200xbf16, #tpu.memory_space<vmem>>, %arg2: memref<3200x128xbf16, #tpu.memory_space<vmem>>, %arg3: memref<1x128xf32, #tpu.memory_space<vmem>>, %arg4: memref<128x128xbf16, #tpu.memory_space<vmem>>, %arg5: memref<1x128xf32, #tpu.memory_space<vmem>>, %arg6: memref<128x128xbf16, #tpu.memory_space<vmem>>, %arg7: memref<1x128xf32, #tpu.memory_space<vmem>>, %arg8: memref<2x128xf32, #tpu.memory_space<vmem>>) attributes {dimension_semantics = [#tpu.dimension_semantics<parallel>], iteration_bounds = array<i64: 1>, scalar_prefetch = 0 : i64, scratch_operands = 0 : i64, tpu.core_type = #tpu.core_type<tc>, window_params = [{transform_indices = @transform_0, window_bounds = array<i64: 2, 3200>}, {pipeline_mode = #tpu.pipeline_mode<synchronous>, transform_indices = @transform_1, window_bounds = array<i64: 3200, 128>}, {pipeline_mode = #tpu.pipeline_mode<synchronous>, transform_indices = @transform_2, window_bounds = array<i64: 1, 128>}, {pipeline_mode = #tpu.pipeline_mode<synchronous>, transform_indices = @transform_3, window_bounds = array<i64: 128, 128>}, {pipeline_mode = #tpu.pipeline_mode<synchronous>, transform_indices = @transform_4, window_bounds = array<i64: 1, 128>}, {pipeline_mode = #tpu.pipeline_mode<synchronous>, transform_indices = @transform_5, window_bounds = array<i64: 128, 128>}, {pipeline_mode = #tpu.pipeline_mode<synchronous>, transform_indices = @transform_6, window_bounds = array<i64: 1, 128>}, {transform_indices = @transform_7, window_bounds = array<i64: 2, 128>}]} {
    %c0 = arith.constant 0 : index
    %c0_0 = arith.constant 0 : index
    %0 = vector.load %arg1[%c0, %c0_0] : memref<2x3200xbf16, #tpu.memory_space<vmem>>, vector<2x3200xbf16>
    %c0_1 = arith.constant 0 : index
    %c0_2 = arith.constant 0 : index
    %1 = vector.load %arg2[%c0_1, %c0_2] : memref<3200x128xbf16, #tpu.memory_space<vmem>>, vector<3200x128xbf16>
    %cst = arith.constant dense<0.000000e+00> : vector<2x128xf32>
    %2 = tpu.matmul %0, %1, %cst {dimension_numbers = #tpu.dot_dimension_numbers<[1], [0], [0], [1], [0, 0, 1, 1], [], []>} : vector<2x3200xbf16>, vector<3200x128xbf16>, vector<2x128xf32> -> vector<2x128xf32>
    %c0_3 = arith.constant 0 : index
    %c0_4 = arith.constant 0 : index
    %3 = vector.load %arg3[%c0_3, %c0_4] : memref<1x128xf32, #tpu.memory_space<vmem>>, vector<1x128xf32>
    %4 = vector.broadcast %3 : vector<1x128xf32> to vector<2x128xf32>
    %5 = arith.addf %2, %4 : vector<2x128xf32>
    %cst_5 = arith.constant 0.000000e+00 : f32
    %6 = vector.broadcast %cst_5 : f32 to vector<2x128xf32>
    %7 = arith.maximumf %5, %6 : vector<2x128xf32>
    %8 = arith.truncf %7 : vector<2x128xf32> to vector<2x128xbf16>
    %c0_6 = arith.constant 0 : index
    %c0_7 = arith.constant 0 : index
    %9 = vector.load %arg4[%c0_6, %c0_7] : memref<128x128xbf16, #tpu.memory_space<vmem>>, vector<128x128xbf16>
    %cst_8 = arith.constant dense<0.000000e+00> : vector<2x128xf32>
    %10 = tpu.matmul %8, %9, %cst_8 {dimension_numbers = #tpu.dot_dimension_numbers<[1], [0], [0], [1], [0, 0, 1, 1], [], []>} : vector<2x128xbf16>, vector<128x128xbf16>, vector<2x128xf32> -> vector<2x128xf32>
    %c0_9 = arith.constant 0 : index
    %c0_10 = arith.constant 0 : index
    %11 = vector.load %arg5[%c0_9, %c0_10] : memref<1x128xf32, #tpu.memory_space<vmem>>, vector<1x128xf32>
    %12 = vector.broadcast %11 : vector<1x128xf32> to vector<2x128xf32>
    %13 = arith.addf %10, %12 : vector<2x128xf32>
    %cst_11 = arith.constant 0.000000e+00 : f32
    %14 = vector.broadcast %cst_11 : f32 to vector<2x128xf32>
    %15 = arith.maximumf %13, %14 : vector<2x128xf32>
    %16 = arith.truncf %15 : vector<2x128xf32> to vector<2x128xbf16>
    %c0_12 = arith.constant 0 : index
    %c0_13 = arith.constant 0 : index
    %17 = vector.load %arg6[%c0_12, %c0_13] : memref<128x128xbf16, #tpu.memory_space<vmem>>, vector<128x128xbf16>
    %cst_14 = arith.constant dense<0.000000e+00> : vector<2x128xf32>
    %18 = tpu.matmul %16, %17, %cst_14 {dimension_numbers = #tpu.dot_dimension_numbers<[1], [0], [0], [1], [0, 0, 1, 1], [], []>} : vector<2x128xbf16>, vector<128x128xbf16>, vector<2x128xf32> -> vector<2x128xf32>
    %c0_15 = arith.constant 0 : index
    %c0_16 = arith.constant 0 : index
    %19 = vector.load %arg7[%c0_15, %c0_16] : memref<1x128xf32, #tpu.memory_space<vmem>>, vector<1x128xf32>
    %20 = vector.broadcast %19 : vector<1x128xf32> to vector<2x128xf32>
    %21 = arith.addf %18, %20 : vector<2x128xf32>
    %c0_17 = arith.constant 0 : index
    %c0_18 = arith.constant 0 : index
    %22 = vector.load %arg8[%c0_17, %c0_18] : memref<2x128xf32, #tpu.memory_space<vmem>>, vector<2x128xf32>
    tpu.vector_store %arg8[%c0_17, %c0_18], %21 {strides = array<i32>} : memref<2x128xf32, #tpu.memory_space<vmem>>, vector<2x128xf32>,
    return
  }
  func.func @transform_0(%arg0: i32) -> (i32, i32) {
    %c0_i32 = arith.constant 0 : i32
    %c0_i32_0 = arith.constant 0 : i32
    return %arg0, %c0_i32 : i32, i32
  }
  func.func @transform_1(%arg0: i32) -> (i32, i32) {
    %c0_i32 = arith.constant 0 : i32
    %c0_i32_0 = arith.constant 0 : i32
    %c0_i32_1 = arith.constant 0 : i32
    return %c0_i32, %c0_i32_0 : i32, i32
  }
  func.func @transform_2(%arg0: i32) -> (i32, i32) {
    %c0_i32 = arith.constant 0 : i32
    %c0_i32_0 = arith.constant 0 : i32
    %c0_i32_1 = arith.constant 0 : i32
    return %c0_i32, %c0_i32_0 : i32, i32
  }
  func.func @transform_3(%arg0: i32) -> (i32, i32) {
    %c0_i32 = arith.constant 0 : i32
    %c0_i32_0 = arith.constant 0 : i32
    %c0_i32_1 = arith.constant 0 : i32
    return %c0_i32, %c0_i32_0 : i32, i32
  }
  func.func @transform_4(%arg0: i32) -> (i32, i32) {
    %c0_i32 = arith.constant 0 : i32
    %c0_i32_0 = arith.constant 0 : i32
    %c0_i32_1 = arith.constant 0 : i32
    return %c0_i32, %c0_i32_0 : i32, i32
  }
  func.func @transform_5(%arg0: i32) -> (i32, i32) {
    %c0_i32 = arith.constant 0 : i32
    %c0_i32_0 = arith.constant 0 : i32
    %c0_i32_1 = arith.constant 0 : i32
    return %c0_i32, %c0_i32_0 : i32, i32
  }
  func.func @transform_6(%arg0: i32) -> (i32, i32) {
    %c0_i32 = arith.constant 0 : i32
    %c0_i32_0 = arith.constant 0 : i32
    %c0_i32_1 = arith.constant 0 : i32
    return %c0_i32, %c0_i32_0 : i32, i32
  }
  func.func @transform_7(%arg0: i32) -> (i32, i32) {
    %c0_i32 = arith.constant 0 : i32
    %c0_i32_0 = arith.constant 0 : i32
    return %arg0, %c0_i32 : i32, i32
  }
}

</mosaic_0001>

<bundles_post_ra>
// kernel: lenet_forward.3
= control target key start
LH: loop header
LB: loop body
LE: loop exit
PB: predicated region body
PF: predicated region fallthrough
CT: control target
= control target key end

     0   :  { %s1476_s12 = smov 0   ;;  %s1837_s0 = inlined_call_operand.vmem [shape: bf16[1568,75], index: 0, kind: input, shape index: {}]   ;;  %s1838_s1 = inlined_call_operand.vmem [shape: bf16[75,128], index: 1, kind: input, shape index: {}]   ;;  %s1839_s2 = inlined_call_operand.vmem [shape: f32[1,128], index: 2, kind: input, shape index: {}]   ;;  %s1840_s3 = inlined_call_operand.vmem [shape: bf16[392,128], index: 3, kind: output, shape index: {}]  }
   0x1 LB: > { %s1248_s13 = sadd.s32 4294967295, %s1453_s12   ;;  %p1252_p0 = scmp.ge.s32.totalorder %s1453_s12, 1  ;;  %s1453_s12 = sphi %s1476_s12, %s13_s12  }
   0x2   : > { %p138_p1 = scmp.lt.s32.totalorder %s1453_s12, 8 }
   0x4   : > { %p139_p2 = pnand %p1252_p0, %p138_p1 }
   0x5   : > { %s162_s18 = smul.u32 (!%p139_p2), 28, %s1248_s13 }
   0x6   : > { %142 = sbr.rel (%p139_p2) target bundleno = 323 (0x143), region = 32 }
   0x7   : > { %p163_p3 = scmp.lt.s32.totalorder (!%p139_p2), %s162_s18, 195  ;;  %s1657_s6 = smul.u32 (!%p139_p2), 7, %s1248_s13 }
   0x9   : > { %p169_p4 = scmp.lt.s32.totalorder (!%p139_p2), %s1657_s6, 48 }
   0xb   : > { %v1329_v0 = vld [vmem:[%s1838_s1 + $0x20] sm:$0xf]  ;;  %v1421_v1 = vld [vmem:[%s1838_s1 + $0x20] sm:$0x30]  ;;  %vm359_vm0 = vcmask 1044480   ;;  %vm360_vm1 = vcmask 1045504  }
   0xc   : > { %v1330_v2 = vor.u32 %v1421_v1, %v1329_v0  ;;  %v1455_v3 = vmov 65535   ;;  %v1420_v7 = vld [vmem:[%s1838_s1 + $0x18] sm:$0xff]  ;;  %v1419_v8 = vld [vmem:[%s1838_s1 + $0x10] sm:$0xff]  ;;  %s1846_s18 = smov (!%p163_p3, %s162_s18), 195  ;;  %v1418_v9 = vld [vmem:[%s1838_s1 + $0x8] sm:$0xff]  ;;  %vm316_vm2 = vcmask 613376  }
   0xd   : > { %v361_v4 = vsel %vm359_vm0, 4294967295, %v1455_v3  ;;  %s1253_s25 = sshll.u32 %s1846_s18, 2  ;;  %v1417_v10 = vld [vmem:[%s1838_s1] sm:$0xff]  ;;  %vm461_vm3 = vcmask 1043456   ;;  %vm1067_vm4 = vcmask 1041409   ;;  %vm1070_vm5 = vcmask 1042434  }
   0xe   : > { %v362_v5 = vsel %vm360_vm1, %v361_v4, 0  ;;  %s1507_s30 = scalar_lea.vmem %s1837_s0, %s1253_s25  ;;  %v1540_v35 = vld [vmem:[%s1839_s2] ss:$0 sm:$0xff]  ;;  %vm1073_vm6 = vcmask 1043459   ;;  %s1848_s6 = smov (!%p169_p4, %s1657_s6), 48  ;;  %vm1076_vm7 = vcmask 1044484  }
   0xf   : > { %v364_v6 = vand.u32 %v1330_v2, %v362_v5  ;;  %v1403_v11 = vld [vmem:[%s1507_s30] sm:$0xff]  ;;  %v1406_v12 = vld [vmem:[%s1507_s30 + $0x18] sm:$0xff]  ;;  %v1404_v15 = vld [vmem:[%s1507_s30 + $0x8] sm:$0xff]  ;;  %vm1079_vm8 = vcmask 1045509   ;;  %s1254_s7 = sshll.u32 %s1848_s6, 2  ;;  %vm1082_vm9 = vcmask 1046534  }
  0x10   : > { %v1410_v13 = vld [vmem:[%s1507_s30 + $0x38] sm:$0xff]  ;;  %v1407_v16 = vld [vmem:[%s1507_s30 + $0x20] sm:$0xff]  ;;  %v1405_v19 = vld [vmem:[%s1507_s30 + $0x10] sm:$0xff]  ;;  %vm1085_vm10 = vcmask 1047559   ;;  %s1686_s10 = scalar_lea.vmem %s1840_s3, %s1254_s7 }
  0x11   : > { %369 = vmatpush.bf16.msra.mxu0 %v364_v6  ;;  %1422 = vmatpush.bf16.msra.mxu1 %v364_v6  ;;  %v1414_v14 = vld [vmem:[%s1507_s30 + $0x58] sm:$0xff]  ;;  %v1411_v17 = vld [vmem:[%s1507_s30 + $0x40] sm:$0xff]  ;;  %v1408_v20 = vld [vmem:[%s1507_s30 + $0x28] sm:$0xff] }
  0x12   : > { %1423 = vmatpush.bf16.msra.mxu2 %v364_v6  ;;  %1424 = vmatpush.bf16.msra.mxu3 %v364_v6  ;;  %v1415_v18 = vld [vmem:[%s1507_s30 + $0x60] sm:$0xff]  ;;  %v1412_v21 = vld [vmem:[%s1507_s30 + $0x48] sm:$0xff]  ;;  %v1409_v23 = vld [vmem:[%s1507_s30 + $0x30] sm:$0xff] }
  0x13   : > { %v1416_v22 = vld [vmem:[%s1507_s30 + $0x68] sm:$0xff]  ;;  %v1413_v24 = vld [vmem:[%s1507_s30 + $0x50] sm:$0xff] }
  0x15   : > { %370 = vmatpush.bf16.msra.mxu0 %v1420_v7  ;;  %1425 = vmatpush.bf16.msra.mxu1 %v1420_v7 }
  0x16   : > { %1426 = vmatpush.bf16.msra.mxu2 %v1420_v7  ;;  %1427 = vmatpush.bf16.msra.mxu3 %v1420_v7 }
  0x19   : > { %371 = vmatpush.bf16.msra.mxu0 %v1419_v8  ;;  %1428 = vmatpush.bf16.msra.mxu1 %v1419_v8 }
  0x1a   : > { %1429 = vmatpush.bf16.msra.mxu2 %v1419_v8  ;;  %1430 = vmatpush.bf16.msra.mxu3 %v1419_v8 }
  0x1d   : > { %372 = vmatpush.bf16.msra.mxu0 %v1418_v9  ;;  %1431 = vmatpush.bf16.msra.mxu1 %v1418_v9 }
  0x1e   : > { %1432 = vmatpush.bf16.msra.mxu2 %v1418_v9  ;;  %1433 = vmatpush.bf16.msra.mxu3 %v1418_v9 }
  0x21   : > { %373 = vmatpush.bf16.msra.mxu0 %v1417_v10  ;;  %1434 = vmatpush.bf16.msra.mxu1 %v1417_v10 }
  0x22   : > { %1435 = vmatpush.bf16.msra.mxu2 %v1417_v10  ;;  %1436 = vmatpush.bf16.msra.mxu3 %v1417_v10 }
  0x24   : > { %1331 = vmatmul.msk.bf16.vlgmr.msra.gmra.mxu0 %vm316_vm2, %v1403_v11  ;;  %1334 = vmatmul.msk.bf16.vlgmr.msra.gmra.mxu1 %vm316_vm2, %v1406_v12 }
  0x25   : > { %1338 = vmatmul.msk.bf16.vlgmr.msra.gmra.mxu2 %vm316_vm2, %v1410_v13  ;;  %1342 = vmatmul.msk.bf16.vlgmr.msra.gmra.mxu3 %vm316_vm2, %v1414_v14 }
  0x34   : > { %1332 = vmatmul.msk.bf16.gmra.mxu0 %vm316_vm2, %v1404_v15  ;;  %1335 = vmatmul.msk.bf16.gmra.mxu1 %vm316_vm2, %v1407_v16 }
  0x35   : > { %1339 = vmatmul.msk.bf16.gmra.mxu2 %vm316_vm2, %v1411_v17  ;;  %1343 = vmatmul.msk.bf16.gmra.mxu3 %vm316_vm2, %v1415_v18 }
  0x44   : > { %1333 = vmatmul.msk.bf16.gmra.mxu0 %vm316_vm2, %v1405_v19  ;;  %1336 = vmatmul.msk.bf16.gmra.mxu1 %vm316_vm2, %v1408_v20 }
  0x45   : > { %1340 = vmatmul.msk.bf16.gmra.mxu2 %vm316_vm2, %v1412_v21  ;;  %1344 = vmatmul.msk.bf16.gmra.mxu3 %vm316_vm2, %v1416_v22 }
  0x54   : > { %1337 = vmatmul.msk.bf16.gmra.mxu1 %vm316_vm2, %v1409_v23 }
  0x55   : > { %1341 = vmatmul.msk.bf16.gmra.mxu2 %vm316_vm2, %v1413_v24 }
  0xa1   : > { %v375_v25 = vpop.f32.mrf.mxu0  ;;  %v390_v26 = vpop.f32.mrf.mxu1 }
  0xa2   : > { %v1543_v36 = vadd.f32 %v1540_v35, %v390_v26  ;;  %v376_v52 = vadd.f32 %v1540_v35, %v375_v25 }
  0xa4   : > { %v467_v40 = vrot.slane %v1543_v36, 4 }
  0xa8   : > { %v410_v27 = vpop.f32.mrf.mxu2  ;;  %v430_v28 = vpop.f32.mrf.mxu3 }
  0xa9   : > { %v377_v29 = vpop.f32.mrf.mxu0  ;;  %v392_v30 = vpop.f32.mrf.mxu1  ;;  %v411_v53 = vadd.f32 %v1540_v35, %v410_v27  ;;  %v431_v58 = vadd.f32 %v1540_v35, %v430_v28 }
  0xaa   : > { %v1563_v59 = vadd.f32 %v1540_v35, %v377_v29  ;;  %v1566_v60 = vadd.f32 %v1540_v35, %v392_v30 }
  0xb0   : > { %v412_v31 = vpop.f32.mrf.mxu2  ;;  %v432_v32 = vpop.f32.mrf.mxu3 }
  0xb1   : > { %v380_v33 = vpop.f32.mrf.mxu0  ;;  %v395_v34 = vpop.f32.mrf.mxu1  ;;  %v1569_v61 = vadd.f32 %v1540_v35, %v412_v31  ;;  %v1572_v63 = vadd.f32 %v1540_v35, %v432_v32 }
  0xb2   : > { %v1575_v0 = vadd.f32 %v1540_v35, %v380_v33  ;;  %v1579_v3 = vadd.f32 %v1540_v35, %v395_v34 }
  0xb8   : > { %v415_v37 = vpop.f32.mrf.mxu2  ;;  %v435_v38 = vpop.f32.mrf.mxu3 }
  0xb9   : > { %v382_v39 = vpop.f32.mrf.mxu0  ;;  %v397_v42 = vpop.f32.mrf.mxu1  ;;  %v1582_v4 = vadd.f32 %v1540_v35, %v415_v37  ;;  %v1585_v5 = vadd.f32 %v1540_v35, %v435_v38 }
  0xba   : > { %v383_v41 = vadd.f32 %v1540_v35, %v382_v39  ;;  %v1605_v37 = vadd.f32 %v1540_v35, %v397_v42 }
  0xbc   : > { %v509_v43 = vmax.f32 %v383_v41, %v467_v40  ;;  %v462_v49 = vrot.slane %v383_v41, 4 }
  0xbe   : > { %v547_v44 = vrot.slane %v509_v43, 2  ;;  %v1357_v45 = vrot.slane %v509_v43, 9 }
  0xc0   : > { %v417_v46 = vpop.f32.mrf.mxu2  ;;  %v437_v47 = vpop.f32.mrf.mxu3  ;;  %v1358_v50 = vrot.slane %v547_v44, 9  ;;  %v798_v54 = vmax.f32 %v509_v43, %v1357_v45 }
  0xc1   : > { %v385_v48 = vpop.f32.mrf.mxu0  ;;  %v1555_v55 = vadd.f32 %v1540_v35, %v417_v46  ;;  %v1558_v56 = vadd.f32 %v1540_v35, %v437_v47  ;;  %v400_v62 = vpop.f32.mrf.mxu1 }
  0xc2   : > { %v1550_v51 = vadd.f32 %v1540_v35, %v385_v48  ;;  %v799_v1 = vmax.f32 %v547_v44, %v1358_v50  ;;  %v854_v7 = vmax.f32 %v798_v54, 0.0  ;;  %v1590_v10 = vadd.f32 %v1540_v35, %v400_v62 }
  0xc3   : > { %v476_v8 = vrot.slane %v1555_v55, 4  ;;  %v1841_v9 = vrot.slane %v1558_v56, 4 }
  0xc4   : > { %v463_v57 = vrot.slane %v1550_v51, 4  ;;  %v855_v18 = vmax.f32 %v799_v1, 0.0  ;;  %v1599_v26 = vpack.c.bf16 %v854_v7, %v854_v7  ;;  %v469_v45 = vrot.slane %v1590_v10, 4 }
  0xc6   : > { %v464_v2 = vsel %vm461_vm3, %v462_v49, %v463_v57  ;;  %v911_v46 = vpack.c.bf16 %v855_v18, %v855_v18  ;;  %v1022_v47 = vunpack.c.l.b16 %v1599_v26 }
  0xc7   : > { %v506_v6 = vmax.f32 %v376_v52, %v464_v2 }
  0xc8   : > { %v420_v11 = vpop.f32.mrf.mxu2  ;;  %v440_v12 = vpop.f32.mrf.mxu3 }
  0xc9   : > { %v538_v13 = vrot.slane %v506_v6, 2  ;;  %v539_v14 = vrot.slane %v506_v6, 4  ;;  %v540_v15 = vrot.slane %v506_v6, 6  ;;  %v1345_v16 = vrot.slane %v506_v6, 9  ;;  %v387_v17 = vpop.f32.mrf.mxu0 }
  0xca   : > { %v1593_v19 = vadd.f32 %v1540_v35, %v420_v11  ;;  %v1596_v20 = vadd.f32 %v1540_v35, %v440_v12  ;;  %v388_v21 = vadd.f32 %v1540_v35, %v387_v17 }
  0xcb   : > { %v1346_v22 = vrot.slane %v538_v13, 9  ;;  %v1347_v23 = vrot.slane %v539_v14, 9  ;;  %v1348_v24 = vrot.slane %v540_v15, 9  ;;  %v786_v25 = vmax.f32 %v506_v6, %v1345_v16 }
  0xcc   : > { %v477_v27 = vrot.slane %v1593_v19, 4  ;;  %v486_v28 = vrot.slane %v1596_v20, 4  ;;  %v465_v29 = vrot.slane %v388_v21, 4 }
  0xcd   : > { %v787_v30 = vmax.f32 %v538_v13, %v1346_v22  ;;  %v788_v31 = vmax.f32 %v539_v14, %v1347_v23  ;;  %v789_v32 = vmax.f32 %v540_v15, %v1348_v24  ;;  %v842_v33 = vmax.f32 %v786_v25, 0.0 }
  0xce   : > { %v478_v38 = vsel %vm461_vm3, %v476_v8, %v477_v27  ;;  %v487_v39 = vsel %vm461_vm3, %v1841_v9, %v486_v28  ;;  %v466_v48 = vsel %vm461_vm3, %v463_v57, %v465_v29  ;;  %v468_v11 = vsel %vm461_vm3, %v465_v29, %v467_v40 }
  0xcf   : > { %v843_v41 = vmax.f32 %v787_v30, 0.0  ;;  %v844_v43 = vmax.f32 %v788_v31, 0.0  ;;  %v845_v44 = vmax.f32 %v789_v32, 0.0  ;;  %v514_v42 = vmax.f32 %v411_v53, %v478_v38 }
  0xd0   : > { %v898_v49 = vpack.c.bf16 %v842_v33, %v842_v33  ;;  %v519_v52 = vmax.f32 %v431_v58, %v487_v39  ;;  %v1023_v39 = vunpack.c.l.b16 %v911_v46 }
  0xd1   : > { %v899_v50 = vpack.c.bf16 %v843_v41, %v843_v41  ;;  %v900_v51 = vpack.c.bf16 %v844_v43, %v844_v43  ;;  %v558_v54 = vrot.slane %v514_v42, 2  ;;  %v559_v62 = vrot.slane %v514_v42, 4 }
  0xd2   : > { %v560_v1 = vrot.slane %v514_v42, 6  ;;  %v1373_v2 = vrot.slane %v514_v42, 9  ;;  %v901_v6 = vpack.c.bf16 %v845_v44, %v845_v44  ;;  %v1010_v14 = vunpack.c.l.b16 %v898_v49 }
  0xd3   : > { %v1011_v7 = vunpack.c.l.b16 %v899_v50  ;;  %v1012_v8 = vunpack.c.l.b16 %v900_v51  ;;  %v1374_v12 = vrot.slane %v558_v54, 9  ;;  %v1375_v53 = vrot.slane %v559_v62, 9 }
  0xd4   : > { %v1376_v13 = vrot.slane %v560_v1, 9  ;;  %v814_v57 = vmax.f32 %v514_v42, %v1373_v2  ;;  %v571_v16 = vrot.slane %v519_v52, 2  ;;  %v572_v58 = vrot.slane %v519_v52, 4 }
  0xd5   : > { %v1066_v15 = vrot.slane %v1011_v7, 7  ;;  %v815_v17 = vmax.f32 %v558_v54, %v1374_v12  ;;  %v816_v18 = vmax.f32 %v559_v62, %v1375_v53  ;;  %v1013_v23 = vunpack.c.l.b16 %v901_v6  ;;  %v402_v54 = vpop.f32.mrf.mxu1 }
  0xd6   : > { %v817_v21 = vmax.f32 %v560_v1, %v1376_v13  ;;  %v870_v22 = vmax.f32 %v814_v57, 0.0  ;;  %v1069_v25 = vrot.slane %v1012_v8, 6  ;;  %v573_v26 = vrot.slane %v519_v52, 6 }
  0xd7   : > { %v1068_v24 = vsel %vm1067_vm4, %v1066_v15, %v1010_v14  ;;  %v871_v36 = vmax.f32 %v815_v17, 0.0  ;;  %v872_v30 = vmax.f32 %v816_v18, 0.0  ;;  %v1391_v29 = vrot.slane %v519_v52, 9 }
  0xd8   : > { %v873_v40 = vmax.f32 %v817_v21, 0.0  ;;  %v926_v31 = vpack.c.bf16 %v870_v22, %v870_v22  ;;  %v1392_v32 = vrot.slane %v571_v16, 9  ;;  %v1393_v33 = vrot.slane %v572_v58, 9 }
  0xd9   : > { %v1394_v38 = vrot.slane %v573_v26, 9  ;;  %v927_v41 = vpack.c.bf16 %v871_v36, %v871_v36  ;;  %v928_v43 = vpack.c.bf16 %v872_v30, %v872_v30  ;;  %v507_v44 = vmax.f32 %v1563_v59, %v466_v48 }
  0xda   : > { %v1071_v42 = vsel %vm1070_vm5, %v1069_v25, %v1068_v24  ;;  %v1624_v49 = vpack.c.bf16 %v873_v40, %v873_v40  ;;  %v834_v50 = vmax.f32 %v572_v58, %v1393_v33  ;;  %v1626_v62 = vrot.slane %v1022_v47, 4 }
  0xdb   : > { %v835_v51 = vmax.f32 %v573_v26, %v1394_v38  ;;  %v1072_v1 = vrot.slane %v1013_v23, 5  ;;  %v1628_v2 = vmax.f32 %v519_v52, %v1391_v29  ;;  %v508_v6 = vmax.f32 %v1575_v0, %v468_v11 }
  0xdc   : > { %v1038_v7 = vunpack.c.l.b16 %v926_v31  ;;  %v1039_v46 = vunpack.c.l.b16 %v927_v41  ;;  %v1631_v8 = vmax.f32 %v571_v16, %v1392_v32  ;;  %v1633_v59 = vrot.slane %v1023_v39, 3 }
  0xdd   : > { %v891_v12 = vmax.f32 %v835_v51, 0.0  ;;  %v1636_v48 = vsel %vm1073_vm6, %v1072_v1, %v1071_v42  ;;  %v1040_v53 = vunpack.c.l.b16 %v928_v43  ;;  %v1639_v13 = vadd.f32 %v1540_v35, %v402_v54 }
  0xde   : > { %v1041_v47 = vunpack.c.l.b16 %v1624_v49  ;;  %v890_v52 = vmax.f32 %v834_v50, 0.0  ;;  %v541_v0 = vrot.slane %v507_v44, 2  ;;  %v888_v11 = vmax.f32 %v1628_v2, 0.0 }
  0xdf   : > { %v1642_v57 = vpack.c.bf16 %v891_v12, %v891_v12  ;;  %v542_v14 = vrot.slane %v507_v44, 4  ;;  %v543_v15 = vrot.slane %v507_v44, 6  ;;  %v544_v16 = vrot.slane %v508_v6, 2 }
  0xe0   : > { %v1645_v58 = vrot.slane %v1038_v7, 4  ;;  %v1647_v17 = vrot.slane %v1039_v46, 3  ;;  %v545_v21 = vrot.slane %v508_v6, 4  ;;  %v1650_v22 = vrot.slane %v1040_v53, 2 }
  0xe1   : > { %v546_v23 = vrot.slane %v508_v6, 6  ;;  %v1349_v24 = vrot.slane %v507_v44, 9  ;;  %v1350_v25 = vrot.slane %v541_v0, 9  ;;  %v1652_v26 = vpack.c.bf16 %v890_v52, %v890_v52 }
  0xe2   : > { %v1059_v36 = vunpack.c.l.b16 %v1642_v57  ;;  %v1351_v30 = vrot.slane %v542_v14, 9  ;;  %v1352_v40 = vrot.slane %v543_v15, 9  ;;  %v1353_v29 = vrot.slane %v508_v6, 9 }
  0xe3   : > { %v1354_v31 = vrot.slane %v544_v16, 9  ;;  %v1355_v32 = vrot.slane %v545_v21, 9  ;;  %v1356_v33 = vrot.slane %v546_v23, 9  ;;  %v790_v38 = vmax.f32 %v507_v44, %v1349_v24 }
  0xe4   : > { %v791_v39 = vmax.f32 %v541_v0, %v1350_v25  ;;  %v792_v41 = vmax.f32 %v542_v14, %v1351_v30  ;;  %v793_v43 = vmax.f32 %v543_v15, %v1352_v40  ;;  %v794_v42 = vmax.f32 %v508_v6, %v1353_v29 }
  0xe5   : > { %v795_v50 = vmax.f32 %v544_v16, %v1354_v31  ;;  %v796_v51 = vmax.f32 %v545_v21, %v1355_v32  ;;  %v797_v54 = vmax.f32 %v546_v23, %v1356_v33  ;;  %v846_v1 = vmax.f32 %v790_v38, 0.0 }
  0xe6   : > { %v847_v7 = vmax.f32 %v791_v39, 0.0  ;;  %v848_v46 = vmax.f32 %v792_v41, 0.0  ;;  %v849_v12 = vmax.f32 %v793_v43, 0.0  ;;  %v850_v53 = vmax.f32 %v794_v42, 0.0  ;;  %v422_v39 = vpop.f32.mrf.mxu2  ;;  %v442_v43 = vpop.f32.mrf.mxu3 }
  0xe7   : > { %v851_v52 = vmax.f32 %v795_v50, 0.0  ;;  %v852_v34 = vmax.f32 %v796_v51, 0.0  ;;  %v853_v9 = vmax.f32 %v797_v54, 0.0  ;;  %v902_v18 = vpack.c.bf16 %v846_v1, %v846_v1 }
  0xe8   : > { %v903_v44 = vpack.c.bf16 %v847_v7, %v847_v7  ;;  %v904_v0 = vpack.c.bf16 %v848_v46, %v848_v46  ;;  %v905_v14 = vpack.c.bf16 %v849_v12, %v849_v12  ;;  %v906_v15 = vpack.c.bf16 %v850_v53, %v850_v53 }
  0xe9   : > { %v907_v6 = vpack.c.bf16 %v851_v52, %v851_v52  ;;  %v908_v16 = vpack.c.bf16 %v852_v34, %v852_v34  ;;  %v909_v21 = vpack.c.bf16 %v853_v9, %v853_v9  ;;  %v1014_v23 = vunpack.c.l.b16 %v902_v18 }
  0xea   : > { %v1015_v24 = vunpack.c.l.b16 %v903_v44  ;;  %v1016_v25 = vunpack.c.l.b16 %v904_v0  ;;  %v1017_v30 = vunpack.c.l.b16 %v905_v14  ;;  %v1018_v40 = vunpack.c.l.b16 %v906_v15 }
  0xeb   : > { %v1019_v29 = vunpack.c.l.b16 %v907_v6  ;;  %v1020_v31 = vunpack.c.l.b16 %v908_v16  ;;  %v1021_v32 = vunpack.c.l.b16 %v909_v21  ;;  %v1075_v33 = vrot.slane %v1014_v23, 4 }
  0xec   : > { %v1078_v38 = vrot.slane %v1015_v24, 3  ;;  %v1081_v41 = vrot.slane %v1016_v25, 2  ;;  %v1084_v34 = vrot.slane %v1017_v30, 1  ;;  %v470_v51 = vrot.slane %v1639_v13, 4 }
  0xed   : > { %v1087_v9 = vrot.slane %v1019_v29, 7  ;;  %v1089_v18 = vrot.slane %v1020_v31, 6  ;;  %v1077_v42 = vsel %vm1076_vm7, %v1075_v33, %v1636_v48  ;;  %v1091_v50 = vrot.slane %v1021_v32, 5 }
  0xee   : > { %v1080_v54 = vsel %vm1079_vm8, %v1078_v38, %v1077_v42  ;;  %v1672_v7 = vadd.f32 %v1540_v35, %v422_v39  ;;  %v471_v48 = vsel %vm461_vm3, %v469_v45, %v470_v51  ;;  %v443_v53 = vadd.f32 %v1540_v35, %v442_v43 }
  0xef   : > { %v1088_v1 = vsel %vm1067_vm4, %v1087_v9, %v1018_v40  ;;  %v1083_v12 = vsel %vm1082_vm9, %v1081_v41, %v1080_v54  ;;  %v510_v44 = vmax.f32 %v1566_v60, %v471_v48  ;;  %v1693_v45 = vrot.slane %v1041_v47, 1 }
  0xf0   : > { %v1090_v46 = vsel %vm1070_vm5, %v1089_v18, %v1088_v1  ;;  %v1086_v0 = vsel %vm1085_vm10, %v1084_v34, %v1083_v12  ;;  %v479_v14 = vrot.slane %v1672_v7, 4  ;;  %v488_v16 = vrot.slane %v443_v53, 4 }
  0xf1   : > { %v1092_v52 = vsel %vm1073_vm6, %v1091_v50, %v1090_v46  ;;  %v1171_v6 = vpack.c.b16 %v1086_v0, %v1086_v0  ;;  %v548_v21 = vrot.slane %v510_v44, 2  ;;  %v549_v23 = vrot.slane %v510_v44, 4 }
  0xf2   : > { %v1094_v15 = vsel %vm1076_vm7, %v1626_v62, %v1092_v52  ;;  %v550_v24 = vrot.slane %v510_v44, 6  ;;  %v1359_v25 = vrot.slane %v510_v44, 9  ;;  %v1700_v60 = vpack.c.bf16 %v888_v11, %v888_v11 }
  0xf3   : > { %v1058_v30 = vunpack.c.l.b16 %v1652_v26  ;;  %v1157_v49 = vrot.slane %v1059_v36, 7  ;;  %1185 = vst [vmem:[%s1686_s10] sm:$0xf] %v1171_v6  ;;  %v480_v62 = vsel %vm461_vm3, %v477_v27, %v479_v14  ;;  %v1360_v47 = vrot.slane %v548_v21, 9 }
  0xf4   : > { %v1361_v40 = vrot.slane %v549_v23, 9  ;;  %v1362_v29 = vrot.slane %v550_v24, 9  ;;  %v800_v31 = vmax.f32 %v510_v44, %v1359_v25  ;;  %v1096_v2 = vsel %vm1079_vm8, %v1633_v59, %v1094_v15 }
  0xf5   : > { %v515_v11 = vmax.f32 %v1569_v61, %v480_v62  ;;  %v489_v57 = vsel %vm461_vm3, %v486_v28, %v488_v16  ;;  %v1718_v26 = vmax.f32 %v1585_v5, %v488_v16  ;;  %v801_v36 = vmax.f32 %v548_v21, %v1360_v47 }
  0xf6   : > { %v802_v19 = vmax.f32 %v549_v23, %v1361_v40  ;;  %v803_v32 = vmax.f32 %v550_v24, %v1362_v29  ;;  %v856_v27 = vmax.f32 %v800_v31, 0.0  ;;  %v520_v1 = vmax.f32 %v1572_v63, %v489_v57 }
  0xf7   : > { %v561_v33 = vrot.slane %v515_v11, 2  ;;  %v562_v38 = vrot.slane %v515_v11, 4  ;;  %v563_v39 = vrot.slane %v515_v11, 6  ;;  %v1377_v41 = vrot.slane %v515_v11, 9 }
  0xf8   : > { %v857_v34 = vmax.f32 %v801_v36, 0.0  ;;  %v858_v9 = vmax.f32 %v802_v19, 0.0  ;;  %v859_v59 = vmax.f32 %v803_v32, 0.0  ;;  %v912_v18 = vpack.c.bf16 %v856_v27, %v856_v27 }
  0xf9   : > { %v1378_v61 = vrot.slane %v561_v33, 9  ;;  %v1379_v43 = vrot.slane %v562_v38, 9  ;;  %v1380_v20 = vrot.slane %v563_v39, 9  ;;  %v818_v42 = vmax.f32 %v515_v11, %v1377_v41  ;;  %v405_v41 = vpop.f32.mrf.mxu1 }
  0xfa   : > { %v913_v28 = vpack.c.bf16 %v857_v34, %v857_v34  ;;  %v915_v50 = vpack.c.bf16 %v859_v59, %v859_v59  ;;  %v1024_v54 = vunpack.c.l.b16 %v912_v18  ;;  %v1722_v15 = vsel %vm1067_vm4, %v1157_v49, %v1058_v30 }
  0xfb   : > { %v819_v46 = vmax.f32 %v561_v33, %v1378_v61  ;;  %v820_v48 = vmax.f32 %v562_v38, %v1379_v43  ;;  %v821_v12 = vmax.f32 %v563_v39, %v1380_v20  ;;  %v874_v53 = vmax.f32 %v818_v42, 0.0 }
  0xfc   : > { %v1025_v52 = vunpack.c.l.b16 %v913_v28  ;;  %v1027_v44 = vunpack.c.l.b16 %v915_v50  ;;  %v1097_v0 = vrot.slane %v1024_v54, 2  ;;  %v914_v6 = vpack.c.bf16 %v858_v9, %v858_v9 }
  0xfd   : > { %v875_v16 = vmax.f32 %v819_v46, 0.0  ;;  %v876_v21 = vmax.f32 %v820_v48, 0.0  ;;  %v877_v23 = vmax.f32 %v821_v12, 0.0  ;;  %v574_v62 = vrot.slane %v520_v1, 2 }
  0xfe   : > { %v1098_v24 = vsel %vm1082_vm9, %v1097_v0, %v1096_v2  ;;  %v1099_v25 = vrot.slane %v1025_v52, 1  ;;  %v577_v63 = vrot.slane %v1718_v26, 2  ;;  %v1101_v47 = vrot.slane %v1027_v44, 7  ;;  %v425_v44 = vpop.f32.mrf.mxu2 }
  0xff   : > { %v1726_v40 = vpack.c.bf16 %v874_v53, %v874_v53  ;;  %v931_v29 = vpack.c.bf16 %v875_v16, %v875_v16  ;;  %v932_v31 = vpack.c.bf16 %v876_v21, %v876_v21  ;;  %v575_v30 = vrot.slane %v520_v1, 4 }
 0x100   : > { %v1100_v11 = vsel %vm1085_vm10, %v1099_v25, %v1098_v24  ;;  %v576_v49 = vrot.slane %v520_v1, 6  ;;  %v1399_v57 = vrot.slane %v1718_v26, 9  ;;  %v1026_v36 = vunpack.c.l.b16 %v914_v6 }
 0x101   : > { %v1172_v19 = vpack.c.b16 %v1100_v11, %v1100_v11  ;;  %v1730_v32 = vpack.c.bf16 %v877_v23, %v877_v23  ;;  %v1043_v2 = vunpack.c.l.b16 %v931_v29  ;;  %v1395_v27 = vrot.slane %v520_v1, 9 }
 0x102   : > { %v1396_v33 = vrot.slane %v574_v62, 9  ;;  %v1397_v38 = vrot.slane %v575_v30, 9  ;;  %v1398_v39 = vrot.slane %v576_v49, 9  ;;  %v1733_v34 = vsel %vm1067_vm4, %v1101_v47, %v1026_v36 }
 0x103   : > { %1186 = vst [vmem:[%s1686_s10 + $0x4] sm:$0xf] %v1172_v19  ;;  %v1042_v9 = vunpack.c.l.b16 %v1726_v40  ;;  %v1044_v59 = vunpack.c.l.b16 %v932_v31  ;;  %v1400_v18 = vrot.slane %v577_v63, 9  ;;  %v836_v61 = vmax.f32 %v520_v1, %v1395_v27 }
 0x104   : > { %v837_v43 = vmax.f32 %v574_v62, %v1396_v33  ;;  %v838_v20 = vmax.f32 %v575_v30, %v1397_v38  ;;  %v839_v42 = vmax.f32 %v576_v49, %v1398_v39  ;;  %v1045_v28 = vunpack.c.l.b16 %v1730_v32 }
 0x105   : > { %v840_v50 = vmax.f32 %v1718_v26, %v1399_v57  ;;  %v841_v54 = vmax.f32 %v577_v63, %v1400_v18  ;;  %v1740_v46 = vadd.f32 %v1540_v35, %v405_v41  ;;  %v1742_v48 = vrot.slane %v1043_v2, 7 }
 0x106   : > { %v892_v12 = vmax.f32 %v836_v61, 0.0  ;;  %v893_v53 = vmax.f32 %v837_v43, 0.0  ;;  %v894_v52 = vmax.f32 %v838_v20, 0.0  ;;  %v1744_v0 = vrot.slane %v1044_v59, 6 }
 0x107   : > { %v895_v1 = vmax.f32 %v839_v42, 0.0  ;;  %v896_v6 = vmax.f32 %v840_v50, 0.0  ;;  %v897_v16 = vmax.f32 %v841_v54, 0.0  ;;  %v472_v26 = vrot.slane %v1740_v46, 4 }
 0x108   : > { %v948_v21 = vpack.c.bf16 %v892_v12, %v892_v12  ;;  %v949_v23 = vpack.c.bf16 %v893_v53, %v893_v53  ;;  %v950_v24 = vpack.c.bf16 %v894_v52, %v894_v52  ;;  %v426_v47 = vadd.f32 %v1540_v35, %v425_v44 }
 0x109   : > { %v951_v25 = vpack.c.bf16 %v895_v1, %v895_v1  ;;  %v952_v62 = vpack.c.bf16 %v896_v6, %v896_v6  ;;  %v953_v63 = vpack.c.bf16 %v897_v16, %v897_v16  ;;  %v473_v30 = vsel %vm461_vm3, %v470_v51, %v472_v26 }
 0x10a   : > { %v1060_v29 = vunpack.c.l.b16 %v948_v21  ;;  %v1061_v31 = vunpack.c.l.b16 %v949_v23  ;;  %v1062_v11 = vunpack.c.l.b16 %v950_v24  ;;  %v511_v19 = vmax.f32 %v1579_v3, %v473_v30 }
 0x10b   : > { %v1063_v49 = vunpack.c.l.b16 %v951_v25  ;;  %v1064_v57 = vunpack.c.l.b16 %v952_v62  ;;  %v1065_v36 = vunpack.c.l.b16 %v953_v63  ;;  %v481_v38 = vrot.slane %v426_v47, 4 }
 0x10c   : > { %v1159_v2 = vrot.slane %v1060_v29, 6  ;;  %v1161_v27 = vrot.slane %v1061_v31, 5  ;;  %v1163_v33 = vrot.slane %v1062_v11, 4  ;;  %v551_v18 = vrot.slane %v511_v19, 2 }
 0x10d   : > { %v1165_v39 = vrot.slane %v1063_v49, 3  ;;  %v1167_v41 = vrot.slane %v1064_v57, 2  ;;  %v1169_v59 = vrot.slane %v1065_v36, 1  ;;  %v552_v43 = vrot.slane %v511_v19, 4 }
 0x10e   : > { %v1160_v61 = vsel %vm1070_vm5, %v1159_v2, %v1722_v15  ;;  %v553_v13 = vrot.slane %v511_v19, 6  ;;  %v1363_v20 = vrot.slane %v511_v19, 9  ;;  %v1364_v42 = vrot.slane %v551_v18, 9 }
 0x10f   : > { %v1162_v51 = vsel %vm1073_vm6, %v1161_v27, %v1160_v61  ;;  %v482_v3 = vsel %vm461_vm3, %v479_v14, %v481_v38  ;;  %v517_v50 = vmax.f32 %v1555_v55, %v481_v38  ;;  %v1365_v12 = vrot.slane %v552_v43, 9 }
 0x110   : > { %v1164_v54 = vsel %vm1076_vm7, %v1163_v33, %v1162_v51  ;;  %v1366_v53 = vrot.slane %v553_v13, 9  ;;  %v804_v52 = vmax.f32 %v511_v19, %v1363_v20  ;;  %v805_v15 = vmax.f32 %v551_v18, %v1364_v42 }
 0x111   : > { %v1166_v44 = vsel %vm1079_vm8, %v1165_v39, %v1164_v54  ;;  %v516_v1 = vmax.f32 %v1582_v4, %v482_v3  ;;  %v567_v6 = vrot.slane %v517_v50, 2  ;;  %v806_v21 = vmax.f32 %v552_v43, %v1365_v12 }
 0x112   : > { %v1168_v16 = vsel %vm1082_vm9, %v1167_v41, %v1166_v44  ;;  %v807_v7 = vmax.f32 %v553_v13, %v1366_v53  ;;  %v860_v23 = vmax.f32 %v804_v52, 0.0  ;;  %v861_v55 = vmax.f32 %v805_v15, 0.0  ;;  %v407_v52 = vpop.f32.mrf.mxu1 }
 0x113   : > { %v1170_v14 = vsel %vm1085_vm10, %v1169_v59, %v1168_v16  ;;  %v564_v24 = vrot.slane %v516_v1, 2  ;;  %v565_v25 = vrot.slane %v516_v1, 4  ;;  %v862_v63 = vmax.f32 %v806_v21, 0.0 }
 0x114   : > { %v1177_v62 = vpack.c.b16 %v1170_v14, %v1170_v14  ;;  %v863_v47 = vmax.f32 %v807_v7, 0.0  ;;  %v916_v29 = vpack.c.bf16 %v860_v23, %v860_v23  ;;  %v917_v31 = vpack.c.bf16 %v861_v55, %v861_v55  ;;  %v427_v23 = vpop.f32.mrf.mxu2 }
 0x115   : > { %v566_v11 = vrot.slane %v516_v1, 6  ;;  %v1381_v30 = vrot.slane %v516_v1, 9  ;;  %v1382_v4 = vrot.slane %v564_v24, 9  ;;  %v918_v49 = vpack.c.bf16 %v862_v63, %v862_v63 }
 0x116   : > { %1191 = vst [vmem:[%s1686_s10 + $0x18] sm:$0xf] %v1177_v62  ;;  %v919_v57 = vpack.c.bf16 %v863_v47, %v863_v47  ;;  %v1028_v36 = vunpack.c.l.b16 %v916_v29  ;;  %v1383_v19 = vrot.slane %v565_v25, 9  ;;  %v1130_v2 = vsel %vm1067_vm4, %v1742_v48, %v1042_v9 }
 0x117   : > { %v1029_v27 = vunpack.c.l.b16 %v917_v31  ;;  %v1384_v33 = vrot.slane %v566_v11, 9  ;;  %v1386_v38 = vrot.slane %v567_v6, 9  ;;  %v1030_v39 = vunpack.c.l.b16 %v918_v49 }
 0x118   : > { %v1103_v41 = vrot.slane %v1028_v36, 6  ;;  %v1385_v59 = vrot.slane %v517_v50, 9  ;;  %v822_v18 = vmax.f32 %v516_v1, %v1381_v30  ;;  %v823_v43 = vmax.f32 %v564_v24, %v1382_v4 }
 0x119   : > { %v1105_v61 = vrot.slane %v1029_v27, 5  ;;  %v824_v13 = vmax.f32 %v565_v25, %v1383_v19  ;;  %v825_v20 = vmax.f32 %v566_v11, %v1384_v33  ;;  %v1842_v51 = vmax.f32 %v1631_v8, 0.0 }
 0x11a   : > { %v1132_v40 = vsel %vm1070_vm5, %v1744_v0, %v1130_v2  ;;  %v1031_v9 = vunpack.c.l.b16 %v919_v57  ;;  %v1104_v48 = vsel %vm1070_vm5, %v1103_v41, %v1733_v34  ;;  %v1107_v3 = vrot.slane %v1030_v39, 4 }
 0x11b   : > { %v1774_v42 = vpack.c.bf16 %v1842_v51, %v1842_v51  ;;  %v827_v54 = vmax.f32 %v567_v6, %v1386_v38  ;;  %v878_v12 = vmax.f32 %v822_v18, 0.0  ;;  %v879_v53 = vmax.f32 %v823_v43, 0.0 }
 0x11c   : > { %v1133_v44 = vrot.slane %v1045_v28, 5  ;;  %v1106_v8 = vsel %vm1073_vm6, %v1105_v61, %v1104_v48  ;;  %v880_v15 = vmax.f32 %v824_v13, 0.0  ;;  %v881_v1 = vmax.f32 %v825_v20, 0.0 }
 0x11d   : > { %v1783_v16 = vmax.f32 %v517_v50, %v1385_v59  ;;  %v883_v21 = vmax.f32 %v827_v54, 0.0  ;;  %v934_v0 = vpack.c.bf16 %v878_v12, %v878_v12  ;;  %v935_v7 = vpack.c.bf16 %v879_v53, %v879_v53 }
 0x11e   : > { %v1134_v34 = vsel %vm1073_vm6, %v1133_v44, %v1132_v40  ;;  %v936_v14 = vpack.c.bf16 %v880_v15, %v880_v15  ;;  %v937_v6 = vpack.c.bf16 %v881_v1, %v881_v1  ;;  %v408_v55 = vadd.f32 %v1540_v35, %v407_v52 }
 0x11f   : > { %v1108_v24 = vsel %vm1076_vm7, %v1107_v3, %v1106_v8  ;;  %v1109_v32 = vrot.slane %v1031_v9, 3  ;;  %v1046_v28 = vunpack.c.l.b16 %v934_v0  ;;  %v1047_v25 = vunpack.c.l.b16 %v935_v7 }
 0x120   : > { %v1048_v62 = vunpack.c.l.b16 %v936_v14  ;;  %v1049_v63 = vunpack.c.l.b16 %v937_v6  ;;  %v474_v47 = vrot.slane %v408_v55, 4  ;;  %v428_v50 = vadd.f32 %v1540_v35, %v427_v23 }
 0x121   : > { %v882_v29 = vmax.f32 %v1783_v16, 0.0  ;;  %v939_v31 = vpack.c.bf16 %v883_v21, %v883_v21  ;;  %v1135_v11 = vrot.slane %v1046_v28, 4  ;;  %v1137_v30 = vrot.slane %v1047_v25, 3 }
 0x122   : > { %v1791_v4 = vsel %vm1079_vm8, %v1109_v32, %v1108_v24  ;;  %v1139_v49 = vrot.slane %v1048_v62, 2  ;;  %v475_v57 = vsel %vm461_vm3, %v472_v26, %v474_v47  ;;  %v513_v36 = vmax.f32 %v1590_v10, %v474_v47 }
 0x123   : > { %v1136_v19 = vsel %vm1076_vm7, %v1135_v11, %v1134_v34  ;;  %v1141_v2 = vrot.slane %v1049_v63, 1  ;;  %v512_v35 = vmax.f32 %v1605_v37, %v475_v57  ;;  %v1843_v27 = vrot.slane %v1558_v56, 4 }
 0x124   : > { %v1844_v33 = vrot.slane %v1585_v5, 4  ;;  %v1138_v39 = vsel %vm1079_vm8, %v1137_v30, %v1136_v19  ;;  %v557_v41 = vrot.slane %v513_v36, 2  ;;  %v1371_v59 = vrot.slane %v513_v36, 9 }
 0x125   : > { %v1051_v18 = vunpack.c.l.b16 %v939_v31  ;;  %v1140_v10 = vsel %vm1082_vm9, %v1139_v49, %v1138_v39  ;;  %v554_v26 = vrot.slane %v512_v35, 2  ;;  %v555_v61 = vrot.slane %v512_v35, 4 }
 0x126   : > { %v485_v38 = vsel %vm461_vm3, %v1844_v33, %v1843_v27  ;;  %v1142_v43 = vsel %vm1085_vm10, %v1141_v2, %v1140_v10  ;;  %v556_v37 = vrot.slane %v512_v35, 6  ;;  %v1367_v13 = vrot.slane %v512_v35, 9 }
 0x127   : > { %v518_v46 = vmax.f32 %v428_v50, %v485_v38  ;;  %v1372_v56 = vrot.slane %v557_v41, 9  ;;  %v1175_v20 = vpack.c.b16 %v1142_v43, %v1142_v43  ;;  %v1368_v5 = vrot.slane %v554_v26, 9 }
 0x128   : > { %v1369_v51 = vrot.slane %v555_v61, 9  ;;  %v812_v40 = vmax.f32 %v513_v36, %v1371_v59  ;;  %v1370_v9 = vrot.slane %v556_v37, 9  ;;  %v808_v48 = vmax.f32 %v512_v35, %v1367_v13 }
 0x129   : > { %v813_v3 = vmax.f32 %v557_v41, %v1372_v56  ;;  %v568_v54 = vrot.slane %v518_v46, 2  ;;  %1189 = vst [vmem:[%s1686_s10 + $0x10] sm:$0xf] %v1175_v20  ;;  %v809_v12 = vmax.f32 %v554_v26, %v1368_v5  ;;  %v569_v44 = vrot.slane %v518_v46, 4 }
 0x12a   : > { %v810_v53 = vmax.f32 %v555_v61, %v1369_v51  ;;  %v868_v52 = vmax.f32 %v812_v40, 0.0  ;;  %v811_v8 = vmax.f32 %v556_v37, %v1370_v9  ;;  %v864_v15 = vmax.f32 %v808_v48, 0.0 }
 0x12b   : > { %v869_v1 = vmax.f32 %v813_v3, 0.0  ;;  %v570_v16 = vrot.slane %v518_v46, 6  ;;  %v865_v21 = vmax.f32 %v809_v12, 0.0  ;;  %v1387_v23 = vrot.slane %v518_v46, 9 }
 0x12c   : > { %v866_v0 = vmax.f32 %v810_v53, 0.0  ;;  %v924_v7 = vpack.c.bf16 %v868_v52, %v868_v52  ;;  %v867_v34 = vmax.f32 %v811_v8, 0.0  ;;  %v920_v14 = vpack.c.bf16 %v864_v15, %v864_v15 }
 0x12d   : > { %v925_v6 = vpack.c.bf16 %v869_v1, %v869_v1  ;;  %v1388_v55 = vrot.slane %v568_v54, 9  ;;  %v938_v24 = vpack.c.bf16 %v882_v29, %v882_v29  ;;  %v921_v32 = vpack.c.bf16 %v865_v21, %v865_v21 }
 0x12e   : > { %v922_v28 = vpack.c.bf16 %v866_v0, %v866_v0  ;;  %v1389_v25 = vrot.slane %v569_v44, 9  ;;  %v923_v62 = vpack.c.bf16 %v867_v34, %v867_v34  ;;  %v1032_v63 = vunpack.c.l.b16 %v920_v14 }
 0x12f   : > { %v1036_v47 = vunpack.c.l.b16 %v924_v7  ;;  %v1390_v50 = vrot.slane %v570_v16, 9  ;;  %v1143_v31 = vrot.slane %v1051_v18, 7  ;;  %v1033_v11 = vunpack.c.l.b16 %v921_v32 }
 0x130   : > { %v1037_v30 = vunpack.c.l.b16 %v925_v6  ;;  %v828_v49 = vmax.f32 %v518_v46, %v1387_v23  ;;  %v1034_v57 = vunpack.c.l.b16 %v922_v28  ;;  %v1035_v36 = vunpack.c.l.b16 %v923_v62 }
 0x131   : > { %v1111_v19 = vrot.slane %v1032_v63, 2  ;;  %v829_v2 = vmax.f32 %v568_v54, %v1388_v55  ;;  %v1113_v35 = vrot.slane %v1033_v11, 1  ;;  %v830_v27 = vmax.f32 %v569_v44, %v1389_v25 }
 0x132   : > { %v831_v33 = vmax.f32 %v570_v16, %v1390_v50  ;;  %v884_v38 = vmax.f32 %v828_v49, 0.0  ;;  %v1115_v39 = vrot.slane %v1035_v36, 7  ;;  %v1117_v41 = vrot.slane %v1036_v47, 6 }
 0x133   : > { %v1112_v29 = vsel %vm1082_vm9, %v1111_v19, %v1791_v4  ;;  %v885_v59 = vmax.f32 %v829_v2, 0.0  ;;  %v886_v10 = vmax.f32 %v830_v27, 0.0  ;;  %v1119_v43 = vrot.slane %v1037_v30, 5 }
 0x134   : > { %v1114_v18 = vsel %vm1085_vm10, %v1113_v35, %v1112_v29  ;;  %v887_v26 = vmax.f32 %v831_v33, 0.0  ;;  %v940_v46 = vpack.c.bf16 %v884_v38, %v884_v38  ;;  %v1116_v61 = vsel %vm1067_vm4, %v1115_v39, %v1034_v57 }
 0x135   : > { %v1173_v37 = vpack.c.b16 %v1114_v18, %v1114_v18  ;;  %v941_v13 = vpack.c.bf16 %v885_v59, %v885_v59  ;;  %v1118_v56 = vsel %vm1070_vm5, %v1117_v41, %v1116_v61  ;;  %v942_v20 = vpack.c.bf16 %v886_v10, %v886_v10 }
 0x136   : > { %v943_v5 = vpack.c.bf16 %v887_v26, %v887_v26  ;;  %v1052_v51 = vunpack.c.l.b16 %v940_v46  ;;  %v1056_v4 = vunpack.c.l.b16 %v1700_v60  ;;  %v1050_v40 = vunpack.c.l.b16 %v938_v24 }
 0x137   : > { %v1120_v9 = vsel %vm1073_vm6, %v1119_v43, %v1118_v56  ;;  %1187 = vst [vmem:[%s1686_s10 + $0x8] sm:$0xf] %v1173_v37  ;;  %v1053_v48 = vunpack.c.l.b16 %v941_v13  ;;  %v1054_v54 = vunpack.c.l.b16 %v942_v20  ;;  %v1057_v52 = vunpack.c.l.b16 %v1774_v42 }
 0x138   : > { %v1122_v3 = vsel %vm1076_vm7, %v1645_v58, %v1120_v9  ;;  %v1055_v12 = vunpack.c.l.b16 %v943_v5  ;;  %v1145_v53 = vrot.slane %v1052_v51, 6  ;;  %v1144_v44 = vsel %vm1067_vm4, %v1143_v31, %v1050_v40 }
 0x139   : > { %v1124_v8 = vsel %vm1079_vm8, %v1647_v17, %v1122_v3  ;;  %v1147_v60 = vrot.slane %v1053_v48, 5  ;;  %v1149_v16 = vrot.slane %v1054_v54, 4  ;;  %v1153_v42 = vrot.slane %v1056_v4, 2 }
 0x13a   : > { %v1126_v15 = vsel %vm1082_vm9, %v1650_v22, %v1124_v8  ;;  %v1146_v1 = vsel %vm1070_vm5, %v1145_v53, %v1144_v44  ;;  %v1151_v0 = vrot.slane %v1055_v12, 3  ;;  %v1155_v34 = vrot.slane %v1057_v52, 1 }
 0x13b   : > { %v1128_v58 = vsel %vm1085_vm10, %v1693_v45, %v1126_v15  ;;  %v1148_v21 = vsel %vm1073_vm6, %v1147_v60, %v1146_v1 }
 0x13c   : > { %v1174_v7 = vpack.c.b16 %v1128_v58, %v1128_v58  ;;  %v1150_v23 = vsel %vm1076_vm7, %v1149_v16, %v1148_v21 }
 0x13d   : > { %v1152_v17 = vsel %vm1079_vm8, %v1151_v0, %v1150_v23 }
 0x13e   : > { %1188 = vst [vmem:[%s1686_s10 + $0xc] sm:$0xf] %v1174_v7  ;;  %v1154_v14 = vsel %vm1082_vm9, %v1153_v42, %v1152_v17 }
 0x13f   : > { %v1156_v22 = vsel %vm1085_vm10, %v1155_v34, %v1154_v14 }
 0x140   : > { %v1176_v6 = vpack.c.b16 %v1156_v22, %v1156_v22 }
 0x142   : > { %1190 = vst [vmem:[%s1686_s10 + $0x14] sm:$0xf] %v1176_v6 }
 0x143 PF: > { %s13_s12 = sadd.s32 1, %s1453_s12  }
 0x144   : > { %p10_p5 = scmp.ge.s32.totalorder %s13_s12, 9  }
 0x146   :  { %12 = sbr.rel (!%p10_p5) target bundleno = 1 (0x1), region = 62 }

// kernel: lenet_forward.4
= control target key start
LH: loop header
LB: loop body
LE: loop exit
PB: predicated region body
PF: predicated region fallthrough
CT: control target
= control target key end

     0   :  { %vm5433_vm0 = vcmask 1041408   ;;  %vm5434_vm1 = vcmask 1045508   ;;  %vm5637_vm3 = vcmask 1043458   ;;  %vm6158_vm4 = vcmask 1041409   ;;  %s12137_s1 = inlined_call_operand.vmem [shape: bf16[3200,128], index: 1, kind: input, shape index: {}]   ;;  %s12138_s2 = inlined_call_operand.vmem [shape: f32[1,128], index: 2, kind: input, shape index: {}]   ;;  %s12139_s0 = inlined_call_operand.vmem [shape: bf16[200,3200], index: 0, kind: input, shape index: {}]   ;;  %s12140_s3 = inlined_call_operand.vmem [shape: bf16[50,128], index: 3, kind: output, shape index: {}]  }
   0x1   :  { %v8642_v0 = vld [vmem:[%s12137_s1 + $0x38] sm:$0xff]  ;;  %v8641_v1 = vld [vmem:[%s12137_s1 + $0x30] sm:$0xff]  ;;  %v8640_v2 = vld [vmem:[%s12137_s1 + $0x28] sm:$0xff]  ;;  %vm6161_vm5 = vcmask 1042434   ;;  %vm6164_vm6 = vcmask 1043459   ;;  %vm6167_vm7 = vcmask 1044484  }
   0x2   :  { %3543 = vmatpush.bf16.msra.mxu0 %v8642_v0  ;;  %8835 = vmatpush.bf16.msra.mxu1 %v8642_v0  ;;  %v8639_v3 = vld [vmem:[%s12137_s1 + $0x20] sm:$0xff]  ;;  %v8638_v4 = vld [vmem:[%s12137_s1 + $0x18] sm:$0xff]  ;;  %v8637_v5 = vld [vmem:[%s12137_s1 + $0x10] sm:$0xff]  ;;  %vm6170_vm8 = vcmask 1045509   ;;  %vm6173_vm9 = vcmask 1046534   ;;  %vm6176_vm10 = vcmask 1047559  }
   0x3   :  { %8837 = vmatpush.bf16.msra.mxu3 %v8642_v0  ;;  %8836 = vmatpush.bf16.msra.mxu2 %v8642_v0  ;;  %v8636_v6 = vld [vmem:[%s12137_s1 + $0x8] sm:$0xff]  ;;  %v8635_v7 = vld [vmem:[%s12137_s1] sm:$0xff]  ;;  %v8650_v12 = vld [vmem:[%s12137_s1 + $0x78] sm:$0xff] }
   0x4   :  { %v6277_v8 = vld [vmem:[%s12139_s0] sm:$0xf]  ;;  %v8347_v9 = vld [vmem:[%s12139_s0 + $0x60] sm:$0xf0]  ;;  %v7277_v13 = vld [vmem:[%s12139_s0 + $0x7d0] sm:$0xf] }
   0x5   :  { %v6677_v10 = vld [vmem:[%s12139_s0 + $0x320] sm:$0xf]  ;;  %v8447_v11 = vld [vmem:[%s12139_s0 + $0x380] sm:$0xf0]  ;;  %v8597_v14 = vld [vmem:[%s12139_s0 + $0x830] sm:$0xf0]  ;;  %v6278_v17 = vor.u32 %v8347_v9, %v6277_v8 }
   0x6   :  { %3544 = vmatpush.bf16.msra.mxu0 %v8641_v1  ;;  %8838 = vmatpush.bf16.msra.mxu1 %v8641_v1  ;;  %v8674_v15 = vld [vmem:[%s12137_s1 + $0x138] sm:$0xff]  ;;  %v6678_v18 = vor.u32 %v8447_v11, %v6677_v10  ;;  %v7278_v19 = vor.u32 %v8597_v14, %v7277_v13  ;;  %v7077_v20 = vld [vmem:[%s12139_s0 + $0x640] sm:$0xf]  ;;  %v8547_v21 = vld [vmem:[%s12139_s0 + $0x6a0] sm:$0xf0] }
   0x7   :  { %8840 = vmatpush.bf16.msra.mxu3 %v8641_v1  ;;  %8839 = vmatpush.bf16.msra.mxu2 %v8641_v1  ;;  %v8666_v16 = vld [vmem:[%s12137_s1 + $0xf8] sm:$0xff]  ;;  %v8649_v22 = vld [vmem:[%s12137_s1 + $0x70] sm:$0xff]  ;;  %v7078_v26 = vor.u32 %v8547_v21, %v7077_v20  ;;  %v8648_v27 = vld [vmem:[%s12137_s1 + $0x68] sm:$0xff] }
   0x8   :  { %v8658_v23 = vld [vmem:[%s12137_s1 + $0xb8] sm:$0xff]  ;;  %v8673_v24 = vld [vmem:[%s12137_s1 + $0x130] sm:$0xff]  ;;  %v8672_v29 = vld [vmem:[%s12137_s1 + $0x128] sm:$0xff] }
   0x9   :  { %v8665_v25 = vld [vmem:[%s12137_s1 + $0xf0] sm:$0xff]  ;;  %v8664_v30 = vld [vmem:[%s12137_s1 + $0xe8] sm:$0xff]  ;;  %v8647_v31 = vld [vmem:[%s12137_s1 + $0x60] sm:$0xff] }
   0xa   :  { %3545 = vmatpush.bf16.msra.mxu0 %v8640_v2  ;;  %8841 = vmatpush.bf16.msra.mxu1 %v8640_v2  ;;  %v8657_v28 = vld [vmem:[%s12137_s1 + $0xb0] sm:$0xff]  ;;  %v8656_v32 = vld [vmem:[%s12137_s1 + $0xa8] sm:$0xff]  ;;  %v8671_v33 = vld [vmem:[%s12137_s1 + $0x120] sm:$0xff] }
   0xb   :  { %8843 = vmatpush.bf16.msra.mxu3 %v8640_v2  ;;  %8842 = vmatpush.bf16.msra.mxu2 %v8640_v2  ;;  %v8663_v34 = vld [vmem:[%s12137_s1 + $0xe0] sm:$0xff]  ;;  %v6377_v35 = vld [vmem:[%s12139_s0 + $0xc8] sm:$0xf]  ;;  %v8372_v36 = vld [vmem:[%s12139_s0 + $0x128] sm:$0xf0] }
   0xc   :  { %v6777_v37 = vld [vmem:[%s12139_s0 + $0x3e8] sm:$0xf]  ;;  %v8472_v38 = vld [vmem:[%s12139_s0 + $0x448] sm:$0xf0]  ;;  %v7377_v39 = vld [vmem:[%s12139_s0 + $0x898] sm:$0xf]  ;;  %v6378_v45 = vor.u32 %v8372_v36, %v6377_v35 }
   0xd   :  { %v8622_v40 = vld [vmem:[%s12139_s0 + $0x8f8] sm:$0xf0]  ;;  %v8655_v42 = vld [vmem:[%s12137_s1 + $0xa0] sm:$0xff]  ;;  %v6778_v46 = vor.u32 %v8472_v38, %v6777_v37  ;;  %v7177_v48 = vld [vmem:[%s12139_s0 + $0x708] sm:$0xf] }
   0xe   :  { %3546 = vmatpush.bf16.msra.mxu0 %v8639_v3  ;;  %8844 = vmatpush.bf16.msra.mxu1 %v8639_v3  ;;  %v8646_v41 = vld [vmem:[%s12137_s1 + $0x58] sm:$0xff]  ;;  %v7378_v47 = vor.u32 %v8622_v40, %v7377_v39  ;;  %v8572_v49 = vld [vmem:[%s12139_s0 + $0x768] sm:$0xf0]  ;;  %v8645_v51 = vld [vmem:[%s12137_s1 + $0x50] sm:$0xff] }
   0xf   :  { %8846 = vmatpush.bf16.msra.mxu3 %v8639_v3  ;;  %8845 = vmatpush.bf16.msra.mxu2 %v8639_v3  ;;  %v8662_v43 = vld [vmem:[%s12137_s1 + $0xd8] sm:$0xff]  ;;  %v8661_v52 = vld [vmem:[%s12137_s1 + $0xd0] sm:$0xff]  ;;  %v7178_v54 = vor.u32 %v8572_v49, %v7177_v48  ;;  %v8644_v56 = vld [vmem:[%s12137_s1 + $0x48] sm:$0xff] }
  0x10   :  { %v8670_v44 = vld [vmem:[%s12137_s1 + $0x118] sm:$0xff]  ;;  %v8669_v53 = vld [vmem:[%s12137_s1 + $0x110] sm:$0xff]  ;;  %v8660_v57 = vld [vmem:[%s12137_s1 + $0xc8] sm:$0xff] }
  0x11   :  { %v8654_v50 = vld [vmem:[%s12137_s1 + $0x98] sm:$0xff]  ;;  %v8653_v55 = vld [vmem:[%s12137_s1 + $0x90] sm:$0xff]  ;;  %v8668_v58 = vld [vmem:[%s12137_s1 + $0x108] sm:$0xff] }
  0x12   :  { %3547 = vmatpush.bf16.msra.mxu0 %v8638_v4  ;;  %8847 = vmatpush.bf16.msra.mxu1 %v8638_v4  ;;  %v9036_v59 = vld [vmem:[%s12139_s0 + $0x960] sm:$0xff]  ;;  %v8652_v60 = vld [vmem:[%s12137_s1 + $0x88] sm:$0xff]  ;;  %v6477_v0 = vld [vmem:[%s12139_s0 + $0x190] sm:$0xf] }
  0x13   :  { %8849 = vmatpush.bf16.msra.mxu3 %v8638_v4  ;;  %8848 = vmatpush.bf16.msra.mxu2 %v8638_v4  ;;  %v8643_v61 = vld [vmem:[%s12137_s1 + $0x40] sm:$0xff]  ;;  %v8698_v1 = vld [vmem:[%s12137_s1 + $0x1f8] sm:$0xff]  ;;  %v8397_v2 = vld [vmem:[%s12139_s0 + $0x1f0] sm:$0xf0] }
  0x14   :  { %v8659_v62 = vld [vmem:[%s12137_s1 + $0xc0] sm:$0xff]  ;;  %v6877_v3 = vld [vmem:[%s12139_s0 + $0x4b0] sm:$0xf]  ;;  %v8497_v4 = vld [vmem:[%s12139_s0 + $0x510] sm:$0xf0]  ;;  %v6478_v8 = vor.u32 %v8397_v2, %v6477_v0 }
  0x15   :  { %v8667_v63 = vld [vmem:[%s12137_s1 + $0x100] sm:$0xff]  ;;  %v6878_v9 = vor.u32 %v8497_v4, %v6877_v3  ;;  %v6285_v11 = vld [vmem:[%s12139_s0 + $0x8] sm:$0xf]  ;;  %v8682_v14 = vld [vmem:[%s12137_s1 + $0x178] sm:$0xff] }
  0x16   :  { %3548 = vmatpush.bf16.msra.mxu0 %v8637_v5  ;;  %8850 = vmatpush.bf16.msra.mxu1 %v8637_v5  ;;  %v8336_v20 = vld [vmem:[%s12139_s0 + $0xc] sm:$0xf]  ;;  %v6287_v21 = vld [vmem:[%s12139_s0 + $0x6c] sm:$0xf0]  ;;  %v8361_v35 = vld [vmem:[%s12139_s0 + $0xd4] sm:$0xf] }
  0x17   :  { %8852 = vmatpush.bf16.msra.mxu3 %v8637_v5  ;;  %8851 = vmatpush.bf16.msra.mxu2 %v8637_v5  ;;  %v1668_v5 = vunpack.c.l.b16 %v9036_v59  ;;  %v6387_v36 = vld [vmem:[%s12139_s0 + $0x134] sm:$0xf0]  ;;  %v8386_v48 = vld [vmem:[%s12139_s0 + $0x19c] sm:$0xf]  ;;  %v6487_v49 = vld [vmem:[%s12139_s0 + $0x1fc] sm:$0xf0] }
  0x18   :  { %v6390_v39 = vor.u32 %v8361_v35, %v6387_v36  ;;  %v6485_v40 = vld [vmem:[%s12139_s0 + $0x198] sm:$0xf]  ;;  %v8399_v0 = vld [vmem:[%s12139_s0 + $0x200] sm:$0xf0]  ;;  %v6587_v2 = vld [vmem:[%s12139_s0 + $0x2c4] sm:$0xf0] }
  0x19   :  { %v1993_v10 = vpack.c.b16 %v1668_v5, %v1668_v5  ;;  %v6885_v36 = vld [vmem:[%s12139_s0 + $0x4b8] sm:$0xf]  ;;  %vm11772_vm2 = vmor %vm5433_vm0, %vm5434_vm1 }
  0x1a   :  { %3549 = vmatpush.bf16.msra.mxu0 %v8636_v6  ;;  %8853 = vmatpush.bf16.msra.mxu1 %v8636_v6 }
  0x1b   :  { %8855 = vmatpush.bf16.msra.mxu3 %v8636_v6  ;;  %8854 = vmatpush.bf16.msra.mxu2 %v8636_v6  ;;  %v8651_v6 = vld [vmem:[%s12137_s1 + $0x80] sm:$0xff] }
  0x1e   :  { %3550 = vmatpush.bf16.msra.mxu0 %v8635_v7  ;;  %8856 = vmatpush.bf16.msra.mxu1 %v8635_v7 }
  0x1f   :  { %8858 = vmatpush.bf16.msra.mxu3 %v8635_v7  ;;  %8857 = vmatpush.bf16.msra.mxu2 %v8635_v7  ;;  %v8690_v7 = vld [vmem:[%s12137_s1 + $0x1b8] sm:$0xff] }
  0x21   :  { %3551 = vmatmul.bf16.vlgmr.msra.gmra.mxu0 %v6278_v17  ;;  %3571 = vmatmul.bf16.vlgmr.msra.gmra.mxu1 %v6678_v18  ;;  %v8422_v17 = vld [vmem:[%s12139_s0 + $0x2b8] sm:$0xf0]  ;;  %v6977_v18 = vld [vmem:[%s12139_s0 + $0x578] sm:$0xf] }
  0x22   :  { %3616 = vmatpush.bf16.msrb.mxu1 %v8650_v12  ;;  %3835 = vmatpush.bf16.msrb.mxu0 %v8674_v15  ;;  %v8348_v12 = vld [vmem:[%s12139_s0 + $0x68] sm:$0xf0]  ;;  %v8706_v15 = vld [vmem:[%s12137_s1 + $0x238] sm:$0xff] }
  0x23   :  { %3762 = vmatpush.bf16.msrb.mxu3 %v8666_v16  ;;  %3689 = vmatpush.bf16.msrb.mxu2 %v8658_v23  ;;  %v6286_v13 = vor.u32 %v8348_v12, %v6285_v11  ;;  %v6577_v16 = vld [vmem:[%s12139_s0 + $0x258] sm:$0xf]  ;;  %v8410_v11 = vld [vmem:[%s12139_s0 + $0x25c] sm:$0xf]  ;;  %v6579_v12 = vld [vmem:[%s12139_s0 + $0x2bc] sm:$0xf0] }
  0x24   :  { %3601 = vmatmul.bf16.vlgmr.msra.gmra.mxu3 %v7278_v19  ;;  %3591 = vmatmul.bf16.vlgmr.msra.gmra.mxu2 %v7078_v26  ;;  %v8522_v19 = vld [vmem:[%s12139_s0 + $0x5d8] sm:$0xf0]  ;;  %v8373_v26 = vld [vmem:[%s12139_s0 + $0x130] sm:$0xf0] }
  0x25   :  { %v6978_v23 = vor.u32 %v8522_v19, %v6977_v18 }
  0x26   :  { %3617 = vmatpush.bf16.msrb.mxu1 %v8649_v22  ;;  %3836 = vmatpush.bf16.msrb.mxu0 %v8673_v24  ;;  %v6578_v22 = vor.u32 %v8422_v17, %v6577_v16  ;;  %v6290_v24 = vor.u32 %v8336_v20, %v6287_v21  ;;  %v6687_v16 = vld [vmem:[%s12139_s0 + $0x38c] sm:$0xf0]  ;;  %v6582_v17 = vor.u32 %v8410_v11, %v6579_v12  ;;  %v8473_v21 = vld [vmem:[%s12139_s0 + $0x450] sm:$0xf0] }
  0x27   :  { %3763 = vmatpush.bf16.msrb.mxu3 %v8665_v25  ;;  %3690 = vmatpush.bf16.msrb.mxu2 %v8657_v28  ;;  %v6385_v25 = vld [vmem:[%s12139_s0 + $0xd0] sm:$0xf]  ;;  %v8485_v12 = vld [vmem:[%s12139_s0 + $0x4b4] sm:$0xf] }
  0x28   :  { %v8689_v28 = vld [vmem:[%s12137_s1 + $0x1b0] sm:$0xff] }
  0x29   :  { %v6785_v20 = vld [vmem:[%s12139_s0 + $0x3f0] sm:$0xf] }
  0x2a   :  { %3618 = vmatpush.bf16.msrb.mxu1 %v8648_v27  ;;  %3837 = vmatpush.bf16.msrb.mxu0 %v8672_v29  ;;  %v6386_v27 = vor.u32 %v8373_v26, %v6385_v25  ;;  %v8697_v29 = vld [vmem:[%s12137_s1 + $0x1f0] sm:$0xff]  ;;  %v8435_v25 = vld [vmem:[%s12139_s0 + $0x324] sm:$0xf]  ;;  %v6679_v26 = vld [vmem:[%s12139_s0 + $0x384] sm:$0xf0] }
  0x2b   :  { %3764 = vmatpush.bf16.msrb.mxu3 %v8664_v30  ;;  %3691 = vmatpush.bf16.msrb.mxu2 %v8656_v32  ;;  %v8681_v30 = vld [vmem:[%s12137_s1 + $0x170] sm:$0xff]  ;;  %v6279_v32 = vld [vmem:[%s12139_s0 + $0x64] sm:$0xf0] }
  0x2e   :  { %3619 = vmatpush.bf16.msrb.mxu1 %v8647_v31  ;;  %3838 = vmatpush.bf16.msrb.mxu0 %v8671_v33  ;;  %v8335_v31 = vld [vmem:[%s12139_s0 + $0x4] sm:$0xf]  ;;  %v6293_v33 = vld [vmem:[%s12139_s0 + $0x10] sm:$0xf] }
  0x2f   :  { %3765 = vmatpush.bf16.msrb.mxu3 %v8663_v34  ;;  %3692 = vmatpush.bf16.msrb.mxu2 %v8655_v42  ;;  %v8349_v34 = vld [vmem:[%s12139_s0 + $0x70] sm:$0xf0]  ;;  %v6282_v37 = vor.u32 %v8335_v31, %v6279_v32  ;;  %v6682_v31 = vor.u32 %v8435_v25, %v6679_v26  ;;  %v7085_v26 = vld [vmem:[%s12139_s0 + $0x648] sm:$0xf] }
  0x30   :  { %v6294_v38 = vor.u32 %v8349_v34, %v6293_v33 }
  0x31   :  { %3556 = vmatmul.bf16.gmra.mxu0 %v6378_v45  ;;  %3576 = vmatmul.bf16.gmra.mxu1 %v6778_v46  ;;  %v6379_v45 = vld [vmem:[%s12139_s0 + $0x12c] sm:$0xf0]  ;;  %v6393_v46 = vld [vmem:[%s12139_s0 + $0xd8] sm:$0xf] }
  0x32   :  { %3620 = vmatpush.bf16.msrb.mxu1 %v8646_v41  ;;  %3839 = vmatpush.bf16.msrb.mxu0 %v8670_v44  ;;  %v8398_v41 = vld [vmem:[%s12139_s0 + $0x1f8] sm:$0xf0]  ;;  %v8360_v44 = vld [vmem:[%s12139_s0 + $0xcc] sm:$0xf] }
  0x33   :  { %3766 = vmatpush.bf16.msrb.mxu3 %v8662_v43  ;;  %3693 = vmatpush.bf16.msrb.mxu2 %v8654_v50  ;;  %v6486_v42 = vor.u32 %v8398_v41, %v6485_v40  ;;  %v8705_v43 = vld [vmem:[%s12137_s1 + $0x230] sm:$0xff]  ;;  %v6382_v50 = vor.u32 %v8360_v44, %v6379_v45  ;;  %v9274_v40 = vld [vmem:[%s12138_s2] ss:$0 sm:$0xff]  ;;  %v8694_v45 = vld [vmem:[%s12137_s1 + $0x1d8] sm:$0xff] }
  0x34   :  { %3606 = vmatmul.bf16.gmra.mxu3 %v7378_v47  ;;  %3596 = vmatmul.bf16.gmra.mxu2 %v7178_v54  ;;  %v8374_v47 = vld [vmem:[%s12139_s0 + $0x138] sm:$0xf0]  ;;  %v8423_v54 = vld [vmem:[%s12139_s0 + $0x2c0] sm:$0xf0] }
  0x36   :  { %3621 = vmatpush.bf16.msrb.mxu1 %v8645_v51  ;;  %3840 = vmatpush.bf16.msrb.mxu0 %v8669_v53  ;;  %v6394_v51 = vor.u32 %v8374_v47, %v6393_v46  ;;  %v6585_v53 = vld [vmem:[%s12139_s0 + $0x260] sm:$0xf]  ;;  %v8678_v46 = vld [vmem:[%s12137_s1 + $0x158] sm:$0xff] }
  0x37   :  { %3767 = vmatpush.bf16.msrb.mxu3 %v8661_v52  ;;  %3694 = vmatpush.bf16.msrb.mxu2 %v8653_v55  ;;  %v6490_v52 = vor.u32 %v8386_v48, %v6487_v49  ;;  %v6586_v55 = vor.u32 %v8423_v54, %v6585_v53  ;;  %v8460_v48 = vld [vmem:[%s12139_s0 + $0x3ec] sm:$0xf]  ;;  %v8486_v53 = vld [vmem:[%s12139_s0 + $0x4bc] sm:$0xf]  ;;  %v6887_v54 = vld [vmem:[%s12139_s0 + $0x51c] sm:$0xf0] }
  0x3a   :  { %3622 = vmatpush.bf16.msrb.mxu1 %v8644_v56  ;;  %3841 = vmatpush.bf16.msrb.mxu0 %v8668_v58  ;;  %v8688_v56 = vld [vmem:[%s12137_s1 + $0x1a8] sm:$0xff] }
  0x3b   :  { %3768 = vmatpush.bf16.msrb.mxu3 %v8660_v57  ;;  %3695 = vmatpush.bf16.msrb.mxu2 %v8652_v60  ;;  %v8696_v57 = vld [vmem:[%s12137_s1 + $0x1e8] sm:$0xff] }
  0x3c   :  { %v8680_v58 = vld [vmem:[%s12137_s1 + $0x168] sm:$0xff] }
  0x3d   :  { %v8704_v60 = vld [vmem:[%s12137_s1 + $0x228] sm:$0xff] }
  0x3e   :  { %3623 = vmatpush.bf16.msrb.mxu1 %v8643_v61  ;;  %3842 = vmatpush.bf16.msrb.mxu0 %v8667_v63  ;;  %v8385_v61 = vld [vmem:[%s12139_s0 + $0x194] sm:$0xf]  ;;  %v6493_v63 = vld [vmem:[%s12139_s0 + $0x1a0] sm:$0xf] }
  0x3f   :  { %3769 = vmatpush.bf16.msrb.mxu3 %v8659_v62  ;;  %3696 = vmatpush.bf16.msrb.mxu2 %v8651_v6  ;;  %v6479_v62 = vld [vmem:[%s12139_s0 + $0x1f4] sm:$0xf0]  ;;  %v6494_v4 = vor.u32 %v8399_v0, %v6493_v63  ;;  %v6685_v6 = vld [vmem:[%s12139_s0 + $0x328] sm:$0xf]  ;;  %v6985_v63 = vld [vmem:[%s12139_s0 + $0x580] sm:$0xf] }
  0x40   :  { %v6482_v3 = vor.u32 %v8385_v61, %v6479_v62  ;;  %v6890_v62 = vor.u32 %v8486_v53, %v6887_v54  ;;  %v8523_v0 = vld [vmem:[%s12139_s0 + $0x5e0] sm:$0xf0]  ;;  %v7087_v53 = vld [vmem:[%s12139_s0 + $0x6ac] sm:$0xf0] }
  0x41   :  { %3561 = vmatmul.bf16.gmra.mxu0 %v6478_v8  ;;  %3581 = vmatmul.bf16.gmra.mxu1 %v6878_v9  ;;  %v8687_v9 = vld [vmem:[%s12137_s1 + $0x1a0] sm:$0xff] }
  0x42   :  { %3908 = vmatpush.bf16.msra.mxu1 %v8682_v14  ;;  %4127 = vmatpush.bf16.msra.mxu0 %v8706_v15  ;;  %v8424_v14 = vld [vmem:[%s12139_s0 + $0x2c8] sm:$0xf0] }
  0x43   :  { %4054 = vmatpush.bf16.msra.mxu3 %v8698_v1  ;;  %3981 = vmatpush.bf16.msra.mxu2 %v8690_v7  ;;  %v8411_v1 = vld [vmem:[%s12139_s0 + $0x264] sm:$0xf]  ;;  %v8448_v7 = vld [vmem:[%s12139_s0 + $0x388] sm:$0xf0] }
  0x44   :  { %3611 = vmatmul.bf16.gmra.mxu3 %v1993_v10  ;;  %3697 = vmatmul.bf16.vlgmr.msrb.gmra.mxu2 %v6286_v13  ;;  %v6590_v5 = vor.u32 %v8411_v1, %v6587_v2  ;;  %v6686_v8 = vor.u32 %v8448_v7, %v6685_v6  ;;  %v8695_v10 = vld [vmem:[%s12137_s1 + $0x1e0] sm:$0xff]  ;;  %v6593_v13 = vld [vmem:[%s12139_s0 + $0x268] sm:$0xf]  ;;  %v8436_v15 = vld [vmem:[%s12139_s0 + $0x32c] sm:$0xf] }
  0x45   :  { %v6594_v18 = vor.u32 %v8424_v14, %v6593_v13  ;;  %v6690_v19 = vor.u32 %v8436_v15, %v6687_v16  ;;  %v8702_v2 = vld [vmem:[%s12137_s1 + $0x218] sm:$0xff]  ;;  %v6893_v15 = vld [vmem:[%s12139_s0 + $0x4c0] sm:$0xf]  ;;  %v8499_v16 = vld [vmem:[%s12139_s0 + $0x520] sm:$0xf0] }
  0x46   :  { %3909 = vmatpush.bf16.msra.mxu1 %v8681_v30  ;;  %4128 = vmatpush.bf16.msra.mxu0 %v8705_v43  ;;  %v6787_v30 = vld [vmem:[%s12139_s0 + $0x454] sm:$0xf0] }
  0x47   :  { %3982 = vmatpush.bf16.msra.mxu2 %v8689_v28  ;;  %4055 = vmatpush.bf16.msra.mxu3 %v8697_v29  ;;  %v8449_v28 = vld [vmem:[%s12139_s0 + $0x390] sm:$0xf0]  ;;  %v6879_v14 = vld [vmem:[%s12139_s0 + $0x514] sm:$0xf0] }
  0x48   :  { %v8461_v29 = vld [vmem:[%s12139_s0 + $0x3f4] sm:$0xf] }
  0x49   :  { %v6790_v35 = vor.u32 %v8461_v29, %v6787_v30 }
  0x4a   :  { %3910 = vmatpush.bf16.msra.mxu1 %v8680_v58  ;;  %4129 = vmatpush.bf16.msra.mxu0 %v8704_v60 }
  0x4b   :  { %3983 = vmatpush.bf16.msra.mxu2 %v8688_v56  ;;  %4056 = vmatpush.bf16.msra.mxu3 %v8696_v57 }
  0x4f   :  { %3984 = vmatpush.bf16.msra.mxu2 %v8687_v9  ;;  %4057 = vmatpush.bf16.msra.mxu3 %v8695_v10 }
  0x51   :  { %3566 = vmatmul.bf16.gmra.mxu0 %v6578_v22  ;;  %3586 = vmatmul.bf16.gmra.mxu1 %v6978_v23  ;;  %v8679_v22 = vld [vmem:[%s12137_s1 + $0x160] sm:$0xff]  ;;  %v6786_v23 = vor.u32 %v8473_v21, %v6785_v20  ;;  %v6894_v20 = vor.u32 %v8499_v16, %v6893_v15 }
  0x52   :  { %3911 = vmatpush.bf16.msra.mxu1 %v8679_v22  ;;  %v8535_v16 = vld [vmem:[%s12139_s0 + $0x644] sm:$0xf] }
  0x53   :  { %4058 = vmatpush.bf16.msra.mxu3 %v8694_v45 }
  0x54   :  { %3770 = vmatmul.bf16.vlgmr.msrb.gmra.mxu3 %v6290_v24  ;;  %3702 = vmatmul.bf16.gmra.mxu2 %v6386_v27  ;;  %v8703_v24 = vld [vmem:[%s12137_s1 + $0x220] sm:$0xff]  ;;  %v6693_v27 = vld [vmem:[%s12139_s0 + $0x330] sm:$0xf] }
  0x55   :  { %4130 = vmatpush.bf16.msra.mxu0 %v8703_v24  ;;  %v6694_v32 = vor.u32 %v8449_v28, %v6693_v27  ;;  %v8548_v27 = vld [vmem:[%s12139_s0 + $0x6a8] sm:$0xf0] }
  0x56   :  { %3912 = vmatpush.bf16.msra.mxu1 %v8678_v46 }
  0x59   :  { %4131 = vmatpush.bf16.msra.mxu0 %v8702_v2  ;;  %v8573_v2 = vld [vmem:[%s12139_s0 + $0x770] sm:$0xf0] }
  0x61   :  { %3624 = vmatmul.bf16.vlgmr.msrb.gmra.mxu1 %v6282_v37  ;;  %3843 = vmatmul.bf16.vlgmr.msrb.gmra.mxu0 %v6294_v38  ;;  %v8498_v37 = vld [vmem:[%s12139_s0 + $0x518] sm:$0xf0] }
  0x62   :  { %v6886_v38 = vor.u32 %v8498_v37, %v6885_v36  ;;  %v8693_v36 = vld [vmem:[%s12137_s1 + $0x1d0] sm:$0xff] }
  0x63   :  { %v8677_v37 = vld [vmem:[%s12137_s1 + $0x150] sm:$0xff]  ;;  %4059 = vmatpush.bf16.msra.mxu3 %v8693_v36 }
  0x64   :  { %3775 = vmatmul.bf16.gmra.mxu3 %v6390_v39  ;;  %3707 = vmatmul.bf16.gmra.mxu2 %v6486_v42  ;;  %v8686_v39 = vld [vmem:[%s12137_s1 + $0x198] sm:$0xff] }
  0x65   :  { %3985 = vmatpush.bf16.msra.mxu2 %v8686_v39  ;;  %3913 = vmatpush.bf16.msra.mxu1 %v8677_v37 }
  0x71   :  { %3629 = vmatmul.bf16.gmra.mxu1 %v6382_v50  ;;  %3848 = vmatmul.bf16.gmra.mxu0 %v6394_v51  ;;  %v6779_v50 = vld [vmem:[%s12139_s0 + $0x44c] sm:$0xf0]  ;;  %v6793_v51 = vld [vmem:[%s12139_s0 + $0x3f8] sm:$0xf] }
  0x74   :  { %3780 = vmatmul.bf16.gmra.mxu3 %v6490_v52  ;;  %3712 = vmatmul.bf16.gmra.mxu2 %v6586_v55  ;;  %v8474_v52 = vld [vmem:[%s12139_s0 + $0x458] sm:$0xf0]  ;;  %v6782_v55 = vor.u32 %v8460_v48, %v6779_v50  ;;  %v6979_v48 = vld [vmem:[%s12139_s0 + $0x5dc] sm:$0xf0]  ;;  %v6993_v50 = vld [vmem:[%s12139_s0 + $0x588] sm:$0xf] }
  0x75   :  { %v6794_v56 = vor.u32 %v8474_v52, %v6793_v51  ;;  %v8524_v51 = vld [vmem:[%s12139_s0 + $0x5e8] sm:$0xf0] }
  0x76   :  { %v8536_v52 = vld [vmem:[%s12139_s0 + $0x64c] sm:$0xf] }
  0x81   :  { %3634 = vmatmul.bf16.gmra.mxu1 %v6482_v3  ;;  %3853 = vmatmul.bf16.gmra.mxu0 %v6494_v4 }
  0x84   :  { %3785 = vmatmul.bf16.gmra.mxu3 %v6590_v5  ;;  %3717 = vmatmul.bf16.gmra.mxu2 %v6686_v8  ;;  %v6986_v5 = vor.u32 %v8523_v0, %v6985_v63  ;;  %v7090_v63 = vor.u32 %v8536_v52, %v7087_v53  ;;  %v7185_v0 = vld [vmem:[%s12139_s0 + $0x710] sm:$0xf] }
  0x91   :  { %3639 = vmatmul.bf16.gmra.mxu1 %v6582_v17  ;;  %3858 = vmatmul.bf16.gmra.mxu0 %v6594_v18  ;;  %v8511_v17 = vld [vmem:[%s12139_s0 + $0x584] sm:$0xf]  ;;  %v6987_v18 = vld [vmem:[%s12139_s0 + $0x5e4] sm:$0xf0] }
  0x92   :  { %v6990_v25 = vor.u32 %v8511_v17, %v6987_v18  ;;  %v7079_v17 = vld [vmem:[%s12139_s0 + $0x6a4] sm:$0xf0]  ;;  %v7093_v18 = vld [vmem:[%s12139_s0 + $0x650] sm:$0xf] }
  0x94   :  { %3790 = vmatmul.bf16.gmra.mxu3 %v6690_v19  ;;  %3722 = vmatmul.bf16.gmra.mxu2 %v6786_v23  ;;  %v6882_v19 = vor.u32 %v8485_v12, %v6879_v14 }
  0x9e   :  { %v9258_v33 = vpop.f32.mrf.mxu0  ;;  %v9260_v34 = vpop.f32.mrf.mxu1 }
  0xa1   :  { %3644 = vmatmul.bf16.gmra.mxu1 %v6682_v31  ;;  %3863 = vmatmul.bf16.gmra.mxu0 %v6694_v32  ;;  %v7086_v31 = vor.u32 %v8548_v27, %v7085_v26 }
  0xa4   :  { %3795 = vmatmul.bf16.gmra.mxu3 %v6790_v35  ;;  %3727 = vmatmul.bf16.gmra.mxu2 %v6886_v38  ;;  %v8685_v35 = vld [vmem:[%s12137_s1 + $0x190] sm:$0xff] }
  0xa5   :  { %3986 = vmatpush.bf16.msra.mxu2 %v8685_v35 }
  0xa6   :  { %v9276_v42 = vpop.f32.mrf.mxu0  ;;  %v9278_v43 = vpop.f32.mrf.mxu1 }
  0xa7   :  { %v3602_v41 = vpop.f32.mrf.mxu3  ;;  %v3592_v47 = vpop.f32.mrf.mxu2  ;;  %v3555_v53 = vadd.f32 %v9274_v40, %v9276_v42  ;;  %v7179_v42 = vld [vmem:[%s12139_s0 + $0x76c] sm:$0xf0] }
  0xa8   :  { %v9281_v44 = vadd.f32 %v9274_v40, %v3602_v41  ;;  %v9293_v49 = vadd.f32 %v9274_v40, %v3592_v47  ;;  %v8510_v47 = vld [vmem:[%s12139_s0 + $0x57c] sm:$0xf] }
  0xa9   :  { %v6982_v54 = vor.u32 %v8510_v47, %v6979_v48 }
  0xae   :  { %v9310_v58 = vpop.f32.mrf.mxu0  ;;  %v3577_v60 = vpop.f32.mrf.mxu1 }
  0xaf   :  { %v3604_v57 = vpop.f32.mrf.mxu3  ;;  %v9322_v1 = vadd.f32 %v9274_v40, %v3577_v60  ;;  %v3594_v3 = vpop.f32.mrf.mxu2 }
  0xb0   :  { %v9313_v61 = vadd.f32 %v9274_v40, %v3604_v57  ;;  %v9328_v4 = vadd.f32 %v9274_v40, %v3594_v3  ;;  %v8701_v57 = vld [vmem:[%s12137_s1 + $0x210] sm:$0xff] }
  0xb1   :  { %3649 = vmatmul.bf16.gmra.mxu1 %v6782_v55  ;;  %3868 = vmatmul.bf16.gmra.mxu0 %v6794_v56  ;;  %v6994_v55 = vor.u32 %v8524_v51, %v6993_v50 }
  0xb2   :  { %4132 = vmatpush.bf16.msra.mxu0 %v8701_v57 }
  0xb4   :  { %3800 = vmatmul.bf16.gmra.mxu3 %v6890_v62  ;;  %3732 = vmatmul.bf16.gmra.mxu2 %v6986_v5 }
  0xb6   :  { %v9330_v7 = vpop.f32.mrf.mxu0  ;;  %v3579_v8 = vpop.f32.mrf.mxu1 }
  0xb7   :  { %v3607_v6 = vpop.f32.mrf.mxu3  ;;  %v9336_v10 = vadd.f32 %v9274_v40, %v3579_v8  ;;  %v3597_v11 = vpop.f32.mrf.mxu2 }
  0xb8   :  { %v9333_v9 = vadd.f32 %v9274_v40, %v3607_v6  ;;  %v9342_v13 = vadd.f32 %v9274_v40, %v3597_v11  ;;  %v7186_v6 = vor.u32 %v8573_v2, %v7185_v0  ;;  %v8560_v2 = vld [vmem:[%s12139_s0 + $0x70c] sm:$0xf] }
  0xbe   :  { %v9359_v22 = vpop.f32.mrf.mxu0  ;;  %v3582_v23 = vpop.f32.mrf.mxu1 }
  0xbf   :  { %v3609_v21 = vpop.f32.mrf.mxu3  ;;  %v9371_v28 = vadd.f32 %v9274_v40, %v3582_v23  ;;  %v3599_v29 = vpop.f32.mrf.mxu2  ;;  %v3553_v23 = vadd.f32 %v9274_v40, %v9258_v33  ;;  %v7285_v33 = vld [vmem:[%s12139_s0 + $0x7d8] sm:$0xf] }
  0xc0   :  { %v9362_v24 = vadd.f32 %v9274_v40, %v3609_v21  ;;  %v9374_v30 = vadd.f32 %v9274_v40, %v3599_v29  ;;  %v7187_v21 = vld [vmem:[%s12139_s0 + $0x774] sm:$0xf0]  ;;  %v8684_v29 = vld [vmem:[%s12137_s1 + $0x188] sm:$0xff] }
  0xc1   :  { %3654 = vmatmul.bf16.gmra.mxu1 %v6882_v19  ;;  %3873 = vmatmul.bf16.gmra.mxu0 %v6894_v20  ;;  %v8549_v19 = vld [vmem:[%s12139_s0 + $0x6b0] sm:$0xf0] }
  0xc2   :  { %v8561_v20 = vld [vmem:[%s12139_s0 + $0x714] sm:$0xf]  ;;  %v7094_v26 = vor.u32 %v8549_v19, %v7093_v18  ;;  %3987 = vmatpush.bf16.msra.mxu2 %v8684_v29  ;;  %v7182_v19 = vor.u32 %v8560_v2, %v7179_v42  ;;  %v8623_v29 = vld [vmem:[%s12139_s0 + $0x900] sm:$0xf0]  ;;  %v7387_v2 = vld [vmem:[%s12139_s0 + $0x904] sm:$0xf0]  ;;  %v3563_v42 = vadd.f32 %v9274_v40, %v9359_v22 }
  0xc3   :  { %v7190_v37 = vor.u32 %v8561_v20, %v7187_v21 }
  0xc4   :  { %3805 = vmatmul.bf16.gmra.mxu3 %v6990_v25  ;;  %3737 = vmatmul.bf16.gmra.mxu2 %v7086_v31  ;;  %v7082_v25 = vor.u32 %v8535_v16, %v7079_v17  ;;  %v8692_v31 = vld [vmem:[%s12137_s1 + $0x1c8] sm:$0xff]  ;;  %v7287_v16 = vld [vmem:[%s12139_s0 + $0x83c] sm:$0xf0]  ;;  %v3558_v17 = vadd.f32 %v9274_v40, %v9310_v58 }
  0xc5   :  { %4060 = vmatpush.bf16.msra.mxu3 %v8692_v31 }
  0xc6   :  { %v9385_v38 = vpop.f32.mrf.mxu0  ;;  %v3584_v39 = vpop.f32.mrf.mxu1 }
  0xc7   :  { %v3612_v32 = vpop.f32.mrf.mxu3  ;;  %v9391_v45 = vadd.f32 %v9274_v40, %v3584_v39  ;;  %v3698_v46 = vpop.f32.mrf.mxu2  ;;  %v8598_v39 = vld [vmem:[%s12139_s0 + $0x838] sm:$0xf0] }
  0xc8   :  { %v9388_v41 = vadd.f32 %v9274_v40, %v3612_v32  ;;  %v8676_v32 = vld [vmem:[%s12137_s1 + $0x148] sm:$0xff]  ;;  %v7286_v51 = vor.u32 %v8598_v39, %v7285_v33 }
  0xc9   :  { %3914 = vmatpush.bf16.msra.mxu1 %v8676_v32 }
  0xce   :  { %v9414_v60 = vpop.f32.mrf.mxu0  ;;  %v3587_v62 = vpop.f32.mrf.mxu1 }
  0xcf   :  { %v3614_v56 = vpop.f32.mrf.mxu3  ;;  %v9423_v3 = vadd.f32 %v9274_v40, %v3587_v62  ;;  %v3700_v5 = vpop.f32.mrf.mxu2 }
  0xd0   :  { %v8700_v56 = vld [vmem:[%s12137_s1 + $0x208] sm:$0xff] }
  0xd1   :  { %3659 = vmatmul.bf16.gmra.mxu1 %v6982_v54  ;;  %3878 = vmatmul.bf16.gmra.mxu0 %v6994_v55 }
  0xd2   :  { %4133 = vmatpush.bf16.msra.mxu0 %v8700_v56  ;;  %v7279_v56 = vld [vmem:[%s12139_s0 + $0x834] sm:$0xf0] }
  0xd4   :  { %3810 = vmatmul.bf16.gmra.mxu3 %v7090_v63  ;;  %3742 = vmatmul.bf16.gmra.mxu2 %v7186_v6  ;;  %v7193_v6 = vld [vmem:[%s12139_s0 + $0x718] sm:$0xf] }
  0xd6   :  { %v9425_v11 = vpop.f32.mrf.mxu0  ;;  %v3589_v12 = vpop.f32.mrf.mxu1 }
  0xd7   :  { %v3771_v8 = vpop.f32.mrf.mxu3  ;;  %v9428_v14 = vadd.f32 %v9274_v40, %v3589_v12  ;;  %v3703_v15 = vpop.f32.mrf.mxu2 }
  0xde   :  { %v3625_v35 = vpop.f32.mrf.mxu1  ;;  %v3844_v36 = vpop.f32.mrf.mxu0 }
  0xdf   :  { %v3773_v27 = vpop.f32.mrf.mxu3  ;;  %v3626_v47 = vadd.f32 %v3625_v35, %v3553_v23  ;;  %v3705_v48 = vpop.f32.mrf.mxu2 }
  0xe1   :  { %v3699_v50 = vadd.f32 %v3698_v46, %v3626_v47  ;;  %3664 = vmatmul.bf16.gmra.mxu1 %v7082_v25  ;;  %3883 = vmatmul.bf16.gmra.mxu0 %v7094_v26  ;;  %v8683_v47 = vld [vmem:[%s12137_s1 + $0x180] sm:$0xff] }
  0xe2   :  { %3988 = vmatpush.bf16.msra.mxu2 %v8683_v47 }
  0xe3   :  { %v3772_v52 = vadd.f32 %v3771_v8, %v3699_v50  ;;  %v8574_v8 = vld [vmem:[%s12139_s0 + $0x778] sm:$0xf0] }
  0xe4   :  { %3815 = vmatmul.bf16.gmra.mxu3 %v7190_v37  ;;  %3747 = vmatmul.bf16.gmra.mxu2 %v7286_v51  ;;  %v7194_v20 = vor.u32 %v8574_v8, %v7193_v6  ;;  %v3560_v37 = vadd.f32 %v9274_v40, %v9330_v7  ;;  %v8585_v7 = vld [vmem:[%s12139_s0 + $0x7d4] sm:$0xf] }
  0xe5   :  { %v9467_v54 = vadd.f32 %v3844_v36, %v3772_v52  ;;  %v7282_v8 = vor.u32 %v8585_v7, %v7279_v56 }
  0xe6   :  { %v3627_v57 = vpop.f32.mrf.mxu1  ;;  %v3846_v62 = vpop.f32.mrf.mxu0 }
  0xe7   :  { %v3776_v55 = vpop.f32.mrf.mxu3  ;;  %v3628_v63 = vadd.f32 %v3627_v57, %v3555_v53  ;;  %v9472_v46 = vpop.f32.mrf.mxu2  ;;  %v7293_v57 = vld [vmem:[%s12139_s0 + $0x7e0] sm:$0xf] }
  0xe9   :  { %v3701_v0 = vadd.f32 %v3700_v5, %v3628_v63  ;;  %v8586_v5 = vld [vmem:[%s12139_s0 + $0x7dc] sm:$0xf] }
  0xea   :  { %v7290_v26 = vor.u32 %v8586_v5, %v7287_v16 }
  0xeb   :  { %v3774_v12 = vadd.f32 %v3773_v27, %v3701_v0  ;;  %v7385_v27 = vld [vmem:[%s12139_s0 + $0x8a0] sm:$0xf]  ;;  %v8611_v0 = vld [vmem:[%s12139_s0 + $0x8a4] sm:$0xf] }
  0xec   :  { %v7386_v58 = vor.u32 %v8623_v29, %v7385_v27 }
  0xed   :  { %v9494_v18 = vadd.f32 %v3846_v62, %v3774_v12  ;;  %v8599_v62 = vld [vmem:[%s12139_s0 + $0x840] sm:$0xf0] }
  0xee   :  { %v3630_v23 = vpop.f32.mrf.mxu1  ;;  %v3849_v25 = vpop.f32.mrf.mxu0  ;;  %v7294_v12 = vor.u32 %v8599_v62, %v7293_v57 }
  0xef   :  { %v3778_v21 = vpop.f32.mrf.mxu3  ;;  %v3631_v31 = vadd.f32 %v3630_v23, %v3558_v17  ;;  %v3710_v32 = vpop.f32.mrf.mxu2  ;;  %v8675_v17 = vld [vmem:[%s12137_s1 + $0x140] sm:$0xff]  ;;  %v7390_v23 = vor.u32 %v8611_v0, %v7387_v2 }
  0xf0   :  { %3915 = vmatpush.bf16.msra.mxu1 %v8675_v17 }
  0xf1   :  { %v3704_v35 = vadd.f32 %v3703_v15, %v3631_v31  ;;  %3669 = vmatmul.bf16.gmra.mxu1 %v7182_v19  ;;  %3888 = vmatmul.bf16.gmra.mxu0 %v7194_v20  ;;  %v8691_v15 = vld [vmem:[%s12137_s1 + $0x1c0] sm:$0xff]  ;;  %v3565_v31 = vadd.f32 %v9274_v40, %v9385_v38  ;;  %v7393_v38 = vld [vmem:[%s12139_s0 + $0x8a8] sm:$0xf] }
  0xf2   :  { %4061 = vmatpush.bf16.msra.mxu3 %v8691_v15  ;;  %v8699_v19 = vld [vmem:[%s12137_s1 + $0x200] sm:$0xff] }
  0xf3   :  { %v3777_v36 = vadd.f32 %v3776_v55, %v3704_v35  ;;  %4134 = vmatpush.bf16.msra.mxu0 %v8699_v19  ;;  %v3570_v19 = vadd.f32 %v9274_v40, %v9425_v11 }
  0xf4   :  { %3820 = vmatmul.bf16.gmra.mxu3 %v7290_v26  ;;  %3752 = vmatmul.bf16.gmra.mxu2 %v7386_v58 }
  0xf5   :  { %v9504_v33 = vadd.f32 %v3849_v25, %v3777_v36 }
  0xf6   :  { %v3632_v50 = vpop.f32.mrf.mxu1  ;;  %v3851_v51 = vpop.f32.mrf.mxu0 }
  0xf7   :  { %v3781_v39 = vpop.f32.mrf.mxu3  ;;  %v3633_v52 = vadd.f32 %v3632_v50, %v3560_v37  ;;  %v3713_v53 = vpop.f32.mrf.mxu2 }
  0xf9   :  { %v3706_v55 = vadd.f32 %v3705_v48, %v3633_v52  ;;  %v327_v48 = vld [vmem:[%s12139_s0 + $0x968] sm:$0xff] }
  0xfa   :  { %v1670_v16 = vunpack.c.l.b16 %v327_v48  ;;  %v1671_v52 = vunpack.c.h.b16 %v327_v48  ;;  %v6301_v48 = vld [vmem:[%s12139_s0 + $0x18] sm:$0xf] }
  0xfb   :  { %v3779_v63 = vadd.f32 %v3778_v21, %v3706_v55 }
  0xfc   :  { %v1995_v27 = vpack.c.b16 %v1670_v16, %v1670_v16 }
  0xfd   :  { %v9535_v6 = vadd.f32 %v3851_v51, %v3779_v63  ;;  %v8624_v51 = vld [vmem:[%s12139_s0 + $0x908] sm:$0xf0]  ;;  %v8722_v63 = vld [vmem:[%s12137_s1 + $0x2b8] sm:$0xff] }
  0xfe   :  { %v3635_v20 = vpop.f32.mrf.mxu1  ;;  %v3854_v21 = vpop.f32.mrf.mxu0  ;;  %v7394_v57 = vor.u32 %v8624_v51, %v7393_v38  ;;  %4273 = vmatpush.bf16.msrb.mxu2 %v8722_v63 }
  0xff   :  { %v3783_v5 = vpop.f32.mrf.mxu3  ;;  %v3636_v25 = vadd.f32 %v3635_v20, %v3563_v42  ;;  %v3715_v22 = vpop.f32.mrf.mxu2  ;;  %v1996_v42 = vpack.c.b16 %v1671_v52, %v1671_v52 }
 0x101   :  { %v3709_v26 = vadd.f32 %v9472_v46, %v3636_v25  ;;  %3674 = vmatmul.bf16.gmra.mxu1 %v7282_v8  ;;  %3893 = vmatmul.bf16.gmra.mxu0 %v7294_v12  ;;  %v8610_v46 = vld [vmem:[%s12139_s0 + $0x89c] sm:$0xf] }
 0x103   :  { %v3782_v29 = vadd.f32 %v3781_v39, %v3709_v26  ;;  %v7379_v39 = vld [vmem:[%s12139_s0 + $0x8fc] sm:$0xf0] }
 0x104   :  { %3825 = vmatmul.bf16.gmra.mxu3 %v7390_v23  ;;  %3757 = vmatmul.bf16.gmra.mxu2 %v1995_v27  ;;  %v7382_v56 = vor.u32 %v8610_v46, %v7379_v39  ;;  %v8730_v23 = vld [vmem:[%s12137_s1 + $0x2f8] sm:$0xff]  ;;  %v9586_v27 = vld [vmem:[%s12139_s0 + $0x970] sm:$0xff]  ;;  %v3573_v46 = vadd.f32 %v9274_v40, %v9260_v34  ;;  %v8375_v34 = vld [vmem:[%s12139_s0 + $0x140] sm:$0xf0] }
 0x105   :  { %v9546_v35 = vadd.f32 %v3854_v21, %v3782_v29  ;;  %4346 = vmatpush.bf16.msrb.mxu3 %v8730_v23 }
 0x106   :  { %v3637_v36 = vpop.f32.mrf.mxu1  ;;  %v3856_v37 = vpop.f32.mrf.mxu0 }
 0x107   :  { %v3786_v58 = vpop.f32.mrf.mxu3  ;;  %v3638_v47 = vadd.f32 %v3637_v36, %v3565_v31  ;;  %v3718_v15 = vpop.f32.mrf.mxu2  ;;  %v1669_v31 = vunpack.c.h.b16 %v9036_v59  ;;  %v1672_v36 = vunpack.c.l.b16 %v9586_v27 }
 0x109   :  { %v3711_v50 = vadd.f32 %v3710_v32, %v3638_v47  ;;  %v3568_v32 = vadd.f32 %v9274_v40, %v9414_v60  ;;  %v8350_v60 = vld [vmem:[%s12139_s0 + $0x78] sm:$0xf0]  ;;  %v1994_v38 = vpack.c.b16 %v1669_v31, %v1669_v31  ;;  %v1997_v51 = vpack.c.b16 %v1672_v36, %v1672_v36  ;;  %v8729_v36 = vld [vmem:[%s12137_s1 + $0x2f0] sm:$0xff] }
 0x10a   :  { %v6302_v16 = vor.u32 %v8350_v60, %v6301_v48  ;;  %v8338_v47 = vld [vmem:[%s12139_s0 + $0x1c] sm:$0xf]  ;;  %4347 = vmatpush.bf16.msrb.mxu3 %v8729_v36 }
 0x10b   :  { %v3784_v55 = vadd.f32 %v3783_v5, %v3711_v50  ;;  %v6303_v50 = vld [vmem:[%s12139_s0 + $0x7c] sm:$0xf0] }
 0x10d   :  { %v9562_v7 = vadd.f32 %v3856_v37, %v3784_v55 }
 0x10e   :  { %v3640_v0 = vpop.f32.mrf.mxu1  ;;  %v3859_v2 = vpop.f32.mrf.mxu0 }
 0x10f   :  { %v3788_v62 = vpop.f32.mrf.mxu3  ;;  %v3641_v8 = vadd.f32 %v3640_v0, %v3568_v32  ;;  %v3720_v12 = vpop.f32.mrf.mxu2  ;;  %v6306_v32 = vor.u32 %v8338_v47, %v6303_v50 }
 0x111   :  { %v3714_v5 = vadd.f32 %v3713_v53, %v3641_v8  ;;  %3679 = vmatmul.bf16.gmra.mxu1 %v7382_v56  ;;  %3898 = vmatmul.bf16.gmra.mxu0 %v7394_v57  ;;  %v8714_v53 = vld [vmem:[%s12137_s1 + $0x278] sm:$0xff]  ;;  %v6401_v56 = vld [vmem:[%s12139_s0 + $0xe0] sm:$0xf] }
 0x112   :  { %4200 = vmatpush.bf16.msrb.mxu1 %v8714_v53  ;;  %v6402_v0 = vor.u32 %v8375_v34, %v6401_v56  ;;  %v6403_v53 = vld [vmem:[%s12139_s0 + $0x144] sm:$0xf0] }
 0x113   :  { %v3787_v17 = vadd.f32 %v3786_v58, %v3714_v5 }
 0x114   :  { %3830 = vmatmul.bf16.gmra.mxu3 %v1996_v42  ;;  %3989 = vmatmul.bf16.vlgmr.msra.gmra.mxu2 %v6302_v16  ;;  %v3575_v42 = vadd.f32 %v9274_v40, %v9278_v43  ;;  %v6309_v40 = vld [vmem:[%s12139_s0 + $0x20] sm:$0xf]  ;;  %v8351_v43 = vld [vmem:[%s12139_s0 + $0x80] sm:$0xf0] }
 0x115   :  { %v9575_v20 = vadd.f32 %v3859_v2, %v3787_v17 }
 0x116   :  { %v3642_v25 = vpop.f32.mrf.mxu1  ;;  %v3861_v26 = vpop.f32.mrf.mxu0 }
 0x117   :  { %v3791_v21 = vpop.f32.mrf.mxu3  ;;  %v3643_v11 = vadd.f32 %v3642_v25, %v3570_v19  ;;  %v3723_v29 = vpop.f32.mrf.mxu2 }
 0x119   :  { %v3716_v58 = vadd.f32 %v3715_v22, %v3643_v11  ;;  %v8738_v22 = vld [vmem:[%s12137_s1 + $0x338] sm:$0xff]  ;;  %v6310_v11 = vor.u32 %v8351_v43, %v6309_v40 }
 0x11a   :  { %4419 = vmatpush.bf16.msrb.mxu0 %v8738_v22 }
 0x11b   :  { %v3789_v37 = vadd.f32 %v3788_v62, %v3716_v58  ;;  %v8721_v58 = vld [vmem:[%s12137_s1 + $0x2b0] sm:$0xff] }
 0x11c   :  { %4274 = vmatpush.bf16.msrb.mxu2 %v8721_v58 }
 0x11d   :  { %v9598_v39 = vadd.f32 %v3861_v26, %v3789_v37  ;;  %v8713_v37 = vld [vmem:[%s12137_s1 + $0x270] sm:$0xff] }
 0x11e   :  { %v3645_v52 = vpop.f32.mrf.mxu1  ;;  %v3864_v55 = vpop.f32.mrf.mxu0  ;;  %4201 = vmatpush.bf16.msrb.mxu1 %v8713_v37 }
 0x11f   :  { %v3793_v59 = vpop.f32.mrf.mxu3  ;;  %v3646_v57 = vadd.f32 %v3645_v52, %v3573_v46  ;;  %v3725_v62 = vpop.f32.mrf.mxu2 }
 0x121   :  { %v3719_v63 = vadd.f32 %v3718_v15, %v3646_v57  ;;  %3684 = vmatmul.bf16.gmra.mxu1 %v1994_v38  ;;  %3903 = vmatmul.bf16.gmra.mxu0 %v1997_v51  ;;  %v8337_v15 = vld [vmem:[%s12139_s0 + $0x14] sm:$0xf]  ;;  %v6501_v38 = vld [vmem:[%s12139_s0 + $0x1a8] sm:$0xf]  ;;  %v8400_v51 = vld [vmem:[%s12139_s0 + $0x208] sm:$0xf0] }
 0x122   :  { %v8737_v57 = vld [vmem:[%s12137_s1 + $0x330] sm:$0xff] }
 0x123   :  { %v3792_v2 = vadd.f32 %v3791_v21, %v3719_v63  ;;  %v6295_v21 = vld [vmem:[%s12139_s0 + $0x74] sm:$0xf0]  ;;  %4420 = vmatpush.bf16.msrb.mxu0 %v8737_v57  ;;  %v6509_v57 = vld [vmem:[%s12139_s0 + $0x1b0] sm:$0xf] }
 0x124   :  { %4062 = vmatmul.bf16.vlgmr.msra.gmra.mxu3 %v6306_v32  ;;  %3994 = vmatmul.bf16.gmra.mxu2 %v6402_v0  ;;  %v6298_v26 = vor.u32 %v8337_v15, %v6295_v21 }
 0x125   :  { %v9611_v48 = vadd.f32 %v3864_v55, %v3792_v2  ;;  %v6502_v55 = vor.u32 %v8400_v51, %v6501_v38  ;;  %v8728_v38 = vld [vmem:[%s12137_s1 + $0x2e8] sm:$0xff] }
 0x126   :  { %v3647_v8 = vpop.f32.mrf.mxu1  ;;  %v3866_v5 = vpop.f32.mrf.mxu0  ;;  %4348 = vmatpush.bf16.msrb.mxu3 %v8728_v38  ;;  %v8426_v38 = vld [vmem:[%s12139_s0 + $0x2d8] sm:$0xf0] }
 0x127   :  { %v3796_v60 = vpop.f32.mrf.mxu3  ;;  %v3648_v16 = vadd.f32 %v3647_v8, %v3575_v42  ;;  %v3728_v17 = vpop.f32.mrf.mxu2  ;;  %v8362_v42 = vld [vmem:[%s12139_s0 + $0xdc] sm:$0xf]  ;;  %v6409_v8 = vld [vmem:[%s12139_s0 + $0xe8] sm:$0xf] }
 0x129   :  { %v3721_v19 = vadd.f32 %v3720_v12, %v3648_v16  ;;  %v8363_v12 = vld [vmem:[%s12139_s0 + $0xe4] sm:$0xf]  ;;  %v6503_v16 = vld [vmem:[%s12139_s0 + $0x20c] sm:$0xf0] }
 0x12a   :  { %v6406_v46 = vor.u32 %v8363_v12, %v6403_v53  ;;  %v6601_v53 = vld [vmem:[%s12139_s0 + $0x270] sm:$0xf] }
 0x12b   :  { %v3794_v23 = vadd.f32 %v3793_v59, %v3721_v19 }
 0x12d   :  { %v9631_v25 = vadd.f32 %v3866_v5, %v3794_v23  ;;  %v8376_v5 = vld [vmem:[%s12139_s0 + $0x148] sm:$0xf0] }
 0x12e   :  { %v3650_v47 = vpop.f32.mrf.mxu1  ;;  %v3869_v50 = vpop.f32.mrf.mxu0  ;;  %v6410_v21 = vor.u32 %v8376_v5, %v6409_v8  ;;  %v8736_v8 = vld [vmem:[%s12137_s1 + $0x328] sm:$0xff] }
 0x12f   :  { %v3798_v31 = vpop.f32.mrf.mxu3  ;;  %v3651_v59 = vadd.f32 %v3650_v47, %v9322_v1  ;;  %v3730_v22 = vpop.f32.mrf.mxu2  ;;  %4421 = vmatpush.bf16.msrb.mxu0 %v8736_v8 }
 0x131   :  { %v3724_v52 = vadd.f32 %v3723_v29, %v3651_v59  ;;  %3916 = vmatmul.bf16.vlgmr.msra.gmra.mxu1 %v6298_v26  ;;  %4135 = vmatmul.bf16.vlgmr.msra.gmra.mxu0 %v6310_v11  ;;  %v8425_v26 = vld [vmem:[%s12139_s0 + $0x2d0] sm:$0xf0] }
 0x132   :  { %v6602_v36 = vor.u32 %v8425_v26, %v6601_v53 }
 0x133   :  { %v3797_v32 = vadd.f32 %v3796_v60, %v3724_v52  ;;  %v6395_v60 = vld [vmem:[%s12139_s0 + $0x13c] sm:$0xf0] }
 0x134   :  { %4067 = vmatmul.bf16.gmra.mxu3 %v6406_v46  ;;  %3999 = vmatmul.bf16.gmra.mxu2 %v6502_v55  ;;  %v6398_v15 = vor.u32 %v8362_v42, %v6395_v60  ;;  %v8720_v46 = vld [vmem:[%s12137_s1 + $0x2a8] sm:$0xff] }
 0x135   :  { %v9649_v56 = vadd.f32 %v3869_v50, %v3797_v32  ;;  %4275 = vmatpush.bf16.msrb.mxu2 %v8720_v46  ;;  %v8387_v32 = vld [vmem:[%s12139_s0 + $0x1a4] sm:$0xf] }
 0x136   :  { %v3652_v63 = vpop.f32.mrf.mxu1  ;;  %v3871_v1 = vpop.f32.mrf.mxu0 }
 0x137   :  { %v3801_v34 = vpop.f32.mrf.mxu3  ;;  %v3653_v0 = vadd.f32 %v3652_v63, %v9336_v10  ;;  %v3733_v2 = vpop.f32.mrf.mxu2 }
 0x139   :  { %v3726_v29 = vadd.f32 %v3725_v62, %v3653_v0  ;;  %v8388_v62 = vld [vmem:[%s12139_s0 + $0x1ac] sm:$0xf] }
 0x13a   :  { %v6506_v12 = vor.u32 %v8388_v62, %v6503_v16  ;;  %v6701_v16 = vld [vmem:[%s12139_s0 + $0x338] sm:$0xf] }
 0x13b   :  { %v3799_v10 = vadd.f32 %v3798_v31, %v3726_v29 }
 0x13d   :  { %v9673_v19 = vadd.f32 %v3871_v1, %v3799_v10  ;;  %v6603_v1 = vld [vmem:[%s12139_s0 + $0x2d4] sm:$0xf0] }
 0x13e   :  { %v3655_v43 = vpop.f32.mrf.mxu1  ;;  %v3874_v23 = vpop.f32.mrf.mxu0 }
 0x13f   :  { %v3803_v40 = vpop.f32.mrf.mxu3  ;;  %v3656_v11 = vadd.f32 %v3655_v43, %v9371_v28  ;;  %v3735_v31 = vpop.f32.mrf.mxu2  ;;  %v8712_v28 = vld [vmem:[%s12137_s1 + $0x268] sm:$0xff] }
 0x140   :  { %4202 = vmatpush.bf16.msrb.mxu1 %v8712_v28 }
 0x141   :  { %v3729_v58 = vadd.f32 %v3728_v17, %v3656_v11  ;;  %3921 = vmatmul.bf16.gmra.mxu1 %v6398_v15  ;;  %4140 = vmatmul.bf16.gmra.mxu0 %v6410_v21  ;;  %v8450_v15 = vld [vmem:[%s12139_s0 + $0x398] sm:$0xf0] }
 0x143   :  { %v3802_v37 = vadd.f32 %v3801_v34, %v3729_v58  ;;  %v6495_v34 = vld [vmem:[%s12139_s0 + $0x204] sm:$0xf0] }
 0x144   :  { %4072 = vmatmul.bf16.gmra.mxu3 %v6506_v12  ;;  %4004 = vmatmul.bf16.gmra.mxu2 %v6602_v36  ;;  %v6498_v29 = vor.u32 %v8387_v32, %v6495_v34  ;;  %v8719_v32 = vld [vmem:[%s12137_s1 + $0x2a0] sm:$0xff] }
 0x145   :  { %v9682_v47 = vadd.f32 %v3874_v23, %v3802_v37  ;;  %v6702_v23 = vor.u32 %v8450_v15, %v6701_v16  ;;  %v8727_v34 = vld [vmem:[%s12137_s1 + $0x2e0] sm:$0xff]  ;;  %4276 = vmatpush.bf16.msrb.mxu2 %v8719_v32 }
 0x146   :  { %v3657_v17 = vpop.f32.mrf.mxu1  ;;  %v3876_v51 = vpop.f32.mrf.mxu0  ;;  %4349 = vmatpush.bf16.msrb.mxu3 %v8727_v34  ;;  %v8711_v16 = vld [vmem:[%s12137_s1 + $0x260] sm:$0xff] }
 0x147   :  { %v3806_v50 = vpop.f32.mrf.mxu3  ;;  %v3658_v59 = vadd.f32 %v3657_v17, %v9391_v45  ;;  %v3738_v52 = vpop.f32.mrf.mxu2  ;;  %v8401_v45 = vld [vmem:[%s12139_s0 + $0x210] sm:$0xf0]  ;;  %4203 = vmatpush.bf16.msrb.mxu1 %v8711_v16  ;;  %v8476_v16 = vld [vmem:[%s12139_s0 + $0x468] sm:$0xf0] }
 0x148   :  { %v6510_v42 = vor.u32 %v8401_v45, %v6509_v57 }
 0x149   :  { %v3731_v55 = vadd.f32 %v3730_v22, %v3658_v59  ;;  %v8413_v22 = vld [vmem:[%s12139_s0 + $0x274] sm:$0xf] }
 0x14a   :  { %v6606_v62 = vor.u32 %v8413_v22, %v6603_v1  ;;  %v6801_v22 = vld [vmem:[%s12139_s0 + $0x400] sm:$0xf]  ;;  %v8475_v1 = vld [vmem:[%s12139_s0 + $0x460] sm:$0xf0] }
 0x14b   :  { %v3804_v63 = vadd.f32 %v3803_v40, %v3731_v55  ;;  %v6802_v8 = vor.u32 %v8475_v1, %v6801_v22  ;;  %v8718_v22 = vld [vmem:[%s12137_s1 + $0x298] sm:$0xff] }
 0x14c   :  { %4277 = vmatpush.bf16.msrb.mxu2 %v8718_v22  ;;  %v6909_v22 = vld [vmem:[%s12139_s0 + $0x4d0] sm:$0xf] }
 0x14d   :  { %v9712_v0 = vadd.f32 %v3876_v51, %v3804_v63 }
 0x14e   :  { %v3660_v5 = vpop.f32.mrf.mxu1  ;;  %v3879_v10 = vpop.f32.mrf.mxu0 }
 0x14f   :  { %v3808_v60 = vpop.f32.mrf.mxu3  ;;  %v3661_v21 = vadd.f32 %v3660_v5, %v9423_v3  ;;  %v3740_v40 = vpop.f32.mrf.mxu2  ;;  %v8412_v3 = vld [vmem:[%s12139_s0 + $0x26c] sm:$0xf] }
 0x151   :  { %v3734_v43 = vadd.f32 %v3733_v2, %v3661_v21  ;;  %3926 = vmatmul.bf16.gmra.mxu1 %v6498_v29  ;;  %4145 = vmatmul.bf16.gmra.mxu0 %v6510_v42  ;;  %v6595_v2 = vld [vmem:[%s12139_s0 + $0x2cc] sm:$0xf0] }
 0x152   :  { %v6598_v51 = vor.u32 %v8412_v3, %v6595_v2 }
 0x153   :  { %v3807_v12 = vadd.f32 %v3806_v50, %v3734_v43  ;;  %v6609_v50 = vld [vmem:[%s12139_s0 + $0x278] sm:$0xf] }
 0x154   :  { %4077 = vmatmul.bf16.gmra.mxu3 %v6606_v62  ;;  %4009 = vmatmul.bf16.gmra.mxu2 %v6702_v23  ;;  %v6610_v59 = vor.u32 %v8426_v38, %v6609_v50 }
 0x155   :  { %v9724_v53 = vadd.f32 %v3879_v10, %v3807_v12  ;;  %v8437_v12 = vld [vmem:[%s12139_s0 + $0x334] sm:$0xf] }
 0x156   :  { %v3662_v11 = vpop.f32.mrf.mxu1  ;;  %v3881_v58 = vpop.f32.mrf.mxu0 }
 0x157   :  { %v3811_v26 = vpop.f32.mrf.mxu3  ;;  %v3663_v36 = vadd.f32 %v3662_v11, %v9428_v14  ;;  %v3743_v37 = vpop.f32.mrf.mxu2  ;;  %v8438_v14 = vld [vmem:[%s12139_s0 + $0x33c] sm:$0xf]  ;;  %v6709_v11 = vld [vmem:[%s12139_s0 + $0x340] sm:$0xf] }
 0x159   :  { %v3736_v46 = vadd.f32 %v3735_v31, %v3663_v36  ;;  %v6703_v31 = vld [vmem:[%s12139_s0 + $0x39c] sm:$0xf0]  ;;  %v6803_v36 = vld [vmem:[%s12139_s0 + $0x464] sm:$0xf0] }
 0x15a   :  { %v6706_v63 = vor.u32 %v8438_v14, %v6703_v31  ;;  %v6901_v31 = vld [vmem:[%s12139_s0 + $0x4c8] sm:$0xf] }
 0x15b   :  { %v3809_v28 = vadd.f32 %v3808_v60, %v3736_v46 }
 0x15d   :  { %v9745_v17 = vadd.f32 %v3881_v58, %v3809_v28 }
 0x15e   :  { %v3665_v57 = vpop.f32.mrf.mxu1  ;;  %v3884_v45 = vpop.f32.mrf.mxu0 }
 0x15f   :  { %v3813_v55 = vpop.f32.mrf.mxu3  ;;  %v3666_v29 = vadd.f32 %v3665_v57, %v9293_v49  ;;  %v3745_v42 = vpop.f32.mrf.mxu2  ;;  %v8735_v49 = vld [vmem:[%s12137_s1 + $0x320] sm:$0xff] }
 0x160   :  { %4422 = vmatpush.bf16.msrb.mxu0 %v8735_v49  ;;  %v6903_v49 = vld [vmem:[%s12139_s0 + $0x52c] sm:$0xf0] }
 0x161   :  { %v3739_v60 = vadd.f32 %v3738_v52, %v3666_v29  ;;  %3931 = vmatmul.bf16.gmra.mxu1 %v6598_v51  ;;  %4150 = vmatmul.bf16.gmra.mxu0 %v6610_v59  ;;  %v8500_v51 = vld [vmem:[%s12139_s0 + $0x528] sm:$0xf0] }
 0x162   :  { %v6902_v34 = vor.u32 %v8500_v51, %v6901_v31  ;;  %v8734_v51 = vld [vmem:[%s12137_s1 + $0x318] sm:$0xff] }
 0x163   :  { %v3812_v5 = vadd.f32 %v3811_v26, %v3739_v60  ;;  %v6695_v26 = vld [vmem:[%s12139_s0 + $0x394] sm:$0xf0] }
 0x164   :  { %4082 = vmatmul.bf16.gmra.mxu3 %v6706_v63  ;;  %4014 = vmatmul.bf16.gmra.mxu2 %v6802_v8  ;;  %v6698_v3 = vor.u32 %v8437_v12, %v6695_v26  ;;  %v8462_v8 = vld [vmem:[%s12139_s0 + $0x3fc] sm:$0xf] }
 0x165   :  { %v9760_v10 = vadd.f32 %v3884_v45, %v3812_v5  ;;  %v6795_v5 = vld [vmem:[%s12139_s0 + $0x45c] sm:$0xf0]  ;;  %v8726_v12 = vld [vmem:[%s12137_s1 + $0x2d8] sm:$0xff]  ;;  %4423 = vmatpush.bf16.msrb.mxu0 %v8734_v51 }
 0x166   :  { %v3667_v15 = vpop.f32.mrf.mxu1  ;;  %v3886_v21 = vpop.f32.mrf.mxu0  ;;  %v8710_v26 = vld [vmem:[%s12137_s1 + $0x258] sm:$0xff]  ;;  %4350 = vmatpush.bf16.msrb.mxu3 %v8726_v12 }
 0x167   :  { %v3816_v62 = vpop.f32.mrf.mxu3  ;;  %v3668_v52 = vadd.f32 %v3667_v15, %v9328_v4  ;;  %v3748_v43 = vpop.f32.mrf.mxu2  ;;  %v8451_v4 = vld [vmem:[%s12139_s0 + $0x3a0] sm:$0xf0]  ;;  %4204 = vmatpush.bf16.msrb.mxu1 %v8710_v26  ;;  %v7009_v51 = vld [vmem:[%s12139_s0 + $0x598] sm:$0xf] }
 0x168   :  { %v6710_v2 = vor.u32 %v8451_v4, %v6709_v11 }
 0x169   :  { %v3741_v23 = vadd.f32 %v3740_v40, %v3668_v52  ;;  %v8463_v40 = vld [vmem:[%s12139_s0 + $0x404] sm:$0xf] }
 0x16a   :  { %v6806_v14 = vor.u32 %v8463_v40, %v6803_v36  ;;  %v7001_v40 = vld [vmem:[%s12139_s0 + $0x590] sm:$0xf]  ;;  %v8525_v36 = vld [vmem:[%s12139_s0 + $0x5f0] sm:$0xf0] }
 0x16b   :  { %v3814_v58 = vadd.f32 %v3813_v55, %v3741_v23 }
 0x16d   :  { %v9787_v46 = vadd.f32 %v3886_v21, %v3814_v58  ;;  %v6798_v21 = vor.u32 %v8462_v8, %v6795_v5 }
 0x16e   :  { %v3670_v38 = vpop.f32.mrf.mxu1  ;;  %v3889_v28 = vpop.f32.mrf.mxu0 }
 0x16f   :  { %v3818_v50 = vpop.f32.mrf.mxu3  ;;  %v3671_v59 = vadd.f32 %v3670_v38, %v9342_v13  ;;  %v3750_v55 = vpop.f32.mrf.mxu2  ;;  %v7002_v38 = vor.u32 %v8525_v36, %v7001_v40  ;;  %v8725_v40 = vld [vmem:[%s12137_s1 + $0x2d0] sm:$0xff] }
 0x170   :  { %4351 = vmatpush.bf16.msrb.mxu3 %v8725_v40 }
 0x171   :  { %v3744_v32 = vadd.f32 %v3743_v37, %v3671_v59  ;;  %3936 = vmatmul.bf16.gmra.mxu1 %v6698_v3  ;;  %4155 = vmatmul.bf16.gmra.mxu0 %v6710_v2 }
 0x173   :  { %v3817_v57 = vadd.f32 %v3816_v62, %v3744_v32  ;;  %v6809_v62 = vld [vmem:[%s12139_s0 + $0x408] sm:$0xf] }
 0x174   :  { %4087 = vmatmul.bf16.gmra.mxu3 %v6806_v14  ;;  %4019 = vmatmul.bf16.gmra.mxu2 %v6902_v34  ;;  %v6810_v52 = vor.u32 %v8476_v16, %v6809_v62 }
 0x175   :  { %v9796_v45 = vadd.f32 %v3889_v28, %v3817_v57  ;;  %v8487_v57 = vld [vmem:[%s12139_s0 + $0x4c4] sm:$0xf] }
 0x176   :  { %v3672_v1 = vpop.f32.mrf.mxu1  ;;  %v3891_v29 = vpop.f32.mrf.mxu0 }
 0x177   :  { %v3821_v63 = vpop.f32.mrf.mxu3  ;;  %v3673_v60 = vadd.f32 %v3672_v1, %v9374_v30  ;;  %v3753_v13 = vpop.f32.mrf.mxu2  ;;  %v8501_v1 = vld [vmem:[%s12139_s0 + $0x530] sm:$0xf0] }
 0x178   :  { %v6910_v8 = vor.u32 %v8501_v1, %v6909_v22  ;;  %v8733_v22 = vld [vmem:[%s12137_s1 + $0x310] sm:$0xff] }
 0x179   :  { %v3746_v37 = vadd.f32 %v3745_v42, %v3673_v60  ;;  %v8488_v42 = vld [vmem:[%s12139_s0 + $0x4cc] sm:$0xf]  ;;  %4424 = vmatpush.bf16.msrb.mxu0 %v8733_v22 }
 0x17a   :  { %v6906_v58 = vor.u32 %v8488_v42, %v6903_v49  ;;  %v7101_v42 = vld [vmem:[%s12139_s0 + $0x658] sm:$0xf]  ;;  %v8550_v49 = vld [vmem:[%s12139_s0 + $0x6b8] sm:$0xf0] }
 0x17b   :  { %v3819_v30 = vadd.f32 %v3818_v50, %v3746_v37  ;;  %v7102_v12 = vor.u32 %v8550_v49, %v7101_v42 }
 0x17d   :  { %v9820_v15 = vadd.f32 %v3891_v29, %v3819_v30  ;;  %v7003_v29 = vld [vmem:[%s12139_s0 + $0x5f4] sm:$0xf0] }
 0x17e   :  { %v3675_v11 = vpop.f32.mrf.mxu1  ;;  %v3894_v4 = vpop.f32.mrf.mxu0 }
 0x17f   :  { %v3823_v23 = vpop.f32.mrf.mxu3  ;;  %v3676_v3 = vadd.f32 %v3675_v11, %v9281_v44  ;;  %v3755_v2 = vpop.f32.mrf.mxu2 }
 0x181   :  { %v3749_v50 = vadd.f32 %v3748_v43, %v3676_v3  ;;  %3941 = vmatmul.bf16.gmra.mxu1 %v6798_v21  ;;  %4160 = vmatmul.bf16.gmra.mxu0 %v6810_v52 }
 0x183   :  { %v3822_v28 = vadd.f32 %v3821_v63, %v3749_v50  ;;  %v6895_v63 = vld [vmem:[%s12139_s0 + $0x524] sm:$0xf0] }
 0x184   :  { %4092 = vmatmul.bf16.gmra.mxu3 %v6906_v58  ;;  %4024 = vmatmul.bf16.gmra.mxu2 %v7002_v38  ;;  %v6898_v37 = vor.u32 %v8487_v57, %v6895_v63  ;;  %v8717_v58 = vld [vmem:[%s12137_s1 + $0x290] sm:$0xff] }
 0x185   :  { %v9835_v14 = vadd.f32 %v3894_v4, %v3822_v28  ;;  %4278 = vmatpush.bf16.msrb.mxu2 %v8717_v58  ;;  %v8512_v28 = vld [vmem:[%s12139_s0 + $0x58c] sm:$0xf]  ;;  %v7203_v58 = vld [vmem:[%s12139_s0 + $0x784] sm:$0xf0] }
 0x186   :  { %v3677_v59 = vpop.f32.mrf.mxu1  ;;  %v3896_v32 = vpop.f32.mrf.mxu0 }
 0x187   :  { %v3826_v31 = vpop.f32.mrf.mxu3  ;;  %v3678_v44 = vadd.f32 %v3677_v59, %v9313_v61  ;;  %v3758_v34 = vpop.f32.mrf.mxu2 }
 0x189   :  { %v3751_v43 = vadd.f32 %v3750_v55, %v3678_v44  ;;  %v8513_v55 = vld [vmem:[%s12139_s0 + $0x594] sm:$0xf] }
 0x18a   :  { %v7006_v30 = vor.u32 %v8513_v55, %v7003_v29  ;;  %v7201_v29 = vld [vmem:[%s12139_s0 + $0x720] sm:$0xf] }
 0x18b   :  { %v3824_v61 = vadd.f32 %v3823_v23, %v3751_v43 }
 0x18d   :  { %v9859_v60 = vadd.f32 %v3896_v32, %v3824_v61  ;;  %v7103_v32 = vld [vmem:[%s12139_s0 + $0x6bc] sm:$0xf0] }
 0x18e   :  { %v3680_v62 = vpop.f32.mrf.mxu1  ;;  %v3899_v16 = vpop.f32.mrf.mxu0 }
 0x18f   :  { %v3828_v5 = vpop.f32.mrf.mxu3  ;;  %v3681_v21 = vadd.f32 %v3680_v62, %v9333_v9  ;;  %v3760_v52 = vpop.f32.mrf.mxu2  ;;  %v8709_v9 = vld [vmem:[%s12137_s1 + $0x250] sm:$0xff] }
 0x190   :  { %4205 = vmatpush.bf16.msrb.mxu1 %v8709_v9 }
 0x191   :  { %v3754_v23 = vadd.f32 %v3753_v13, %v3681_v21  ;;  %3946 = vmatmul.bf16.gmra.mxu1 %v6898_v37  ;;  %4165 = vmatmul.bf16.gmra.mxu0 %v6910_v8  ;;  %v8575_v37 = vld [vmem:[%s12139_s0 + $0x780] sm:$0xf0] }
 0x193   :  { %v3827_v26 = vadd.f32 %v3826_v31, %v3754_v23  ;;  %v6995_v31 = vld [vmem:[%s12139_s0 + $0x5ec] sm:$0xf0] }
 0x194   :  { %4097 = vmatmul.bf16.gmra.mxu3 %v7006_v30  ;;  %4029 = vmatmul.bf16.gmra.mxu2 %v7102_v12  ;;  %v6998_v43 = vor.u32 %v8512_v28, %v6995_v31  ;;  %v8537_v12 = vld [vmem:[%s12139_s0 + $0x654] sm:$0xf] }
 0x195   :  { %v9868_v11 = vadd.f32 %v3899_v16, %v3827_v26  ;;  %v7202_v16 = vor.u32 %v8575_v37, %v7201_v29  ;;  %v8551_v26 = vld [vmem:[%s12139_s0 + $0x6c0] sm:$0xf0] }
 0x196   :  { %v3682_v13 = vpop.f32.mrf.mxu1  ;;  %v3901_v36 = vpop.f32.mrf.mxu0 }
 0x197   :  { %v3831_v4 = vpop.f32.mrf.mxu3  ;;  %v3683_v3 = vadd.f32 %v3682_v13, %v9362_v24  ;;  %v3990_v50 = vpop.f32.mrf.mxu2  ;;  %v8526_v24 = vld [vmem:[%s12139_s0 + $0x5f8] sm:$0xf0] }
 0x198   :  { %v7010_v57 = vor.u32 %v8526_v24, %v7009_v51  ;;  %v7301_v24 = vld [vmem:[%s12139_s0 + $0x7e8] sm:$0xf] }
 0x199   :  { %v3756_v38 = vadd.f32 %v3755_v2, %v3683_v3  ;;  %v8538_v2 = vld [vmem:[%s12139_s0 + $0x65c] sm:$0xf]  ;;  %v8724_v3 = vld [vmem:[%s12137_s1 + $0x2c8] sm:$0xff] }
 0x19a   :  { %v7106_v55 = vor.u32 %v8538_v2, %v7103_v32  ;;  %4352 = vmatpush.bf16.msrb.mxu3 %v8724_v3 }
 0x19b   :  { %v3829_v59 = vadd.f32 %v3828_v5, %v3756_v38  ;;  %v8708_v38 = vld [vmem:[%s12137_s1 + $0x248] sm:$0xff] }
 0x19c   :  { %4206 = vmatpush.bf16.msrb.mxu1 %v8708_v38 }
 0x19d   :  { %v9898_v44 = vadd.f32 %v3901_v36, %v3829_v59  ;;  %v8716_v36 = vld [vmem:[%s12137_s1 + $0x288] sm:$0xff] }
 0x19e   :  { %v3685_v1 = vpop.f32.mrf.mxu1  ;;  %v3904_v61 = vpop.f32.mrf.mxu0  ;;  %v8600_v59 = vld [vmem:[%s12139_s0 + $0x848] sm:$0xf0]  ;;  %4279 = vmatpush.bf16.msrb.mxu2 %v8716_v36 }
 0x19f   :  { %v3833_v63 = vpop.f32.mrf.mxu3  ;;  %v3686_v8 = vadd.f32 %v3685_v1, %v9388_v41  ;;  %v3992_v5 = vpop.f32.mrf.mxu2  ;;  %v7095_v41 = vld [vmem:[%s12139_s0 + $0x6b4] sm:$0xf0] }
 0x1a0   :  { %v7098_v40 = vor.u32 %v8537_v12, %v7095_v41 }
 0x1a1   :  { %v3759_v62 = vadd.f32 %v3758_v34, %v3686_v8  ;;  %3951 = vmatmul.bf16.gmra.mxu1 %v6998_v43  ;;  %4170 = vmatmul.bf16.gmra.mxu0 %v7010_v57  ;;  %v7109_v34 = vld [vmem:[%s12139_s0 + $0x660] sm:$0xf]  ;;  %v7302_v57 = vor.u32 %v8600_v59, %v7301_v24  ;;  %v8562_v8 = vld [vmem:[%s12139_s0 + $0x71c] sm:$0xf] }
 0x1a2   :  { %v7110_v9 = vor.u32 %v8551_v26, %v7109_v34  ;;  %v8723_v24 = vld [vmem:[%s12137_s1 + $0x2c0] sm:$0xff] }
 0x1a3   :  { %v3832_v30 = vadd.f32 %v3831_v4, %v3759_v62  ;;  %v8563_v4 = vld [vmem:[%s12139_s0 + $0x724] sm:$0xf]  ;;  %v7195_v62 = vld [vmem:[%s12139_s0 + $0x77c] sm:$0xf0]  ;;  %4353 = vmatpush.bf16.msrb.mxu3 %v8723_v24  ;;  %v8626_v24 = vld [vmem:[%s12139_s0 + $0x918] sm:$0xf0] }
 0x1a4   :  { %4102 = vmatmul.bf16.gmra.mxu3 %v7106_v55  ;;  %4034 = vmatmul.bf16.gmra.mxu2 %v7202_v16  ;;  %v7206_v51 = vor.u32 %v8563_v4, %v7203_v58  ;;  %v7209_v16 = vld [vmem:[%s12139_s0 + $0x728] sm:$0xf]  ;;  %v7401_v58 = vld [vmem:[%s12139_s0 + $0x8b0] sm:$0xf] }
 0x1a5   :  { %v9910_v42 = vadd.f32 %v3904_v61, %v3832_v30  ;;  %v8732_v61 = vld [vmem:[%s12137_s1 + $0x308] sm:$0xff] }
 0x1a6   :  { %v3687_v21 = vpop.f32.mrf.mxu1  ;;  %v3906_v52 = vpop.f32.mrf.mxu0  ;;  %4425 = vmatpush.bf16.msrb.mxu0 %v8732_v61  ;;  %v8576_v30 = vld [vmem:[%s12139_s0 + $0x788] sm:$0xf0] }
 0x1a7   :  { %v4063_v49 = vpop.f32.mrf.mxu3  ;;  %v3995_v23 = vpop.f32.mrf.mxu2  ;;  %v7198_v52 = vor.u32 %v8562_v8, %v7195_v62  ;;  %v7210_v12 = vor.u32 %v8576_v30, %v7209_v16  ;;  %v8707_v30 = vld [vmem:[%s12137_s1 + $0x240] sm:$0xff] }
 0x1a8   :  { %4207 = vmatpush.bf16.msrb.mxu1 %v8707_v30 }
 0x1ae   :  { %v3917_v28 = vpop.f32.mrf.mxu1  ;;  %v4136_v31 = vpop.f32.mrf.mxu0 }
 0x1af   :  { %v4065_v13 = vpop.f32.mrf.mxu3  ;;  %v3918_v2 = vadd.f32 %v3917_v28, %v9467_v54  ;;  %v3997_v32 = vpop.f32.mrf.mxu2 }
 0x1b1   :  { %v3991_v43 = vadd.f32 %v3990_v50, %v3918_v2  ;;  %3956 = vmatmul.bf16.gmra.mxu1 %v7098_v40  ;;  %4175 = vmatmul.bf16.gmra.mxu0 %v7110_v9  ;;  %v8625_v40 = vld [vmem:[%s12139_s0 + $0x910] sm:$0xf0] }
 0x1b2   :  { %v7402_v3 = vor.u32 %v8625_v40, %v7401_v58 }
 0x1b3   :  { %v4064_v63 = vadd.f32 %v4063_v49, %v3991_v43  ;;  %v7303_v49 = vld [vmem:[%s12139_s0 + $0x84c] sm:$0xf0] }
 0x1b4   :  { %4107 = vmatmul.bf16.gmra.mxu3 %v7206_v51  ;;  %4039 = vmatmul.bf16.gmra.mxu2 %v7302_v57  ;;  %v8715_v51 = vld [vmem:[%s12137_s1 + $0x280] sm:$0xff] }
 0x1b5   :  { %v9946_v22 = vadd.f32 %v4136_v31, %v4064_v63  ;;  %4280 = vmatpush.bf16.msrb.mxu2 %v8715_v51  ;;  %v8587_v57 = vld [vmem:[%s12139_s0 + $0x7e4] sm:$0xf]  ;;  %v7295_v63 = vld [vmem:[%s12139_s0 + $0x844] sm:$0xf0] }
 0x1b6   :  { %v3919_v55 = vpop.f32.mrf.mxu1  ;;  %v4138_v54 = vpop.f32.mrf.mxu0 }
 0x1b7   :  { %v4068_v1 = vpop.f32.mrf.mxu3  ;;  %v3920_v29 = vadd.f32 %v3919_v55, %v9494_v18  ;;  %v4000_v37 = vpop.f32.mrf.mxu2  ;;  %v8613_v55 = vld [vmem:[%s12139_s0 + $0x8b4] sm:$0xf] }
 0x1b9   :  { %v3993_v50 = vadd.f32 %v3992_v5, %v3920_v29  ;;  %v8588_v5 = vld [vmem:[%s12139_s0 + $0x7ec] sm:$0xf] }
 0x1ba   :  { %v7306_v4 = vor.u32 %v8588_v5, %v7303_v49 }
 0x1bb   :  { %v4066_v18 = vadd.f32 %v4065_v13, %v3993_v50  ;;  %v7298_v50 = vor.u32 %v8587_v57, %v7295_v63  ;;  %v8754_v57 = vld [vmem:[%s12137_s1 + $0x3b8] sm:$0xff] }
 0x1bc   :  { %4565 = vmatpush.bf16.msra.mxu2 %v8754_v57 }
 0x1bd   :  { %v9970_v21 = vadd.f32 %v4138_v54, %v4066_v18  ;;  %v7403_v54 = vld [vmem:[%s12139_s0 + $0x914] sm:$0xf0]  ;;  %v8731_v18 = vld [vmem:[%s12137_s1 + $0x300] sm:$0xff] }
 0x1be   :  { %v3922_v34 = vpop.f32.mrf.mxu1  ;;  %v4141_v26 = vpop.f32.mrf.mxu0  ;;  %4426 = vmatpush.bf16.msrb.mxu0 %v8731_v18  ;;  %v8762_v18 = vld [vmem:[%s12137_s1 + $0x3f8] sm:$0xff] }
 0x1bf   :  { %v4070_v41 = vpop.f32.mrf.mxu3  ;;  %v3923_v9 = vadd.f32 %v3922_v34, %v9504_v33  ;;  %v4002_v13 = vpop.f32.mrf.mxu2  ;;  %4638 = vmatpush.bf16.msra.mxu3 %v8762_v18 }
 0x1c1   :  { %v3996_v36 = vadd.f32 %v3995_v23, %v3923_v9  ;;  %3961 = vmatmul.bf16.gmra.mxu1 %v7198_v52  ;;  %4180 = vmatmul.bf16.gmra.mxu0 %v7210_v12  ;;  %v7406_v52 = vor.u32 %v8613_v55, %v7403_v54 }
 0x1c3   :  { %v4069_v38 = vadd.f32 %v4068_v1, %v3996_v36  ;;  %v7309_v1 = vld [vmem:[%s12139_s0 + $0x7f0] sm:$0xf] }
 0x1c4   :  { %4112 = vmatmul.bf16.gmra.mxu3 %v7306_v4  ;;  %4044 = vmatmul.bf16.gmra.mxu2 %v7402_v3 }
 0x1c5   :  { %v9979_v28 = vadd.f32 %v4141_v26, %v4069_v38 }
 0x1c6   :  { %v3924_v33 = vpop.f32.mrf.mxu1  ;;  %v4143_v59 = vpop.f32.mrf.mxu0 }
 0x1c7   :  { %v4073_v31 = vpop.f32.mrf.mxu3  ;;  %v3925_v23 = vadd.f32 %v3924_v33, %v9535_v6  ;;  %v4005_v2 = vpop.f32.mrf.mxu2  ;;  %v8601_v6 = vld [vmem:[%s12139_s0 + $0x850] sm:$0xf0] }
 0x1c8   :  { %v7310_v8 = vor.u32 %v8601_v6, %v7309_v1 }
 0x1c9   :  { %v3998_v43 = vadd.f32 %v3997_v32, %v3925_v23  ;;  %v329_v32 = vld [vmem:[%s12139_s0 + $0x978] sm:$0xff] }
 0x1ca   :  { %v1674_v16 = vunpack.c.l.b16 %v329_v32  ;;  %v1675_v33 = vunpack.c.h.b16 %v329_v32  ;;  %v8352_v32 = vld [vmem:[%s12139_s0 + $0x88] sm:$0xf0] }
 0x1cb   :  { %v4071_v61 = vadd.f32 %v4070_v41, %v3998_v43 }
 0x1cc   :  { %v1999_v26 = vpack.c.b16 %v1674_v16, %v1674_v16  ;;  %v2000_v6 = vpack.c.b16 %v1675_v33, %v1675_v33  ;;  %v8377_v33 = vld [vmem:[%s12139_s0 + $0x150] sm:$0xf0] }
 0x1cd   :  { %v10009_v29 = vadd.f32 %v4143_v59, %v4071_v61  ;;  %v6317_v61 = vld [vmem:[%s12139_s0 + $0x28] sm:$0xf] }
 0x1ce   :  { %v3927_v5 = vpop.f32.mrf.mxu1  ;;  %v4146_v49 = vpop.f32.mrf.mxu0 }
 0x1cf   :  { %v4075_v62 = vpop.f32.mrf.mxu3  ;;  %v3928_v12 = vadd.f32 %v3927_v5, %v9546_v35  ;;  %v4007_v41 = vpop.f32.mrf.mxu2  ;;  %v8612_v35 = vld [vmem:[%s12139_s0 + $0x8ac] sm:$0xf] }
 0x1d1   :  { %v4001_v34 = vadd.f32 %v4000_v37, %v3928_v12  ;;  %3966 = vmatmul.bf16.gmra.mxu1 %v7298_v50  ;;  %4185 = vmatmul.bf16.gmra.mxu0 %v7310_v8  ;;  %v7395_v37 = vld [vmem:[%s12139_s0 + $0x90c] sm:$0xf0]  ;;  %v6318_v8 = vor.u32 %v8352_v32, %v6317_v61 }
 0x1d3   :  { %v4074_v4 = vadd.f32 %v4073_v31, %v4001_v34  ;;  %v7409_v31 = vld [vmem:[%s12139_s0 + $0x8b8] sm:$0xf] }
 0x1d4   :  { %4117 = vmatmul.bf16.gmra.mxu3 %v7406_v52  ;;  %4049 = vmatmul.bf16.gmra.mxu2 %v1999_v26  ;;  %v7410_v23 = vor.u32 %v8626_v24, %v7409_v31  ;;  %v1673_v26 = vunpack.c.h.b16 %v9586_v27  ;;  %v8770_v27 = vld [vmem:[%s12137_s1 + $0x438] sm:$0xff]  ;;  %v6417_v24 = vld [vmem:[%s12139_s0 + $0xf0] sm:$0xf] }
 0x1d5   :  { %v10018_v58 = vadd.f32 %v4146_v49, %v4074_v4  ;;  %4711 = vmatpush.bf16.msra.mxu0 %v8770_v27 }
 0x1d6   :  { %v3929_v9 = vpop.f32.mrf.mxu1  ;;  %v4148_v36 = vpop.f32.mrf.mxu0 }
 0x1d7   :  { %v4078_v40 = vpop.f32.mrf.mxu3  ;;  %v3930_v3 = vadd.f32 %v3929_v9, %v9562_v7  ;;  %v4010_v38 = vpop.f32.mrf.mxu2  ;;  %v8340_v9 = vld [vmem:[%s12139_s0 + $0x2c] sm:$0xf] }
 0x1d9   :  { %v4003_v51 = vadd.f32 %v4002_v13, %v3930_v3  ;;  %v7398_v13 = vor.u32 %v8612_v35, %v7395_v37 }
 0x1db   :  { %v4076_v7 = vadd.f32 %v4075_v62, %v4003_v51 }
 0x1dd   :  { %v10033_v59 = vadd.f32 %v4148_v36, %v4076_v7  ;;  %v6319_v36 = vld [vmem:[%s12139_s0 + $0x8c] sm:$0xf0] }
 0x1de   :  { %v3932_v63 = vpop.f32.mrf.mxu1  ;;  %v4151_v1 = vpop.f32.mrf.mxu0  ;;  %v6322_v31 = vor.u32 %v8340_v9, %v6319_v36  ;;  %v6517_v36 = vld [vmem:[%s12139_s0 + $0x1b8] sm:$0xf] }
 0x1df   :  { %v4080_v43 = vpop.f32.mrf.mxu3  ;;  %v3933_v55 = vadd.f32 %v3932_v63, %v9575_v20  ;;  %v4012_v54 = vpop.f32.mrf.mxu2  ;;  %v8746_v20 = vld [vmem:[%s12137_s1 + $0x378] sm:$0xff] }
 0x1e0   :  { %4492 = vmatpush.bf16.msra.mxu1 %v8746_v20 }
 0x1e1   :  { %v4006_v50 = vadd.f32 %v4005_v2, %v3933_v55  ;;  %3971 = vmatmul.bf16.gmra.mxu1 %v7398_v13  ;;  %4190 = vmatmul.bf16.gmra.mxu0 %v7410_v23  ;;  %v10056_v2 = vld [vmem:[%s12139_s0 + $0x980] sm:$0xff] }
 0x1e2   :  { %v1676_v4 = vunpack.c.l.b16 %v10056_v2 }
 0x1e3   :  { %v4079_v62 = vadd.f32 %v4078_v40, %v4006_v50 }
 0x1e4   :  { %4122 = vmatmul.bf16.gmra.mxu3 %v2000_v6  ;;  %4281 = vmatmul.bf16.vlgmr.msrb.gmra.mxu2 %v6318_v8  ;;  %v2001_v51 = vpack.c.b16 %v1676_v4, %v1676_v4  ;;  %v6325_v8 = vld [vmem:[%s12139_s0 + $0x30] sm:$0xf] }
 0x1e5   :  { %v10045_v16 = vadd.f32 %v4151_v1, %v4079_v62  ;;  %v8353_v62 = vld [vmem:[%s12139_s0 + $0x90] sm:$0xf0] }
 0x1e6   :  { %v3934_v5 = vpop.f32.mrf.mxu1  ;;  %v4153_v49 = vpop.f32.mrf.mxu0 }
 0x1e7   :  { %v4083_v30 = vpop.f32.mrf.mxu3  ;;  %v3935_v52 = vadd.f32 %v3934_v5, %v9598_v39  ;;  %v4015_v12 = vpop.f32.mrf.mxu2  ;;  %v1998_v39 = vpack.c.b16 %v1673_v26, %v1673_v26  ;;  %v6326_v5 = vor.u32 %v8353_v62, %v6325_v8  ;;  %v8745_v26 = vld [vmem:[%s12137_s1 + $0x370] sm:$0xff] }
 0x1e8   :  { %4493 = vmatpush.bf16.msra.mxu1 %v8745_v26 }
 0x1e9   :  { %v4008_v34 = vadd.f32 %v4007_v41, %v3935_v52  ;;  %v8753_v52 = vld [vmem:[%s12137_s1 + $0x3b0] sm:$0xff] }
 0x1ea   :  { %4566 = vmatpush.bf16.msra.mxu2 %v8753_v52 }
 0x1eb   :  { %v4081_v40 = vadd.f32 %v4080_v43, %v4008_v34  ;;  %v6418_v43 = vor.u32 %v8377_v33, %v6417_v24  ;;  %v8761_v34 = vld [vmem:[%s12137_s1 + $0x3f0] sm:$0xff] }
 0x1ec   :  { %4639 = vmatpush.bf16.msra.mxu3 %v8761_v34  ;;  %v8769_v33 = vld [vmem:[%s12137_s1 + $0x430] sm:$0xff] }
 0x1ed   :  { %v10067_v3 = vadd.f32 %v4153_v49, %v4081_v40  ;;  %4712 = vmatpush.bf16.msra.mxu0 %v8769_v33  ;;  %v6525_v33 = vld [vmem:[%s12139_s0 + $0x1c0] sm:$0xf] }
 0x1ee   :  { %v3937_v41 = vpop.f32.mrf.mxu1  ;;  %v4156_v37 = vpop.f32.mrf.mxu0 }
 0x1ef   :  { %v4085_v35 = vpop.f32.mrf.mxu3  ;;  %v3938_v7 = vadd.f32 %v3937_v41, %v9611_v48  ;;  %v4017_v13 = vpop.f32.mrf.mxu2  ;;  %v8339_v48 = vld [vmem:[%s12139_s0 + $0x24] sm:$0xf] }
 0x1f1   :  { %v4011_v23 = vadd.f32 %v4010_v38, %v3938_v7  ;;  %3976 = vmatmul.bf16.gmra.mxu1 %v1998_v39  ;;  %4195 = vmatmul.bf16.gmra.mxu0 %v2001_v51  ;;  %v6311_v38 = vld [vmem:[%s12139_s0 + $0x84] sm:$0xf0]  ;;  %v8402_v39 = vld [vmem:[%s12139_s0 + $0x218] sm:$0xf0] }
 0x1f2   :  { %v6314_v20 = vor.u32 %v8339_v48, %v6311_v38  ;;  %v6518_v41 = vor.u32 %v8402_v39, %v6517_v36  ;;  %v8760_v36 = vld [vmem:[%s12137_s1 + $0x3e8] sm:$0xff] }
 0x1f3   :  { %v4084_v57 = vadd.f32 %v4083_v30, %v4011_v23  ;;  %4640 = vmatpush.bf16.msra.mxu3 %v8760_v36  ;;  %v8428_v36 = vld [vmem:[%s12139_s0 + $0x2e8] sm:$0xf0] }
 0x1f4   :  { %4354 = vmatmul.bf16.vlgmr.msrb.gmra.mxu3 %v6322_v31  ;;  %4286 = vmatmul.bf16.gmra.mxu2 %v6418_v43 }
 0x1f5   :  { %v10079_v63 = vadd.f32 %v4156_v37, %v4084_v57  ;;  %v8364_v57 = vld [vmem:[%s12139_s0 + $0xec] sm:$0xf] }
 0x1f6   :  { %v3939_v6 = vpop.f32.mrf.mxu1  ;;  %v4158_v61 = vpop.f32.mrf.mxu0 }
 0x1f7   :  { %v4088_v1 = vpop.f32.mrf.mxu3  ;;  %v3940_v32 = vadd.f32 %v3939_v6, %v9631_v25  ;;  %v4020_v55 = vpop.f32.mrf.mxu2  ;;  %v8365_v25 = vld [vmem:[%s12139_s0 + $0xf4] sm:$0xf]  ;;  %v6425_v6 = vld [vmem:[%s12139_s0 + $0xf8] sm:$0xf] }
 0x1f9   :  { %v4013_v50 = vadd.f32 %v4012_v54, %v3940_v32  ;;  %v6419_v54 = vld [vmem:[%s12139_s0 + $0x154] sm:$0xf0]  ;;  %v6519_v32 = vld [vmem:[%s12139_s0 + $0x21c] sm:$0xf0] }
 0x1fa   :  { %v6422_v9 = vor.u32 %v8365_v25, %v6419_v54  ;;  %v6617_v54 = vld [vmem:[%s12139_s0 + $0x280] sm:$0xf] }
 0x1fb   :  { %v4086_v30 = vadd.f32 %v4085_v35, %v4013_v50 }
 0x1fd   :  { %v10100_v18 = vadd.f32 %v4158_v61, %v4086_v30  ;;  %v8378_v61 = vld [vmem:[%s12139_s0 + $0x158] sm:$0xf0] }
 0x1fe   :  { %v3942_v4 = vpop.f32.mrf.mxu1  ;;  %v4161_v40 = vpop.f32.mrf.mxu0  ;;  %v6426_v38 = vor.u32 %v8378_v61, %v6425_v6  ;;  %v8768_v6 = vld [vmem:[%s12137_s1 + $0x428] sm:$0xff] }
 0x1ff   :  { %v4090_v49 = vpop.f32.mrf.mxu3  ;;  %v3943_v51 = vadd.f32 %v3942_v4, %v9649_v56  ;;  %v4022_v35 = vpop.f32.mrf.mxu2  ;;  %4713 = vmatpush.bf16.msra.mxu0 %v8768_v6 }
 0x201   :  { %v4016_v27 = vadd.f32 %v4015_v12, %v3943_v51  ;;  %4208 = vmatmul.bf16.vlgmr.msrb.gmra.mxu1 %v6314_v20  ;;  %4427 = vmatmul.bf16.vlgmr.msrb.gmra.mxu0 %v6326_v5  ;;  %v8427_v20 = vld [vmem:[%s12139_s0 + $0x2e0] sm:$0xf0] }
 0x202   :  { %v6618_v34 = vor.u32 %v8427_v20, %v6617_v54 }
 0x203   :  { %v4089_v37 = vadd.f32 %v4088_v1, %v4016_v27  ;;  %v6411_v1 = vld [vmem:[%s12139_s0 + $0x14c] sm:$0xf0] }
 0x204   :  { %4359 = vmatmul.bf16.gmra.mxu3 %v6422_v9  ;;  %4291 = vmatmul.bf16.gmra.mxu2 %v6518_v41  ;;  %v6414_v48 = vor.u32 %v8364_v57, %v6411_v1  ;;  %v8752_v9 = vld [vmem:[%s12137_s1 + $0x3a8] sm:$0xff] }
 0x205   :  { %v10118_v31 = vadd.f32 %v4161_v40, %v4089_v37  ;;  %4567 = vmatpush.bf16.msra.mxu2 %v8752_v9  ;;  %v8389_v37 = vld [vmem:[%s12139_s0 + $0x1b4] sm:$0xf] }
 0x206   :  { %v3944_v7 = vpop.f32.mrf.mxu1  ;;  %v4163_v56 = vpop.f32.mrf.mxu0 }
 0x207   :  { %v4093_v24 = vpop.f32.mrf.mxu3  ;;  %v3945_v23 = vadd.f32 %v3944_v7, %v9673_v19  ;;  %v4025_v43 = vpop.f32.mrf.mxu2 }
 0x209   :  { %v4018_v12 = vadd.f32 %v4017_v13, %v3945_v23  ;;  %v8390_v13 = vld [vmem:[%s12139_s0 + $0x1bc] sm:$0xf] }
 0x20a   :  { %v6522_v25 = vor.u32 %v8390_v13, %v6519_v32  ;;  %v6717_v32 = vld [vmem:[%s12139_s0 + $0x348] sm:$0xf] }
 0x20b   :  { %v4091_v19 = vadd.f32 %v4090_v49, %v4018_v12 }
 0x20d   :  { %v10142_v50 = vadd.f32 %v4163_v56, %v4091_v19  ;;  %v6619_v56 = vld [vmem:[%s12139_s0 + $0x2e4] sm:$0xf0] }
 0x20e   :  { %v3947_v62 = vpop.f32.mrf.mxu1  ;;  %v4166_v30 = vpop.f32.mrf.mxu0 }
 0x20f   :  { %v4095_v8 = vpop.f32.mrf.mxu3  ;;  %v3948_v5 = vadd.f32 %v3947_v62, %v9682_v47  ;;  %v4027_v49 = vpop.f32.mrf.mxu2  ;;  %v8744_v47 = vld [vmem:[%s12137_s1 + $0x368] sm:$0xff] }
 0x210   :  { %4494 = vmatpush.bf16.msra.mxu1 %v8744_v47 }
 0x211   :  { %v4021_v52 = vadd.f32 %v4020_v55, %v3948_v5  ;;  %4213 = vmatmul.bf16.gmra.mxu1 %v6414_v48  ;;  %4432 = vmatmul.bf16.gmra.mxu0 %v6426_v38  ;;  %v8452_v48 = vld [vmem:[%s12139_s0 + $0x3a8] sm:$0xf0] }
 0x213   :  { %v4094_v26 = vadd.f32 %v4093_v24, %v4021_v52  ;;  %v6511_v24 = vld [vmem:[%s12139_s0 + $0x214] sm:$0xf0] }
 0x214   :  { %4364 = vmatmul.bf16.gmra.mxu3 %v6522_v25  ;;  %4296 = vmatmul.bf16.gmra.mxu2 %v6618_v34  ;;  %v6514_v12 = vor.u32 %v8389_v37, %v6511_v24  ;;  %v8751_v37 = vld [vmem:[%s12137_s1 + $0x3a0] sm:$0xff] }
 0x215   :  { %v10151_v4 = vadd.f32 %v4166_v30, %v4094_v26  ;;  %v6718_v30 = vor.u32 %v8452_v48, %v6717_v32  ;;  %v8759_v24 = vld [vmem:[%s12137_s1 + $0x3e0] sm:$0xff]  ;;  %4568 = vmatpush.bf16.msra.mxu2 %v8751_v37 }
 0x216   :  { %v3949_v55 = vpop.f32.mrf.mxu1  ;;  %v4168_v39 = vpop.f32.mrf.mxu0  ;;  %4641 = vmatpush.bf16.msra.mxu3 %v8759_v24  ;;  %v8743_v32 = vld [vmem:[%s12137_s1 + $0x360] sm:$0xff] }
 0x217   :  { %v4098_v40 = vpop.f32.mrf.mxu3  ;;  %v3950_v51 = vadd.f32 %v3949_v55, %v9712_v0  ;;  %v4030_v27 = vpop.f32.mrf.mxu2  ;;  %v8403_v0 = vld [vmem:[%s12139_s0 + $0x220] sm:$0xf0]  ;;  %4495 = vmatpush.bf16.msra.mxu1 %v8743_v32  ;;  %v8478_v32 = vld [vmem:[%s12139_s0 + $0x478] sm:$0xf0] }
 0x218   :  { %v6526_v57 = vor.u32 %v8403_v0, %v6525_v33 }
 0x219   :  { %v4023_v41 = vadd.f32 %v4022_v35, %v3950_v51  ;;  %v8415_v35 = vld [vmem:[%s12139_s0 + $0x284] sm:$0xf] }
 0x21a   :  { %v6622_v13 = vor.u32 %v8415_v35, %v6619_v56  ;;  %v6817_v35 = vld [vmem:[%s12139_s0 + $0x410] sm:$0xf]  ;;  %v8477_v56 = vld [vmem:[%s12139_s0 + $0x470] sm:$0xf0] }
 0x21b   :  { %v4096_v7 = vadd.f32 %v4095_v8, %v4023_v41  ;;  %v6818_v6 = vor.u32 %v8477_v56, %v6817_v35  ;;  %v8750_v35 = vld [vmem:[%s12137_s1 + $0x398] sm:$0xff] }
 0x21c   :  { %4569 = vmatpush.bf16.msra.mxu2 %v8750_v35  ;;  %v6925_v35 = vld [vmem:[%s12139_s0 + $0x4e0] sm:$0xf] }
 0x21d   :  { %v10181_v23 = vadd.f32 %v4168_v39, %v4096_v7 }
 0x21e   :  { %v3952_v61 = vpop.f32.mrf.mxu1  ;;  %v4171_v19 = vpop.f32.mrf.mxu0 }
 0x21f   :  { %v4100_v1 = vpop.f32.mrf.mxu3  ;;  %v3953_v38 = vadd.f32 %v3952_v61, %v9724_v53  ;;  %v4032_v8 = vpop.f32.mrf.mxu2  ;;  %v8414_v53 = vld [vmem:[%s12139_s0 + $0x27c] sm:$0xf] }
 0x221   :  { %v4026_v62 = vadd.f32 %v4025_v43, %v3953_v38  ;;  %4218 = vmatmul.bf16.gmra.mxu1 %v6514_v12  ;;  %4437 = vmatmul.bf16.gmra.mxu0 %v6526_v57  ;;  %v6611_v43 = vld [vmem:[%s12139_s0 + $0x2dc] sm:$0xf0] }
 0x222   :  { %v6614_v39 = vor.u32 %v8414_v53, %v6611_v43 }
 0x223   :  { %v4099_v25 = vadd.f32 %v4098_v40, %v4026_v62  ;;  %v6625_v40 = vld [vmem:[%s12139_s0 + $0x288] sm:$0xf] }
 0x224   :  { %4369 = vmatmul.bf16.gmra.mxu3 %v6622_v13  ;;  %4301 = vmatmul.bf16.gmra.mxu2 %v6718_v30  ;;  %v6626_v51 = vor.u32 %v8428_v36, %v6625_v40 }
 0x225   :  { %v10193_v54 = vadd.f32 %v4171_v19, %v4099_v25  ;;  %v8439_v25 = vld [vmem:[%s12139_s0 + $0x344] sm:$0xf] }
 0x226   :  { %v3954_v5 = vpop.f32.mrf.mxu1  ;;  %v4173_v52 = vpop.f32.mrf.mxu0 }
 0x227   :  { %v4103_v20 = vpop.f32.mrf.mxu3  ;;  %v3955_v34 = vadd.f32 %v3954_v5, %v9745_v17  ;;  %v4035_v26 = vpop.f32.mrf.mxu2  ;;  %v8440_v17 = vld [vmem:[%s12139_s0 + $0x34c] sm:$0xf]  ;;  %v6725_v5 = vld [vmem:[%s12139_s0 + $0x350] sm:$0xf] }
 0x229   :  { %v4028_v9 = vadd.f32 %v4027_v49, %v3955_v34  ;;  %v6719_v49 = vld [vmem:[%s12139_s0 + $0x3ac] sm:$0xf0]  ;;  %v6819_v34 = vld [vmem:[%s12139_s0 + $0x474] sm:$0xf0] }
 0x22a   :  { %v6722_v7 = vor.u32 %v8440_v17, %v6719_v49  ;;  %v6917_v49 = vld [vmem:[%s12139_s0 + $0x4d8] sm:$0xf] }
 0x22b   :  { %v4101_v47 = vadd.f32 %v4100_v1, %v4028_v9 }
 0x22d   :  { %v10214_v55 = vadd.f32 %v4173_v52, %v4101_v47 }
 0x22e   :  { %v3957_v33 = vpop.f32.mrf.mxu1  ;;  %v4176_v0 = vpop.f32.mrf.mxu0 }
 0x22f   :  { %v4105_v41 = vpop.f32.mrf.mxu3  ;;  %v3958_v12 = vadd.f32 %v3957_v33, %v9760_v10  ;;  %v4037_v57 = vpop.f32.mrf.mxu2  ;;  %v8767_v10 = vld [vmem:[%s12137_s1 + $0x420] sm:$0xff] }
 0x230   :  { %4714 = vmatpush.bf16.msra.mxu0 %v8767_v10  ;;  %v6919_v10 = vld [vmem:[%s12139_s0 + $0x53c] sm:$0xf0] }
 0x231   :  { %v4031_v1 = vadd.f32 %v4030_v27, %v3958_v12  ;;  %4223 = vmatmul.bf16.gmra.mxu1 %v6614_v39  ;;  %4442 = vmatmul.bf16.gmra.mxu0 %v6626_v51  ;;  %v8502_v39 = vld [vmem:[%s12139_s0 + $0x538] sm:$0xf0] }
 0x232   :  { %v6918_v24 = vor.u32 %v8502_v39, %v6917_v49  ;;  %v8766_v39 = vld [vmem:[%s12137_s1 + $0x418] sm:$0xff] }
 0x233   :  { %v4104_v61 = vadd.f32 %v4103_v20, %v4031_v1  ;;  %v6711_v20 = vld [vmem:[%s12139_s0 + $0x3a4] sm:$0xf0] }
 0x234   :  { %4374 = vmatmul.bf16.gmra.mxu3 %v6722_v7  ;;  %4306 = vmatmul.bf16.gmra.mxu2 %v6818_v6  ;;  %v6714_v53 = vor.u32 %v8439_v25, %v6711_v20  ;;  %v8464_v6 = vld [vmem:[%s12139_s0 + $0x40c] sm:$0xf]  ;;  %v8758_v25 = vld [vmem:[%s12137_s1 + $0x3d8] sm:$0xff] }
 0x235   :  { %v10229_v19 = vadd.f32 %v4176_v0, %v4104_v61  ;;  %v6811_v61 = vld [vmem:[%s12139_s0 + $0x46c] sm:$0xf0]  ;;  %v8742_v20 = vld [vmem:[%s12137_s1 + $0x358] sm:$0xff]  ;;  %4642 = vmatpush.bf16.msra.mxu3 %v8758_v25  ;;  %4715 = vmatpush.bf16.msra.mxu0 %v8766_v39  ;;  %v7025_v39 = vld [vmem:[%s12139_s0 + $0x5a8] sm:$0xf] }
 0x236   :  { %v3959_v48 = vpop.f32.mrf.mxu1  ;;  %v4178_v38 = vpop.f32.mrf.mxu0  ;;  %4496 = vmatpush.bf16.msra.mxu1 %v8742_v20 }
 0x237   :  { %v4108_v13 = vpop.f32.mrf.mxu3  ;;  %v3960_v27 = vadd.f32 %v3959_v48, %v9787_v46  ;;  %v4040_v62 = vpop.f32.mrf.mxu2  ;;  %v8453_v46 = vld [vmem:[%s12139_s0 + $0x3b0] sm:$0xf0] }
 0x238   :  { %v6726_v43 = vor.u32 %v8453_v46, %v6725_v5 }
 0x239   :  { %v4033_v30 = vadd.f32 %v4032_v8, %v3960_v27  ;;  %v8465_v8 = vld [vmem:[%s12139_s0 + $0x414] sm:$0xf] }
 0x23a   :  { %v6822_v17 = vor.u32 %v8465_v8, %v6819_v34  ;;  %v7017_v8 = vld [vmem:[%s12139_s0 + $0x5a0] sm:$0xf]  ;;  %v8527_v34 = vld [vmem:[%s12139_s0 + $0x600] sm:$0xf0] }
 0x23b   :  { %v4106_v52 = vadd.f32 %v4105_v41, %v4033_v30 }
 0x23d   :  { %v10256_v9 = vadd.f32 %v4178_v38, %v4106_v52  ;;  %v6814_v38 = vor.u32 %v8464_v6, %v6811_v61 }
 0x23e   :  { %v3962_v36 = vpop.f32.mrf.mxu1  ;;  %v4181_v47 = vpop.f32.mrf.mxu0 }
 0x23f   :  { %v4110_v40 = vpop.f32.mrf.mxu3  ;;  %v3963_v51 = vadd.f32 %v3962_v36, %v9796_v45  ;;  %v4042_v41 = vpop.f32.mrf.mxu2  ;;  %v7018_v36 = vor.u32 %v8527_v34, %v7017_v8  ;;  %v8757_v8 = vld [vmem:[%s12137_s1 + $0x3d0] sm:$0xff] }
 0x240   :  { %4643 = vmatpush.bf16.msra.mxu3 %v8757_v8 }
 0x241   :  { %v4036_v37 = vadd.f32 %v4035_v26, %v3963_v51  ;;  %4228 = vmatmul.bf16.gmra.mxu1 %v6714_v53  ;;  %4447 = vmatmul.bf16.gmra.mxu0 %v6726_v43 }
 0x243   :  { %v4109_v33 = vadd.f32 %v4108_v13, %v4036_v37  ;;  %v6825_v13 = vld [vmem:[%s12139_s0 + $0x418] sm:$0xf] }
 0x244   :  { %4379 = vmatmul.bf16.gmra.mxu3 %v6822_v17  ;;  %4311 = vmatmul.bf16.gmra.mxu2 %v6918_v24  ;;  %v6826_v27 = vor.u32 %v8478_v32, %v6825_v13 }
 0x245   :  { %v10265_v0 = vadd.f32 %v4181_v47, %v4109_v33  ;;  %v8489_v33 = vld [vmem:[%s12139_s0 + $0x4d4] sm:$0xf] }
 0x246   :  { %v3964_v56 = vpop.f32.mrf.mxu1  ;;  %v4183_v12 = vpop.f32.mrf.mxu0 }
 0x247   :  { %v4113_v7 = vpop.f32.mrf.mxu3  ;;  %v3965_v1 = vadd.f32 %v3964_v56, %v9820_v15  ;;  %v4045_v45 = vpop.f32.mrf.mxu2  ;;  %v8503_v56 = vld [vmem:[%s12139_s0 + $0x540] sm:$0xf0] }
 0x248   :  { %v6926_v6 = vor.u32 %v8503_v56, %v6925_v35  ;;  %v8765_v35 = vld [vmem:[%s12137_s1 + $0x410] sm:$0xff] }
 0x249   :  { %v4038_v26 = vadd.f32 %v4037_v57, %v3965_v1  ;;  %v8490_v57 = vld [vmem:[%s12139_s0 + $0x4dc] sm:$0xf]  ;;  %4716 = vmatpush.bf16.msra.mxu0 %v8765_v35 }
 0x24a   :  { %v6922_v52 = vor.u32 %v8490_v57, %v6919_v10  ;;  %v7117_v57 = vld [vmem:[%s12139_s0 + $0x668] sm:$0xf]  ;;  %v8552_v10 = vld [vmem:[%s12139_s0 + $0x6c8] sm:$0xf0] }
 0x24b   :  { %v4111_v15 = vadd.f32 %v4110_v40, %v4038_v26  ;;  %v7118_v25 = vor.u32 %v8552_v10, %v7117_v57 }
 0x24d   :  { %v10289_v48 = vadd.f32 %v4183_v12, %v4111_v15  ;;  %v7019_v12 = vld [vmem:[%s12139_s0 + $0x604] sm:$0xf0] }
 0x24e   :  { %v3967_v5 = vpop.f32.mrf.mxu1  ;;  %v4186_v46 = vpop.f32.mrf.mxu0 }
 0x24f   :  { %v4115_v30 = vpop.f32.mrf.mxu3  ;;  %v3968_v53 = vadd.f32 %v3967_v5, %v9835_v14  ;;  %v4047_v43 = vpop.f32.mrf.mxu2 }
 0x251   :  { %v4041_v40 = vadd.f32 %v4040_v62, %v3968_v53  ;;  %4233 = vmatmul.bf16.gmra.mxu1 %v6814_v38  ;;  %4452 = vmatmul.bf16.gmra.mxu0 %v6826_v27 }
 0x253   :  { %v4114_v47 = vadd.f32 %v4113_v7, %v4041_v40  ;;  %v6911_v7 = vld [vmem:[%s12139_s0 + $0x534] sm:$0xf0] }
 0x254   :  { %4384 = vmatmul.bf16.gmra.mxu3 %v6922_v52  ;;  %4316 = vmatmul.bf16.gmra.mxu2 %v7018_v36  ;;  %v6914_v26 = vor.u32 %v8489_v33, %v6911_v7  ;;  %v8749_v52 = vld [vmem:[%s12137_s1 + $0x390] sm:$0xff] }
 0x255   :  { %v10304_v17 = vadd.f32 %v4186_v46, %v4114_v47  ;;  %4570 = vmatpush.bf16.msra.mxu2 %v8749_v52  ;;  %v8514_v47 = vld [vmem:[%s12139_s0 + $0x59c] sm:$0xf]  ;;  %v7219_v52 = vld [vmem:[%s12139_s0 + $0x794] sm:$0xf0] }
 0x256   :  { %v3969_v51 = vpop.f32.mrf.mxu1  ;;  %v4188_v37 = vpop.f32.mrf.mxu0 }
 0x257   :  { %v4118_v49 = vpop.f32.mrf.mxu3  ;;  %v3970_v14 = vadd.f32 %v3969_v51, %v9859_v60  ;;  %v4050_v24 = vpop.f32.mrf.mxu2 }
 0x259   :  { %v4043_v62 = vadd.f32 %v4042_v41, %v3970_v14  ;;  %v8515_v41 = vld [vmem:[%s12139_s0 + $0x5a4] sm:$0xf] }
 0x25a   :  { %v7022_v15 = vor.u32 %v8515_v41, %v7019_v12  ;;  %v7217_v12 = vld [vmem:[%s12139_s0 + $0x730] sm:$0xf] }
 0x25b   :  { %v4116_v60 = vadd.f32 %v4115_v30, %v4043_v62 }
 0x25d   :  { %v10328_v1 = vadd.f32 %v4188_v37, %v4116_v60  ;;  %v7119_v37 = vld [vmem:[%s12139_s0 + $0x6cc] sm:$0xf0] }
 0x25e   :  { %v3972_v13 = vpop.f32.mrf.mxu1  ;;  %v4191_v32 = vpop.f32.mrf.mxu0 }
 0x25f   :  { %v4120_v61 = vpop.f32.mrf.mxu3  ;;  %v3973_v38 = vadd.f32 %v3972_v13, %v9868_v11  ;;  %v4052_v27 = vpop.f32.mrf.mxu2  ;;  %v8741_v11 = vld [vmem:[%s12137_s1 + $0x350] sm:$0xff] }
 0x260   :  { %4497 = vmatpush.bf16.msra.mxu1 %v8741_v11 }
 0x261   :  { %v4046_v30 = vadd.f32 %v4045_v45, %v3973_v38  ;;  %4238 = vmatmul.bf16.gmra.mxu1 %v6914_v26  ;;  %4457 = vmatmul.bf16.gmra.mxu0 %v6926_v6  ;;  %v8577_v26 = vld [vmem:[%s12139_s0 + $0x790] sm:$0xf0] }
 0x263   :  { %v4119_v20 = vadd.f32 %v4118_v49, %v4046_v30  ;;  %v7011_v49 = vld [vmem:[%s12139_s0 + $0x5fc] sm:$0xf0] }
 0x264   :  { %4389 = vmatmul.bf16.gmra.mxu3 %v7022_v15  ;;  %4321 = vmatmul.bf16.gmra.mxu2 %v7118_v25  ;;  %v7014_v62 = vor.u32 %v8514_v47, %v7011_v49  ;;  %v8539_v25 = vld [vmem:[%s12139_s0 + $0x664] sm:$0xf] }
 0x265   :  { %v10337_v5 = vadd.f32 %v4191_v32, %v4119_v20  ;;  %v7218_v32 = vor.u32 %v8577_v26, %v7217_v12  ;;  %v8553_v20 = vld [vmem:[%s12139_s0 + $0x6d0] sm:$0xf0] }
 0x266   :  { %v3974_v45 = vpop.f32.mrf.mxu1  ;;  %v4193_v34 = vpop.f32.mrf.mxu0 }
 0x267   :  { %v4123_v46 = vpop.f32.mrf.mxu3  ;;  %v3975_v53 = vadd.f32 %v3974_v45, %v9898_v44  ;;  %v4282_v40 = vpop.f32.mrf.mxu2  ;;  %v8528_v44 = vld [vmem:[%s12139_s0 + $0x608] sm:$0xf0] }
 0x268   :  { %v7026_v33 = vor.u32 %v8528_v44, %v7025_v39  ;;  %v7317_v44 = vld [vmem:[%s12139_s0 + $0x7f8] sm:$0xf] }
 0x269   :  { %v4048_v36 = vadd.f32 %v4047_v43, %v3975_v53  ;;  %v8540_v43 = vld [vmem:[%s12139_s0 + $0x66c] sm:$0xf] }
 0x26a   :  { %v7122_v41 = vor.u32 %v8540_v43, %v7119_v37  ;;  %v8756_v53 = vld [vmem:[%s12137_s1 + $0x3c8] sm:$0xff] }
 0x26b   :  { %v4121_v51 = vadd.f32 %v4120_v61, %v4048_v36  ;;  %v8740_v36 = vld [vmem:[%s12137_s1 + $0x348] sm:$0xff]  ;;  %4644 = vmatpush.bf16.msra.mxu3 %v8756_v53 }
 0x26c   :  { %4498 = vmatpush.bf16.msra.mxu1 %v8740_v36 }
 0x26d   :  { %v10367_v14 = vadd.f32 %v4193_v34, %v4121_v51  ;;  %v8748_v34 = vld [vmem:[%s12137_s1 + $0x388] sm:$0xff]  ;;  %v8602_v51 = vld [vmem:[%s12139_s0 + $0x858] sm:$0xf0] }
 0x26e   :  { %v3977_v56 = vpop.f32.mrf.mxu1  ;;  %v4196_v60 = vpop.f32.mrf.mxu0  ;;  %4571 = vmatpush.bf16.msra.mxu2 %v8748_v34 }
 0x26f   :  { %v4125_v7 = vpop.f32.mrf.mxu3  ;;  %v3978_v6 = vadd.f32 %v3977_v56, %v9910_v42  ;;  %v4284_v61 = vpop.f32.mrf.mxu2  ;;  %v7111_v42 = vld [vmem:[%s12139_s0 + $0x6c4] sm:$0xf0] }
 0x270   :  { %v7114_v8 = vor.u32 %v8539_v25, %v7111_v42 }
 0x271   :  { %v4051_v13 = vadd.f32 %v4050_v24, %v3978_v6  ;;  %4243 = vmatmul.bf16.gmra.mxu1 %v7014_v62  ;;  %4462 = vmatmul.bf16.gmra.mxu0 %v7026_v33  ;;  %v7125_v24 = vld [vmem:[%s12139_s0 + $0x670] sm:$0xf]  ;;  %v7318_v33 = vor.u32 %v8602_v51, %v7317_v44  ;;  %v8564_v6 = vld [vmem:[%s12139_s0 + $0x72c] sm:$0xf]  ;;  %v8755_v44 = vld [vmem:[%s12137_s1 + $0x3c0] sm:$0xff] }
 0x272   :  { %v7126_v11 = vor.u32 %v8553_v20, %v7125_v24  ;;  %4645 = vmatpush.bf16.msra.mxu3 %v8755_v44  ;;  %v8628_v44 = vld [vmem:[%s12139_s0 + $0x928] sm:$0xf0] }
 0x273   :  { %v4124_v15 = vadd.f32 %v4123_v46, %v4051_v13  ;;  %v8565_v46 = vld [vmem:[%s12139_s0 + $0x734] sm:$0xf]  ;;  %v7211_v13 = vld [vmem:[%s12139_s0 + $0x78c] sm:$0xf0] }
 0x274   :  { %4394 = vmatmul.bf16.gmra.mxu3 %v7122_v41  ;;  %4326 = vmatmul.bf16.gmra.mxu2 %v7218_v32  ;;  %v7222_v39 = vor.u32 %v8565_v46, %v7219_v52  ;;  %v7225_v32 = vld [vmem:[%s12139_s0 + $0x738] sm:$0xf]  ;;  %v7417_v52 = vld [vmem:[%s12139_s0 + $0x8c0] sm:$0xf] }
 0x275   :  { %v10379_v57 = vadd.f32 %v4196_v60, %v4124_v15  ;;  %v8764_v60 = vld [vmem:[%s12137_s1 + $0x408] sm:$0xff]  ;;  %v8578_v15 = vld [vmem:[%s12139_s0 + $0x798] sm:$0xf0] }
 0x276   :  { %v3979_v38 = vpop.f32.mrf.mxu1  ;;  %v4198_v27 = vpop.f32.mrf.mxu0  ;;  %4717 = vmatpush.bf16.msra.mxu0 %v8764_v60  ;;  %v7226_v25 = vor.u32 %v8578_v15, %v7225_v32  ;;  %v8739_v15 = vld [vmem:[%s12137_s1 + $0x340] sm:$0xff] }
 0x277   :  { %v4355_v10 = vpop.f32.mrf.mxu3  ;;  %v4287_v30 = vpop.f32.mrf.mxu2  ;;  %v7214_v27 = vor.u32 %v8564_v6, %v7211_v13  ;;  %4499 = vmatpush.bf16.msra.mxu1 %v8739_v15 }
 0x27e   :  { %v4209_v47 = vpop.f32.mrf.mxu1  ;;  %v4428_v49 = vpop.f32.mrf.mxu0 }
 0x27f   :  { %v4357_v45 = vpop.f32.mrf.mxu3  ;;  %v4210_v43 = vadd.f32 %v4209_v47, %v9946_v22  ;;  %v4289_v37 = vpop.f32.mrf.mxu2 }
 0x281   :  { %v4283_v62 = vadd.f32 %v4282_v40, %v4210_v43  ;;  %4248 = vmatmul.bf16.gmra.mxu1 %v7114_v8  ;;  %4467 = vmatmul.bf16.gmra.mxu0 %v7126_v11  ;;  %v8627_v8 = vld [vmem:[%s12139_s0 + $0x920] sm:$0xf0] }
 0x282   :  { %v7418_v53 = vor.u32 %v8627_v8, %v7417_v52 }
 0x283   :  { %v4356_v7 = vadd.f32 %v4355_v10, %v4283_v62  ;;  %v7319_v10 = vld [vmem:[%s12139_s0 + $0x85c] sm:$0xf0] }
 0x284   :  { %4399 = vmatmul.bf16.gmra.mxu3 %v7222_v39  ;;  %4331 = vmatmul.bf16.gmra.mxu2 %v7318_v33  ;;  %v8747_v39 = vld [vmem:[%s12137_s1 + $0x380] sm:$0xff]  ;;  %v8589_v33 = vld [vmem:[%s12139_s0 + $0x7f4] sm:$0xf] }
 0x285   :  { %v10415_v35 = vadd.f32 %v4428_v49, %v4356_v7  ;;  %4572 = vmatpush.bf16.msra.mxu2 %v8747_v39  ;;  %v7311_v7 = vld [vmem:[%s12139_s0 + $0x854] sm:$0xf0] }
 0x286   :  { %v4211_v41 = vpop.f32.mrf.mxu1  ;;  %v4430_v22 = vpop.f32.mrf.mxu0 }
 0x287   :  { %v4360_v56 = vpop.f32.mrf.mxu3  ;;  %v4212_v12 = vadd.f32 %v4211_v41, %v9970_v21  ;;  %v4292_v26 = vpop.f32.mrf.mxu2  ;;  %v8615_v41 = vld [vmem:[%s12139_s0 + $0x8c4] sm:$0xf] }
 0x289   :  { %v4285_v40 = vadd.f32 %v4284_v61, %v4212_v12  ;;  %v8590_v61 = vld [vmem:[%s12139_s0 + $0x7fc] sm:$0xf] }
 0x28a   :  { %v7322_v46 = vor.u32 %v8590_v61, %v7319_v10 }
 0x28b   :  { %v4358_v21 = vadd.f32 %v4357_v45, %v4285_v40  ;;  %v7314_v40 = vor.u32 %v8589_v33, %v7311_v7  ;;  %v8786_v33 = vld [vmem:[%s12137_s1 + $0x4b8] sm:$0xff] }
 0x28c   :  { %4857 = vmatpush.bf16.msrb.mxu2 %v8786_v33 }
 0x28d   :  { %v10439_v38 = vadd.f32 %v4430_v22, %v4358_v21  ;;  %v7419_v22 = vld [vmem:[%s12139_s0 + $0x924] sm:$0xf0]  ;;  %v8763_v21 = vld [vmem:[%s12137_s1 + $0x400] sm:$0xff] }
 0x28e   :  { %v4214_v24 = vpop.f32.mrf.mxu1  ;;  %v4433_v20 = vpop.f32.mrf.mxu0  ;;  %4718 = vmatpush.bf16.msra.mxu0 %v8763_v21  ;;  %v8794_v21 = vld [vmem:[%s12137_s1 + $0x4f8] sm:$0xff] }
 0x28f   :  { %v4362_v42 = vpop.f32.mrf.mxu3  ;;  %v4215_v11 = vadd.f32 %v4214_v24, %v9979_v28  ;;  %v4294_v45 = vpop.f32.mrf.mxu2  ;;  %4930 = vmatpush.bf16.msrb.mxu3 %v8794_v21 }
 0x291   :  { %v4288_v34 = vadd.f32 %v4287_v30, %v4215_v11  ;;  %4253 = vmatmul.bf16.gmra.mxu1 %v7214_v27  ;;  %4472 = vmatmul.bf16.gmra.mxu0 %v7226_v25  ;;  %v7422_v27 = vor.u32 %v8615_v41, %v7419_v22 }
 0x293   :  { %v4361_v36 = vadd.f32 %v4360_v56, %v4288_v34  ;;  %v7325_v56 = vld [vmem:[%s12139_s0 + $0x800] sm:$0xf] }
 0x294   :  { %4404 = vmatmul.bf16.gmra.mxu3 %v7322_v46  ;;  %4336 = vmatmul.bf16.gmra.mxu2 %v7418_v53 }
 0x295   :  { %v10448_v47 = vadd.f32 %v4433_v20, %v4361_v36 }
 0x296   :  { %v4216_v28 = vpop.f32.mrf.mxu1  ;;  %v4435_v51 = vpop.f32.mrf.mxu0 }
 0x297   :  { %v4365_v49 = vpop.f32.mrf.mxu3  ;;  %v4217_v30 = vadd.f32 %v4216_v28, %v10009_v29  ;;  %v4297_v43 = vpop.f32.mrf.mxu2  ;;  %v8603_v29 = vld [vmem:[%s12139_s0 + $0x860] sm:$0xf0] }
 0x298   :  { %v7326_v6 = vor.u32 %v8603_v29, %v7325_v56 }
 0x299   :  { %v4290_v62 = vadd.f32 %v4289_v37, %v4217_v30  ;;  %v331_v37 = vld [vmem:[%s12139_s0 + $0x988] sm:$0xff] }
 0x29a   :  { %v1678_v32 = vunpack.c.l.b16 %v331_v37  ;;  %v1679_v28 = vunpack.c.h.b16 %v331_v37  ;;  %v8354_v37 = vld [vmem:[%s12139_s0 + $0x98] sm:$0xf0] }
 0x29b   :  { %v4363_v60 = vadd.f32 %v4362_v42, %v4290_v62 }
 0x29c   :  { %v2003_v20 = vpack.c.b16 %v1678_v32, %v1678_v32  ;;  %v2004_v29 = vpack.c.b16 %v1679_v28, %v1679_v28  ;;  %v8379_v28 = vld [vmem:[%s12139_s0 + $0x160] sm:$0xf0] }
 0x29d   :  { %v10478_v12 = vadd.f32 %v4435_v51, %v4363_v60  ;;  %v6333_v60 = vld [vmem:[%s12139_s0 + $0x38] sm:$0xf] }
 0x29e   :  { %v4219_v61 = vpop.f32.mrf.mxu1  ;;  %v4438_v10 = vpop.f32.mrf.mxu0 }
 0x29f   :  { %v4367_v13 = vpop.f32.mrf.mxu3  ;;  %v4220_v25 = vadd.f32 %v4219_v61, %v10018_v58  ;;  %v4299_v42 = vpop.f32.mrf.mxu2  ;;  %v8614_v58 = vld [vmem:[%s12139_s0 + $0x8bc] sm:$0xf] }
 0x2a1   :  { %v4293_v24 = vadd.f32 %v4292_v26, %v4220_v25  ;;  %4258 = vmatmul.bf16.gmra.mxu1 %v7314_v40  ;;  %4477 = vmatmul.bf16.gmra.mxu0 %v7326_v6  ;;  %v7411_v26 = vld [vmem:[%s12139_s0 + $0x91c] sm:$0xf0]  ;;  %v6334_v6 = vor.u32 %v8354_v37, %v6333_v60 }
 0x2a3   :  { %v4366_v46 = vadd.f32 %v4365_v49, %v4293_v24  ;;  %v7425_v49 = vld [vmem:[%s12139_s0 + $0x8c8] sm:$0xf] }
 0x2a4   :  { %4409 = vmatmul.bf16.gmra.mxu3 %v7422_v27  ;;  %4341 = vmatmul.bf16.gmra.mxu2 %v2003_v20  ;;  %v7426_v30 = vor.u32 %v8628_v44, %v7425_v49  ;;  %v1677_v20 = vunpack.c.h.b16 %v10056_v2  ;;  %v8802_v2 = vld [vmem:[%s12137_s1 + $0x538] sm:$0xff]  ;;  %v6433_v44 = vld [vmem:[%s12139_s0 + $0x100] sm:$0xf] }
 0x2a5   :  { %v10487_v52 = vadd.f32 %v4438_v10, %v4366_v46  ;;  %5003 = vmatpush.bf16.msrb.mxu0 %v8802_v2 }
 0x2a6   :  { %v4221_v11 = vpop.f32.mrf.mxu1  ;;  %v4440_v34 = vpop.f32.mrf.mxu0 }
 0x2a7   :  { %v4370_v8 = vpop.f32.mrf.mxu3  ;;  %v4222_v53 = vadd.f32 %v4221_v11, %v10033_v59  ;;  %v4302_v36 = vpop.f32.mrf.mxu2  ;;  %v8342_v11 = vld [vmem:[%s12139_s0 + $0x3c] sm:$0xf] }
 0x2a9   :  { %v4295_v39 = vadd.f32 %v4294_v45, %v4222_v53  ;;  %v7414_v45 = vor.u32 %v8614_v58, %v7411_v26 }
 0x2ab   :  { %v4368_v59 = vadd.f32 %v4367_v13, %v4295_v39 }
 0x2ad   :  { %v10502_v51 = vadd.f32 %v4440_v34, %v4368_v59  ;;  %v6335_v34 = vld [vmem:[%s12139_s0 + $0x9c] sm:$0xf0] }
 0x2ae   :  { %v4224_v7 = vpop.f32.mrf.mxu1  ;;  %v4443_v56 = vpop.f32.mrf.mxu0  ;;  %v6338_v49 = vor.u32 %v8342_v11, %v6335_v34  ;;  %v6533_v34 = vld [vmem:[%s12139_s0 + $0x1c8] sm:$0xf] }
 0x2af   :  { %v4372_v62 = vpop.f32.mrf.mxu3  ;;  %v4225_v41 = vadd.f32 %v4224_v7, %v10045_v16  ;;  %v4304_v22 = vpop.f32.mrf.mxu2  ;;  %v8778_v16 = vld [vmem:[%s12137_s1 + $0x478] sm:$0xff] }
 0x2b0   :  { %4784 = vmatpush.bf16.msrb.mxu1 %v8778_v16 }
 0x2b1   :  { %v4298_v40 = vadd.f32 %v4297_v43, %v4225_v41  ;;  %4263 = vmatmul.bf16.gmra.mxu1 %v7414_v45  ;;  %4482 = vmatmul.bf16.gmra.mxu0 %v7426_v30  ;;  %v10525_v43 = vld [vmem:[%s12139_s0 + $0x990] sm:$0xff] }
 0x2b2   :  { %v1680_v46 = vunpack.c.l.b16 %v10525_v43 }
 0x2b3   :  { %v4371_v13 = vadd.f32 %v4370_v8, %v4298_v40 }
 0x2b4   :  { %4414 = vmatmul.bf16.gmra.mxu3 %v2004_v29  ;;  %4573 = vmatmul.bf16.vlgmr.msra.gmra.mxu2 %v6334_v6  ;;  %v2005_v39 = vpack.c.b16 %v1680_v46, %v1680_v46  ;;  %v6341_v6 = vld [vmem:[%s12139_s0 + $0x40] sm:$0xf] }
 0x2b5   :  { %v10514_v32 = vadd.f32 %v4443_v56, %v4371_v13  ;;  %v8355_v13 = vld [vmem:[%s12139_s0 + $0xa0] sm:$0xf0] }
 0x2b6   :  { %v4226_v61 = vpop.f32.mrf.mxu1  ;;  %v4445_v10 = vpop.f32.mrf.mxu0 }
 0x2b7   :  { %v4375_v15 = vpop.f32.mrf.mxu3  ;;  %v4227_v27 = vadd.f32 %v4226_v61, %v10067_v3  ;;  %v4307_v25 = vpop.f32.mrf.mxu2  ;;  %v2002_v3 = vpack.c.b16 %v1677_v20, %v1677_v20  ;;  %v6342_v61 = vor.u32 %v8355_v13, %v6341_v6  ;;  %v8777_v20 = vld [vmem:[%s12137_s1 + $0x470] sm:$0xff] }
 0x2b8   :  { %4785 = vmatpush.bf16.msrb.mxu1 %v8777_v20 }
 0x2b9   :  { %v4300_v24 = vadd.f32 %v4299_v42, %v4227_v27  ;;  %v8785_v27 = vld [vmem:[%s12137_s1 + $0x4b0] sm:$0xff] }
 0x2ba   :  { %4858 = vmatpush.bf16.msrb.mxu2 %v8785_v27 }
 0x2bb   :  { %v4373_v8 = vadd.f32 %v4372_v62, %v4300_v24  ;;  %v6434_v62 = vor.u32 %v8379_v28, %v6433_v44  ;;  %v8793_v24 = vld [vmem:[%s12137_s1 + $0x4f0] sm:$0xff] }
 0x2bc   :  { %4931 = vmatpush.bf16.msrb.mxu3 %v8793_v24  ;;  %v8801_v28 = vld [vmem:[%s12137_s1 + $0x530] sm:$0xff] }
 0x2bd   :  { %v10536_v53 = vadd.f32 %v4445_v10, %v4373_v8  ;;  %5004 = vmatpush.bf16.msrb.mxu0 %v8801_v28  ;;  %v6541_v28 = vld [vmem:[%s12139_s0 + $0x1d0] sm:$0xf] }
 0x2be   :  { %v4229_v42 = vpop.f32.mrf.mxu1  ;;  %v4448_v26 = vpop.f32.mrf.mxu0 }
 0x2bf   :  { %v4377_v58 = vpop.f32.mrf.mxu3  ;;  %v4230_v59 = vadd.f32 %v4229_v42, %v10079_v63  ;;  %v4309_v45 = vpop.f32.mrf.mxu2  ;;  %v8341_v63 = vld [vmem:[%s12139_s0 + $0x34] sm:$0xf] }
 0x2c1   :  { %v4303_v30 = vadd.f32 %v4302_v36, %v4230_v59  ;;  %4268 = vmatmul.bf16.gmra.mxu1 %v2002_v3  ;;  %4487 = vmatmul.bf16.gmra.mxu0 %v2005_v39  ;;  %v6327_v36 = vld [vmem:[%s12139_s0 + $0x94] sm:$0xf0]  ;;  %v8404_v3 = vld [vmem:[%s12139_s0 + $0x228] sm:$0xf0] }
 0x2c2   :  { %v6330_v16 = vor.u32 %v8341_v63, %v6327_v36  ;;  %v6534_v42 = vor.u32 %v8404_v3, %v6533_v34  ;;  %v8792_v34 = vld [vmem:[%s12137_s1 + $0x4e8] sm:$0xff] }
 0x2c3   :  { %v4376_v33 = vadd.f32 %v4375_v15, %v4303_v30  ;;  %4932 = vmatpush.bf16.msrb.mxu3 %v8792_v34  ;;  %v8430_v34 = vld [vmem:[%s12139_s0 + $0x2f8] sm:$0xf0] }
 0x2c4   :  { %4646 = vmatmul.bf16.vlgmr.msra.gmra.mxu3 %v6338_v49  ;;  %4578 = vmatmul.bf16.gmra.mxu2 %v6434_v62 }
 0x2c5   :  { %v10548_v7 = vadd.f32 %v4448_v26, %v4376_v33  ;;  %v8366_v33 = vld [vmem:[%s12139_s0 + $0xfc] sm:$0xf] }
 0x2c6   :  { %v4231_v29 = vpop.f32.mrf.mxu1  ;;  %v4450_v60 = vpop.f32.mrf.mxu0 }
 0x2c7   :  { %v4380_v56 = vpop.f32.mrf.mxu3  ;;  %v4232_v37 = vadd.f32 %v4231_v29, %v10100_v18  ;;  %v4312_v41 = vpop.f32.mrf.mxu2  ;;  %v8367_v18 = vld [vmem:[%s12139_s0 + $0x104] sm:$0xf]  ;;  %v6441_v29 = vld [vmem:[%s12139_s0 + $0x108] sm:$0xf] }
 0x2c9   :  { %v4305_v40 = vadd.f32 %v4304_v22, %v4232_v37  ;;  %v6435_v22 = vld [vmem:[%s12139_s0 + $0x164] sm:$0xf0]  ;;  %v6535_v37 = vld [vmem:[%s12139_s0 + $0x22c] sm:$0xf0] }
 0x2ca   :  { %v6438_v11 = vor.u32 %v8367_v18, %v6435_v22  ;;  %v6633_v22 = vld [vmem:[%s12139_s0 + $0x290] sm:$0xf] }
 0x2cb   :  { %v4378_v15 = vadd.f32 %v4377_v58, %v4305_v40 }
 0x2cd   :  { %v10569_v21 = vadd.f32 %v4450_v60, %v4378_v15  ;;  %v8380_v60 = vld [vmem:[%s12139_s0 + $0x168] sm:$0xf0] }
 0x2ce   :  { %v4234_v46 = vpop.f32.mrf.mxu1  ;;  %v4453_v8 = vpop.f32.mrf.mxu0  ;;  %v6442_v36 = vor.u32 %v8380_v60, %v6441_v29  ;;  %v8800_v29 = vld [vmem:[%s12137_s1 + $0x528] sm:$0xff] }
 0x2cf   :  { %v4382_v10 = vpop.f32.mrf.mxu3  ;;  %v4235_v39 = vadd.f32 %v4234_v46, %v10118_v31  ;;  %v4314_v58 = vpop.f32.mrf.mxu2  ;;  %5005 = vmatpush.bf16.msrb.mxu0 %v8800_v29 }
 0x2d1   :  { %v4308_v2 = vadd.f32 %v4307_v25, %v4235_v39  ;;  %4500 = vmatmul.bf16.vlgmr.msra.gmra.mxu1 %v6330_v16  ;;  %4719 = vmatmul.bf16.vlgmr.msra.gmra.mxu0 %v6342_v61  ;;  %v8429_v16 = vld [vmem:[%s12139_s0 + $0x2f0] sm:$0xf0] }
 0x2d2   :  { %v6634_v24 = vor.u32 %v8429_v16, %v6633_v22 }
 0x2d3   :  { %v4381_v26 = vadd.f32 %v4380_v56, %v4308_v2  ;;  %v6427_v56 = vld [vmem:[%s12139_s0 + $0x15c] sm:$0xf0] }
 0x2d4   :  { %4651 = vmatmul.bf16.gmra.mxu3 %v6438_v11  ;;  %4583 = vmatmul.bf16.gmra.mxu2 %v6534_v42  ;;  %v6430_v63 = vor.u32 %v8366_v33, %v6427_v56  ;;  %v8784_v11 = vld [vmem:[%s12137_s1 + $0x4a8] sm:$0xff] }
 0x2d5   :  { %v10587_v49 = vadd.f32 %v4453_v8, %v4381_v26  ;;  %4859 = vmatpush.bf16.msrb.mxu2 %v8784_v11  ;;  %v8391_v26 = vld [vmem:[%s12139_s0 + $0x1c4] sm:$0xf] }
 0x2d6   :  { %v4236_v59 = vpop.f32.mrf.mxu1  ;;  %v4455_v31 = vpop.f32.mrf.mxu0 }
 0x2d7   :  { %v4385_v44 = vpop.f32.mrf.mxu3  ;;  %v4237_v30 = vadd.f32 %v4236_v59, %v10142_v50  ;;  %v4317_v62 = vpop.f32.mrf.mxu2 }
 0x2d9   :  { %v4310_v25 = vadd.f32 %v4309_v45, %v4237_v30  ;;  %v8392_v45 = vld [vmem:[%s12139_s0 + $0x1cc] sm:$0xf] }
 0x2da   :  { %v6538_v18 = vor.u32 %v8392_v45, %v6535_v37  ;;  %v6733_v37 = vld [vmem:[%s12139_s0 + $0x358] sm:$0xf] }
 0x2db   :  { %v4383_v50 = vadd.f32 %v4382_v10, %v4310_v25 }
 0x2dd   :  { %v10611_v40 = vadd.f32 %v4455_v31, %v4383_v50  ;;  %v6635_v31 = vld [vmem:[%s12139_s0 + $0x2f4] sm:$0xf0] }
 0x2de   :  { %v4239_v13 = vpop.f32.mrf.mxu1  ;;  %v4458_v15 = vpop.f32.mrf.mxu0 }
 0x2df   :  { %v4387_v6 = vpop.f32.mrf.mxu3  ;;  %v4240_v61 = vadd.f32 %v4239_v13, %v10151_v4  ;;  %v4319_v10 = vpop.f32.mrf.mxu2  ;;  %v8776_v4 = vld [vmem:[%s12137_s1 + $0x468] sm:$0xff] }
 0x2e0   :  { %4786 = vmatpush.bf16.msrb.mxu1 %v8776_v4 }
 0x2e1   :  { %v4313_v27 = vadd.f32 %v4312_v41, %v4240_v61  ;;  %4505 = vmatmul.bf16.gmra.mxu1 %v6430_v63  ;;  %4724 = vmatmul.bf16.gmra.mxu0 %v6442_v36  ;;  %v8454_v63 = vld [vmem:[%s12139_s0 + $0x3b8] sm:$0xf0] }
 0x2e3   :  { %v4386_v20 = vadd.f32 %v4385_v44, %v4313_v27  ;;  %v6527_v44 = vld [vmem:[%s12139_s0 + $0x224] sm:$0xf0] }
 0x2e4   :  { %4656 = vmatmul.bf16.gmra.mxu3 %v6538_v18  ;;  %4588 = vmatmul.bf16.gmra.mxu2 %v6634_v24  ;;  %v6530_v25 = vor.u32 %v8391_v26, %v6527_v44  ;;  %v8783_v26 = vld [vmem:[%s12137_s1 + $0x4a0] sm:$0xff] }
 0x2e5   :  { %v10620_v46 = vadd.f32 %v4458_v15, %v4386_v20  ;;  %v6734_v15 = vor.u32 %v8454_v63, %v6733_v37  ;;  %v8791_v44 = vld [vmem:[%s12137_s1 + $0x4e0] sm:$0xff]  ;;  %4860 = vmatpush.bf16.msrb.mxu2 %v8783_v26 }
 0x2e6   :  { %v4241_v41 = vpop.f32.mrf.mxu1  ;;  %v4460_v3 = vpop.f32.mrf.mxu0  ;;  %4933 = vmatpush.bf16.msrb.mxu3 %v8791_v44  ;;  %v8775_v37 = vld [vmem:[%s12137_s1 + $0x460] sm:$0xff] }
 0x2e7   :  { %v4390_v8 = vpop.f32.mrf.mxu3  ;;  %v4242_v39 = vadd.f32 %v4241_v41, %v10181_v23  ;;  %v4322_v2 = vpop.f32.mrf.mxu2  ;;  %v8405_v23 = vld [vmem:[%s12139_s0 + $0x230] sm:$0xf0]  ;;  %4787 = vmatpush.bf16.msrb.mxu1 %v8775_v37  ;;  %v8480_v37 = vld [vmem:[%s12139_s0 + $0x488] sm:$0xf0] }
 0x2e8   :  { %v6542_v33 = vor.u32 %v8405_v23, %v6541_v28 }
 0x2e9   :  { %v4315_v42 = vadd.f32 %v4314_v58, %v4242_v39  ;;  %v8417_v58 = vld [vmem:[%s12139_s0 + $0x294] sm:$0xf] }
 0x2ea   :  { %v6638_v45 = vor.u32 %v8417_v58, %v6635_v31  ;;  %v6833_v58 = vld [vmem:[%s12139_s0 + $0x420] sm:$0xf]  ;;  %v8479_v31 = vld [vmem:[%s12139_s0 + $0x480] sm:$0xf0] }
 0x2eb   :  { %v4388_v59 = vadd.f32 %v4387_v6, %v4315_v42  ;;  %v6834_v29 = vor.u32 %v8479_v31, %v6833_v58  ;;  %v8782_v58 = vld [vmem:[%s12137_s1 + $0x498] sm:$0xff] }
 0x2ec   :  { %4861 = vmatpush.bf16.msrb.mxu2 %v8782_v58  ;;  %v6941_v58 = vld [vmem:[%s12139_s0 + $0x4f0] sm:$0xf] }
 0x2ed   :  { %v10650_v30 = vadd.f32 %v4460_v3, %v4388_v59 }
 0x2ee   :  { %v4244_v60 = vpop.f32.mrf.mxu1  ;;  %v4463_v50 = vpop.f32.mrf.mxu0 }
 0x2ef   :  { %v4392_v56 = vpop.f32.mrf.mxu3  ;;  %v4245_v36 = vadd.f32 %v4244_v60, %v10193_v54  ;;  %v4324_v6 = vpop.f32.mrf.mxu2  ;;  %v8416_v54 = vld [vmem:[%s12139_s0 + $0x28c] sm:$0xf] }
 0x2f1   :  { %v4318_v13 = vadd.f32 %v4317_v62, %v4245_v36  ;;  %4510 = vmatmul.bf16.gmra.mxu1 %v6530_v25  ;;  %4729 = vmatmul.bf16.gmra.mxu0 %v6542_v33  ;;  %v6627_v62 = vld [vmem:[%s12139_s0 + $0x2ec] sm:$0xf0] }
 0x2f2   :  { %v6630_v3 = vor.u32 %v8416_v54, %v6627_v62 }
 0x2f3   :  { %v4391_v18 = vadd.f32 %v4390_v8, %v4318_v13  ;;  %v6641_v8 = vld [vmem:[%s12139_s0 + $0x298] sm:$0xf] }
 0x2f4   :  { %4661 = vmatmul.bf16.gmra.mxu3 %v6638_v45  ;;  %4593 = vmatmul.bf16.gmra.mxu2 %v6734_v15  ;;  %v6642_v39 = vor.u32 %v8430_v34, %v6641_v8 }
 0x2f5   :  { %v10662_v22 = vadd.f32 %v4463_v50, %v4391_v18  ;;  %v8441_v18 = vld [vmem:[%s12139_s0 + $0x354] sm:$0xf] }
 0x2f6   :  { %v4246_v61 = vpop.f32.mrf.mxu1  ;;  %v4465_v27 = vpop.f32.mrf.mxu0 }
 0x2f7   :  { %v4395_v16 = vpop.f32.mrf.mxu3  ;;  %v4247_v24 = vadd.f32 %v4246_v61, %v10214_v55  ;;  %v4327_v20 = vpop.f32.mrf.mxu2  ;;  %v8442_v55 = vld [vmem:[%s12139_s0 + $0x35c] sm:$0xf]  ;;  %v6741_v61 = vld [vmem:[%s12139_s0 + $0x360] sm:$0xf] }
 0x2f9   :  { %v4320_v11 = vadd.f32 %v4319_v10, %v4247_v24  ;;  %v6735_v10 = vld [vmem:[%s12139_s0 + $0x3bc] sm:$0xf0]  ;;  %v6835_v24 = vld [vmem:[%s12139_s0 + $0x484] sm:$0xf0] }
 0x2fa   :  { %v6738_v59 = vor.u32 %v8442_v55, %v6735_v10  ;;  %v6933_v10 = vld [vmem:[%s12139_s0 + $0x4e8] sm:$0xf] }
 0x2fb   :  { %v4393_v4 = vadd.f32 %v4392_v56, %v4320_v11 }
 0x2fd   :  { %v10683_v41 = vadd.f32 %v4465_v27, %v4393_v4 }
 0x2fe   :  { %v4249_v28 = vpop.f32.mrf.mxu1  ;;  %v4468_v23 = vpop.f32.mrf.mxu0 }
 0x2ff   :  { %v4397_v42 = vpop.f32.mrf.mxu3  ;;  %v4250_v25 = vadd.f32 %v4249_v28, %v10229_v19  ;;  %v4329_v33 = vpop.f32.mrf.mxu2  ;;  %v8799_v19 = vld [vmem:[%s12137_s1 + $0x520] sm:$0xff] }
 0x300   :  { %5006 = vmatpush.bf16.msrb.mxu0 %v8799_v19  ;;  %v6935_v19 = vld [vmem:[%s12139_s0 + $0x54c] sm:$0xf0] }
 0x301   :  { %v4323_v56 = vadd.f32 %v4322_v2, %v4250_v25  ;;  %4515 = vmatmul.bf16.gmra.mxu1 %v6630_v3  ;;  %4734 = vmatmul.bf16.gmra.mxu0 %v6642_v39  ;;  %v8504_v3 = vld [vmem:[%s12139_s0 + $0x548] sm:$0xf0] }
 0x302   :  { %v6934_v44 = vor.u32 %v8504_v3, %v6933_v10  ;;  %v8798_v3 = vld [vmem:[%s12137_s1 + $0x518] sm:$0xff] }
 0x303   :  { %v4396_v60 = vadd.f32 %v4395_v16, %v4323_v56  ;;  %v6727_v16 = vld [vmem:[%s12139_s0 + $0x3b4] sm:$0xf0] }
 0x304   :  { %4666 = vmatmul.bf16.gmra.mxu3 %v6738_v59  ;;  %4598 = vmatmul.bf16.gmra.mxu2 %v6834_v29  ;;  %v6730_v54 = vor.u32 %v8441_v18, %v6727_v16  ;;  %v8466_v29 = vld [vmem:[%s12139_s0 + $0x41c] sm:$0xf] }
 0x305   :  { %v10698_v50 = vadd.f32 %v4468_v23, %v4396_v60  ;;  %v6827_v60 = vld [vmem:[%s12139_s0 + $0x47c] sm:$0xf0]  ;;  %v8790_v18 = vld [vmem:[%s12137_s1 + $0x4d8] sm:$0xff]  ;;  %5007 = vmatpush.bf16.msrb.mxu0 %v8798_v3 }
 0x306   :  { %v4251_v63 = vpop.f32.mrf.mxu1  ;;  %v4470_v36 = vpop.f32.mrf.mxu0  ;;  %v8774_v16 = vld [vmem:[%s12137_s1 + $0x458] sm:$0xff]  ;;  %4934 = vmatpush.bf16.msrb.mxu3 %v8790_v18 }
 0x307   :  { %v4400_v45 = vpop.f32.mrf.mxu3  ;;  %v4252_v2 = vadd.f32 %v4251_v63, %v10256_v9  ;;  %v4332_v13 = vpop.f32.mrf.mxu2  ;;  %v8455_v9 = vld [vmem:[%s12139_s0 + $0x3c0] sm:$0xf0]  ;;  %4788 = vmatpush.bf16.msrb.mxu1 %v8774_v16  ;;  %v7041_v3 = vld [vmem:[%s12139_s0 + $0x5b8] sm:$0xf] }
 0x308   :  { %v6742_v62 = vor.u32 %v8455_v9, %v6741_v61 }
 0x309   :  { %v4325_v15 = vadd.f32 %v4324_v6, %v4252_v2  ;;  %v8467_v6 = vld [vmem:[%s12139_s0 + $0x424] sm:$0xf] }
 0x30a   :  { %v6838_v55 = vor.u32 %v8467_v6, %v6835_v24  ;;  %v7033_v6 = vld [vmem:[%s12139_s0 + $0x5b0] sm:$0xf]  ;;  %v8529_v24 = vld [vmem:[%s12139_s0 + $0x610] sm:$0xf0] }
 0x30b   :  { %v4398_v27 = vadd.f32 %v4397_v42, %v4325_v15 }
 0x30d   :  { %v10725_v11 = vadd.f32 %v4470_v36, %v4398_v27  ;;  %v6830_v36 = vor.u32 %v8466_v29, %v6827_v60 }
 0x30e   :  { %v4254_v34 = vpop.f32.mrf.mxu1  ;;  %v4473_v4 = vpop.f32.mrf.mxu0 }
 0x30f   :  { %v4402_v8 = vpop.f32.mrf.mxu3  ;;  %v4255_v39 = vadd.f32 %v4254_v34, %v10265_v0  ;;  %v4334_v42 = vpop.f32.mrf.mxu2  ;;  %v7034_v34 = vor.u32 %v8529_v24, %v7033_v6  ;;  %v8789_v6 = vld [vmem:[%s12137_s1 + $0x4d0] sm:$0xff] }
 0x310   :  { %4935 = vmatpush.bf16.msrb.mxu3 %v8789_v6 }
 0x311   :  { %v4328_v26 = vadd.f32 %v4327_v20, %v4255_v39  ;;  %4520 = vmatmul.bf16.gmra.mxu1 %v6730_v54  ;;  %4739 = vmatmul.bf16.gmra.mxu0 %v6742_v62 }
 0x313   :  { %v4401_v28 = vadd.f32 %v4400_v45, %v4328_v26  ;;  %v6841_v45 = vld [vmem:[%s12139_s0 + $0x428] sm:$0xf] }
 0x314   :  { %4671 = vmatmul.bf16.gmra.mxu3 %v6838_v55  ;;  %4603 = vmatmul.bf16.gmra.mxu2 %v6934_v44  ;;  %v6842_v2 = vor.u32 %v8480_v37, %v6841_v45 }
 0x315   :  { %v10734_v23 = vadd.f32 %v4473_v4, %v4401_v28  ;;  %v8491_v28 = vld [vmem:[%s12139_s0 + $0x4e4] sm:$0xf] }
 0x316   :  { %v4256_v31 = vpop.f32.mrf.mxu1  ;;  %v4475_v25 = vpop.f32.mrf.mxu0 }
 0x317   :  { %v4405_v59 = vpop.f32.mrf.mxu3  ;;  %v4257_v56 = vadd.f32 %v4256_v31, %v10289_v48  ;;  %v4337_v0 = vpop.f32.mrf.mxu2  ;;  %v8505_v31 = vld [vmem:[%s12139_s0 + $0x550] sm:$0xf0] }
 0x318   :  { %v6942_v29 = vor.u32 %v8505_v31, %v6941_v58  ;;  %v8797_v58 = vld [vmem:[%s12137_s1 + $0x510] sm:$0xff] }
 0x319   :  { %v4330_v20 = vadd.f32 %v4329_v33, %v4257_v56  ;;  %v8492_v33 = vld [vmem:[%s12139_s0 + $0x4ec] sm:$0xf]  ;;  %5008 = vmatpush.bf16.msrb.mxu0 %v8797_v58 }
 0x31a   :  { %v6938_v27 = vor.u32 %v8492_v33, %v6935_v19  ;;  %v7133_v33 = vld [vmem:[%s12139_s0 + $0x678] sm:$0xf]  ;;  %v8554_v19 = vld [vmem:[%s12139_s0 + $0x6d8] sm:$0xf0] }
 0x31b   :  { %v4403_v48 = vadd.f32 %v4402_v8, %v4330_v20  ;;  %v7134_v18 = vor.u32 %v8554_v19, %v7133_v33 }
 0x31d   :  { %v10758_v63 = vadd.f32 %v4475_v25, %v4403_v48  ;;  %v7035_v25 = vld [vmem:[%s12139_s0 + $0x614] sm:$0xf0] }
 0x31e   :  { %v4259_v61 = vpop.f32.mrf.mxu1  ;;  %v4478_v9 = vpop.f32.mrf.mxu0 }
 0x31f   :  { %v4407_v15 = vpop.f32.mrf.mxu3  ;;  %v4260_v54 = vadd.f32 %v4259_v61, %v10304_v17  ;;  %v4339_v62 = vpop.f32.mrf.mxu2 }
 0x321   :  { %v4333_v8 = vadd.f32 %v4332_v13, %v4260_v54  ;;  %4525 = vmatmul.bf16.gmra.mxu1 %v6830_v36  ;;  %4744 = vmatmul.bf16.gmra.mxu0 %v6842_v2 }
 0x323   :  { %v4406_v4 = vadd.f32 %v4405_v59, %v4333_v8  ;;  %v6927_v59 = vld [vmem:[%s12139_s0 + $0x544] sm:$0xf0] }
 0x324   :  { %4676 = vmatmul.bf16.gmra.mxu3 %v6938_v27  ;;  %4608 = vmatmul.bf16.gmra.mxu2 %v7034_v34  ;;  %v6930_v20 = vor.u32 %v8491_v28, %v6927_v59  ;;  %v8781_v27 = vld [vmem:[%s12137_s1 + $0x490] sm:$0xff] }
 0x325   :  { %v10773_v55 = vadd.f32 %v4478_v9, %v4406_v4  ;;  %4862 = vmatpush.bf16.msrb.mxu2 %v8781_v27  ;;  %v8516_v4 = vld [vmem:[%s12139_s0 + $0x5ac] sm:$0xf]  ;;  %v7235_v27 = vld [vmem:[%s12139_s0 + $0x7a4] sm:$0xf0] }
 0x326   :  { %v4261_v39 = vpop.f32.mrf.mxu1  ;;  %v4480_v26 = vpop.f32.mrf.mxu0 }
 0x327   :  { %v4410_v10 = vpop.f32.mrf.mxu3  ;;  %v4262_v17 = vadd.f32 %v4261_v39, %v10328_v1  ;;  %v4342_v44 = vpop.f32.mrf.mxu2 }
 0x329   :  { %v4335_v13 = vadd.f32 %v4334_v42, %v4262_v17  ;;  %v8517_v42 = vld [vmem:[%s12139_s0 + $0x5b4] sm:$0xf] }
 0x32a   :  { %v7038_v48 = vor.u32 %v8517_v42, %v7035_v25  ;;  %v7233_v25 = vld [vmem:[%s12139_s0 + $0x740] sm:$0xf] }
 0x32b   :  { %v4408_v1 = vadd.f32 %v4407_v15, %v4335_v13 }
 0x32d   :  { %v10797_v56 = vadd.f32 %v4480_v26, %v4408_v1  ;;  %v7135_v26 = vld [vmem:[%s12139_s0 + $0x6dc] sm:$0xf0] }
 0x32e   :  { %v4264_v45 = vpop.f32.mrf.mxu1  ;;  %v4483_v37 = vpop.f32.mrf.mxu0 }
 0x32f   :  { %v4412_v60 = vpop.f32.mrf.mxu3  ;;  %v4265_v36 = vadd.f32 %v4264_v45, %v10337_v5  ;;  %v4344_v2 = vpop.f32.mrf.mxu2  ;;  %v8773_v5 = vld [vmem:[%s12137_s1 + $0x450] sm:$0xff] }
 0x330   :  { %4789 = vmatpush.bf16.msrb.mxu1 %v8773_v5 }
 0x331   :  { %v4338_v15 = vadd.f32 %v4337_v0, %v4265_v36  ;;  %4530 = vmatmul.bf16.gmra.mxu1 %v6930_v20  ;;  %4749 = vmatmul.bf16.gmra.mxu0 %v6942_v29  ;;  %v8579_v20 = vld [vmem:[%s12139_s0 + $0x7a0] sm:$0xf0] }
 0x333   :  { %v4411_v16 = vadd.f32 %v4410_v10, %v4338_v15  ;;  %v7027_v10 = vld [vmem:[%s12139_s0 + $0x60c] sm:$0xf0] }
 0x334   :  { %4681 = vmatmul.bf16.gmra.mxu3 %v7038_v48  ;;  %4613 = vmatmul.bf16.gmra.mxu2 %v7134_v18  ;;  %v7030_v13 = vor.u32 %v8516_v4, %v7027_v10  ;;  %v8541_v18 = vld [vmem:[%s12139_s0 + $0x674] sm:$0xf] }
 0x335   :  { %v10806_v61 = vadd.f32 %v4483_v37, %v4411_v16  ;;  %v7234_v37 = vor.u32 %v8579_v20, %v7233_v25  ;;  %v8555_v16 = vld [vmem:[%s12139_s0 + $0x6e0] sm:$0xf0] }
 0x336   :  { %v4266_v0 = vpop.f32.mrf.mxu1  ;;  %v4485_v24 = vpop.f32.mrf.mxu0 }
 0x337   :  { %v4415_v9 = vpop.f32.mrf.mxu3  ;;  %v4267_v54 = vadd.f32 %v4266_v0, %v10367_v14  ;;  %v4574_v8 = vpop.f32.mrf.mxu2  ;;  %v8530_v14 = vld [vmem:[%s12139_s0 + $0x618] sm:$0xf0] }
 0x338   :  { %v7042_v28 = vor.u32 %v8530_v14, %v7041_v3  ;;  %v7333_v14 = vld [vmem:[%s12139_s0 + $0x808] sm:$0xf] }
 0x339   :  { %v4340_v34 = vadd.f32 %v4339_v62, %v4267_v54  ;;  %v8542_v62 = vld [vmem:[%s12139_s0 + $0x67c] sm:$0xf]  ;;  %v8788_v54 = vld [vmem:[%s12137_s1 + $0x4c8] sm:$0xff] }
 0x33a   :  { %v7138_v42 = vor.u32 %v8542_v62, %v7135_v26  ;;  %4936 = vmatpush.bf16.msrb.mxu3 %v8788_v54 }
 0x33b   :  { %v4413_v39 = vadd.f32 %v4412_v60, %v4340_v34  ;;  %v8772_v34 = vld [vmem:[%s12137_s1 + $0x448] sm:$0xff] }
 0x33c   :  { %4790 = vmatpush.bf16.msrb.mxu1 %v8772_v34 }
 0x33d   :  { %v10836_v17 = vadd.f32 %v4485_v24, %v4413_v39  ;;  %v8780_v24 = vld [vmem:[%s12137_s1 + $0x488] sm:$0xff] }
 0x33e   :  { %v4269_v31 = vpop.f32.mrf.mxu1  ;;  %v4488_v1 = vpop.f32.mrf.mxu0  ;;  %v8604_v39 = vld [vmem:[%s12139_s0 + $0x868] sm:$0xf0]  ;;  %4863 = vmatpush.bf16.msrb.mxu2 %v8780_v24 }
 0x33f   :  { %v4417_v59 = vpop.f32.mrf.mxu3  ;;  %v4270_v29 = vadd.f32 %v4269_v31, %v10379_v57  ;;  %v4576_v60 = vpop.f32.mrf.mxu2  ;;  %v7127_v57 = vld [vmem:[%s12139_s0 + $0x6d4] sm:$0xf0] }
 0x340   :  { %v7130_v6 = vor.u32 %v8541_v18, %v7127_v57 }
 0x341   :  { %v4343_v45 = vadd.f32 %v4342_v44, %v4270_v29  ;;  %4535 = vmatmul.bf16.gmra.mxu1 %v7030_v13  ;;  %4754 = vmatmul.bf16.gmra.mxu0 %v7042_v28  ;;  %v7141_v44 = vld [vmem:[%s12139_s0 + $0x680] sm:$0xf]  ;;  %v7334_v28 = vor.u32 %v8604_v39, %v7333_v14  ;;  %v8566_v29 = vld [vmem:[%s12139_s0 + $0x73c] sm:$0xf] }
 0x342   :  { %v7142_v5 = vor.u32 %v8555_v16, %v7141_v44  ;;  %v8787_v14 = vld [vmem:[%s12137_s1 + $0x4c0] sm:$0xff] }
 0x343   :  { %v4416_v48 = vadd.f32 %v4415_v9, %v4343_v45  ;;  %v8567_v9 = vld [vmem:[%s12139_s0 + $0x744] sm:$0xf]  ;;  %v7227_v45 = vld [vmem:[%s12139_s0 + $0x79c] sm:$0xf0]  ;;  %4937 = vmatpush.bf16.msrb.mxu3 %v8787_v14  ;;  %v8630_v14 = vld [vmem:[%s12139_s0 + $0x938] sm:$0xf0] }
 0x344   :  { %4686 = vmatmul.bf16.gmra.mxu3 %v7138_v42  ;;  %4618 = vmatmul.bf16.gmra.mxu2 %v7234_v37  ;;  %v7238_v3 = vor.u32 %v8567_v9, %v7235_v27  ;;  %v7241_v37 = vld [vmem:[%s12139_s0 + $0x748] sm:$0xf]  ;;  %v7433_v27 = vld [vmem:[%s12139_s0 + $0x8d0] sm:$0xf] }
 0x345   :  { %v10848_v33 = vadd.f32 %v4488_v1, %v4416_v48  ;;  %v8796_v1 = vld [vmem:[%s12137_s1 + $0x508] sm:$0xff] }
 0x346   :  { %v4271_v36 = vpop.f32.mrf.mxu1  ;;  %v4490_v2 = vpop.f32.mrf.mxu0  ;;  %5009 = vmatpush.bf16.msrb.mxu0 %v8796_v1  ;;  %v8580_v48 = vld [vmem:[%s12139_s0 + $0x7a8] sm:$0xf0] }
 0x347   :  { %v4647_v19 = vpop.f32.mrf.mxu3  ;;  %v4579_v15 = vpop.f32.mrf.mxu2  ;;  %v7230_v2 = vor.u32 %v8566_v29, %v7227_v45  ;;  %v7242_v18 = vor.u32 %v8580_v48, %v7241_v37  ;;  %v8771_v48 = vld [vmem:[%s12137_s1 + $0x440] sm:$0xff] }
 0x348   :  { %4791 = vmatpush.bf16.msrb.mxu1 %v8771_v48 }
 0x34e   :  { %v4501_v4 = vpop.f32.mrf.mxu1  ;;  %v4720_v10 = vpop.f32.mrf.mxu0 }
 0x34f   :  { %v4649_v0 = vpop.f32.mrf.mxu3  ;;  %v4502_v62 = vadd.f32 %v4501_v4, %v10415_v35  ;;  %v4581_v26 = vpop.f32.mrf.mxu2 }
 0x351   :  { %v4575_v13 = vadd.f32 %v4574_v8, %v4502_v62  ;;  %4540 = vmatmul.bf16.gmra.mxu1 %v7130_v6  ;;  %4759 = vmatmul.bf16.gmra.mxu0 %v7142_v5  ;;  %v8629_v6 = vld [vmem:[%s12139_s0 + $0x930] sm:$0xf0] }
 0x352   :  { %v7434_v54 = vor.u32 %v8629_v6, %v7433_v27 }
 0x353   :  { %v4648_v59 = vadd.f32 %v4647_v19, %v4575_v13  ;;  %v7335_v19 = vld [vmem:[%s12139_s0 + $0x86c] sm:$0xf0] }
 0x354   :  { %4691 = vmatmul.bf16.gmra.mxu3 %v7238_v3  ;;  %4623 = vmatmul.bf16.gmra.mxu2 %v7334_v28  ;;  %v8779_v3 = vld [vmem:[%s12137_s1 + $0x480] sm:$0xff] }
 0x355   :  { %v10884_v58 = vadd.f32 %v4720_v10, %v4648_v59  ;;  %4864 = vmatpush.bf16.msrb.mxu2 %v8779_v3  ;;  %v8591_v28 = vld [vmem:[%s12139_s0 + $0x804] sm:$0xf]  ;;  %v7327_v59 = vld [vmem:[%s12139_s0 + $0x864] sm:$0xf0] }
 0x356   :  { %v4503_v42 = vpop.f32.mrf.mxu1  ;;  %v4722_v35 = vpop.f32.mrf.mxu0 }
 0x357   :  { %v4652_v31 = vpop.f32.mrf.mxu3  ;;  %v4504_v25 = vadd.f32 %v4503_v42, %v10439_v38  ;;  %v4584_v20 = vpop.f32.mrf.mxu2  ;;  %v8617_v42 = vld [vmem:[%s12139_s0 + $0x8d4] sm:$0xf] }
 0x359   :  { %v4577_v8 = vadd.f32 %v4576_v60, %v4504_v25  ;;  %v8592_v60 = vld [vmem:[%s12139_s0 + $0x80c] sm:$0xf] }
 0x35a   :  { %v7338_v9 = vor.u32 %v8592_v60, %v7335_v19 }
 0x35b   :  { %v4650_v38 = vadd.f32 %v4649_v0, %v4577_v8  ;;  %v7330_v8 = vor.u32 %v8591_v28, %v7327_v59  ;;  %v8818_v28 = vld [vmem:[%s12137_s1 + $0x5b8] sm:$0xff] }
 0x35c   :  { %5149 = vmatpush.bf16.msra.mxu2 %v8818_v28 }
 0x35d   :  { %v10908_v36 = vadd.f32 %v4722_v35, %v4650_v38  ;;  %v7435_v35 = vld [vmem:[%s12139_s0 + $0x934] sm:$0xf0]  ;;  %v8795_v38 = vld [vmem:[%s12137_s1 + $0x500] sm:$0xff] }
 0x35e   :  { %v4506_v44 = vpop.f32.mrf.mxu1  ;;  %v4725_v16 = vpop.f32.mrf.mxu0  ;;  %5010 = vmatpush.bf16.msrb.mxu0 %v8795_v38  ;;  %v8826_v38 = vld [vmem:[%s12137_s1 + $0x5f8] sm:$0xff] }
 0x35f   :  { %v4654_v57 = vpop.f32.mrf.mxu3  ;;  %v4507_v5 = vadd.f32 %v4506_v44, %v10448_v47  ;;  %v4586_v0 = vpop.f32.mrf.mxu2  ;;  %5222 = vmatpush.bf16.msra.mxu3 %v8826_v38 }
 0x361   :  { %v4580_v24 = vadd.f32 %v4579_v15, %v4507_v5  ;;  %4545 = vmatmul.bf16.gmra.mxu1 %v7230_v2  ;;  %4764 = vmatmul.bf16.gmra.mxu0 %v7242_v18  ;;  %v7438_v2 = vor.u32 %v8617_v42, %v7435_v35 }
 0x363   :  { %v4653_v34 = vadd.f32 %v4652_v31, %v4580_v24  ;;  %v7341_v31 = vld [vmem:[%s12139_s0 + $0x810] sm:$0xf] }
 0x364   :  { %4696 = vmatmul.bf16.gmra.mxu3 %v7338_v9  ;;  %4628 = vmatmul.bf16.gmra.mxu2 %v7434_v54 }
 0x365   :  { %v10917_v4 = vadd.f32 %v4725_v16, %v4653_v34 }
 0x366   :  { %v4508_v47 = vpop.f32.mrf.mxu1  ;;  %v4727_v39 = vpop.f32.mrf.mxu0 }
 0x367   :  { %v4657_v10 = vpop.f32.mrf.mxu3  ;;  %v4509_v15 = vadd.f32 %v4508_v47, %v10478_v12  ;;  %v4589_v62 = vpop.f32.mrf.mxu2  ;;  %v8605_v12 = vld [vmem:[%s12139_s0 + $0x870] sm:$0xf0] }
 0x368   :  { %v7342_v29 = vor.u32 %v8605_v12, %v7341_v31 }
 0x369   :  { %v4582_v13 = vadd.f32 %v4581_v26, %v4509_v15  ;;  %v333_v26 = vld [vmem:[%s12139_s0 + $0x998] sm:$0xff] }
 0x36a   :  { %v1682_v37 = vunpack.c.l.b16 %v333_v26  ;;  %v1683_v47 = vunpack.c.h.b16 %v333_v26  ;;  %v8356_v26 = vld [vmem:[%s12139_s0 + $0xa8] sm:$0xf0] }
 0x36b   :  { %v4655_v1 = vadd.f32 %v4654_v57, %v4582_v13 }
 0x36c   :  { %v2007_v16 = vpack.c.b16 %v1682_v37, %v1682_v37  ;;  %v2008_v12 = vpack.c.b16 %v1683_v47, %v1683_v47  ;;  %v8381_v47 = vld [vmem:[%s12139_s0 + $0x170] sm:$0xf0] }
 0x36d   :  { %v10947_v25 = vadd.f32 %v4727_v39, %v4655_v1  ;;  %v6349_v1 = vld [vmem:[%s12139_s0 + $0x48] sm:$0xf] }
 0x36e   :  { %v4511_v60 = vpop.f32.mrf.mxu1  ;;  %v4730_v19 = vpop.f32.mrf.mxu0 }
 0x36f   :  { %v4659_v45 = vpop.f32.mrf.mxu3  ;;  %v4512_v18 = vadd.f32 %v4511_v60, %v10487_v52  ;;  %v4591_v57 = vpop.f32.mrf.mxu2  ;;  %v8616_v52 = vld [vmem:[%s12139_s0 + $0x8cc] sm:$0xf] }
 0x371   :  { %v4585_v44 = vadd.f32 %v4584_v20, %v4512_v18  ;;  %4550 = vmatmul.bf16.gmra.mxu1 %v7330_v8  ;;  %4769 = vmatmul.bf16.gmra.mxu0 %v7342_v29  ;;  %v7427_v20 = vld [vmem:[%s12139_s0 + $0x92c] sm:$0xf0]  ;;  %v6350_v29 = vor.u32 %v8356_v26, %v6349_v1 }
 0x373   :  { %v4658_v9 = vadd.f32 %v4657_v10, %v4585_v44  ;;  %v7441_v10 = vld [vmem:[%s12139_s0 + $0x8d8] sm:$0xf] }
 0x374   :  { %4701 = vmatmul.bf16.gmra.mxu3 %v7438_v2  ;;  %4633 = vmatmul.bf16.gmra.mxu2 %v2007_v16  ;;  %v7442_v15 = vor.u32 %v8630_v14, %v7441_v10  ;;  %v1681_v16 = vunpack.c.h.b16 %v10525_v43  ;;  %v8834_v43 = vld [vmem:[%s12137_s1 + $0x638] sm:$0xff]  ;;  %v6449_v14 = vld [vmem:[%s12139_s0 + $0x110] sm:$0xf] }
 0x375   :  { %v10956_v27 = vadd.f32 %v4730_v19, %v4658_v9  ;;  %5295 = vmatpush.bf16.msra.mxu0 %v8834_v43 }
 0x376   :  { %v4513_v5 = vpop.f32.mrf.mxu1  ;;  %v4732_v24 = vpop.f32.mrf.mxu0 }
 0x377   :  { %v4662_v6 = vpop.f32.mrf.mxu3  ;;  %v4514_v54 = vadd.f32 %v4513_v5, %v10502_v51  ;;  %v4594_v34 = vpop.f32.mrf.mxu2  ;;  %v8344_v5 = vld [vmem:[%s12139_s0 + $0x4c] sm:$0xf] }
 0x379   :  { %v4587_v3 = vadd.f32 %v4586_v0, %v4514_v54  ;;  %v7430_v0 = vor.u32 %v8616_v52, %v7427_v20 }
 0x37b   :  { %v4660_v51 = vadd.f32 %v4659_v45, %v4587_v3 }
 0x37d   :  { %v10971_v39 = vadd.f32 %v4732_v24, %v4660_v51  ;;  %v6351_v24 = vld [vmem:[%s12139_s0 + $0xac] sm:$0xf0] }
 0x37e   :  { %v4516_v59 = vpop.f32.mrf.mxu1  ;;  %v4735_v31 = vpop.f32.mrf.mxu0  ;;  %v6354_v10 = vor.u32 %v8344_v5, %v6351_v24  ;;  %v6549_v24 = vld [vmem:[%s12139_s0 + $0x1d8] sm:$0xf] }
 0x37f   :  { %v4664_v13 = vpop.f32.mrf.mxu3  ;;  %v4517_v42 = vadd.f32 %v4516_v59, %v10514_v32  ;;  %v4596_v35 = vpop.f32.mrf.mxu2  ;;  %v8810_v32 = vld [vmem:[%s12137_s1 + $0x578] sm:$0xff] }
 0x380   :  { %5076 = vmatpush.bf16.msra.mxu1 %v8810_v32 }
 0x381   :  { %v4590_v8 = vadd.f32 %v4589_v62, %v4517_v42  ;;  %4555 = vmatmul.bf16.gmra.mxu1 %v7430_v0  ;;  %4774 = vmatmul.bf16.gmra.mxu0 %v7442_v15  ;;  %v10994_v62 = vld [vmem:[%s12139_s0 + $0x9a0] sm:$0xff] }
 0x382   :  { %v1684_v9 = vunpack.c.l.b16 %v10994_v62 }
 0x383   :  { %v4663_v45 = vadd.f32 %v4662_v6, %v4590_v8 }
 0x384   :  { %4706 = vmatmul.bf16.gmra.mxu3 %v2008_v12  ;;  %4865 = vmatmul.bf16.vlgmr.msrb.gmra.mxu2 %v6350_v29  ;;  %v2009_v3 = vpack.c.b16 %v1684_v9, %v1684_v9  ;;  %v6357_v29 = vld [vmem:[%s12139_s0 + $0x50] sm:$0xf] }
 0x385   :  { %v10983_v37 = vadd.f32 %v4735_v31, %v4663_v45  ;;  %v8357_v45 = vld [vmem:[%s12139_s0 + $0xb0] sm:$0xf0] }
 0x386   :  { %v4518_v60 = vpop.f32.mrf.mxu1  ;;  %v4737_v19 = vpop.f32.mrf.mxu0 }
 0x387   :  { %v4667_v48 = vpop.f32.mrf.mxu3  ;;  %v4519_v2 = vadd.f32 %v4518_v60, %v10536_v53  ;;  %v4599_v18 = vpop.f32.mrf.mxu2  ;;  %v2006_v53 = vpack.c.b16 %v1681_v16, %v1681_v16  ;;  %v6358_v60 = vor.u32 %v8357_v45, %v6357_v29  ;;  %v8809_v16 = vld [vmem:[%s12137_s1 + $0x570] sm:$0xff] }
 0x388   :  { %5077 = vmatpush.bf16.msra.mxu1 %v8809_v16 }
 0x389   :  { %v4592_v44 = vadd.f32 %v4591_v57, %v4519_v2  ;;  %v8817_v2 = vld [vmem:[%s12137_s1 + $0x5b0] sm:$0xff] }
 0x38a   :  { %5150 = vmatpush.bf16.msra.mxu2 %v8817_v2 }
 0x38b   :  { %v4665_v6 = vadd.f32 %v4664_v13, %v4592_v44  ;;  %v6450_v13 = vor.u32 %v8381_v47, %v6449_v14  ;;  %v8825_v44 = vld [vmem:[%s12137_s1 + $0x5f0] sm:$0xff] }
 0x38c   :  { %5223 = vmatpush.bf16.msra.mxu3 %v8825_v44  ;;  %v8833_v47 = vld [vmem:[%s12137_s1 + $0x630] sm:$0xff] }
 0x38d   :  { %v11005_v54 = vadd.f32 %v4737_v19, %v4665_v6  ;;  %5296 = vmatpush.bf16.msra.mxu0 %v8833_v47  ;;  %v6557_v47 = vld [vmem:[%s12139_s0 + $0x1e0] sm:$0xf] }
 0x38e   :  { %v4521_v57 = vpop.f32.mrf.mxu1  ;;  %v4740_v20 = vpop.f32.mrf.mxu0 }
 0x38f   :  { %v4669_v52 = vpop.f32.mrf.mxu3  ;;  %v4522_v51 = vadd.f32 %v4521_v57, %v10548_v7  ;;  %v4601_v0 = vpop.f32.mrf.mxu2  ;;  %v8343_v7 = vld [vmem:[%s12139_s0 + $0x44] sm:$0xf] }
 0x391   :  { %v4595_v15 = vadd.f32 %v4594_v34, %v4522_v51  ;;  %4560 = vmatmul.bf16.gmra.mxu1 %v2006_v53  ;;  %4779 = vmatmul.bf16.gmra.mxu0 %v2009_v3  ;;  %v6343_v34 = vld [vmem:[%s12139_s0 + $0xa4] sm:$0xf0]  ;;  %v8406_v53 = vld [vmem:[%s12139_s0 + $0x238] sm:$0xf0] }
 0x392   :  { %v6346_v32 = vor.u32 %v8343_v7, %v6343_v34  ;;  %v6550_v57 = vor.u32 %v8406_v53, %v6549_v24  ;;  %v8824_v24 = vld [vmem:[%s12137_s1 + $0x5e8] sm:$0xff] }
 0x393   :  { %v4668_v28 = vadd.f32 %v4667_v48, %v4595_v15  ;;  %5224 = vmatpush.bf16.msra.mxu3 %v8824_v24  ;;  %v8432_v24 = vld [vmem:[%s12139_s0 + $0x308] sm:$0xf0] }
 0x394   :  { %4938 = vmatmul.bf16.vlgmr.msrb.gmra.mxu3 %v6354_v10  ;;  %4870 = vmatmul.bf16.gmra.mxu2 %v6450_v13 }
 0x395   :  { %v11017_v59 = vadd.f32 %v4740_v20, %v4668_v28  ;;  %v8368_v28 = vld [vmem:[%s12139_s0 + $0x10c] sm:$0xf] }
 0x396   :  { %v4523_v12 = vpop.f32.mrf.mxu1  ;;  %v4742_v1 = vpop.f32.mrf.mxu0 }
 0x397   :  { %v4672_v31 = vpop.f32.mrf.mxu3  ;;  %v4524_v26 = vadd.f32 %v4523_v12, %v10569_v21  ;;  %v4604_v42 = vpop.f32.mrf.mxu2  ;;  %v8369_v21 = vld [vmem:[%s12139_s0 + $0x114] sm:$0xf]  ;;  %v6457_v12 = vld [vmem:[%s12139_s0 + $0x118] sm:$0xf] }
 0x399   :  { %v4597_v8 = vadd.f32 %v4596_v35, %v4524_v26  ;;  %v6451_v35 = vld [vmem:[%s12139_s0 + $0x174] sm:$0xf0]  ;;  %v6551_v26 = vld [vmem:[%s12139_s0 + $0x23c] sm:$0xf0] }
 0x39a   :  { %v6454_v5 = vor.u32 %v8369_v21, %v6451_v35  ;;  %v6649_v35 = vld [vmem:[%s12139_s0 + $0x2a0] sm:$0xf] }
 0x39b   :  { %v4670_v48 = vadd.f32 %v4669_v52, %v4597_v8 }
 0x39d   :  { %v11038_v38 = vadd.f32 %v4742_v1, %v4670_v48  ;;  %v8382_v1 = vld [vmem:[%s12139_s0 + $0x178] sm:$0xf0] }
 0x39e   :  { %v4526_v9 = vpop.f32.mrf.mxu1  ;;  %v4745_v6 = vpop.f32.mrf.mxu0  ;;  %v6458_v34 = vor.u32 %v8382_v1, %v6457_v12  ;;  %v8832_v12 = vld [vmem:[%s12137_s1 + $0x628] sm:$0xff] }
 0x39f   :  { %v4674_v19 = vpop.f32.mrf.mxu3  ;;  %v4527_v3 = vadd.f32 %v4526_v9, %v10587_v49  ;;  %v4606_v52 = vpop.f32.mrf.mxu2  ;;  %5297 = vmatpush.bf16.msra.mxu0 %v8832_v12 }
 0x3a1   :  { %v4600_v43 = vadd.f32 %v4599_v18, %v4527_v3  ;;  %4792 = vmatmul.bf16.vlgmr.msrb.gmra.mxu1 %v6346_v32  ;;  %5011 = vmatmul.bf16.vlgmr.msrb.gmra.mxu0 %v6358_v60  ;;  %v8431_v32 = vld [vmem:[%s12139_s0 + $0x300] sm:$0xf0] }
 0x3a2   :  { %v6650_v44 = vor.u32 %v8431_v32, %v6649_v35 }
 0x3a3   :  { %v4673_v20 = vadd.f32 %v4672_v31, %v4600_v43  ;;  %v6443_v31 = vld [vmem:[%s12139_s0 + $0x16c] sm:$0xf0] }
 0x3a4   :  { %4943 = vmatmul.bf16.gmra.mxu3 %v6454_v5  ;;  %4875 = vmatmul.bf16.gmra.mxu2 %v6550_v57  ;;  %v6446_v7 = vor.u32 %v8368_v28, %v6443_v31  ;;  %v8816_v5 = vld [vmem:[%s12137_s1 + $0x5a8] sm:$0xff] }
 0x3a5   :  { %v11056_v10 = vadd.f32 %v4745_v6, %v4673_v20  ;;  %5151 = vmatpush.bf16.msra.mxu2 %v8816_v5  ;;  %v8393_v20 = vld [vmem:[%s12139_s0 + $0x1d4] sm:$0xf] }
 0x3a6   :  { %v4528_v51 = vpop.f32.mrf.mxu1  ;;  %v4747_v49 = vpop.f32.mrf.mxu0 }
 0x3a7   :  { %v4677_v14 = vpop.f32.mrf.mxu3  ;;  %v4529_v15 = vadd.f32 %v4528_v51, %v10611_v40  ;;  %v4609_v13 = vpop.f32.mrf.mxu2 }
 0x3a9   :  { %v4602_v18 = vadd.f32 %v4601_v0, %v4529_v15  ;;  %v8394_v0 = vld [vmem:[%s12139_s0 + $0x1dc] sm:$0xf] }
 0x3aa   :  { %v6554_v21 = vor.u32 %v8394_v0, %v6551_v26  ;;  %v6749_v26 = vld [vmem:[%s12139_s0 + $0x368] sm:$0xf] }
 0x3ab   :  { %v4675_v40 = vadd.f32 %v4674_v19, %v4602_v18 }
 0x3ad   :  { %v11080_v8 = vadd.f32 %v4747_v49, %v4675_v40  ;;  %v6651_v49 = vld [vmem:[%s12139_s0 + $0x304] sm:$0xf0] }
 0x3ae   :  { %v4531_v45 = vpop.f32.mrf.mxu1  ;;  %v4750_v48 = vpop.f32.mrf.mxu0 }
 0x3af   :  { %v4679_v29 = vpop.f32.mrf.mxu3  ;;  %v4532_v60 = vadd.f32 %v4531_v45, %v10620_v46  ;;  %v4611_v19 = vpop.f32.mrf.mxu2  ;;  %v8808_v46 = vld [vmem:[%s12137_s1 + $0x568] sm:$0xff] }
 0x3b0   :  { %5078 = vmatpush.bf16.msra.mxu1 %v8808_v46 }
 0x3b1   :  { %v4605_v2 = vadd.f32 %v4604_v42, %v4532_v60  ;;  %4797 = vmatmul.bf16.gmra.mxu1 %v6446_v7  ;;  %5016 = vmatmul.bf16.gmra.mxu0 %v6458_v34  ;;  %v8456_v7 = vld [vmem:[%s12139_s0 + $0x3c8] sm:$0xf0] }
 0x3b3   :  { %v4678_v16 = vadd.f32 %v4677_v14, %v4605_v2  ;;  %v6543_v14 = vld [vmem:[%s12139_s0 + $0x234] sm:$0xf0] }
 0x3b4   :  { %4948 = vmatmul.bf16.gmra.mxu3 %v6554_v21  ;;  %4880 = vmatmul.bf16.gmra.mxu2 %v6650_v44  ;;  %v6546_v18 = vor.u32 %v8393_v20, %v6543_v14  ;;  %v8815_v20 = vld [vmem:[%s12137_s1 + $0x5a0] sm:$0xff] }
 0x3b5   :  { %v11089_v9 = vadd.f32 %v4750_v48, %v4678_v16  ;;  %v6750_v48 = vor.u32 %v8456_v7, %v6749_v26  ;;  %v8823_v14 = vld [vmem:[%s12137_s1 + $0x5e0] sm:$0xff]  ;;  %5152 = vmatpush.bf16.msra.mxu2 %v8815_v20 }
 0x3b6   :  { %v4533_v42 = vpop.f32.mrf.mxu1  ;;  %v4752_v53 = vpop.f32.mrf.mxu0  ;;  %5225 = vmatpush.bf16.msra.mxu3 %v8823_v14  ;;  %v8807_v26 = vld [vmem:[%s12137_s1 + $0x560] sm:$0xff] }
 0x3b7   :  { %v4682_v6 = vpop.f32.mrf.mxu3  ;;  %v4534_v3 = vadd.f32 %v4533_v42, %v10650_v30  ;;  %v4614_v43 = vpop.f32.mrf.mxu2  ;;  %v8407_v30 = vld [vmem:[%s12139_s0 + $0x240] sm:$0xf0]  ;;  %5079 = vmatpush.bf16.msra.mxu1 %v8807_v26  ;;  %v8482_v26 = vld [vmem:[%s12139_s0 + $0x498] sm:$0xf0] }
 0x3b8   :  { %v6558_v28 = vor.u32 %v8407_v30, %v6557_v47 }
 0x3b9   :  { %v4607_v57 = vadd.f32 %v4606_v52, %v4534_v3  ;;  %v8419_v52 = vld [vmem:[%s12139_s0 + $0x2a4] sm:$0xf] }
 0x3ba   :  { %v6654_v0 = vor.u32 %v8419_v52, %v6651_v49  ;;  %v6849_v52 = vld [vmem:[%s12139_s0 + $0x430] sm:$0xf]  ;;  %v8481_v49 = vld [vmem:[%s12139_s0 + $0x490] sm:$0xf0] }
 0x3bb   :  { %v4680_v51 = vadd.f32 %v4679_v29, %v4607_v57  ;;  %v6850_v12 = vor.u32 %v8481_v49, %v6849_v52  ;;  %v8814_v52 = vld [vmem:[%s12137_s1 + $0x598] sm:$0xff] }
 0x3bc   :  { %5153 = vmatpush.bf16.msra.mxu2 %v8814_v52  ;;  %v6957_v52 = vld [vmem:[%s12139_s0 + $0x500] sm:$0xf] }
 0x3bd   :  { %v11119_v15 = vadd.f32 %v4752_v53, %v4680_v51 }
 0x3be   :  { %v4536_v1 = vpop.f32.mrf.mxu1  ;;  %v4755_v40 = vpop.f32.mrf.mxu0 }
 0x3bf   :  { %v4684_v31 = vpop.f32.mrf.mxu3  ;;  %v4537_v34 = vadd.f32 %v4536_v1, %v10662_v22  ;;  %v4616_v29 = vpop.f32.mrf.mxu2  ;;  %v8418_v22 = vld [vmem:[%s12139_s0 + $0x29c] sm:$0xf] }
 0x3c1   :  { %v4610_v45 = vadd.f32 %v4609_v13, %v4537_v34  ;;  %4802 = vmatmul.bf16.gmra.mxu1 %v6546_v18  ;;  %5021 = vmatmul.bf16.gmra.mxu0 %v6558_v28  ;;  %v6643_v13 = vld [vmem:[%s12139_s0 + $0x2fc] sm:$0xf0] }
 0x3c2   :  { %v6646_v53 = vor.u32 %v8418_v22, %v6643_v13 }
 0x3c3   :  { %v4683_v21 = vadd.f32 %v4682_v6, %v4610_v45  ;;  %v6657_v6 = vld [vmem:[%s12139_s0 + $0x2a8] sm:$0xf] }
 0x3c4   :  { %4953 = vmatmul.bf16.gmra.mxu3 %v6654_v0  ;;  %4885 = vmatmul.bf16.gmra.mxu2 %v6750_v48  ;;  %v6658_v3 = vor.u32 %v8432_v24, %v6657_v6 }
 0x3c5   :  { %v11131_v35 = vadd.f32 %v4755_v40, %v4683_v21  ;;  %v8443_v21 = vld [vmem:[%s12139_s0 + $0x364] sm:$0xf] }
 0x3c6   :  { %v4538_v60 = vpop.f32.mrf.mxu1  ;;  %v4757_v2 = vpop.f32.mrf.mxu0 }
 0x3c7   :  { %v4687_v32 = vpop.f32.mrf.mxu3  ;;  %v4539_v44 = vadd.f32 %v4538_v60, %v10683_v41  ;;  %v4619_v16 = vpop.f32.mrf.mxu2  ;;  %v8444_v41 = vld [vmem:[%s12139_s0 + $0x36c] sm:$0xf]  ;;  %v6757_v60 = vld [vmem:[%s12139_s0 + $0x370] sm:$0xf] }
 0x3c9   :  { %v4612_v5 = vadd.f32 %v4611_v19, %v4539_v44  ;;  %v6751_v19 = vld [vmem:[%s12139_s0 + $0x3cc] sm:$0xf0]  ;;  %v6851_v44 = vld [vmem:[%s12139_s0 + $0x494] sm:$0xf0] }
 0x3ca   :  { %v6754_v51 = vor.u32 %v8444_v41, %v6751_v19  ;;  %v6949_v19 = vld [vmem:[%s12139_s0 + $0x4f8] sm:$0xf] }
 0x3cb   :  { %v4685_v46 = vadd.f32 %v4684_v31, %v4612_v5 }
 0x3cd   :  { %v11152_v42 = vadd.f32 %v4757_v2, %v4685_v46 }
 0x3ce   :  { %v4541_v47 = vpop.f32.mrf.mxu1  ;;  %v4760_v30 = vpop.f32.mrf.mxu0 }
 0x3cf   :  { %v4689_v57 = vpop.f32.mrf.mxu3  ;;  %v4542_v18 = vadd.f32 %v4541_v47, %v10698_v50  ;;  %v4621_v28 = vpop.f32.mrf.mxu2  ;;  %v8831_v50 = vld [vmem:[%s12137_s1 + $0x620] sm:$0xff] }
 0x3d0   :  { %5298 = vmatpush.bf16.msra.mxu0 %v8831_v50  ;;  %v6951_v50 = vld [vmem:[%s12139_s0 + $0x55c] sm:$0xf0] }
 0x3d1   :  { %v4615_v31 = vadd.f32 %v4614_v43, %v4542_v18  ;;  %4807 = vmatmul.bf16.gmra.mxu1 %v6646_v53  ;;  %5026 = vmatmul.bf16.gmra.mxu0 %v6658_v3  ;;  %v8506_v53 = vld [vmem:[%s12139_s0 + $0x558] sm:$0xf0] }
 0x3d2   :  { %v6950_v14 = vor.u32 %v8506_v53, %v6949_v19  ;;  %v8830_v53 = vld [vmem:[%s12137_s1 + $0x618] sm:$0xff] }
 0x3d3   :  { %v4688_v1 = vadd.f32 %v4687_v32, %v4615_v31  ;;  %v6743_v32 = vld [vmem:[%s12139_s0 + $0x3c4] sm:$0xf0] }
 0x3d4   :  { %4958 = vmatmul.bf16.gmra.mxu3 %v6754_v51  ;;  %4890 = vmatmul.bf16.gmra.mxu2 %v6850_v12  ;;  %v6746_v22 = vor.u32 %v8443_v21, %v6743_v32  ;;  %v8468_v12 = vld [vmem:[%s12139_s0 + $0x42c] sm:$0xf]  ;;  %v8822_v21 = vld [vmem:[%s12137_s1 + $0x5d8] sm:$0xff] }
 0x3d5   :  { %v11167_v40 = vadd.f32 %v4760_v30, %v4688_v1  ;;  %v6843_v1 = vld [vmem:[%s12139_s0 + $0x48c] sm:$0xf0]  ;;  %v8806_v32 = vld [vmem:[%s12137_s1 + $0x558] sm:$0xff]  ;;  %5226 = vmatpush.bf16.msra.mxu3 %v8822_v21  ;;  %5299 = vmatpush.bf16.msra.mxu0 %v8830_v53  ;;  %v7057_v53 = vld [vmem:[%s12139_s0 + $0x5c8] sm:$0xf] }
 0x3d6   :  { %v4543_v7 = vpop.f32.mrf.mxu1  ;;  %v4762_v34 = vpop.f32.mrf.mxu0  ;;  %5080 = vmatpush.bf16.msra.mxu1 %v8806_v32 }
 0x3d7   :  { %v4692_v0 = vpop.f32.mrf.mxu3  ;;  %v4544_v43 = vadd.f32 %v4543_v7, %v10725_v11  ;;  %v4624_v45 = vpop.f32.mrf.mxu2  ;;  %v8457_v11 = vld [vmem:[%s12139_s0 + $0x3d0] sm:$0xf0] }
 0x3d8   :  { %v6758_v13 = vor.u32 %v8457_v11, %v6757_v60 }
 0x3d9   :  { %v4617_v48 = vadd.f32 %v4616_v29, %v4544_v43  ;;  %v8469_v29 = vld [vmem:[%s12139_s0 + $0x434] sm:$0xf] }
 0x3da   :  { %v6854_v41 = vor.u32 %v8469_v29, %v6851_v44  ;;  %v7049_v29 = vld [vmem:[%s12139_s0 + $0x5c0] sm:$0xf]  ;;  %v8531_v44 = vld [vmem:[%s12139_s0 + $0x620] sm:$0xf0] }
 0x3db   :  { %v4690_v2 = vadd.f32 %v4689_v57, %v4617_v48 }
 0x3dd   :  { %v11194_v5 = vadd.f32 %v4762_v34, %v4690_v2  ;;  %v6846_v34 = vor.u32 %v8468_v12, %v6843_v1 }
 0x3de   :  { %v4546_v24 = vpop.f32.mrf.mxu1  ;;  %v4765_v46 = vpop.f32.mrf.mxu0 }
 0x3df   :  { %v4694_v6 = vpop.f32.mrf.mxu3  ;;  %v4547_v3 = vadd.f32 %v4546_v24, %v10734_v23  ;;  %v4626_v57 = vpop.f32.mrf.mxu2  ;;  %v7050_v24 = vor.u32 %v8531_v44, %v7049_v29  ;;  %v8821_v29 = vld [vmem:[%s12137_s1 + $0x5d0] sm:$0xff] }
 0x3e0   :  { %5227 = vmatpush.bf16.msra.mxu3 %v8821_v29 }
 0x3e1   :  { %v4620_v20 = vadd.f32 %v4619_v16, %v4547_v3  ;;  %4812 = vmatmul.bf16.gmra.mxu1 %v6746_v22  ;;  %5031 = vmatmul.bf16.gmra.mxu0 %v6758_v13 }
 0x3e3   :  { %v4693_v47 = vadd.f32 %v4692_v0, %v4620_v20  ;;  %v6857_v0 = vld [vmem:[%s12139_s0 + $0x438] sm:$0xf] }
 0x3e4   :  { %4963 = vmatmul.bf16.gmra.mxu3 %v6854_v41  ;;  %4895 = vmatmul.bf16.gmra.mxu2 %v6950_v14  ;;  %v6858_v43 = vor.u32 %v8482_v26, %v6857_v0 }
 0x3e5   :  { %v11203_v30 = vadd.f32 %v4765_v46, %v4693_v47  ;;  %v8493_v47 = vld [vmem:[%s12139_s0 + $0x4f4] sm:$0xf] }
 0x3e6   :  { %v4548_v49 = vpop.f32.mrf.mxu1  ;;  %v4767_v18 = vpop.f32.mrf.mxu0 }
 0x3e7   :  { %v4697_v51 = vpop.f32.mrf.mxu3  ;;  %v4549_v31 = vadd.f32 %v4548_v49, %v10758_v63  ;;  %v4629_v23 = vpop.f32.mrf.mxu2  ;;  %v8507_v49 = vld [vmem:[%s12139_s0 + $0x560] sm:$0xf0] }
 0x3e8   :  { %v6958_v12 = vor.u32 %v8507_v49, %v6957_v52  ;;  %v8829_v52 = vld [vmem:[%s12137_s1 + $0x610] sm:$0xff] }
 0x3e9   :  { %v4622_v16 = vadd.f32 %v4621_v28, %v4549_v31  ;;  %v8494_v28 = vld [vmem:[%s12139_s0 + $0x4fc] sm:$0xf]  ;;  %5300 = vmatpush.bf16.msra.mxu0 %v8829_v52 }
 0x3ea   :  { %v6954_v2 = vor.u32 %v8494_v28, %v6951_v50  ;;  %v7149_v28 = vld [vmem:[%s12139_s0 + $0x688] sm:$0xf]  ;;  %v8556_v50 = vld [vmem:[%s12139_s0 + $0x6e8] sm:$0xf0] }
 0x3eb   :  { %v4695_v63 = vadd.f32 %v4694_v6, %v4622_v16  ;;  %v7150_v21 = vor.u32 %v8556_v50, %v7149_v28 }
 0x3ed   :  { %v11227_v7 = vadd.f32 %v4767_v18, %v4695_v63  ;;  %v7051_v18 = vld [vmem:[%s12139_s0 + $0x624] sm:$0xf0] }
 0x3ee   :  { %v4551_v60 = vpop.f32.mrf.mxu1  ;;  %v4770_v11 = vpop.f32.mrf.mxu0 }
 0x3ef   :  { %v4699_v48 = vpop.f32.mrf.mxu3  ;;  %v4552_v22 = vadd.f32 %v4551_v60, %v10773_v55  ;;  %v4631_v13 = vpop.f32.mrf.mxu2 }
 0x3f1   :  { %v4625_v6 = vadd.f32 %v4624_v45, %v4552_v22  ;;  %4817 = vmatmul.bf16.gmra.mxu1 %v6846_v34  ;;  %5036 = vmatmul.bf16.gmra.mxu0 %v6858_v43 }
 0x3f3   :  { %v4698_v46 = vadd.f32 %v4697_v51, %v4625_v6  ;;  %v6943_v51 = vld [vmem:[%s12139_s0 + $0x554] sm:$0xf0] }
 0x3f4   :  { %4968 = vmatmul.bf16.gmra.mxu3 %v6954_v2  ;;  %4900 = vmatmul.bf16.gmra.mxu2 %v7050_v24  ;;  %v6946_v16 = vor.u32 %v8493_v47, %v6943_v51  ;;  %v8813_v2 = vld [vmem:[%s12137_s1 + $0x590] sm:$0xff] }
 0x3f5   :  { %v11242_v41 = vadd.f32 %v4770_v11, %v4698_v46  ;;  %5154 = vmatpush.bf16.msra.mxu2 %v8813_v2  ;;  %v8518_v46 = vld [vmem:[%s12139_s0 + $0x5bc] sm:$0xf]  ;;  %v7251_v2 = vld [vmem:[%s12139_s0 + $0x7b4] sm:$0xf0] }
 0x3f6   :  { %v4553_v3 = vpop.f32.mrf.mxu1  ;;  %v4772_v20 = vpop.f32.mrf.mxu0 }
 0x3f7   :  { %v4702_v19 = vpop.f32.mrf.mxu3  ;;  %v4554_v55 = vadd.f32 %v4553_v3, %v10797_v56  ;;  %v4634_v14 = vpop.f32.mrf.mxu2 }
 0x3f9   :  { %v4627_v45 = vadd.f32 %v4626_v57, %v4554_v55  ;;  %v8519_v57 = vld [vmem:[%s12139_s0 + $0x5c4] sm:$0xf] }
 0x3fa   :  { %v7054_v63 = vor.u32 %v8519_v57, %v7051_v18  ;;  %v7249_v18 = vld [vmem:[%s12139_s0 + $0x750] sm:$0xf] }
 0x3fb   :  { %v4700_v56 = vadd.f32 %v4699_v48, %v4627_v45 }
 0x3fd   :  { %v11266_v31 = vadd.f32 %v4772_v20, %v4700_v56  ;;  %v7151_v20 = vld [vmem:[%s12139_s0 + $0x6ec] sm:$0xf0] }
 0x3fe   :  { %v4556_v0 = vpop.f32.mrf.mxu1  ;;  %v4775_v26 = vpop.f32.mrf.mxu0 }
 0x3ff   :  { %v4704_v1 = vpop.f32.mrf.mxu3  ;;  %v4557_v34 = vadd.f32 %v4556_v0, %v10806_v61  ;;  %v4636_v43 = vpop.f32.mrf.mxu2  ;;  %v8805_v61 = vld [vmem:[%s12137_s1 + $0x550] sm:$0xff] }
 0x400   :  { %5081 = vmatpush.bf16.msra.mxu1 %v8805_v61 }
 0x401   :  { %v4630_v48 = vadd.f32 %v4629_v23, %v4557_v34  ;;  %4822 = vmatmul.bf16.gmra.mxu1 %v6946_v16  ;;  %5041 = vmatmul.bf16.gmra.mxu0 %v6958_v12  ;;  %v8581_v16 = vld [vmem:[%s12139_s0 + $0x7b0] sm:$0xf0] }
 0x403   :  { %v4703_v32 = vadd.f32 %v4702_v19, %v4630_v48  ;;  %v7043_v19 = vld [vmem:[%s12139_s0 + $0x61c] sm:$0xf0] }
 0x404   :  { %4973 = vmatmul.bf16.gmra.mxu3 %v7054_v63  ;;  %4905 = vmatmul.bf16.gmra.mxu2 %v7150_v21  ;;  %v7046_v45 = vor.u32 %v8518_v46, %v7043_v19  ;;  %v8543_v21 = vld [vmem:[%s12139_s0 + $0x684] sm:$0xf] }
 0x405   :  { %v11275_v60 = vadd.f32 %v4775_v26, %v4703_v32  ;;  %v7250_v26 = vor.u32 %v8581_v16, %v7249_v18  ;;  %v8557_v32 = vld [vmem:[%s12139_s0 + $0x6f0] sm:$0xf0] }
 0x406   :  { %v4558_v23 = vpop.f32.mrf.mxu1  ;;  %v4777_v44 = vpop.f32.mrf.mxu0 }
 0x407   :  { %v4707_v11 = vpop.f32.mrf.mxu3  ;;  %v4559_v22 = vadd.f32 %v4558_v23, %v10836_v17  ;;  %v4866_v6 = vpop.f32.mrf.mxu2  ;;  %v8532_v17 = vld [vmem:[%s12139_s0 + $0x628] sm:$0xf0] }
 0x408   :  { %v7058_v47 = vor.u32 %v8532_v17, %v7057_v53  ;;  %v7349_v17 = vld [vmem:[%s12139_s0 + $0x818] sm:$0xf] }
 0x409   :  { %v4632_v24 = vadd.f32 %v4631_v13, %v4559_v22  ;;  %v8544_v13 = vld [vmem:[%s12139_s0 + $0x68c] sm:$0xf] }
 0x40a   :  { %v7154_v57 = vor.u32 %v8544_v13, %v7151_v20  ;;  %v8820_v22 = vld [vmem:[%s12137_s1 + $0x5c8] sm:$0xff] }
 0x40b   :  { %v4705_v3 = vadd.f32 %v4704_v1, %v4632_v24  ;;  %v8804_v24 = vld [vmem:[%s12137_s1 + $0x548] sm:$0xff]  ;;  %5228 = vmatpush.bf16.msra.mxu3 %v8820_v22 }
 0x40c   :  { %5082 = vmatpush.bf16.msra.mxu1 %v8804_v24 }
 0x40d   :  { %v11305_v55 = vadd.f32 %v4777_v44, %v4705_v3  ;;  %v8812_v44 = vld [vmem:[%s12137_s1 + $0x588] sm:$0xff]  ;;  %v8606_v3 = vld [vmem:[%s12139_s0 + $0x878] sm:$0xf0] }
 0x40e   :  { %v4561_v49 = vpop.f32.mrf.mxu1  ;;  %v4780_v56 = vpop.f32.mrf.mxu0  ;;  %5155 = vmatpush.bf16.msra.mxu2 %v8812_v44 }
 0x40f   :  { %v4709_v51 = vpop.f32.mrf.mxu3  ;;  %v4562_v12 = vadd.f32 %v4561_v49, %v10848_v33  ;;  %v4868_v1 = vpop.f32.mrf.mxu2  ;;  %v7143_v33 = vld [vmem:[%s12139_s0 + $0x6e4] sm:$0xf0] }
 0x410   :  { %v7146_v29 = vor.u32 %v8543_v21, %v7143_v33 }
 0x411   :  { %v4635_v0 = vadd.f32 %v4634_v14, %v4562_v12  ;;  %4827 = vmatmul.bf16.gmra.mxu1 %v7046_v45  ;;  %5046 = vmatmul.bf16.gmra.mxu0 %v7058_v47  ;;  %v7157_v14 = vld [vmem:[%s12139_s0 + $0x690] sm:$0xf]  ;;  %v7350_v47 = vor.u32 %v8606_v3, %v7349_v17  ;;  %v8568_v12 = vld [vmem:[%s12139_s0 + $0x74c] sm:$0xf]  ;;  %v8819_v17 = vld [vmem:[%s12137_s1 + $0x5c0] sm:$0xff] }
 0x412   :  { %v7158_v61 = vor.u32 %v8557_v32, %v7157_v14  ;;  %5229 = vmatpush.bf16.msra.mxu3 %v8819_v17  ;;  %v8632_v17 = vld [vmem:[%s12139_s0 + $0x948] sm:$0xf0] }
 0x413   :  { %v4708_v63 = vadd.f32 %v4707_v11, %v4635_v0  ;;  %v8569_v11 = vld [vmem:[%s12139_s0 + $0x754] sm:$0xf]  ;;  %v7243_v0 = vld [vmem:[%s12139_s0 + $0x7ac] sm:$0xf0] }
 0x414   :  { %4978 = vmatmul.bf16.gmra.mxu3 %v7154_v57  ;;  %4910 = vmatmul.bf16.gmra.mxu2 %v7250_v26  ;;  %v7254_v53 = vor.u32 %v8569_v11, %v7251_v2  ;;  %v7257_v26 = vld [vmem:[%s12139_s0 + $0x758] sm:$0xf]  ;;  %v7449_v2 = vld [vmem:[%s12139_s0 + $0x8e0] sm:$0xf] }
 0x415   :  { %v11317_v28 = vadd.f32 %v4780_v56, %v4708_v63  ;;  %v8828_v56 = vld [vmem:[%s12137_s1 + $0x608] sm:$0xff]  ;;  %v8582_v63 = vld [vmem:[%s12139_s0 + $0x7b8] sm:$0xf0] }
 0x416   :  { %v4563_v34 = vpop.f32.mrf.mxu1  ;;  %v4782_v43 = vpop.f32.mrf.mxu0  ;;  %5301 = vmatpush.bf16.msra.mxu0 %v8828_v56  ;;  %v7258_v21 = vor.u32 %v8582_v63, %v7257_v26  ;;  %v8803_v63 = vld [vmem:[%s12137_s1 + $0x540] sm:$0xff] }
 0x417   :  { %v4939_v50 = vpop.f32.mrf.mxu3  ;;  %v4871_v48 = vpop.f32.mrf.mxu2  ;;  %v7246_v43 = vor.u32 %v8568_v12, %v7243_v0  ;;  %5083 = vmatpush.bf16.msra.mxu1 %v8803_v63 }
 0x41e   :  { %v4793_v46 = vpop.f32.mrf.mxu1  ;;  %v5012_v19 = vpop.f32.mrf.mxu0 }
 0x41f   :  { %v4941_v23 = vpop.f32.mrf.mxu3  ;;  %v4794_v13 = vadd.f32 %v4793_v46, %v10884_v58  ;;  %v4873_v20 = vpop.f32.mrf.mxu2 }
 0x421   :  { %v4867_v45 = vadd.f32 %v4866_v6, %v4794_v13  ;;  %4832 = vmatmul.bf16.gmra.mxu1 %v7146_v29  ;;  %5051 = vmatmul.bf16.gmra.mxu0 %v7158_v61  ;;  %v8631_v29 = vld [vmem:[%s12139_s0 + $0x940] sm:$0xf0] }
 0x422   :  { %v7450_v22 = vor.u32 %v8631_v29, %v7449_v2 }
 0x423   :  { %v4940_v51 = vadd.f32 %v4939_v50, %v4867_v45  ;;  %v7351_v50 = vld [vmem:[%s12139_s0 + $0x87c] sm:$0xf0] }
 0x424   :  { %4983 = vmatmul.bf16.gmra.mxu3 %v7254_v53  ;;  %4915 = vmatmul.bf16.gmra.mxu2 %v7350_v47  ;;  %v8811_v53 = vld [vmem:[%s12137_s1 + $0x580] sm:$0xff]  ;;  %v8593_v47 = vld [vmem:[%s12139_s0 + $0x814] sm:$0xf] }
 0x425   :  { %v11353_v52 = vadd.f32 %v5012_v19, %v4940_v51  ;;  %5156 = vmatpush.bf16.msra.mxu2 %v8811_v53  ;;  %v7343_v51 = vld [vmem:[%s12139_s0 + $0x874] sm:$0xf0] }
 0x426   :  { %v4795_v57 = vpop.f32.mrf.mxu1  ;;  %v5014_v58 = vpop.f32.mrf.mxu0 }
 0x427   :  { %v4944_v49 = vpop.f32.mrf.mxu3  ;;  %v4796_v18 = vadd.f32 %v4795_v57, %v10908_v36  ;;  %v4876_v16 = vpop.f32.mrf.mxu2  ;;  %v8619_v57 = vld [vmem:[%s12139_s0 + $0x8e4] sm:$0xf] }
 0x429   :  { %v4869_v6 = vadd.f32 %v4868_v1, %v4796_v18  ;;  %v8594_v1 = vld [vmem:[%s12139_s0 + $0x81c] sm:$0xf] }
 0x42a   :  { %v7354_v11 = vor.u32 %v8594_v1, %v7351_v50 }
 0x42b   :  { %v4942_v36 = vadd.f32 %v4941_v23, %v4869_v6  ;;  %v7346_v6 = vor.u32 %v8593_v47, %v7343_v51 }
 0x42d   :  { %v11377_v34 = vadd.f32 %v5014_v58, %v4942_v36  ;;  %v7451_v58 = vld [vmem:[%s12139_s0 + $0x944] sm:$0xf0]  ;;  %v8827_v36 = vld [vmem:[%s12137_s1 + $0x600] sm:$0xff] }
 0x42e   :  { %v4798_v14 = vpop.f32.mrf.mxu1  ;;  %v5017_v32 = vpop.f32.mrf.mxu0  ;;  %5302 = vmatpush.bf16.msra.mxu0 %v8827_v36 }
 0x42f   :  { %v4946_v33 = vpop.f32.mrf.mxu3  ;;  %v4799_v61 = vadd.f32 %v4798_v14, %v10917_v4  ;;  %v4878_v23 = vpop.f32.mrf.mxu2 }
 0x431   :  { %v4872_v44 = vadd.f32 %v4871_v48, %v4799_v61  ;;  %4837 = vmatmul.bf16.gmra.mxu1 %v7246_v43  ;;  %5056 = vmatmul.bf16.gmra.mxu0 %v7258_v21  ;;  %v7454_v43 = vor.u32 %v8619_v57, %v7451_v58 }
 0x433   :  { %v4945_v24 = vadd.f32 %v4944_v49, %v4872_v44  ;;  %v7357_v49 = vld [vmem:[%s12139_s0 + $0x820] sm:$0xf] }
 0x434   :  { %4988 = vmatmul.bf16.gmra.mxu3 %v7354_v11  ;;  %4920 = vmatmul.bf16.gmra.mxu2 %v7450_v22 }
 0x435   :  { %v11386_v46 = vadd.f32 %v5017_v32, %v4945_v24 }
 0x436   :  { %v4800_v4 = vpop.f32.mrf.mxu1  ;;  %v5019_v3 = vpop.f32.mrf.mxu0 }
 0x437   :  { %v4949_v19 = vpop.f32.mrf.mxu3  ;;  %v4801_v48 = vadd.f32 %v4800_v4, %v10947_v25  ;;  %v4881_v13 = vpop.f32.mrf.mxu2  ;;  %v8607_v25 = vld [vmem:[%s12139_s0 + $0x880] sm:$0xf0] }
 0x438   :  { %v7358_v12 = vor.u32 %v8607_v25, %v7357_v49  ;;  %v6365_v25 = vld [vmem:[%s12139_s0 + $0x58] sm:$0xf] }
 0x439   :  { %v4874_v45 = vadd.f32 %v4873_v20, %v4801_v48  ;;  %v335_v20 = vld [vmem:[%s12139_s0 + $0x9a8] sm:$0xff] }
 0x43a   :  { %v1686_v26 = vunpack.c.l.b16 %v335_v20  ;;  %v1687_v4 = vunpack.c.h.b16 %v335_v20 }
 0x43b   :  { %v4947_v56 = vadd.f32 %v4946_v33, %v4874_v45 }
 0x43c   :  { %v2011_v32 = vpack.c.b16 %v1686_v26, %v1686_v26  ;;  %v2012_v49 = vpack.c.b16 %v1687_v4, %v1687_v4 }
 0x43d   :  { %v11416_v18 = vadd.f32 %v5019_v3, %v4947_v56  ;;  %v8358_v56 = vld [vmem:[%s12139_s0 + $0xb8] sm:$0xf0] }
 0x43e   :  { %v4803_v1 = vpop.f32.mrf.mxu1  ;;  %v5022_v50 = vpop.f32.mrf.mxu0 }
 0x43f   :  { %v4951_v0 = vpop.f32.mrf.mxu3  ;;  %v4804_v21 = vadd.f32 %v4803_v1, %v10956_v27  ;;  %v4883_v33 = vpop.f32.mrf.mxu2  ;;  %v8618_v27 = vld [vmem:[%s12139_s0 + $0x8dc] sm:$0xf]  ;;  %v11454_v1 = vld [vmem:[%s12139_s0 + $0x9b0] sm:$0xff] }
 0x441   :  { %v4877_v14 = vadd.f32 %v4876_v16, %v4804_v21  ;;  %4842 = vmatmul.bf16.gmra.mxu1 %v7346_v6  ;;  %5061 = vmatmul.bf16.gmra.mxu0 %v7358_v12  ;;  %v7443_v16 = vld [vmem:[%s12139_s0 + $0x93c] sm:$0xf0]  ;;  %v6366_v6 = vor.u32 %v8358_v56, %v6365_v25  ;;  %v1688_v21 = vunpack.c.l.b16 %v11454_v1 }
 0x442   :  { %v6373_v56 = vld [vmem:[%s12139_s0 + $0x60] sm:$0xf] }
 0x443   :  { %v4950_v11 = vadd.f32 %v4949_v19, %v4877_v14  ;;  %v7457_v19 = vld [vmem:[%s12139_s0 + $0x8e8] sm:$0xf] }
 0x444   :  { %4993 = vmatmul.bf16.gmra.mxu3 %v7454_v43  ;;  %4925 = vmatmul.bf16.gmra.mxu2 %v2011_v32  ;;  %v7458_v48 = vor.u32 %v8632_v17, %v7457_v19  ;;  %v1685_v43 = vunpack.c.h.b16 %v10994_v62  ;;  %v8346_v32 = vld [vmem:[%s12139_s0 + $0x5c] sm:$0xf]  ;;  %v6465_v62 = vld [vmem:[%s12139_s0 + $0x120] sm:$0xf] }
 0x445   :  { %v11425_v2 = vadd.f32 %v5022_v50, %v4950_v11  ;;  %v6367_v11 = vld [vmem:[%s12139_s0 + $0xbc] sm:$0xf0] }
 0x446   :  { %v4805_v61 = vpop.f32.mrf.mxu1  ;;  %v5024_v44 = vpop.f32.mrf.mxu0 }
 0x447   :  { %v4954_v29 = vpop.f32.mrf.mxu3  ;;  %v4806_v22 = vadd.f32 %v4805_v61, %v10971_v39  ;;  %v4886_v24 = vpop.f32.mrf.mxu2  ;;  %v2010_v61 = vpack.c.b16 %v1685_v43, %v1685_v43  ;;  %v6565_v43 = vld [vmem:[%s12139_s0 + $0x1e8] sm:$0xf] }
 0x449   :  { %v4879_v53 = vadd.f32 %v4878_v23, %v4806_v22  ;;  %v7446_v23 = vor.u32 %v8618_v27, %v7443_v16  ;;  %v8383_v27 = vld [vmem:[%s12139_s0 + $0x180] sm:$0xf0] }
 0x44a   :  { %v6466_v4 = vor.u32 %v8383_v27, %v6465_v62 }
 0x44b   :  { %v4952_v39 = vadd.f32 %v4951_v0, %v4879_v53  ;;  %v6370_v53 = vor.u32 %v8346_v32, %v6367_v11 }
 0x44d   :  { %v11440_v3 = vadd.f32 %v5024_v44, %v4952_v39  ;;  %v2013_v44 = vpack.c.b16 %v1688_v21, %v1688_v21  ;;  %v8408_v21 = vld [vmem:[%s12139_s0 + $0x248] sm:$0xf0] }
 0x44e   :  { %v4808_v47 = vpop.f32.mrf.mxu1  ;;  %v5027_v51 = vpop.f32.mrf.mxu0 }
 0x44f   :  { %v4956_v45 = vpop.f32.mrf.mxu3  ;;  %v4809_v57 = vadd.f32 %v4808_v47, %v10983_v37  ;;  %v4888_v20 = vpop.f32.mrf.mxu2 }
 0x451   :  { %v4882_v58 = vadd.f32 %v4881_v13, %v4809_v57  ;;  %4847 = vmatmul.bf16.gmra.mxu1 %v7446_v23  ;;  %5066 = vmatmul.bf16.gmra.mxu0 %v7458_v48  ;;  %v8359_v57 = vld [vmem:[%s12139_s0 + $0xc0] sm:$0xf0] }
 0x453   :  { %v4955_v12 = vadd.f32 %v4954_v29, %v4882_v58 }
 0x454   :  { %4998 = vmatmul.bf16.gmra.mxu3 %v2012_v49  ;;  %5157 = vmatmul.bf16.vlgmr.msra.gmra.mxu2 %v6366_v6 }
 0x455   :  { %v11449_v0 = vadd.f32 %v5027_v51, %v4955_v12 }
 0x456   :  { %v4810_v63 = vpop.f32.mrf.mxu1  ;;  %v5029_v36 = vpop.f32.mrf.mxu0 }
 0x457   :  { %v4959_v26 = vpop.f32.mrf.mxu3  ;;  %v4811_v37 = vadd.f32 %v4810_v63, %v11005_v54  ;;  %v4891_v50 = vpop.f32.mrf.mxu2 }
 0x459   :  { %v4884_v13 = vadd.f32 %v4883_v33, %v4811_v37 }
 0x45b   :  { %v4957_v14 = vadd.f32 %v4956_v45, %v4884_v13 }
 0x45d   :  { %v11465_v29 = vadd.f32 %v5029_v36, %v4957_v14 }
 0x45e   :  { %v4813_v22 = vpop.f32.mrf.mxu1  ;;  %v5032_v33 = vpop.f32.mrf.mxu0 }
 0x45f   :  { %v4961_v54 = vpop.f32.mrf.mxu3  ;;  %v4814_v16 = vadd.f32 %v4813_v22, %v11017_v59  ;;  %v4893_v19 = vpop.f32.mrf.mxu2  ;;  %v8345_v59 = vld [vmem:[%s12139_s0 + $0x54] sm:$0xf] }
 0x461   :  { %v4887_v17 = vadd.f32 %v4886_v24, %v4814_v16  ;;  %4852 = vmatmul.bf16.gmra.mxu1 %v2010_v61  ;;  %5071 = vmatmul.bf16.gmra.mxu0 %v2013_v44  ;;  %v6359_v24 = vld [vmem:[%s12139_s0 + $0xb4] sm:$0xf0]  ;;  %v6566_v61 = vor.u32 %v8408_v21, %v6565_v43 }
 0x462   :  { %v6362_v12 = vor.u32 %v8345_v59, %v6359_v24 }
 0x463   :  { %v4960_v39 = vadd.f32 %v4959_v26, %v4887_v17  ;;  %v6374_v26 = vor.u32 %v8359_v57, %v6373_v56  ;;  %v6473_v17 = vld [vmem:[%s12139_s0 + $0x128] sm:$0xf]  ;;  %v6665_v56 = vld [vmem:[%s12139_s0 + $0x2b0] sm:$0xf]  ;;  %v8433_v57 = vld [vmem:[%s12139_s0 + $0x310] sm:$0xf0] }
 0x464   :  { %5230 = vmatmul.bf16.vlgmr.msra.gmra.mxu3 %v6370_v53  ;;  %5162 = vmatmul.bf16.gmra.mxu2 %v6466_v4  ;;  %v8384_v4 = vld [vmem:[%s12139_s0 + $0x188] sm:$0xf0] }
 0x465   :  { %v11474_v23 = vadd.f32 %v5032_v33, %v4960_v39 }
 0x466   :  { %v4815_v45 = vpop.f32.mrf.mxu1  ;;  %v5034_v47 = vpop.f32.mrf.mxu0 }
 0x467   :  { %v4964_v48 = vpop.f32.mrf.mxu3  ;;  %v4816_v51 = vadd.f32 %v4815_v45, %v11038_v38  ;;  %v4896_v49 = vpop.f32.mrf.mxu2  ;;  %v8371_v38 = vld [vmem:[%s12139_s0 + $0x124] sm:$0xf] }
 0x469   :  { %v4889_v25 = vadd.f32 %v4888_v20, %v4816_v51  ;;  %v6467_v20 = vld [vmem:[%s12139_s0 + $0x184] sm:$0xf0] }
 0x46a   :  { %v6470_v13 = vor.u32 %v8371_v38, %v6467_v20 }
 0x46b   :  { %v4962_v58 = vadd.f32 %v4961_v54, %v4889_v25 }
 0x46d   :  { %v11495_v6 = vadd.f32 %v5034_v47, %v4962_v58  ;;  %v6474_v47 = vor.u32 %v8384_v4, %v6473_v17  ;;  %v6765_v17 = vld [vmem:[%s12139_s0 + $0x378] sm:$0xf]  ;;  %v8458_v4 = vld [vmem:[%s12139_s0 + $0x3d8] sm:$0xf0] }
 0x46e   :  { %v4818_v36 = vpop.f32.mrf.mxu1  ;;  %v5037_v37 = vpop.f32.mrf.mxu0 }
 0x46f   :  { %v4966_v63 = vpop.f32.mrf.mxu3  ;;  %v4819_v14 = vadd.f32 %v4818_v36, %v11056_v10  ;;  %v4898_v32 = vpop.f32.mrf.mxu2  ;;  %v8370_v10 = vld [vmem:[%s12139_s0 + $0x11c] sm:$0xf] }
 0x471   :  { %v4892_v11 = vadd.f32 %v4891_v50, %v4819_v14  ;;  %5084 = vmatmul.bf16.vlgmr.msra.gmra.mxu1 %v6362_v12  ;;  %5303 = vmatmul.bf16.vlgmr.msra.gmra.mxu0 %v6374_v26  ;;  %v6459_v50 = vld [vmem:[%s12139_s0 + $0x17c] sm:$0xf0]  ;;  %v6666_v12 = vor.u32 %v8433_v57, %v6665_v56 }
 0x472   :  { %v6462_v45 = vor.u32 %v8370_v10, %v6459_v50 }
 0x473   :  { %v4965_v44 = vadd.f32 %v4964_v48, %v4892_v11  ;;  %v6573_v11 = vld [vmem:[%s12139_s0 + $0x1f0] sm:$0xf] }
 0x474   :  { %5235 = vmatmul.bf16.gmra.mxu3 %v6470_v13  ;;  %5167 = vmatmul.bf16.gmra.mxu2 %v6566_v61  ;;  %v8409_v61 = vld [vmem:[%s12139_s0 + $0x250] sm:$0xf0] }
 0x475   :  { %v11504_v54 = vadd.f32 %v5037_v37, %v4965_v44 }
 0x476   :  { %v4820_v33 = vpop.f32.mrf.mxu1  ;;  %v5039_v53 = vpop.f32.mrf.mxu0 }
 0x477   :  { %v4969_v22 = vpop.f32.mrf.mxu3  ;;  %v4821_v62 = vadd.f32 %v4820_v33, %v11080_v8  ;;  %v4901_v27 = vpop.f32.mrf.mxu2  ;;  %v8396_v8 = vld [vmem:[%s12139_s0 + $0x1ec] sm:$0xf] }
 0x479   :  { %v4894_v16 = vadd.f32 %v4893_v19, %v4821_v62  ;;  %v6567_v19 = vld [vmem:[%s12139_s0 + $0x24c] sm:$0xf0] }
 0x47a   :  { %v6570_v24 = vor.u32 %v8396_v8, %v6567_v19 }
 0x47b   :  { %v4967_v39 = vadd.f32 %v4966_v63, %v4894_v16 }
 0x47d   :  { %v11525_v48 = vadd.f32 %v5039_v53, %v4967_v39  ;;  %v6574_v53 = vor.u32 %v8409_v61, %v6573_v11  ;;  %v6865_v11 = vld [vmem:[%s12139_s0 + $0x440] sm:$0xf]  ;;  %v8483_v61 = vld [vmem:[%s12139_s0 + $0x4a0] sm:$0xf0] }
 0x47e   :  { %v4823_v25 = vpop.f32.mrf.mxu1  ;;  %v5042_v59 = vpop.f32.mrf.mxu0 }
 0x47f   :  { %v4971_v51 = vpop.f32.mrf.mxu3  ;;  %v4824_v58 = vadd.f32 %v4823_v25, %v11089_v9  ;;  %v4903_v38 = vpop.f32.mrf.mxu2  ;;  %v8395_v9 = vld [vmem:[%s12139_s0 + $0x1e4] sm:$0xf] }
 0x481   :  { %v4897_v20 = vadd.f32 %v4896_v49, %v4824_v58  ;;  %5089 = vmatmul.bf16.gmra.mxu1 %v6462_v45  ;;  %5308 = vmatmul.bf16.gmra.mxu0 %v6474_v47  ;;  %v6559_v49 = vld [vmem:[%s12139_s0 + $0x244] sm:$0xf0]  ;;  %v6766_v45 = vor.u32 %v8458_v4, %v6765_v17 }
 0x482   :  { %v6562_v33 = vor.u32 %v8395_v9, %v6559_v49 }
 0x483   :  { %v4970_v26 = vadd.f32 %v4969_v22, %v4897_v20  ;;  %v6673_v20 = vld [vmem:[%s12139_s0 + $0x2b8] sm:$0xf] }
 0x484   :  { %5240 = vmatmul.bf16.gmra.mxu3 %v6570_v24  ;;  %5172 = vmatmul.bf16.gmra.mxu2 %v6666_v12  ;;  %v8434_v12 = vld [vmem:[%s12139_s0 + $0x318] sm:$0xf0] }
 0x485   :  { %v11534_v63 = vadd.f32 %v5042_v59, %v4970_v26 }
 0x486   :  { %v4825_v37 = vpop.f32.mrf.mxu1  ;;  %v5044_v13 = vpop.f32.mrf.mxu0 }
 0x487   :  { %v4974_v36 = vpop.f32.mrf.mxu3  ;;  %v4826_v43 = vadd.f32 %v4825_v37, %v11119_v15  ;;  %v4906_v21 = vpop.f32.mrf.mxu2  ;;  %v8421_v15 = vld [vmem:[%s12139_s0 + $0x2b4] sm:$0xf] }
 0x489   :  { %v4899_v14 = vadd.f32 %v4898_v32, %v4826_v43  ;;  %v6667_v32 = vld [vmem:[%s12139_s0 + $0x314] sm:$0xf0] }
 0x48a   :  { %v6670_v50 = vor.u32 %v8421_v15, %v6667_v32 }
 0x48b   :  { %v4972_v44 = vadd.f32 %v4971_v51, %v4899_v14 }
 0x48d   :  { %v11555_v22 = vadd.f32 %v5044_v13, %v4972_v44  ;;  %v6674_v13 = vor.u32 %v8434_v12, %v6673_v20  ;;  %v6965_v20 = vld [vmem:[%s12139_s0 + $0x508] sm:$0xf]  ;;  %v8508_v12 = vld [vmem:[%s12139_s0 + $0x568] sm:$0xf0] }
 0x48e   :  { %v4828_v16 = vpop.f32.mrf.mxu1  ;;  %v5047_v10 = vpop.f32.mrf.mxu0 }
 0x48f   :  { %v4976_v62 = vpop.f32.mrf.mxu3  ;;  %v4829_v39 = vadd.f32 %v4828_v16, %v11131_v35  ;;  %v4908_v8 = vpop.f32.mrf.mxu2  ;;  %v8420_v35 = vld [vmem:[%s12139_s0 + $0x2ac] sm:$0xf] }
 0x491   :  { %v4902_v19 = vadd.f32 %v4901_v27, %v4829_v39  ;;  %5094 = vmatmul.bf16.gmra.mxu1 %v6562_v33  ;;  %5313 = vmatmul.bf16.gmra.mxu0 %v6574_v53  ;;  %v6659_v27 = vld [vmem:[%s12139_s0 + $0x30c] sm:$0xf0]  ;;  %v6866_v33 = vor.u32 %v8483_v61, %v6865_v11 }
 0x492   :  { %v6662_v37 = vor.u32 %v8420_v35, %v6659_v27 }
 0x493   :  { %v4975_v47 = vadd.f32 %v4974_v36, %v4902_v19  ;;  %v6773_v19 = vld [vmem:[%s12139_s0 + $0x380] sm:$0xf] }
 0x494   :  { %5245 = vmatmul.bf16.gmra.mxu3 %v6670_v50  ;;  %5177 = vmatmul.bf16.gmra.mxu2 %v6766_v45  ;;  %v8459_v45 = vld [vmem:[%s12139_s0 + $0x3e0] sm:$0xf0] }
 0x495   :  { %v11564_v51 = vadd.f32 %v5047_v10, %v4975_v47 }
 0x496   :  { %v4830_v59 = vpop.f32.mrf.mxu1  ;;  %v5049_v24 = vpop.f32.mrf.mxu0 }
 0x497   :  { %v4979_v25 = vpop.f32.mrf.mxu3  ;;  %v4831_v56 = vadd.f32 %v4830_v59, %v11152_v42  ;;  %v4911_v57 = vpop.f32.mrf.mxu2  ;;  %v8446_v42 = vld [vmem:[%s12139_s0 + $0x37c] sm:$0xf] }
 0x499   :  { %v4904_v58 = vadd.f32 %v4903_v38, %v4831_v56  ;;  %v6767_v38 = vld [vmem:[%s12139_s0 + $0x3dc] sm:$0xf0] }
 0x49a   :  { %v6770_v49 = vor.u32 %v8446_v42, %v6767_v38 }
 0x49b   :  { %v4977_v26 = vadd.f32 %v4976_v62, %v4904_v58 }
 0x49d   :  { %v11585_v36 = vadd.f32 %v5049_v24, %v4977_v26  ;;  %v6774_v24 = vor.u32 %v8459_v45, %v6773_v19  ;;  %v7065_v19 = vld [vmem:[%s12139_s0 + $0x5d0] sm:$0xf]  ;;  %v8533_v45 = vld [vmem:[%s12139_s0 + $0x630] sm:$0xf0] }
 0x49e   :  { %v4833_v14 = vpop.f32.mrf.mxu1  ;;  %v5052_v9 = vpop.f32.mrf.mxu0 }
 0x49f   :  { %v4981_v43 = vpop.f32.mrf.mxu3  ;;  %v4834_v44 = vadd.f32 %v4833_v14, %v11167_v40  ;;  %v4913_v15 = vpop.f32.mrf.mxu2  ;;  %v8445_v40 = vld [vmem:[%s12139_s0 + $0x374] sm:$0xf] }
 0x4a1   :  { %v4907_v32 = vadd.f32 %v4906_v21, %v4834_v44  ;;  %5099 = vmatmul.bf16.gmra.mxu1 %v6662_v37  ;;  %5318 = vmatmul.bf16.gmra.mxu0 %v6674_v13  ;;  %v6759_v21 = vld [vmem:[%s12139_s0 + $0x3d4] sm:$0xf0]  ;;  %v6966_v37 = vor.u32 %v8508_v12, %v6965_v20 }
 0x4a2   :  { %v6762_v59 = vor.u32 %v8445_v40, %v6759_v21 }
 0x4a3   :  { %v4980_v53 = vadd.f32 %v4979_v25, %v4907_v32  ;;  %v6873_v32 = vld [vmem:[%s12139_s0 + $0x448] sm:$0xf] }
 0x4a4   :  { %5250 = vmatmul.bf16.gmra.mxu3 %v6770_v49  ;;  %5182 = vmatmul.bf16.gmra.mxu2 %v6866_v33  ;;  %v8484_v33 = vld [vmem:[%s12139_s0 + $0x4a8] sm:$0xf0] }
 0x4a5   :  { %v11594_v62 = vadd.f32 %v5052_v9, %v4980_v53 }
 0x4a6   :  { %v4835_v10 = vpop.f32.mrf.mxu1  ;;  %v5054_v50 = vpop.f32.mrf.mxu0 }
 0x4a7   :  { %v4984_v16 = vpop.f32.mrf.mxu3  ;;  %v4836_v17 = vadd.f32 %v4835_v10, %v11194_v5  ;;  %v4916_v4 = vpop.f32.mrf.mxu2  ;;  %v8471_v5 = vld [vmem:[%s12139_s0 + $0x444] sm:$0xf] }
 0x4a9   :  { %v4909_v39 = vadd.f32 %v4908_v8, %v4836_v17  ;;  %v6867_v8 = vld [vmem:[%s12139_s0 + $0x4a4] sm:$0xf0] }
 0x4aa   :  { %v6870_v27 = vor.u32 %v8471_v5, %v6867_v8 }
 0x4ab   :  { %v4982_v47 = vadd.f32 %v4981_v43, %v4909_v39 }
 0x4ad   :  { %v11615_v25 = vadd.f32 %v5054_v50, %v4982_v47  ;;  %v6874_v50 = vor.u32 %v8484_v33, %v6873_v32  ;;  %v7165_v32 = vld [vmem:[%s12139_s0 + $0x698] sm:$0xf]  ;;  %v8558_v33 = vld [vmem:[%s12139_s0 + $0x6f8] sm:$0xf0] }
 0x4ae   :  { %v4838_v58 = vpop.f32.mrf.mxu1  ;;  %v5057_v35 = vpop.f32.mrf.mxu0 }
 0x4af   :  { %v4986_v56 = vpop.f32.mrf.mxu3  ;;  %v4839_v26 = vadd.f32 %v4838_v58, %v11203_v30  ;;  %v4918_v42 = vpop.f32.mrf.mxu2  ;;  %v8470_v30 = vld [vmem:[%s12139_s0 + $0x43c] sm:$0xf] }
 0x4b1   :  { %v4912_v38 = vadd.f32 %v4911_v57, %v4839_v26  ;;  %5104 = vmatmul.bf16.gmra.mxu1 %v6762_v59  ;;  %5323 = vmatmul.bf16.gmra.mxu0 %v6774_v24  ;;  %v6859_v57 = vld [vmem:[%s12139_s0 + $0x49c] sm:$0xf0]  ;;  %v7066_v59 = vor.u32 %v8533_v45, %v7065_v19 }
 0x4b2   :  { %v6862_v10 = vor.u32 %v8470_v30, %v6859_v57 }
 0x4b3   :  { %v4985_v13 = vadd.f32 %v4984_v16, %v4912_v38  ;;  %v6973_v38 = vld [vmem:[%s12139_s0 + $0x510] sm:$0xf] }
 0x4b4   :  { %5255 = vmatmul.bf16.gmra.mxu3 %v6870_v27  ;;  %5187 = vmatmul.bf16.gmra.mxu2 %v6966_v37  ;;  %v8509_v37 = vld [vmem:[%s12139_s0 + $0x570] sm:$0xf0] }
 0x4b5   :  { %v11624_v43 = vadd.f32 %v5057_v35, %v4985_v13 }
 0x4b6   :  { %v4840_v9 = vpop.f32.mrf.mxu1  ;;  %v5059_v49 = vpop.f32.mrf.mxu0 }
 0x4b7   :  { %v4989_v14 = vpop.f32.mrf.mxu3  ;;  %v4841_v11 = vadd.f32 %v4840_v9, %v11227_v7  ;;  %v4921_v61 = vpop.f32.mrf.mxu2  ;;  %v8496_v7 = vld [vmem:[%s12139_s0 + $0x50c] sm:$0xf] }
 0x4b9   :  { %v4914_v44 = vadd.f32 %v4913_v15, %v4841_v11  ;;  %v6967_v15 = vld [vmem:[%s12139_s0 + $0x56c] sm:$0xf0] }
 0x4ba   :  { %v6970_v21 = vor.u32 %v8496_v7, %v6967_v15 }
 0x4bb   :  { %v4987_v53 = vadd.f32 %v4986_v56, %v4914_v44 }
 0x4bd   :  { %v11645_v16 = vadd.f32 %v5059_v49, %v4987_v53  ;;  %v6974_v49 = vor.u32 %v8509_v37, %v6973_v38  ;;  %v7265_v38 = vld [vmem:[%s12139_s0 + $0x760] sm:$0xf]  ;;  %v8583_v37 = vld [vmem:[%s12139_s0 + $0x7c0] sm:$0xf0] }
 0x4be   :  { %v4843_v39 = vpop.f32.mrf.mxu1  ;;  %v5062_v40 = vpop.f32.mrf.mxu0 }
 0x4bf   :  { %v4991_v17 = vpop.f32.mrf.mxu3  ;;  %v4844_v47 = vadd.f32 %v4843_v39, %v11242_v41  ;;  %v4923_v5 = vpop.f32.mrf.mxu2  ;;  %v8495_v41 = vld [vmem:[%s12139_s0 + $0x504] sm:$0xf] }
 0x4c1   :  { %v4917_v8 = vadd.f32 %v4916_v4, %v4844_v47  ;;  %5109 = vmatmul.bf16.gmra.mxu1 %v6862_v10  ;;  %5328 = vmatmul.bf16.gmra.mxu0 %v6874_v50  ;;  %v6959_v4 = vld [vmem:[%s12139_s0 + $0x564] sm:$0xf0]  ;;  %v7166_v10 = vor.u32 %v8558_v33, %v7165_v32  ;;  %v8545_v33 = vld [vmem:[%s12139_s0 + $0x694] sm:$0xf] }
 0x4c2   :  { %v6962_v9 = vor.u32 %v8495_v41, %v6959_v4 }
 0x4c3   :  { %v4990_v24 = vadd.f32 %v4989_v14, %v4917_v8  ;;  %v7073_v8 = vld [vmem:[%s12139_s0 + $0x5d8] sm:$0xf] }
 0x4c4   :  { %5260 = vmatmul.bf16.gmra.mxu3 %v6970_v21  ;;  %5192 = vmatmul.bf16.gmra.mxu2 %v7066_v59  ;;  %v8534_v59 = vld [vmem:[%s12139_s0 + $0x638] sm:$0xf0] }
 0x4c5   :  { %v11654_v56 = vadd.f32 %v5062_v40, %v4990_v24 }
 0x4c6   :  { %v4845_v35 = vpop.f32.mrf.mxu1  ;;  %v5064_v27 = vpop.f32.mrf.mxu0 }
 0x4c7   :  { %v4994_v58 = vpop.f32.mrf.mxu3  ;;  %v4846_v20 = vadd.f32 %v4845_v35, %v11266_v31  ;;  %v4926_v12 = vpop.f32.mrf.mxu2  ;;  %v8521_v31 = vld [vmem:[%s12139_s0 + $0x5d4] sm:$0xf] }
 0x4c9   :  { %v4919_v26 = vadd.f32 %v4918_v42, %v4846_v20  ;;  %v7067_v42 = vld [vmem:[%s12139_s0 + $0x634] sm:$0xf0] }
 0x4ca   :  { %v7070_v57 = vor.u32 %v8521_v31, %v7067_v42 }
 0x4cb   :  { %v4992_v13 = vadd.f32 %v4991_v17, %v4919_v26 }
 0x4cd   :  { %v11675_v14 = vadd.f32 %v5064_v27, %v4992_v13  ;;  %v7074_v27 = vor.u32 %v8534_v59, %v7073_v8 }
 0x4ce   :  { %v4848_v44 = vpop.f32.mrf.mxu1  ;;  %v5067_v30 = vpop.f32.mrf.mxu0 }
 0x4cf   :  { %v4996_v11 = vpop.f32.mrf.mxu3  ;;  %v4849_v53 = vadd.f32 %v4848_v44, %v11275_v60  ;;  %v4928_v7 = vpop.f32.mrf.mxu2  ;;  %v8520_v60 = vld [vmem:[%s12139_s0 + $0x5cc] sm:$0xf] }
 0x4d0   :  { %v8571_v7 = vld [vmem:[%s12139_s0 + $0x764] sm:$0xf] }
 0x4d1   :  { %v4922_v15 = vadd.f32 %v4921_v61, %v4849_v53  ;;  %5114 = vmatmul.bf16.gmra.mxu1 %v6962_v9  ;;  %5333 = vmatmul.bf16.gmra.mxu0 %v6974_v49  ;;  %v7059_v61 = vld [vmem:[%s12139_s0 + $0x62c] sm:$0xf0]  ;;  %v7266_v9 = vor.u32 %v8583_v37, %v7265_v38  ;;  %v8559_v53 = vld [vmem:[%s12139_s0 + $0x700] sm:$0xf0]  ;;  %v8596_v37 = vld [vmem:[%s12139_s0 + $0x82c] sm:$0xf] }
 0x4d2   :  { %v7062_v35 = vor.u32 %v8520_v60, %v7059_v61  ;;  %v8608_v60 = vld [vmem:[%s12139_s0 + $0x888] sm:$0xf0] }
 0x4d3   :  { %v4995_v50 = vadd.f32 %v4994_v58, %v4922_v15  ;;  %v7267_v15 = vld [vmem:[%s12139_s0 + $0x7c4] sm:$0xf0] }
 0x4d4   :  { %5265 = vmatmul.bf16.gmra.mxu3 %v7070_v57  ;;  %5197 = vmatmul.bf16.gmra.mxu2 %v7166_v10 }
 0x4d5   :  { %v11684_v17 = vadd.f32 %v5067_v30, %v4995_v50 }
 0x4d6   :  { %v4850_v40 = vpop.f32.mrf.mxu1  ;;  %v5069_v21 = vpop.f32.mrf.mxu0 }
 0x4d7   :  { %v4999_v39 = vpop.f32.mrf.mxu3  ;;  %v4851_v19 = vadd.f32 %v4850_v40, %v11305_v55  ;;  %v5158_v45 = vpop.f32.mrf.mxu2  ;;  %v8546_v55 = vld [vmem:[%s12139_s0 + $0x69c] sm:$0xf] }
 0x4d9   :  { %v4924_v47 = vadd.f32 %v4923_v5, %v4851_v19  ;;  %v7167_v5 = vld [vmem:[%s12139_s0 + $0x6fc] sm:$0xf0]  ;;  %v7270_v19 = vor.u32 %v8571_v7, %v7267_v15 }
 0x4da   :  { %v7170_v4 = vor.u32 %v8546_v55, %v7167_v5 }
 0x4db   :  { %v4997_v24 = vadd.f32 %v4996_v11, %v4924_v47  ;;  %v7365_v47 = vld [vmem:[%s12139_s0 + $0x828] sm:$0xf] }
 0x4dc   :  { %v7366_v8 = vor.u32 %v8608_v60, %v7365_v47 }
 0x4dd   :  { %v11705_v58 = vadd.f32 %v5069_v21, %v4997_v24 }
 0x4de   :  { %v4853_v26 = vpop.f32.mrf.mxu1  ;;  %v5072_v41 = vpop.f32.mrf.mxu0 }
 0x4df   :  { %v5001_v20 = vpop.f32.mrf.mxu3  ;;  %v4854_v13 = vadd.f32 %v4853_v26, %v11317_v28  ;;  %v5160_v31 = vpop.f32.mrf.mxu2  ;;  %v7159_v28 = vld [vmem:[%s12139_s0 + $0x6f4] sm:$0xf0]  ;;  %v8570_v26 = vld [vmem:[%s12139_s0 + $0x75c] sm:$0xf] }
 0x4e0   :  { %v7162_v10 = vor.u32 %v8545_v33, %v7159_v28  ;;  %v7465_v28 = vld [vmem:[%s12139_s0 + $0x8f0] sm:$0xf] }
 0x4e1   :  { %v4927_v42 = vadd.f32 %v4926_v12, %v4854_v13  ;;  %5119 = vmatmul.bf16.gmra.mxu1 %v7062_v35  ;;  %5338 = vmatmul.bf16.gmra.mxu0 %v7074_v27  ;;  %v7173_v12 = vld [vmem:[%s12139_s0 + $0x6a0] sm:$0xf] }
 0x4e2   :  { %v7174_v50 = vor.u32 %v8559_v53, %v7173_v12  ;;  %v8633_v12 = vld [vmem:[%s12139_s0 + $0x950] sm:$0xf0] }
 0x4e3   :  { %v5000_v49 = vadd.f32 %v4999_v39, %v4927_v42 }
 0x4e4   :  { %5270 = vmatmul.bf16.gmra.mxu3 %v7170_v4  ;;  %5202 = vmatmul.bf16.gmra.mxu2 %v7266_v9  ;;  %v7259_v4 = vld [vmem:[%s12139_s0 + $0x7bc] sm:$0xf0] }
 0x4e5   :  { %v11714_v11 = vadd.f32 %v5072_v41, %v5000_v49 }
 0x4e6   :  { %v4855_v30 = vpop.f32.mrf.mxu1  ;;  %v5074_v57 = vpop.f32.mrf.mxu0 }
 0x4e7   :  { %v5231_v44 = vpop.f32.mrf.mxu3  ;;  %v5163_v32 = vpop.f32.mrf.mxu2 }
 0x4ee   :  { %v5085_v40 = vpop.f32.mrf.mxu1  ;;  %v5304_v21 = vpop.f32.mrf.mxu0 }
 0x4ef   :  { %v5233_v39 = vpop.f32.mrf.mxu3  ;;  %v11740_v61 = vpop.f32.mrf.mxu2  ;;  %v5086_v24 = vadd.f32 %v5085_v40, %v11353_v52  ;;  %v7273_v52 = vld [vmem:[%s12139_s0 + $0x768] sm:$0xf]  ;;  %v7466_v40 = vor.u32 %v8633_v12, %v7465_v28  ;;  %v8621_v12 = vld [vmem:[%s12139_s0 + $0x8f4] sm:$0xf] }
 0x4f1   :  { %5124 = vmatmul.bf16.gmra.mxu1 %v7162_v10  ;;  %5343 = vmatmul.bf16.gmra.mxu0 %v7174_v50  ;;  %v5159_v41 = vadd.f32 %v5158_v45, %v5086_v24  ;;  %v7367_v45 = vld [vmem:[%s12139_s0 + $0x88c] sm:$0xf0] }
 0x4f2   :  { %v7370_v33 = vor.u32 %v8596_v37, %v7367_v45 }
 0x4f3   :  { %v5232_v49 = vadd.f32 %v5231_v44, %v5159_v41 }
 0x4f4   :  { %5275 = vmatmul.bf16.gmra.mxu3 %v7270_v19  ;;  %5207 = vmatmul.bf16.gmra.mxu2 %v7366_v8 }
 0x4f5   :  { %v5305_v19 = vadd.f32 %v5304_v21, %v5232_v49 }
 0x4f6   :  { %v5087_v55 = vpop.f32.mrf.mxu1  ;;  %v5306_v5 = vpop.f32.mrf.mxu0 }
 0x4f7   :  { %v5236_v59 = vpop.f32.mrf.mxu3  ;;  %v5088_v35 = vadd.f32 %v5087_v55, %v11377_v34  ;;  %v11744_v27 = vpop.f32.mrf.mxu2  ;;  %v8584_v34 = vld [vmem:[%s12139_s0 + $0x7c8] sm:$0xf0] }
 0x4f8   :  { %v7274_v42 = vor.u32 %v8584_v34, %v7273_v52  ;;  %v7359_v52 = vld [vmem:[%s12139_s0 + $0x884] sm:$0xf0]  ;;  %v7373_v34 = vld [vmem:[%s12139_s0 + $0x830] sm:$0xf] }
 0x4f9   :  { %v5161_v20 = vadd.f32 %v5160_v31, %v5088_v35  ;;  %v7262_v31 = vor.u32 %v8570_v26, %v7259_v4  ;;  %v8595_v26 = vld [vmem:[%s12139_s0 + $0x824] sm:$0xf] }
 0x4fb   :  { %v5234_v38 = vadd.f32 %v5233_v39, %v5161_v20 }
 0x4fd   :  { %v5307_v13 = vadd.f32 %v5306_v5, %v5234_v38 }
 0x4fe   :  { %v5090_v30 = vpop.f32.mrf.mxu1  ;;  %v5309_v57 = vpop.f32.mrf.mxu0 }
 0x4ff   :  { %v5238_v9 = vpop.f32.mrf.mxu3  ;;  %v5394_v53 = vrot.slane %v5307_v13, 4  ;;  %v5091_v7 = vadd.f32 %v5090_v30, %v11386_v46  ;;  %v11776_v44 = vpop.f32.mrf.mxu2  ;;  %v8275_v10 = vrot.slane %v5307_v13, 10 }
 0x501   :  { %v5438_v50 = vrot.slane %v5394_v53, 6  ;;  %v5164_v39 = vadd.f32 %v5163_v32, %v5091_v7  ;;  %5129 = vmatmul.bf16.gmra.mxu1 %v7262_v31  ;;  %5348 = vmatmul.bf16.gmra.mxu0 %v7274_v42  ;;  %v8609_v42 = vld [vmem:[%s12139_s0 + $0x890] sm:$0xf0]  ;;  %v7467_v53 = vld [vmem:[%s12139_s0 + $0x954] sm:$0xf0] }
 0x503   :  { %v5439_v47 = vsel %vm11772_vm2, %v8275_v10, %v5438_v50  ;;  %v5237_v60 = vadd.f32 %v5236_v59, %v5164_v39  ;;  %v5440_v32 = vrot.slane %v5438_v50, 4  ;;  %v5393_v59 = vrot.slane %v5305_v19, 4 }
 0x504   :  { %5280 = vmatmul.bf16.gmra.mxu3 %v7370_v33  ;;  %v5546_v46 = vmax.f32 %v5305_v19, %v5439_v47  ;;  %5212 = vmatmul.bf16.gmra.mxu2 %v7466_v40  ;;  %v7362_v50 = vor.u32 %v8595_v26, %v7359_v52  ;;  %v7374_v39 = vor.u32 %v8609_v42, %v7373_v34 }
 0x505   :  { %v11780_v8 = vadd.f32 %v5309_v57, %v5237_v60  ;;  %v11808_v57 = vld [vmem:[%s12139_s0 + $0x9b8] sm:$0xff] }
 0x506   :  { %v5606_v55 = vrot.slane %v5546_v46, 2  ;;  %v5092_v5 = vpop.f32.mrf.mxu1  ;;  %v5311_v35 = vpop.f32.mrf.mxu0  ;;  %v1690_v60 = vunpack.c.l.b16 %v11808_v57 }
 0x507   :  { %v11782_v24 = vpop.f32.mrf.mxu3  ;;  %v5441_v20 = vrot.slane %v11780_v8, 6  ;;  %v5093_v21 = vadd.f32 %v5092_v5, %v11416_v18  ;;  %v11797_v38 = vpop.f32.mrf.mxu2 }
 0x508   :  { %v5636_v41 = vsel %vm5433_vm0, %v5546_v46, %v5606_v55  ;;  %v5638_v4 = vsel %vm5637_vm3, %v5546_v46, %v5606_v55 }
 0x509   :  { %v5639_v18 = vrot.slane %v5638_v4, 2  ;;  %v8285_v37 = vrot.slane %v5636_v41, 9  ;;  %v5442_v45 = vsel %vm11772_vm2, %v5440_v32, %v5441_v20  ;;  %v5443_v31 = vrot.slane %v5441_v20, 4 }
 0x50a   :  { %v5547_v49 = vmax.f32 %v5393_v59, %v5442_v45  ;;  %v5166_v30 = vadd.f32 %v11740_v61, %v5093_v21  ;;  %v7470_v32 = vor.u32 %v8621_v12, %v7467_v53  ;;  %v2015_v45 = vpack.c.b16 %v1690_v60, %v1690_v60 }
 0x50b   :  { %v8286_v33 = vrot.slane %v5639_v18, 9  ;;  %v5548_v28 = vmax.f32 %v5307_v13, %v5443_v31  ;;  %v5907_v61 = vmax.f32 %v5636_v41, %v8285_v37 }
 0x50c   :  { %v5607_v7 = vrot.slane %v5547_v49, 2  ;;  %v5239_v10 = vadd.f32 %v5238_v9, %v5166_v30 }
 0x50d   :  { %v5908_v40 = vmax.f32 %v5639_v18, %v8286_v33  ;;  %v5608_v19 = vrot.slane %v5548_v28, 2  ;;  %v5957_v34 = vmax.f32 %v5907_v61, 0.0 }
 0x50e   :  { %v5640_v13 = vsel %vm5433_vm0, %v5547_v49, %v5607_v7  ;;  %v5641_v46 = vsel %vm5637_vm3, %v5547_v49, %v5607_v7  ;;  %v5095_v55 = vpop.f32.mrf.mxu1  ;;  %v5314_v5 = vpop.f32.mrf.mxu0  ;;  %v11822_v26 = vadd.f32 %v5311_v35, %v5239_v10 }
 0x50f   :  { %v11816_v47 = vpop.f32.mrf.mxu3  ;;  %v5958_v20 = vmax.f32 %v5908_v40, 0.0  ;;  %v5642_v21 = vrot.slane %v5641_v46, 2  ;;  %v5643_v9 = vsel %vm5433_vm0, %v5548_v28, %v5608_v19  ;;  %v8287_v59 = vrot.slane %v5640_v13, 9  ;;  %v11825_v52 = vpop.f32.mrf.mxu2  ;;  %v8620_v19 = vld [vmem:[%s12139_s0 + $0x8ec] sm:$0xf] }
 0x510   :  { %v8289_v41 = vrot.slane %v5643_v9, 9  ;;  %v5096_v4 = vadd.f32 %v5095_v55, %v11425_v2  ;;  %v5396_v33 = vrot.slane %v11822_v26, 4  ;;  %v6007_v53 = vpack.c.bf16 %v5957_v34, %v5957_v34 }
 0x511   :  { %v6008_v18 = vpack.c.bf16 %v5958_v20, %v5958_v20  ;;  %v8288_v37 = vrot.slane %v5642_v21, 9  ;;  %5134 = vmatmul.bf16.gmra.mxu1 %v7362_v50  ;;  %5353 = vmatmul.bf16.gmra.mxu0 %v7374_v39  ;;  %v5909_v31 = vmax.f32 %v5640_v13, %v8287_v59 }
 0x512   :  { %v5911_v42 = vmax.f32 %v5643_v9, %v8289_v41  ;;  %v5169_v49 = vadd.f32 %v11744_v27, %v5096_v4  ;;  %v8276_v46 = vrot.slane %v5396_v33, 10  ;;  %v6107_v59 = vunpack.c.l.b16 %v6007_v53 }
 0x513   :  { %v6108_v30 = vunpack.c.l.b16 %v6008_v18  ;;  %v5910_v35 = vmax.f32 %v5642_v21, %v8288_v37  ;;  %v5959_v28 = vmax.f32 %v5909_v31, 0.0  ;;  %v5395_v41 = vrot.slane %v11780_v8, 4  ;;  %v7473_v18 = vld [vmem:[%s12139_s0 + $0x8f8] sm:$0xf]  ;;  %v8634_v37 = vld [vmem:[%s12139_s0 + $0x958] sm:$0xf0] }
 0x514   :  { %5285 = vmatmul.bf16.gmra.mxu3 %v7470_v32  ;;  %v5961_v12 = vmax.f32 %v5911_v42, 0.0  ;;  %v5242_v2 = vadd.f32 %v11782_v24, %v5169_v49  ;;  %5217 = vmatmul.bf16.gmra.mxu2 %v2015_v45  ;;  %v7459_v24 = vld [vmem:[%s12139_s0 + $0x94c] sm:$0xf0]  ;;  %v1691_v42 = vunpack.c.h.b16 %v11808_v57  ;;  %v7474_v53 = vor.u32 %v8634_v37, %v7473_v18 }
 0x515   :  { %v5960_v7 = vmax.f32 %v5910_v35, 0.0  ;;  %v6009_v50 = vpack.c.bf16 %v5959_v28, %v5959_v28  ;;  %v6157_v60 = vrot.slane %v6108_v30, 7  ;;  %v7462_v34 = vor.u32 %v8620_v19, %v7459_v24 }
 0x516   :  { %v6011_v39 = vpack.c.bf16 %v5961_v12, %v5961_v12  ;;  %v5315_v27 = vadd.f32 %v5314_v5, %v5242_v2  ;;  %v5097_v61 = vpop.f32.mrf.mxu1  ;;  %v11832_v40 = vpop.f32.mrf.mxu0 }
 0x517   :  { %v11830_v10 = vpop.f32.mrf.mxu3  ;;  %v6010_v13 = vpack.c.bf16 %v5960_v7, %v5960_v7  ;;  %v5098_v55 = vadd.f32 %v5097_v61, %v11440_v3  ;;  %v6109_v32 = vunpack.c.l.b16 %v6009_v50  ;;  %v11841_v9 = vpop.f32.mrf.mxu2  ;;  %v6159_v49 = vsel %vm6158_vm4, %v6157_v60, %v6107_v59 }
 0x518   :  { %v6111_v20 = vunpack.c.l.b16 %v6011_v39  ;;  %v5397_v21 = vrot.slane %v5315_v27, 4  ;;  %v5446_v5 = vrot.slane %v5315_v27, 6 }
 0x519   :  { %v6110_v4 = vunpack.c.l.b16 %v6010_v13  ;;  %v6160_v3 = vrot.slane %v6109_v32, 6  ;;  %v5171_v2 = vadd.f32 %v11776_v44, %v5098_v55  ;;  %v2016_v13 = vpack.c.b16 %v1691_v42, %v1691_v42 }
 0x51a   :  { %v5447_v45 = vsel %vm11772_vm2, %v8276_v46, %v5446_v5  ;;  %v5448_v31 = vrot.slane %v5446_v5, 4  ;;  %v5449_v30 = vrot.slane %v5397_v21, 6  ;;  %v6166_v12 = vrot.slane %v6111_v20, 4 }
 0x51b   :  { %v6163_v8 = vrot.slane %v6110_v4, 5  ;;  %v5549_v35 = vmax.f32 %v5395_v41, %v5447_v45  ;;  %v6162_v28 = vsel %vm6161_vm5, %v6160_v3, %v6159_v49  ;;  %v5244_v4 = vadd.f32 %v11816_v47, %v5171_v2 }
 0x51c   :  { %v5450_v50 = vsel %vm11772_vm2, %v5448_v31, %v5449_v30  ;;  %v5451_v39 = vrot.slane %v5449_v30, 4 }
 0x51d   :  { %v6165_v7 = vsel %vm6164_vm6, %v6163_v8, %v6162_v28  ;;  %v5609_v27 = vrot.slane %v5549_v35, 2  ;;  %v5550_v19 = vmax.f32 %v11822_v26, %v5450_v50 }
 0x51e   :  { %v11862_v57 = vsel %vm6167_vm7, %v6166_v12, %v6165_v7  ;;  %v5100_v24 = vpop.f32.mrf.mxu1  ;;  %v5319_v60 = vpop.f32.mrf.mxu0  ;;  %v5551_v46 = vmax.f32 %v5396_v33, %v5451_v39  ;;  %v1689_v12 = vunpack.c.h.b16 %v11454_v1 }
 0x51f   :  { %v11859_v61 = vpop.f32.mrf.mxu3  ;;  %v5644_v44 = vsel %vm5433_vm0, %v5549_v35, %v5609_v27  ;;  %v5645_v55 = vsel %vm5637_vm3, %v5549_v35, %v5609_v27  ;;  %v5101_v32 = vadd.f32 %v5100_v24, %v11449_v0  ;;  %v5610_v20 = vrot.slane %v5550_v19, 2  ;;  %v11868_v59 = vpop.f32.mrf.mxu2 }
 0x520   :  { %v5646_v21 = vrot.slane %v5645_v55, 2  ;;  %v8290_v5 = vrot.slane %v5644_v44, 9  ;;  %v5611_v41 = vrot.slane %v5551_v46, 2  ;;  %v5317_v24 = vadd.f32 %v11832_v40, %v5244_v4 }
 0x521   :  { %v5174_v26 = vadd.f32 %v11797_v38, %v5101_v32  ;;  %5139 = vmatmul.bf16.gmra.mxu1 %v7462_v34  ;;  %5358 = vmatmul.bf16.gmra.mxu0 %v7474_v53  ;;  %v5647_v33 = vsel %vm5433_vm0, %v5550_v19, %v5610_v20  ;;  %v5648_v18 = vsel %vm5637_vm3, %v5550_v19, %v5610_v20  ;;  %v338_v38 = vld [vmem:[%s12139_s0 + $0x9c0] sm:$0xf] }
 0x522   :  { %v8291_v37 = vrot.slane %v5646_v21, 9  ;;  %v5912_v3 = vmax.f32 %v5644_v44, %v8290_v5  ;;  %v5649_v0 = vrot.slane %v5648_v18, 2  ;;  %v5650_v45 = vsel %vm5433_vm0, %v5551_v46, %v5611_v41 }
 0x523   :  { %v8292_v31 = vrot.slane %v5647_v33, 9  ;;  %v5247_v42 = vadd.f32 %v11830_v10, %v5174_v26  ;;  %v8294_v47 = vrot.slane %v5650_v45, 9  ;;  %v1692_v39 = vunpack.c.l.b16 %v338_v38 }
 0x524   :  { %5290 = vmatmul.bf16.gmra.mxu3 %v2016_v13  ;;  %v5913_v34 = vmax.f32 %v5646_v21, %v8291_v37  ;;  %v5962_v49 = vmax.f32 %v5912_v3, 0.0  ;;  %v8293_v8 = vrot.slane %v5649_v0, 9  ;;  %v2014_v3 = vpack.c.b16 %v1689_v12, %v1689_v12 }
 0x525   :  { %v5914_v30 = vmax.f32 %v5647_v33, %v8292_v31  ;;  %v11879_v35 = vadd.f32 %v5319_v60, %v5247_v42  ;;  %v5916_v2 = vmax.f32 %v5650_v45, %v8294_v47 }
 0x526   :  { %v5963_v53 = vmax.f32 %v5913_v34, 0.0  ;;  %v6012_v7 = vpack.c.bf16 %v5962_v49, %v5962_v49  ;;  %v5102_v10 = vpop.f32.mrf.mxu1  ;;  %v5321_v50 = vpop.f32.mrf.mxu0  ;;  %v5915_v27 = vmax.f32 %v5649_v0, %v8293_v8  ;;  %v2017_v34 = vpack.c.b16 %v1692_v39, %v1692_v39 }
 0x527   :  { %v11881_v28 = vpop.f32.mrf.mxu3  ;;  %v5964_v19 = vmax.f32 %v5914_v30, 0.0  ;;  %v5399_v13 = vrot.slane %v11879_v35, 4  ;;  %v5966_v46 = vmax.f32 %v5916_v2, 0.0  ;;  %v5103_v55 = vadd.f32 %v5102_v10, %v11465_v29  ;;  %v11887_v32 = vpop.f32.mrf.mxu2 }
 0x528   :  { %v6013_v44 = vpack.c.bf16 %v5963_v53, %v5963_v53  ;;  %v6112_v60 = vunpack.c.l.b16 %v6012_v7  ;;  %v5965_v1 = vmax.f32 %v5915_v27, 0.0  ;;  %v8277_v21 = vrot.slane %v11879_v35, 10 }
 0x529   :  { %v6014_v20 = vpack.c.bf16 %v5964_v19, %v5964_v19  ;;  %v5454_v5 = vrot.slane %v5399_v13, 6  ;;  %v6016_v41 = vpack.c.bf16 %v5966_v46, %v5966_v46  ;;  %v5176_v18 = vadd.f32 %v11825_v52, %v5103_v55 }
 0x52a   :  { %v6113_v26 = vunpack.c.l.b16 %v6013_v44  ;;  %v6169_v33 = vrot.slane %v6112_v60, 3  ;;  %v6015_v40 = vpack.c.bf16 %v5965_v1, %v5965_v1 }
 0x52b   :  { %v6114_v4 = vunpack.c.l.b16 %v6014_v20  ;;  %v5455_v37 = vsel %vm11772_vm2, %v8277_v21, %v5454_v5  ;;  %v6116_v0 = vunpack.c.l.b16 %v6016_v41  ;;  %v5249_v47 = vadd.f32 %v11859_v61, %v5176_v18 }
 0x52c   :  { %v6171_v29 = vsel %vm6170_vm8, %v6169_v33, %v11862_v57  ;;  %v6172_v45 = vrot.slane %v6113_v26, 2  ;;  %v5552_v31 = vmax.f32 %v5317_v24, %v5455_v37  ;;  %v6115_v42 = vunpack.c.l.b16 %v6015_v40 }
 0x52d   :  { %v6175_v38 = vrot.slane %v6114_v4, 1  ;;  %v6178_v8 = vrot.slane %v6116_v0, 7  ;;  %v11898_v7 = vadd.f32 %v5321_v50, %v5249_v47  ;;  %v5456_v13 = vrot.slane %v5454_v5, 4 }
 0x52e   :  { %v6174_v52 = vsel %vm6173_vm9, %v6172_v45, %v6171_v29  ;;  %v5612_v30 = vrot.slane %v5552_v31, 2  ;;  %v5105_v2 = vpop.f32.mrf.mxu1  ;;  %v5324_v53 = vpop.f32.mrf.mxu0 }
 0x52f   :  { %v5253_v49 = vpop.f32.mrf.mxu3  ;;  %v6177_v12 = vsel %vm6176_vm10, %v6175_v38, %v6174_v52  ;;  %v5106_v57 = vadd.f32 %v5105_v2, %v11474_v23  ;;  %v6179_v10 = vsel %vm6158_vm4, %v6178_v8, %v6115_v42  ;;  %v11904_v39 = vpop.f32.mrf.mxu2  ;;  %v5457_v60 = vrot.slane %v11898_v7, 6 }
 0x530   :  { %v6250_v27 = vpack.c.b16 %v6177_v12, %v6177_v12  ;;  %v5651_v19 = vsel %vm5433_vm0, %v5552_v31, %v5612_v30  ;;  %v5652_v61 = vsel %vm5637_vm3, %v5552_v31, %v5612_v30  ;;  %v5398_v23 = vrot.slane %v5317_v24, 4 }
 0x531   :  { %v5653_v46 = vrot.slane %v5652_v61, 2  ;;  %v8295_v44 = vrot.slane %v5651_v19, 9  ;;  %5144 = vmatmul.bf16.gmra.mxu1 %v2014_v3  ;;  %5363 = vmatmul.bf16.gmra.mxu0 %v2017_v34  ;;  %v5179_v50 = vadd.f32 %v11841_v9, %v5106_v57  ;;  %v5458_v20 = vsel %vm11772_vm2, %v5456_v13, %v5457_v60 }
 0x532   :  { %6264 = vst [vmem:[%s12140_s3] sm:$0xf] %v6250_v27  ;;  %v5459_v21 = vrot.slane %v5457_v60, 4  ;;  %v5553_v5 = vmax.f32 %v5398_v23, %v5458_v20 }
 0x533   :  { %v8296_v55 = vrot.slane %v5653_v46, 9  ;;  %v5917_v1 = vmax.f32 %v5651_v19, %v8295_v44  ;;  %v5252_v41 = vadd.f32 %v11881_v28, %v5179_v50 }
 0x534   :  { %v5554_v18 = vmax.f32 %v11879_v35, %v5459_v21  ;;  %v5613_v4 = vrot.slane %v5553_v5, 2 }
 0x535   :  { %v5918_v26 = vmax.f32 %v5653_v46, %v8296_v55  ;;  %v5967_v33 = vmax.f32 %v5917_v1, 0.0  ;;  %v11917_v37 = vadd.f32 %v5324_v53, %v5252_v41 }
 0x536   :  { %v5107_v24 = vpop.f32.mrf.mxu1  ;;  %v5326_v9 = vpop.f32.mrf.mxu0  ;;  %v5614_v29 = vrot.slane %v5554_v18, 2  ;;  %v5654_v31 = vsel %vm5433_vm0, %v5553_v5, %v5613_v4  ;;  %v5655_v28 = vsel %vm5637_vm3, %v5553_v5, %v5613_v4 }
 0x537   :  { %v11915_v40 = vpop.f32.mrf.mxu3  ;;  %v5968_v3 = vmax.f32 %v5918_v26, 0.0  ;;  %v6017_v0 = vpack.c.bf16 %v5967_v33, %v5967_v33  ;;  %v5108_v45 = vadd.f32 %v5107_v24, %v11495_v6  ;;  %v11922_v42 = vpop.f32.mrf.mxu2  ;;  %v5656_v47 = vrot.slane %v5655_v28, 2 }
 0x538   :  { %v5657_v34 = vsel %vm5433_vm0, %v5554_v18, %v5614_v29  ;;  %v8297_v52 = vrot.slane %v5654_v31, 9  ;;  %v5401_v6 = vrot.slane %v11917_v37, 4 }
 0x539   :  { %v6018_v38 = vpack.c.bf16 %v5968_v3, %v5968_v3  ;;  %v6117_v35 = vunpack.c.l.b16 %v6017_v0  ;;  %v8299_v8 = vrot.slane %v5657_v34, 9  ;;  %v5181_v30 = vadd.f32 %v11868_v59, %v5108_v45 }
 0x53a   :  { %v8298_v12 = vrot.slane %v5656_v47, 9  ;;  %v5919_v57 = vmax.f32 %v5654_v31, %v8297_v52  ;;  %v8278_v21 = vrot.slane %v5401_v6, 10 }
 0x53b   :  { %v6118_v2 = vunpack.c.l.b16 %v6018_v38  ;;  %v6180_v53 = vrot.slane %v6117_v35, 6  ;;  %v5921_v27 = vmax.f32 %v5657_v34, %v8299_v8  ;;  %v5254_v19 = vadd.f32 %v5253_v49, %v5181_v30 }
 0x53c   :  { %v5920_v46 = vmax.f32 %v5656_v47, %v8298_v12  ;;  %v5969_v60 = vmax.f32 %v5919_v57, 0.0 }
 0x53d   :  { %v6181_v61 = vsel %vm6161_vm5, %v6180_v53, %v6179_v10  ;;  %v6182_v13 = vrot.slane %v6118_v2, 5  ;;  %v5971_v23 = vmax.f32 %v5921_v27, 0.0  ;;  %v5327_v50 = vadd.f32 %v5326_v9, %v5254_v19 }
 0x53e   :  { %v5110_v55 = vpop.f32.mrf.mxu1  ;;  %v11928_v1 = vpop.f32.mrf.mxu0  ;;  %v5970_v59 = vmax.f32 %v5920_v46, 0.0  ;;  %v6019_v5 = vpack.c.bf16 %v5969_v60, %v5969_v60  ;;  %v5400_v10 = vrot.slane %v11898_v7, 4 }
 0x53f   :  { %v5258_v44 = vpop.f32.mrf.mxu3  ;;  %v6183_v20 = vsel %vm6164_vm6, %v6182_v13, %v6181_v61  ;;  %v6021_v41 = vpack.c.bf16 %v5971_v23, %v5971_v23  ;;  %v5402_v26 = vrot.slane %v5327_v50, 4  ;;  %v5462_v33 = vrot.slane %v5327_v50, 6  ;;  %v11931_v49 = vpop.f32.mrf.mxu2 }
 0x540   :  { %v6020_v18 = vpack.c.bf16 %v5970_v59, %v5970_v59  ;;  %v6119_v4 = vunpack.c.l.b16 %v6019_v5  ;;  %v5111_v28 = vadd.f32 %v5110_v55, %v11504_v54 }
 0x541   :  { %v6121_v24 = vunpack.c.l.b16 %v6021_v41  ;;  %v5463_v9 = vsel %vm11772_vm2, %v8278_v21, %v5462_v33  ;;  %v5464_v3 = vrot.slane %v5462_v33, 4  ;;  %v5465_v29 = vrot.slane %v5402_v26, 6 }
 0x542   :  { %v6120_v0 = vunpack.c.l.b16 %v6020_v18  ;;  %v5555_v45 = vmax.f32 %v5400_v10, %v5463_v9  ;;  %v6184_v31 = vrot.slane %v6119_v4, 4  ;;  %v5184_v50 = vadd.f32 %v11887_v32, %v5111_v28 }
 0x543   :  { %v5466_v35 = vsel %vm11772_vm2, %v5464_v3, %v5465_v29  ;;  %v5467_v47 = vrot.slane %v5465_v29, 4  ;;  %v6188_v8 = vrot.slane %v6121_v24, 2 }
 0x544   :  { %v6186_v38 = vrot.slane %v6120_v0, 3  ;;  %v5615_v34 = vrot.slane %v5555_v45, 2  ;;  %v6185_v52 = vsel %vm6167_vm7, %v6184_v31, %v6183_v20  ;;  %v5556_v30 = vmax.f32 %v11917_v37, %v5466_v35 }
 0x545   :  { %v5557_v57 = vmax.f32 %v5401_v6, %v5467_v47  ;;  %v5257_v29 = vadd.f32 %v11915_v40, %v5184_v50 }
 0x546   :  { %v5112_v2 = vpop.f32.mrf.mxu1  ;;  %v5331_v53 = vpop.f32.mrf.mxu0  ;;  %v6187_v12 = vsel %vm6170_vm8, %v6186_v38, %v6185_v52  ;;  %v5658_v27 = vsel %vm5433_vm0, %v5555_v45, %v5615_v34  ;;  %v5659_v54 = vsel %vm5637_vm3, %v5555_v45, %v5615_v34  ;;  %v5616_v61 = vrot.slane %v5556_v30, 2 }
 0x547   :  { %v5261_v7 = vpop.f32.mrf.mxu3  ;;  %v6189_v19 = vsel %vm6173_vm9, %v6188_v8, %v6187_v12  ;;  %v5660_v13 = vrot.slane %v5659_v54, 2  ;;  %v8300_v46 = vrot.slane %v5658_v27, 9  ;;  %v11945_v60 = vpop.f32.mrf.mxu2  ;;  %v5617_v23 = vrot.slane %v5557_v57, 2 }
 0x548   :  { %v5113_v37 = vadd.f32 %v5112_v2, %v11525_v48  ;;  %v5661_v55 = vsel %vm5433_vm0, %v5556_v30, %v5616_v61  ;;  %v5662_v6 = vsel %vm5637_vm3, %v5556_v30, %v5616_v61 }
 0x549   :  { %v8301_v59 = vrot.slane %v5660_v13, 9  ;;  %v5922_v20 = vmax.f32 %v5658_v27, %v8300_v46  ;;  %v5663_v21 = vrot.slane %v5662_v6, 2  ;;  %v5664_v5 = vsel %vm5433_vm0, %v5557_v57, %v5617_v23 }
 0x54a   :  { %v8302_v41 = vrot.slane %v5661_v55, 9  ;;  %v5186_v26 = vadd.f32 %v11904_v39, %v5113_v37  ;;  %v8304_v33 = vrot.slane %v5664_v5, 9  ;;  %v5330_v27 = vadd.f32 %v11928_v1, %v5257_v29 }
 0x54b   :  { %v5923_v10 = vmax.f32 %v5660_v13, %v8301_v59  ;;  %v5972_v18 = vmax.f32 %v5922_v20, 0.0  ;;  %v8303_v4 = vrot.slane %v5663_v21, 9 }
 0x54c   :  { %v5924_v24 = vmax.f32 %v5661_v55, %v8302_v41  ;;  %v5259_v32 = vadd.f32 %v5258_v44, %v5186_v26  ;;  %v5926_v48 = vmax.f32 %v5664_v5, %v8304_v33 }
 0x54d   :  { %v5973_v3 = vmax.f32 %v5923_v10, 0.0  ;;  %v6022_v0 = vpack.c.bf16 %v5972_v18, %v5972_v18  ;;  %v5925_v28 = vmax.f32 %v5663_v21, %v8303_v4 }
 0x54e   :  { %v5115_v45 = vpop.f32.mrf.mxu1  ;;  %v5334_v31 = vpop.f32.mrf.mxu0  ;;  %v5974_v38 = vmax.f32 %v5924_v24, 0.0  ;;  %v5332_v35 = vadd.f32 %v5331_v53, %v5259_v32  ;;  %v5976_v39 = vmax.f32 %v5926_v48, 0.0  ;;  %v5403_v32 = vrot.slane %v5330_v27, 4 }
 0x54f   :  { %v5263_v9 = vpop.f32.mrf.mxu3  ;;  %v5116_v47 = vadd.f32 %v5115_v45, %v11534_v63  ;;  %v6023_v34 = vpack.c.bf16 %v5973_v3, %v5973_v3  ;;  %v6122_v52 = vunpack.c.l.b16 %v6022_v0  ;;  %v11955_v8 = vpop.f32.mrf.mxu2  ;;  %v5975_v30 = vmax.f32 %v5925_v28, 0.0 }
 0x550   :  { %v6024_v44 = vpack.c.bf16 %v5974_v38, %v5974_v38  ;;  %v5404_v2 = vrot.slane %v5332_v35, 4  ;;  %v6026_v12 = vpack.c.bf16 %v5976_v39, %v5976_v39  ;;  %v8279_v13 = vrot.slane %v5332_v35, 10 }
 0x551   :  { %v6190_v57 = vrot.slane %v6122_v52, 1  ;;  %v5189_v40 = vadd.f32 %v11922_v42, %v5116_v47  ;;  %v6025_v54 = vpack.c.bf16 %v5975_v30, %v5975_v30  ;;  %v6123_v46 = vunpack.c.l.b16 %v6023_v34 }
 0x552   :  { %v6124_v61 = vunpack.c.l.b16 %v6024_v44  ;;  %v5470_v53 = vrot.slane %v5404_v2, 6  ;;  %v6126_v63 = vunpack.c.l.b16 %v6026_v12 }
 0x553   :  { %v6191_v23 = vsel %vm6176_vm10, %v6190_v57, %v6189_v19  ;;  %v5262_v50 = vadd.f32 %v5261_v7, %v5189_v40  ;;  %v6125_v37 = vunpack.c.l.b16 %v6025_v54 }
 0x554   :  { %v6192_v55 = vrot.slane %v6124_v61, 7  ;;  %v6251_v6 = vpack.c.b16 %v6191_v23, %v6191_v23  ;;  %v5471_v59 = vsel %vm11772_vm2, %v8279_v13, %v5470_v53  ;;  %v6196_v19 = vrot.slane %v6126_v63, 5 }
 0x555   :  { %v5558_v21 = vmax.f32 %v5330_v27, %v5471_v59  ;;  %v11962_v1 = vadd.f32 %v5334_v31, %v5262_v50  ;;  %v6194_v26 = vrot.slane %v6125_v37, 6  ;;  %v5472_v33 = vrot.slane %v5470_v53, 4 }
 0x556   :  { %v5117_v42 = vpop.f32.mrf.mxu1  ;;  %v5336_v5 = vpop.f32.mrf.mxu0  ;;  %v6193_v41 = vsel %vm6158_vm4, %v6192_v55, %v6123_v46  ;;  %6265 = vst [vmem:[%s12140_s3 + $0x4] sm:$0xf] %v6251_v6 }
 0x557   :  { %v5266_v20 = vpop.f32.mrf.mxu3  ;;  %v5118_v7 = vadd.f32 %v5117_v42, %v11555_v22  ;;  %v5618_v10 = vrot.slane %v5558_v21, 2  ;;  %v5473_v18 = vrot.slane %v11962_v1, 6  ;;  %v11970_v4 = vpop.f32.mrf.mxu2  ;;  %v6195_v24 = vsel %vm6161_vm5, %v6194_v26, %v6193_v41 }
 0x558   :  { %v6197_v3 = vsel %vm6164_vm6, %v6196_v19, %v6195_v24 }
 0x559   :  { %v5191_v48 = vadd.f32 %v11931_v49, %v5118_v7  ;;  %v5665_v0 = vsel %vm5433_vm0, %v5558_v21, %v5618_v10  ;;  %v5666_v29 = vsel %vm5637_vm3, %v5558_v21, %v5618_v10  ;;  %v5474_v22 = vsel %vm11772_vm2, %v5472_v33, %v5473_v18 }
 0x55a   :  { %v5667_v45 = vrot.slane %v5666_v29, 2  ;;  %v8305_v31 = vrot.slane %v5665_v0, 9  ;;  %v5475_v28 = vrot.slane %v5473_v18, 4  ;;  %v5559_v38 = vmax.f32 %v5403_v32, %v5474_v22 }
 0x55b   :  { %v5264_v47 = vadd.f32 %v5263_v9, %v5191_v48 }
 0x55c   :  { %v8306_v39 = vrot.slane %v5667_v45, 9  ;;  %v5927_v34 = vmax.f32 %v5665_v0, %v8305_v31  ;;  %v5560_v52 = vmax.f32 %v5332_v35, %v5475_v28  ;;  %v5619_v30 = vrot.slane %v5559_v38, 2 }
 0x55d   :  { %v5337_v13 = vadd.f32 %v5336_v5, %v5264_v47  ;;  %v5405_v31 = vrot.slane %v11962_v1, 4 }
 0x55e   :  { %v5120_v49 = vpop.f32.mrf.mxu1  ;;  %v5339_v2 = vpop.f32.mrf.mxu0  ;;  %v5928_v12 = vmax.f32 %v5667_v45, %v8306_v39  ;;  %v5977_v57 = vmax.f32 %v5927_v34, 0.0  ;;  %v5620_v27 = vrot.slane %v5560_v52, 2  ;;  %v5668_v40 = vsel %vm5433_vm0, %v5559_v38, %v5619_v30 }
 0x55f   :  { %v11979_v44 = vpop.f32.mrf.mxu3  ;;  %v5669_v54 = vsel %vm5637_vm3, %v5559_v38, %v5619_v30  ;;  %v8307_v61 = vrot.slane %v5668_v40, 9  ;;  %v5121_v53 = vadd.f32 %v5120_v49, %v11564_v51  ;;  %v11984_v9 = vpop.f32.mrf.mxu2  ;;  %v5406_v42 = vrot.slane %v5337_v13, 4 }
 0x560   :  { %v5978_v46 = vmax.f32 %v5928_v12, 0.0  ;;  %v6027_v35 = vpack.c.bf16 %v5977_v57, %v5977_v57  ;;  %v5670_v63 = vrot.slane %v5669_v54, 2  ;;  %v5671_v6 = vsel %vm5433_vm0, %v5560_v52, %v5620_v27 }
 0x561   :  { %v5929_v23 = vmax.f32 %v5668_v40, %v8307_v61  ;;  %v5194_v50 = vadd.f32 %v11945_v60, %v5121_v53  ;;  %v8309_v19 = vrot.slane %v5671_v6, 9  ;;  %v8280_v29 = vrot.slane %v5406_v42, 10 }
 0x562   :  { %v6028_v37 = vpack.c.bf16 %v5978_v46, %v5978_v46  ;;  %v6127_v55 = vunpack.c.l.b16 %v6027_v35  ;;  %v8308_v59 = vrot.slane %v5670_v63, 9 }
 0x563   :  { %v5979_v21 = vmax.f32 %v5929_v23, 0.0  ;;  %v5267_v41 = vadd.f32 %v5266_v20, %v5194_v50  ;;  %v5931_v47 = vmax.f32 %v5671_v6, %v8309_v19 }
 0x564   :  { %v6128_v26 = vunpack.c.l.b16 %v6028_v37  ;;  %v6198_v5 = vrot.slane %v6127_v55, 4  ;;  %v5930_v7 = vmax.f32 %v5670_v63, %v8308_v59 }
 0x565   :  { %v6029_v33 = vpack.c.bf16 %v5979_v21, %v5979_v21  ;;  %v5340_v10 = vadd.f32 %v5339_v2, %v5267_v41  ;;  %v5981_v61 = vmax.f32 %v5931_v47, 0.0 }
 0x566   :  { %v5122_v18 = vpop.f32.mrf.mxu1  ;;  %v11990_v24 = vpop.f32.mrf.mxu0  ;;  %v6199_v60 = vsel %vm6167_vm7, %v6198_v5, %v6197_v3  ;;  %v6200_v32 = vrot.slane %v6128_v26, 3  ;;  %v5980_v48 = vmax.f32 %v5930_v7, 0.0 }
 0x567   :  { %v11988_v51 = vpop.f32.mrf.mxu3  ;;  %v6129_v0 = vunpack.c.l.b16 %v6029_v33  ;;  %v5407_v22 = vrot.slane %v5340_v10, 4  ;;  %v5478_v45 = vrot.slane %v5340_v10, 6  ;;  %v11993_v20 = vpop.f32.mrf.mxu2  ;;  %v5123_v12 = vadd.f32 %v5122_v18, %v11585_v36 }
 0x568   :  { %v6030_v28 = vpack.c.bf16 %v5980_v48, %v5980_v48  ;;  %v6201_v38 = vsel %vm6170_vm8, %v6200_v32, %v6199_v60  ;;  %v6031_v32 = vpack.c.bf16 %v5981_v61, %v5981_v61 }
 0x569   :  { %v6202_v39 = vrot.slane %v6129_v0, 2  ;;  %v5479_v34 = vsel %vm11772_vm2, %v8280_v29, %v5478_v45  ;;  %v5480_v52 = vrot.slane %v5478_v45, 4  ;;  %v5481_v30 = vrot.slane %v5407_v22, 6 }
 0x56a   :  { %v6130_v3 = vunpack.c.l.b16 %v6030_v28  ;;  %v5561_v49 = vmax.f32 %v5405_v31, %v5479_v34  ;;  %v5196_v26 = vadd.f32 %v11955_v8, %v5123_v12 }
 0x56b   :  { %v6203_v2 = vsel %vm6173_vm9, %v6202_v39, %v6201_v38  ;;  %v5482_v1 = vsel %vm11772_vm2, %v5480_v52, %v5481_v30  ;;  %v5483_v27 = vrot.slane %v5481_v30, 4 }
 0x56c   :  { %v6204_v57 = vrot.slane %v6130_v3, 1  ;;  %v5621_v40 = vrot.slane %v5561_v49, 2  ;;  %v5562_v53 = vmax.f32 %v5337_v13, %v5482_v1  ;;  %v5269_v22 = vadd.f32 %v11979_v44, %v5196_v26 }
 0x56d   :  { %v5563_v23 = vmax.f32 %v5406_v42, %v5483_v27 }
 0x56e   :  { %v5125_v46 = vpop.f32.mrf.mxu1  ;;  %v5344_v35 = vpop.f32.mrf.mxu0  ;;  %v6205_v63 = vsel %vm6176_vm10, %v6204_v57, %v6203_v2  ;;  %v5672_v50 = vsel %vm5433_vm0, %v5561_v49, %v5621_v40  ;;  %v5673_v37 = vsel %vm5637_vm3, %v5561_v49, %v5621_v40  ;;  %v5622_v55 = vrot.slane %v5562_v53, 2 }
 0x56f   :  { %v12003_v54 = vpop.f32.mrf.mxu3  ;;  %v6252_v36 = vpack.c.b16 %v6205_v63, %v6205_v63  ;;  %v5674_v6 = vrot.slane %v5673_v37, 2  ;;  %v8310_v59 = vrot.slane %v5672_v50, 9  ;;  %v12008_v21 = vpop.f32.mrf.mxu2  ;;  %v5623_v41 = vrot.slane %v5563_v23, 2 }
 0x570   :  { %v5126_v13 = vadd.f32 %v5125_v46, %v11594_v62  ;;  %v5675_v42 = vsel %vm5433_vm0, %v5562_v53, %v5622_v55  ;;  %v5676_v5 = vsel %vm5637_vm3, %v5562_v53, %v5622_v55  ;;  %v6131_v49 = vunpack.c.l.b16 %v6031_v32 }
 0x571   :  { %6266 = vst [vmem:[%s12140_s3 + $0x8] sm:$0xf] %v6252_v36  ;;  %v8311_v7 = vrot.slane %v5674_v6, 9  ;;  %v5932_v19 = vmax.f32 %v5672_v50, %v8310_v59  ;;  %v5677_v33 = vrot.slane %v5676_v5, 2  ;;  %v5678_v10 = vsel %vm5433_vm0, %v5563_v23, %v5623_v41 }
 0x572   :  { %v8312_v18 = vrot.slane %v5675_v42, 9  ;;  %v5199_v60 = vadd.f32 %v11970_v4, %v5126_v13  ;;  %v8314_v8 = vrot.slane %v5678_v10, 9 }
 0x573   :  { %v5933_v48 = vmax.f32 %v5674_v6, %v8311_v7  ;;  %v5982_v62 = vmax.f32 %v5932_v19, 0.0  ;;  %v8313_v0 = vrot.slane %v5677_v33, 9 }
 0x574   :  { %v5934_v29 = vmax.f32 %v5675_v42, %v8312_v18  ;;  %v5272_v45 = vadd.f32 %v11988_v51, %v5199_v60  ;;  %v5936_v28 = vmax.f32 %v5678_v10, %v8314_v8  ;;  %v5342_v51 = vadd.f32 %v11990_v24, %v5269_v22 }
 0x575   :  { %v5983_v38 = vmax.f32 %v5933_v48, 0.0  ;;  %v6032_v47 = vpack.c.bf16 %v5982_v62, %v5982_v62  ;;  %v5935_v52 = vmax.f32 %v5677_v33, %v8313_v0 }
 0x576   :  { %v5127_v39 = vpop.f32.mrf.mxu1  ;;  %v5346_v34 = vpop.f32.mrf.mxu0  ;;  %v5984_v3 = vmax.f32 %v5934_v29, 0.0  ;;  %v5345_v30 = vadd.f32 %v5344_v35, %v5272_v45  ;;  %v5986_v2 = vmax.f32 %v5936_v28, 0.0  ;;  %v5408_v62 = vrot.slane %v5342_v51, 4 }
 0x577   :  { %v5276_v31 = vpop.f32.mrf.mxu3  ;;  %v5128_v4 = vadd.f32 %v5127_v39, %v11615_v25  ;;  %v6033_v12 = vpack.c.bf16 %v5983_v38, %v5983_v38  ;;  %v6132_v57 = vunpack.c.l.b16 %v6032_v47  ;;  %v12022_v1 = vpop.f32.mrf.mxu2  ;;  %v5985_v44 = vmax.f32 %v5935_v52, 0.0 }
 0x578   :  { %v6034_v27 = vpack.c.bf16 %v5984_v3, %v5984_v3  ;;  %v5409_v40 = vrot.slane %v5345_v30, 4  ;;  %v6036_v61 = vpack.c.bf16 %v5986_v2, %v5986_v2  ;;  %v8281_v50 = vrot.slane %v5345_v30, 10 }
 0x579   :  { %v6133_v53 = vunpack.c.l.b16 %v6033_v12  ;;  %v6206_v46 = vrot.slane %v6132_v57, 7  ;;  %v5201_v63 = vadd.f32 %v11984_v9, %v5128_v4  ;;  %v6035_v23 = vpack.c.bf16 %v5985_v44, %v5985_v44 }
 0x57a   :  { %v6134_v35 = vunpack.c.l.b16 %v6034_v27  ;;  %v5486_v25 = vrot.slane %v5409_v40, 6  ;;  %v6136_v37 = vunpack.c.l.b16 %v6036_v61 }
 0x57b   :  { %v6207_v36 = vsel %vm6158_vm4, %v6206_v46, %v6131_v49  ;;  %v6208_v55 = vrot.slane %v6133_v53, 6  ;;  %v5274_v6 = vadd.f32 %v12003_v54, %v5201_v63  ;;  %v6135_v59 = vunpack.c.l.b16 %v6035_v23 }
 0x57c   :  { %v6210_v41 = vrot.slane %v6134_v35, 5  ;;  %v5487_v24 = vsel %vm11772_vm2, %v8281_v50, %v5486_v25  ;;  %v6214_v18 = vrot.slane %v6136_v37, 3  ;;  %v5488_v54 = vrot.slane %v5486_v25, 4 }
 0x57d   :  { %v6209_v13 = vsel %vm6161_vm5, %v6208_v55, %v6207_v36  ;;  %v5564_v42 = vmax.f32 %v5342_v51, %v5487_v24  ;;  %v12031_v9 = vadd.f32 %v5346_v34, %v5274_v6  ;;  %v6212_v33 = vrot.slane %v6135_v59, 4 }
 0x57e   :  { %v5130_v5 = vpop.f32.mrf.mxu1  ;;  %v5349_v7 = vpop.f32.mrf.mxu0  ;;  %v6211_v19 = vsel %vm6164_vm6, %v6210_v41, %v6209_v13 }
 0x57f   :  { %v5278_v26 = vpop.f32.mrf.mxu3  ;;  %v5131_v10 = vadd.f32 %v5130_v5, %v11624_v43  ;;  %v5624_v60 = vrot.slane %v5564_v42, 2  ;;  %v5489_v32 = vrot.slane %v12031_v9, 6  ;;  %v12036_v8 = vpop.f32.mrf.mxu2  ;;  %v6213_v48 = vsel %vm6167_vm7, %v6212_v33, %v6211_v19 }
 0x580   :  { %v6215_v29 = vsel %vm6170_vm8, %v6214_v18, %v6213_v48 }
 0x581   :  { %v5204_v0 = vadd.f32 %v11993_v20, %v5131_v10  ;;  %v5679_v22 = vsel %vm5433_vm0, %v5564_v42, %v5624_v60  ;;  %v5680_v45 = vsel %vm5637_vm3, %v5564_v42, %v5624_v60  ;;  %v5490_v43 = vsel %vm11772_vm2, %v5488_v54, %v5489_v32 }
 0x582   :  { %v5681_v28 = vrot.slane %v5680_v45, 2  ;;  %v8315_v38 = vrot.slane %v5679_v22, 9  ;;  %v5491_v47 = vrot.slane %v5489_v32, 4  ;;  %v5565_v39 = vmax.f32 %v5408_v62, %v5490_v43 }
 0x583   :  { %v5277_v34 = vadd.f32 %v5276_v31, %v5204_v0  ;;  %v5410_v43 = vrot.slane %v12031_v9, 4 }
 0x584   :  { %v8316_v52 = vrot.slane %v5681_v28, 9  ;;  %v5937_v3 = vmax.f32 %v5679_v22, %v8315_v38  ;;  %v5566_v4 = vmax.f32 %v5345_v30, %v5491_v47  ;;  %v5625_v49 = vrot.slane %v5565_v39, 2 }
 0x585   :  { %v12047_v20 = vadd.f32 %v5349_v7, %v5277_v34 }
 0x586   :  { %v5132_v12 = vpop.f32.mrf.mxu1  ;;  %v5351_v57 = vpop.f32.mrf.mxu0  ;;  %v5938_v44 = vmax.f32 %v5681_v28, %v8316_v52  ;;  %v5987_v27 = vmax.f32 %v5937_v3, 0.0  ;;  %v5626_v51 = vrot.slane %v5566_v4, 2  ;;  %v5682_v40 = vsel %vm5433_vm0, %v5565_v39, %v5625_v49 }
 0x587   :  { %v12045_v2 = vpop.f32.mrf.mxu3  ;;  %v5683_v61 = vsel %vm5637_vm3, %v5565_v39, %v5625_v49  ;;  %v8317_v53 = vrot.slane %v5682_v40, 9  ;;  %v5133_v31 = vadd.f32 %v5132_v12, %v11645_v16  ;;  %v12052_v46 = vpop.f32.mrf.mxu2  ;;  %v5411_v59 = vrot.slane %v12047_v20, 4 }
 0x588   :  { %v5988_v30 = vmax.f32 %v5938_v44, 0.0  ;;  %v6037_v63 = vpack.c.bf16 %v5987_v27, %v5987_v27  ;;  %v5684_v23 = vrot.slane %v5683_v61, 2  ;;  %v5685_v35 = vsel %vm5433_vm0, %v5566_v4, %v5626_v51 }
 0x589   :  { %v8319_v50 = vrot.slane %v5685_v35, 9  ;;  %v5939_v25 = vmax.f32 %v5682_v40, %v8317_v53  ;;  %v5206_v37 = vadd.f32 %v12008_v21, %v5133_v31  ;;  %v8282_v32 = vrot.slane %v5411_v59, 10 }
 0x58a   :  { %v6038_v36 = vpack.c.bf16 %v5988_v30, %v5988_v30  ;;  %v6137_v55 = vunpack.c.l.b16 %v6037_v63  ;;  %v8318_v6 = vrot.slane %v5684_v23, 9 }
 0x58b   :  { %v5941_v41 = vmax.f32 %v5685_v35, %v8319_v50  ;;  %v5989_v24 = vmax.f32 %v5939_v25, 0.0  ;;  %v5279_v13 = vadd.f32 %v5278_v26, %v5206_v37 }
 0x58c   :  { %v6138_v16 = vunpack.c.l.b16 %v6038_v36  ;;  %v6216_v42 = vrot.slane %v6137_v55, 2  ;;  %v5940_v5 = vmax.f32 %v5684_v23, %v8318_v6 }
 0x58d   :  { %v5991_v19 = vmax.f32 %v5941_v41, 0.0  ;;  %v5352_v33 = vadd.f32 %v5351_v57, %v5279_v13  ;;  %v6039_v48 = vpack.c.bf16 %v5989_v24, %v5989_v24 }
 0x58e   :  { %v5135_v10 = vpop.f32.mrf.mxu1  ;;  %v12057_v18 = vpop.f32.mrf.mxu0  ;;  %v6217_v54 = vsel %vm6173_vm9, %v6216_v42, %v6215_v29  ;;  %v6218_v21 = vrot.slane %v6138_v16, 1  ;;  %v5990_v60 = vmax.f32 %v5940_v5, 0.0 }
 0x58f   :  { %v5283_v7 = vpop.f32.mrf.mxu3  ;;  %v6041_v62 = vpack.c.bf16 %v5991_v19, %v5991_v19  ;;  %v5412_v0 = vrot.slane %v5352_v33, 4  ;;  %v5494_v22 = vrot.slane %v5352_v33, 6  ;;  %v12060_v45 = vpop.f32.mrf.mxu2  ;;  %v6139_v4 = vunpack.c.l.b16 %v6039_v48 }
 0x590   :  { %v6219_v26 = vsel %vm6176_vm10, %v6218_v21, %v6217_v54  ;;  %v6040_v28 = vpack.c.bf16 %v5990_v60, %v5990_v60  ;;  %v5136_v49 = vadd.f32 %v5135_v10, %v11654_v56 }
 0x591   :  { %v6253_v38 = vpack.c.b16 %v6219_v26, %v6219_v26  ;;  %v6141_v47 = vunpack.c.l.b16 %v6041_v62  ;;  %v5495_v39 = vsel %vm11772_vm2, %v8282_v32, %v5494_v22  ;;  %v5496_v29 = vrot.slane %v5494_v22, 4 }
 0x592   :  { %v6140_v34 = vunpack.c.l.b16 %v6040_v28  ;;  %v5497_v52 = vrot.slane %v5412_v0, 6  ;;  %v5567_v3 = vmax.f32 %v5410_v43, %v5495_v39  ;;  %v5209_v55 = vadd.f32 %v12022_v1, %v5136_v49 }
 0x593   :  { %6267 = vst [vmem:[%s12140_s3 + $0xc] sm:$0xf] %v6253_v38  ;;  %v6222_v51 = vrot.slane %v6141_v47, 6 }
 0x594   :  { %v6220_v12 = vrot.slane %v6140_v34, 7  ;;  %v5498_v9 = vsel %vm11772_vm2, %v5496_v29, %v5497_v52  ;;  %v5499_v57 = vrot.slane %v5497_v52, 4  ;;  %v5627_v44 = vrot.slane %v5567_v3, 2 }
 0x595   :  { %v5568_v40 = vmax.f32 %v12047_v20, %v5498_v9  ;;  %v5282_v1 = vadd.f32 %v12045_v2, %v5209_v55 }
 0x596   :  { %v5137_v61 = vpop.f32.mrf.mxu1  ;;  %v5356_v53 = vpop.f32.mrf.mxu0  ;;  %v6221_v31 = vsel %vm6158_vm4, %v6220_v12, %v6139_v4  ;;  %v5569_v30 = vmax.f32 %v5411_v59, %v5499_v57  ;;  %v5686_v63 = vsel %vm5433_vm0, %v5567_v3, %v5627_v44  ;;  %v5687_v23 = vsel %vm5637_vm3, %v5567_v3, %v5627_v44 }
 0x597   :  { %v5286_v27 = vpop.f32.mrf.mxu3  ;;  %v6223_v56 = vsel %vm6161_vm5, %v6222_v51, %v6221_v31  ;;  %v5628_v35 = vrot.slane %v5568_v40, 2  ;;  %v5688_v50 = vrot.slane %v5687_v23, 2  ;;  %v8320_v25 = vrot.slane %v5686_v63, 9  ;;  %v12077_v37 = vpop.f32.mrf.mxu2 }
 0x598   :  { %v5629_v36 = vrot.slane %v5569_v30, 2  ;;  %v5138_v20 = vadd.f32 %v5137_v61, %v11675_v14  ;;  %v5355_v2 = vadd.f32 %v12057_v18, %v5282_v1 }
 0x599   :  { %v5689_v6 = vsel %vm5433_vm0, %v5568_v40, %v5628_v35  ;;  %v5690_v59 = vsel %vm5637_vm3, %v5568_v40, %v5628_v35  ;;  %v8321_v41 = vrot.slane %v5688_v50, 9  ;;  %v5942_v24 = vmax.f32 %v5686_v63, %v8320_v25 }
 0x59a   :  { %v5691_v13 = vrot.slane %v5690_v59, 2  ;;  %v5692_v16 = vsel %vm5433_vm0, %v5569_v30, %v5629_v36  ;;  %v8322_v42 = vrot.slane %v5689_v6, 9  ;;  %v5211_v5 = vadd.f32 %v12036_v8, %v5138_v20 }
 0x59b   :  { %v8324_v19 = vrot.slane %v5692_v16, 9  ;;  %v5943_v33 = vmax.f32 %v5688_v50, %v8321_v41  ;;  %v5992_v10 = vmax.f32 %v5942_v24, 0.0  ;;  %v5413_v24 = vrot.slane %v5355_v2, 4 }
 0x59c   :  { %v8323_v54 = vrot.slane %v5691_v13, 9  ;;  %v5944_v21 = vmax.f32 %v5689_v6, %v8322_v42  ;;  %v5284_v14 = vadd.f32 %v5283_v7, %v5211_v5 }
 0x59d   :  { %v5946_v32 = vmax.f32 %v5692_v16, %v8324_v19  ;;  %v5993_v48 = vmax.f32 %v5943_v33, 0.0  ;;  %v6042_v62 = vpack.c.bf16 %v5992_v10, %v5992_v10 }
 0x59e   :  { %v5140_v0 = vpop.f32.mrf.mxu1  ;;  %v5359_v22 = vpop.f32.mrf.mxu0  ;;  %v5945_v26 = vmax.f32 %v5691_v13, %v8323_v54  ;;  %v5994_v43 = vmax.f32 %v5944_v21, 0.0  ;;  %v5357_v28 = vadd.f32 %v5356_v53, %v5284_v14 }
 0x59f   :  { %v5288_v60 = vpop.f32.mrf.mxu3  ;;  %v5141_v38 = vadd.f32 %v5140_v0, %v11684_v17  ;;  %v5996_v8 = vmax.f32 %v5946_v32, 0.0  ;;  %v6043_v47 = vpack.c.bf16 %v5993_v48, %v5993_v48  ;;  %v6142_v39 = vunpack.c.l.b16 %v6042_v62  ;;  %v5220_v29 = vpop.f32.mrf.mxu2 }
 0x5a0   :  { %v5995_v34 = vmax.f32 %v5945_v26, 0.0  ;;  %v6044_v52 = vpack.c.bf16 %v5994_v43, %v5994_v43  ;;  %v5414_v7 = vrot.slane %v5357_v28, 4  ;;  %v8283_v44 = vrot.slane %v5357_v28, 10 }
 0x5a1   :  { %v6046_v3 = vpack.c.bf16 %v5996_v8, %v5996_v8  ;;  %v6143_v4 = vunpack.c.l.b16 %v6043_v47  ;;  %v6224_v49 = vrot.slane %v6142_v39, 5  ;;  %v5214_v12 = vadd.f32 %v12052_v46, %v5141_v38 }
 0x5a2   :  { %v6045_v9 = vpack.c.bf16 %v5995_v34, %v5995_v34  ;;  %v6144_v57 = vunpack.c.l.b16 %v6044_v52  ;;  %v5502_v51 = vrot.slane %v5414_v7, 6 }
 0x5a3   :  { %v6146_v40 = vunpack.c.l.b16 %v6046_v3  ;;  %v6225_v17 = vsel %vm6164_vm6, %v6224_v49, %v6223_v56  ;;  %v6226_v61 = vrot.slane %v6143_v4, 4  ;;  %v5287_v53 = vadd.f32 %v5286_v27, %v5214_v12 }
 0x5a4   :  { %v6145_v31 = vunpack.c.l.b16 %v6045_v9  ;;  %v6228_v30 = vrot.slane %v6144_v57, 3  ;;  %v5503_v18 = vsel %vm11772_vm2, %v8283_v44, %v5502_v51  ;;  %v5504_v27 = vrot.slane %v5502_v51, 4 }
 0x5a5   :  { %v6227_v23 = vsel %vm6167_vm7, %v6226_v61, %v6225_v17  ;;  %v5570_v35 = vmax.f32 %v5355_v2, %v5503_v18  ;;  %v12093_v50 = vadd.f32 %v5359_v22, %v5287_v53  ;;  %v6232_v20 = vrot.slane %v6146_v40, 1 }
 0x5a6   :  { %v5142_v46 = vpop.f32.mrf.mxu1  ;;  %v5361_v25 = vpop.f32.mrf.mxu0  ;;  %v6229_v36 = vsel %vm6170_vm8, %v6228_v30, %v6227_v23  ;;  %v6230_v55 = vrot.slane %v6145_v31, 2 }
 0x5a7   :  { %v5291_v63 = vpop.f32.mrf.mxu3  ;;  %v5143_v56 = vadd.f32 %v5142_v46, %v11705_v58  ;;  %v5630_v6 = vrot.slane %v5570_v35, 2  ;;  %v5505_v59 = vrot.slane %v12093_v50, 6 }
 0x5a8   :  { %v6231_v41 = vsel %vm6173_vm9, %v6230_v55, %v6229_v36  ;;  %v5415_v55 = vrot.slane %v12093_v50, 4 }
 0x5a9   :  { %v5216_v13 = vadd.f32 %v12060_v45, %v5143_v56  ;;  %v6233_v16 = vsel %vm6176_vm10, %v6232_v20, %v6231_v41  ;;  %v5693_v42 = vsel %vm5433_vm0, %v5570_v35, %v5630_v6  ;;  %v5694_v5 = vsel %vm5637_vm3, %v5570_v35, %v5630_v6 }
 0x5aa   :  { %v5506_v19 = vsel %vm11772_vm2, %v5504_v27, %v5505_v59  ;;  %v6254_v58 = vpack.c.b16 %v6233_v16, %v6233_v16  ;;  %v5695_v33 = vrot.slane %v5694_v5, 2  ;;  %v8325_v10 = vrot.slane %v5693_v42, 9 }
 0x5ab   :  { %v5507_v54 = vrot.slane %v5505_v59, 4  ;;  %v5571_v21 = vmax.f32 %v5413_v24, %v5506_v19  ;;  %v5289_v1 = vadd.f32 %v5288_v60, %v5216_v13 }
 0x5ac   :  { %6268 = vst [vmem:[%s12140_s3 + $0x10] sm:$0xf] %v6254_v58  ;;  %v8326_v45 = vrot.slane %v5695_v33, 9  ;;  %v5947_v14 = vmax.f32 %v5693_v42, %v8325_v10 }
 0x5ad   :  { %v5572_v32 = vmax.f32 %v5357_v28, %v5507_v54  ;;  %v5631_v62 = vrot.slane %v5571_v21, 2  ;;  %v5362_v38 = vadd.f32 %v5361_v25, %v5289_v1 }
 0x5ae   :  { %v5145_v0 = vpop.f32.mrf.mxu1  ;;  %v5364_v22 = vpop.f32.mrf.mxu0  ;;  %v5948_v26 = vmax.f32 %v5695_v33, %v8326_v45  ;;  %v5997_v39 = vmax.f32 %v5947_v14, 0.0 }
 0x5af   :  { %v5293_v48 = vpop.f32.mrf.mxu3  ;;  %v5632_v43 = vrot.slane %v5572_v32, 2  ;;  %v5146_v8 = vadd.f32 %v5145_v0, %v11714_v11  ;;  %v5696_v47 = vsel %vm5433_vm0, %v5571_v21, %v5631_v62  ;;  %v5697_v60 = vsel %vm5637_vm3, %v5571_v21, %v5631_v62 }
 0x5b0   :  { %v5998_v29 = vmax.f32 %v5948_v26, 0.0  ;;  %v5698_v34 = vrot.slane %v5697_v60, 2  ;;  %v8327_v2 = vrot.slane %v5696_v47, 9  ;;  %v5416_v49 = vrot.slane %v5362_v38, 4 }
 0x5b1   :  { %v5699_v52 = vsel %vm5433_vm0, %v5572_v32, %v5632_v43  ;;  %v5219_v7 = vadd.f32 %v12077_v37, %v5146_v8  ;;  %v6047_v11 = vpack.c.bf16 %v5997_v39, %v5997_v39 }
 0x5b2   :  { %v8329_v28 = vrot.slane %v5699_v52, 9  ;;  %v6048_v3 = vpack.c.bf16 %v5998_v29, %v5998_v29  ;;  %v8328_v4 = vrot.slane %v5698_v34, 9  ;;  %v5949_v12 = vmax.f32 %v5696_v47, %v8327_v2 }
 0x5b3   :  { %v5292_v57 = vadd.f32 %v5291_v63, %v5219_v7  ;;  %v8284_v23 = vrot.slane %v5416_v49, 10  ;;  %v6147_v36 = vunpack.c.l.b16 %v6047_v11 }
 0x5b4   :  { %v5951_v9 = vmax.f32 %v5699_v52, %v8329_v28  ;;  %v6148_v44 = vunpack.c.l.b16 %v6048_v3  ;;  %v5950_v51 = vmax.f32 %v5698_v34, %v8328_v4  ;;  %v5999_v40 = vmax.f32 %v5949_v12, 0.0 }
 0x5b5   :  { %v5365_v61 = vadd.f32 %v5364_v22, %v5292_v57 }
 0x5b6   :  { %v6001_v17 = vmax.f32 %v5951_v9, 0.0  ;;  %v5147_v53 = vpop.f32.mrf.mxu1  ;;  %v5366_v31 = vpop.f32.mrf.mxu0  ;;  %v6234_v30 = vrot.slane %v6148_v44, 7  ;;  %v6000_v18 = vmax.f32 %v5950_v51, 0.0  ;;  %v6049_v35 = vpack.c.bf16 %v5999_v40, %v5999_v40 }
 0x5b7   :  { %v5417_v37 = vrot.slane %v5365_v61, 4  ;;  %v5510_v25 = vrot.slane %v5365_v61, 6 }
 0x5b8   :  { %v6051_v46 = vpack.c.bf16 %v6001_v17, %v6001_v17  ;;  %v6050_v56 = vpack.c.bf16 %v6000_v18, %v6000_v18  ;;  %v6149_v63 = vunpack.c.l.b16 %v6049_v35  ;;  %v6235_v13 = vsel %vm6158_vm4, %v6234_v30, %v6147_v36 }
 0x5b9   :  { %v5511_v27 = vsel %vm11772_vm2, %v8284_v23, %v5510_v25  ;;  %v5512_v6 = vrot.slane %v5510_v25, 4  ;;  %v5513_v41 = vrot.slane %v5417_v37, 6 }
 0x5ba   :  { %v6151_v20 = vunpack.c.l.b16 %v6051_v46  ;;  %v6150_v59 = vunpack.c.l.b16 %v6050_v56  ;;  %v5573_v24 = vmax.f32 %v5415_v55, %v5511_v27  ;;  %v6236_v16 = vrot.slane %v6149_v63, 6 }
 0x5bb   :  { %v5514_v5 = vsel %vm11772_vm2, %v5512_v6, %v5513_v41  ;;  %v5515_v19 = vrot.slane %v5513_v41, 4 }
 0x5bc   :  { %v6238_v42 = vrot.slane %v6150_v59, 5  ;;  %v5633_v58 = vrot.slane %v5573_v24, 2  ;;  %v6237_v50 = vsel %vm6161_vm5, %v6236_v16, %v6235_v13  ;;  %v6240_v33 = vrot.slane %v6151_v20, 4 }
 0x5bd   :  { %v5574_v10 = vmax.f32 %v5362_v38, %v5514_v5  ;;  %v5575_v21 = vmax.f32 %v5416_v49, %v5515_v19 }
 0x5be   :  { %v6239_v54 = vsel %vm6164_vm6, %v6238_v42, %v6237_v50  ;;  %v5700_v1 = vsel %vm5433_vm0, %v5573_v24, %v5633_v58  ;;  %v5701_v45 = vsel %vm5637_vm3, %v5573_v24, %v5633_v58 }
 0x5bf   :  { %v6241_v14 = vsel %vm6167_vm7, %v6240_v33, %v6239_v54  ;;  %v5634_v32 = vrot.slane %v5574_v10, 2  ;;  %v5702_v48 = vrot.slane %v5701_v45, 2  ;;  %v8330_v62 = vrot.slane %v5700_v1, 9 }
 0x5c0   :  { %v5635_v15 = vrot.slane %v5575_v21, 2 }
 0x5c1   :  { %v5703_v0 = vsel %vm5433_vm0, %v5574_v10, %v5634_v32  ;;  %v5704_v22 = vsel %vm5637_vm3, %v5574_v10, %v5634_v32  ;;  %v8331_v26 = vrot.slane %v5702_v48, 9  ;;  %v5952_v43 = vmax.f32 %v5700_v1, %v8330_v62 }
 0x5c2   :  { %v5705_v38 = vrot.slane %v5704_v22, 2  ;;  %v5706_v8 = vsel %vm5433_vm0, %v5575_v21, %v5635_v15  ;;  %v8332_v47 = vrot.slane %v5703_v0, 9 }
 0x5c3   :  { %v8334_v60 = vrot.slane %v5706_v8, 9  ;;  %v5953_v39 = vmax.f32 %v5702_v48, %v8331_v26  ;;  %v6002_v29 = vmax.f32 %v5952_v43, 0.0 }
 0x5c4   :  { %v8333_v34 = vrot.slane %v5705_v38, 9  ;;  %v5954_v52 = vmax.f32 %v5703_v0, %v8332_v47 }
 0x5c5   :  { %v5956_v2 = vmax.f32 %v5706_v8, %v8334_v60  ;;  %v6003_v28 = vmax.f32 %v5953_v39, 0.0  ;;  %v6052_v7 = vpack.c.bf16 %v6002_v29, %v6002_v29 }
 0x5c6   :  { %v5955_v3 = vmax.f32 %v5705_v38, %v8333_v34  ;;  %v6004_v4 = vmax.f32 %v5954_v52, 0.0 }
 0x5c7   :  { %v6006_v49 = vmax.f32 %v5956_v2, 0.0  ;;  %v6053_v12 = vpack.c.bf16 %v6003_v28, %v6003_v28  ;;  %v6152_v9 = vunpack.c.l.b16 %v6052_v7 }
 0x5c8   :  { %v6005_v57 = vmax.f32 %v5955_v3, 0.0  ;;  %v6054_v11 = vpack.c.bf16 %v6004_v4, %v6004_v4 }
 0x5c9   :  { %v6056_v44 = vpack.c.bf16 %v6006_v49, %v6006_v49  ;;  %v6153_v51 = vunpack.c.l.b16 %v6053_v12  ;;  %v6242_v40 = vrot.slane %v6152_v9, 3 }
 0x5ca   :  { %v6055_v17 = vpack.c.bf16 %v6005_v57, %v6005_v57  ;;  %v6154_v61 = vunpack.c.l.b16 %v6054_v11 }
 0x5cb   :  { %v6156_v53 = vunpack.c.l.b16 %v6056_v44  ;;  %v6243_v31 = vsel %vm6170_vm8, %v6242_v40, %v6241_v14  ;;  %v6244_v30 = vrot.slane %v6153_v51, 2 }
 0x5cc   :  { %v6155_v18 = vunpack.c.l.b16 %v6055_v17  ;;  %v6246_v23 = vrot.slane %v6154_v61, 1 }
 0x5cd   :  { %v6245_v35 = vsel %vm6173_vm9, %v6244_v30, %v6243_v31  ;;  %v6248_v46 = vrot.slane %v6156_v53, 7 }
 0x5ce   :  { %v6247_v37 = vsel %vm6176_vm10, %v6246_v23, %v6245_v35 }
 0x5cf   :  { %v6249_v25 = vsel %vm6158_vm4, %v6248_v46, %v6155_v18  ;;  %v6255_v36 = vpack.c.b16 %v6247_v37, %v6247_v37 }
 0x5d0   :  { %v6256_v55 = vpack.c.b16 %v6249_v25, %v6249_v25 }
 0x5d1   :  { %6269 = vst [vmem:[%s12140_s3 + $0x14] sm:$0xf] %v6255_v36 }
 0x5d2   :  { %6270 = vst [vmem:[%s12140_s3 + $0x18] sm:$0x1] %v6256_v55 }

// kernel: lenet_forward.5
= control target key start
LH: loop header
LB: loop body
LE: loop exit
PB: predicated region body
PF: predicated region fallthrough
CT: control target
= control target key end

     0   :  { %s4036_s0 = inlined_call_operand.vmem [shape: bf16[2,3200], index: 0, kind: input, shape index: {}]   ;;  %s4037_s1 = inlined_call_operand.vmem [shape: bf16[3200,128], index: 1, kind: input, shape index: {}]   ;;  %s4038_s2 = inlined_call_operand.vmem [shape: f32[1,128], index: 2, kind: input, shape index: {}]   ;;  %s4039_s3 = inlined_call_operand.vmem [shape: bf16[128,128], index: 3, kind: input, shape index: {}]   ;;  %s4040_s4 = inlined_call_operand.vmem [shape: f32[1,128], index: 4, kind: input, shape index: {}]   ;;  %s4041_s5 = inlined_call_operand.vmem [shape: bf16[128,128], index: 5, kind: input, shape index: {}]   ;;  %s4042_s6 = inlined_call_operand.vmem [shape: f32[1,128], index: 6, kind: input, shape index: {}]   ;;  %s4043_s7 = inlined_call_operand.hbm [shape: f32[2,128], index: 7, kind: output, shape index: {}]  }
   0x1   :  { %v3072_v0 = vld [vmem:[%s4037_s1 + $0x38] sm:$0xff]  ;;  %v3071_v4 = vld [vmem:[%s4037_s1 + $0x30] sm:$0xff]  ;;  %v3070_v8 = vld [vmem:[%s4037_s1 + $0x28] sm:$0xff] }
   0x2   :  { %v3088_v1 = vld [vmem:[%s4037_s1 + $0xb8] sm:$0xff]  ;;  %1693 = vmatpush.bf16.msra.mxu0 %v3072_v0  ;;  %v3087_v5 = vld [vmem:[%s4037_s1 + $0xb0] sm:$0xff]  ;;  %v3086_v9 = vld [vmem:[%s4037_s1 + $0xa8] sm:$0xff] }
   0x3   :  { %v3080_v2 = vld [vmem:[%s4037_s1 + $0x78] sm:$0xff]  ;;  %1719 = vmatpush.bf16.msra.mxu2 %v3088_v1  ;;  %v3079_v6 = vld [vmem:[%s4037_s1 + $0x70] sm:$0xff]  ;;  %v3078_v10 = vld [vmem:[%s4037_s1 + $0x68] sm:$0xff] }
   0x4   :  { %v3096_v3 = vld [vmem:[%s4037_s1 + $0xf8] sm:$0xff]  ;;  %1706 = vmatpush.bf16.msra.mxu1 %v3080_v2  ;;  %v3095_v7 = vld [vmem:[%s4037_s1 + $0xf0] sm:$0xff]  ;;  %v3094_v11 = vld [vmem:[%s4037_s1 + $0xe8] sm:$0xff] }
   0x5   :  { %1732 = vmatpush.bf16.msra.mxu3 %v3096_v3  ;;  %v3069_v12 = vld [vmem:[%s4037_s1 + $0x20] sm:$0xff]  ;;  %v3068_v16 = vld [vmem:[%s4037_s1 + $0x18] sm:$0xff]  ;;  %v3067_v21 = vld [vmem:[%s4037_s1 + $0x10] sm:$0xff] }
   0x6   :  { %1694 = vmatpush.bf16.msra.mxu0 %v3071_v4  ;;  %v3085_v13 = vld [vmem:[%s4037_s1 + $0xa0] sm:$0xff]  ;;  %v3084_v17 = vld [vmem:[%s4037_s1 + $0x98] sm:$0xff]  ;;  %v3083_v22 = vld [vmem:[%s4037_s1 + $0x90] sm:$0xff] }
   0x7   :  { %1720 = vmatpush.bf16.msra.mxu2 %v3087_v5  ;;  %v3077_v14 = vld [vmem:[%s4037_s1 + $0x60] sm:$0xff]  ;;  %v3076_v18 = vld [vmem:[%s4037_s1 + $0x58] sm:$0xff]  ;;  %v3075_v23 = vld [vmem:[%s4037_s1 + $0x50] sm:$0xff] }
   0x8   :  { %1707 = vmatpush.bf16.msra.mxu1 %v3079_v6  ;;  %v3093_v15 = vld [vmem:[%s4037_s1 + $0xe0] sm:$0xff]  ;;  %v3092_v19 = vld [vmem:[%s4037_s1 + $0xd8] sm:$0xff]  ;;  %v3091_v24 = vld [vmem:[%s4037_s1 + $0xd0] sm:$0xff] }
   0x9   :  { %1733 = vmatpush.bf16.msra.mxu3 %v3095_v7  ;;  %v27_v20 = vld [vmem:[%s4036_s0] sm:$0xff] }
   0xa   :  { %1695 = vmatpush.bf16.msra.mxu0 %v3070_v8  ;;  %436 = vst [vmem:[#allocation1] ss:$9 sm:$0xff] %v27_v20 }
   0xb   :  { %1721 = vmatpush.bf16.msra.mxu2 %v3086_v9 }
   0xc   :  { %1708 = vmatpush.bf16.msra.mxu1 %v3078_v10 }
   0xd   :  { %1734 = vmatpush.bf16.msra.mxu3 %v3094_v11 }
   0xe   :  { %1696 = vmatpush.bf16.msra.mxu0 %v3069_v12 }
   0xf   :  { %1722 = vmatpush.bf16.msra.mxu2 %v3085_v13 }
  0x10   :  { %1709 = vmatpush.bf16.msra.mxu1 %v3077_v14 }
  0x11   :  { %1735 = vmatpush.bf16.msra.mxu3 %v3093_v15 }
  0x12   :  { %1697 = vmatpush.bf16.msra.mxu0 %v3068_v16 }
  0x13   :  { %1723 = vmatpush.bf16.msra.mxu2 %v3084_v17 }
  0x14   :  { %1710 = vmatpush.bf16.msra.mxu1 %v3076_v18 }
  0x15   :  { %1736 = vmatpush.bf16.msra.mxu3 %v3092_v19 }
  0x16   :  { %12 = vsyncpa [#allocation3], 0  ;;  %1698 = vmatpush.bf16.msra.mxu0 %v3067_v21  ;;  %v3066_v25 = vld [vmem:[%s4037_s1 + $0x8] sm:$0xff]  ;;  %v3065_v29 = vld [vmem:[%s4037_s1] sm:$0xff]  ;;  %s3311_s23 = smov [#allocation2]  }
  0x17   :  { %1724 = vmatpush.bf16.msra.mxu2 %v3083_v22  ;;  %v3082_v26 = vld [vmem:[%s4037_s1 + $0x88] sm:$0xff]  ;;  %v3081_v30 = vld [vmem:[%s4037_s1 + $0x80] sm:$0xff]  ;;  %v3104_v31 = vld [vmem:[%s4037_s1 + $0x138] sm:$0xff]  ;;  %s2190_s24 = sshll.u32 %s3311_s23, 4  ;;  %s2191_s24 = int_to_ptr.vmem [resolvable:$true] %s2190_s24 }
  0x18   :  { %1711 = vmatpush.bf16.msra.mxu1 %v3075_v23  ;;  %v3074_v27 = vld [vmem:[%s4037_s1 + $0x48] sm:$0xff]  ;;  %v3120_v32 = vld [vmem:[%s4037_s1 + $0x1b8] sm:$0xff]  ;;  %v3073_v33 = vld [vmem:[%s4037_s1 + $0x40] sm:$0xff] }
  0x19   :  { %1737 = vmatpush.bf16.msra.mxu3 %v3091_v24  ;;  %v3090_v28 = vld [vmem:[%s4037_s1 + $0xc8] sm:$0xff]  ;;  %v3089_v34 = vld [vmem:[%s4037_s1 + $0xc0] sm:$0xff]  ;;  %v3112_v35 = vld [vmem:[%s4037_s1 + $0x178] sm:$0xff] }
  0x1a   :  { %1699 = vmatpush.bf16.msra.mxu0 %v3066_v25  ;;  %v3128_v36 = vld [vmem:[%s4037_s1 + $0x1f8] sm:$0xff]  ;;  %v3103_v37 = vld [vmem:[%s4037_s1 + $0x130] sm:$0xff]  ;;  %v437_v40 = vld [vmem:[#allocation1] sm:$0xff] }
  0x1b   :  { %1725 = vmatpush.bf16.msra.mxu2 %v3082_v26  ;;  %v3119_v38 = vld [vmem:[%s4037_s1 + $0x1b0] sm:$0xff]  ;;  %v440_v43 = vld [vmem:[#allocation1 + $0x1b] sm:$0xff]  ;;  %v3102_v45 = vld [vmem:[%s4037_s1 + $0x128] sm:$0xff] }
  0x1c   :  { %1712 = vmatpush.bf16.msra.mxu1 %v3074_v27  ;;  %v439_v39 = vld [vmem:[#allocation1 + $0x12] sm:$0xff]  ;;  %v438_v44 = vld [vmem:[#allocation1 + $0x9] sm:$0xff]  ;;  %v3485_v49 = vld [vmem:[#allocation1 + $0x3f] sm:$0xff] }
  0x1d   :  { %1738 = vmatpush.bf16.msra.mxu3 %v3090_v28  ;;  %v3111_v41 = vld [vmem:[%s4037_s1 + $0x170] sm:$0xff]  ;;  %v3118_v46 = vld [vmem:[%s4037_s1 + $0x1a8] sm:$0xff]  ;;  %v3101_v54 = vld [vmem:[%s4037_s1 + $0x120] sm:$0xff] }
  0x1e   :  { %1700 = vmatpush.bf16.msra.mxu0 %v3065_v29  ;;  %v3127_v42 = vld [vmem:[%s4037_s1 + $0x1f0] sm:$0xff]  ;;  %v3483_v48 = vld [vmem:[#allocation1 + $0x24] sm:$0xff]  ;;  %v3100_v58 = vld [vmem:[%s4037_s1 + $0x118] sm:$0xff] }
  0x1f   :  { %1726 = vmatpush.bf16.msra.mxu2 %v3081_v30  ;;  %v3481_v47 = vld [vmem:[#allocation1 + $0x36] sm:$0xff]  ;;  %v28_v50 = vld [vmem:[%s4036_s0 + $0x8] sm:$0xff]  ;;  %v3117_v55 = vld [vmem:[%s4037_s1 + $0x1a0] sm:$0xff] }
  0x20   :  { %1713 = vmatpush.bf16.msra.mxu1 %v3073_v33  ;;  %v3490_v51 = vld [vmem:[#allocation1 + $0x2d] sm:$0xff]  ;;  %v3109_v56 = vld [vmem:[%s4037_s1 + $0x160] sm:$0xff]  ;;  %v3116_v59 = vld [vmem:[%s4037_s1 + $0x198] sm:$0xff] }
  0x21   :  { %1739 = vmatpush.bf16.msra.mxu3 %v3089_v34  ;;  %1701 = vmatmul.bf16.vlgmr.msra.gmra.mxu0 %v437_v40  ;;  %v3110_v52 = vld [vmem:[%s4037_s1 + $0x168] sm:$0xff]  ;;  %446 = vst [vmem:[#allocation1] ss:$9 sm:$0xff] %v28_v50  ;;  %v3125_v57 = vld [vmem:[%s4037_s1 + $0x1e0] sm:$0xff]  ;;  %v3108_v60 = vld [vmem:[%s4037_s1 + $0x158] sm:$0xff] }
  0x22   :  { %1745 = vmatpush.bf16.msrb.mxu0 %v3104_v31  ;;  %1727 = vmatmul.bf16.vlgmr.msra.gmra.mxu2 %v439_v39  ;;  %v3126_v53 = vld [vmem:[%s4037_s1 + $0x1e8] sm:$0xff]  ;;  %v3124_v61 = vld [vmem:[%s4037_s1 + $0x1d8] sm:$0xff]  ;;  %v3099_v62 = vld [vmem:[%s4037_s1 + $0x110] sm:$0xff] }
  0x23   :  { %1771 = vmatpush.bf16.msrb.mxu2 %v3120_v32  ;;  %1714 = vmatmul.bf16.vlgmr.msra.gmra.mxu1 %v438_v44  ;;  %v3115_v63 = vld [vmem:[%s4037_s1 + $0x190] sm:$0xff]  ;;  %v3098_v2 = vld [vmem:[%s4037_s1 + $0x108] sm:$0xff]  ;;  %v3097_v6 = vld [vmem:[%s4037_s1 + $0x100] sm:$0xff] }
  0x24   :  { %1758 = vmatpush.bf16.msrb.mxu1 %v3112_v35  ;;  %1740 = vmatmul.bf16.vlgmr.msra.gmra.mxu3 %v440_v43  ;;  %v3107_v0 = vld [vmem:[%s4037_s1 + $0x150] sm:$0xff]  ;;  %v3114_v3 = vld [vmem:[%s4037_s1 + $0x188] sm:$0xff]  ;;  %v3113_v7 = vld [vmem:[%s4037_s1 + $0x180] sm:$0xff] }
  0x25   :  { %1784 = vmatpush.bf16.msrb.mxu3 %v3128_v36  ;;  %v3123_v1 = vld [vmem:[%s4037_s1 + $0x1d0] sm:$0xff]  ;;  %v3106_v4 = vld [vmem:[%s4037_s1 + $0x148] sm:$0xff]  ;;  %v3136_v8 = vld [vmem:[%s4037_s1 + $0x238] sm:$0xff] }
  0x26   :  { %1746 = vmatpush.bf16.msrb.mxu0 %v3103_v37  ;;  %v3122_v5 = vld [vmem:[%s4037_s1 + $0x1c8] sm:$0xff]  ;;  %v3152_v9 = vld [vmem:[%s4037_s1 + $0x2b8] sm:$0xff]  ;;  %v3105_v10 = vld [vmem:[%s4037_s1 + $0x140] sm:$0xff] }
  0x27   :  { %1772 = vmatpush.bf16.msrb.mxu2 %v3119_v38  ;;  %v3121_v11 = vld [vmem:[%s4037_s1 + $0x1c0] sm:$0xff]  ;;  %v3144_v12 = vld [vmem:[%s4037_s1 + $0x278] sm:$0xff]  ;;  %v3135_v14 = vld [vmem:[%s4037_s1 + $0x230] sm:$0xff] }
  0x28   :  { %1759 = vmatpush.bf16.msrb.mxu1 %v3111_v41  ;;  %v3160_v13 = vld [vmem:[%s4037_s1 + $0x2f8] sm:$0xff]  ;;  %v3151_v15 = vld [vmem:[%s4037_s1 + $0x2b0] sm:$0xff]  ;;  %v3134_v18 = vld [vmem:[%s4037_s1 + $0x228] sm:$0xff] }
  0x29   :  { %1785 = vmatpush.bf16.msrb.mxu3 %v3127_v42  ;;  %v3143_v16 = vld [vmem:[%s4037_s1 + $0x270] sm:$0xff]  ;;  %v3150_v19 = vld [vmem:[%s4037_s1 + $0x2a8] sm:$0xff]  ;;  %v3133_v22 = vld [vmem:[%s4037_s1 + $0x220] sm:$0xff] }
  0x2a   :  { %1747 = vmatpush.bf16.msrb.mxu0 %v3102_v45  ;;  %v3159_v17 = vld [vmem:[%s4037_s1 + $0x2f0] sm:$0xff]  ;;  %v3142_v20 = vld [vmem:[%s4037_s1 + $0x268] sm:$0xff]  ;;  %v3149_v23 = vld [vmem:[%s4037_s1 + $0x2a0] sm:$0xff] }
  0x2b   :  { %1773 = vmatpush.bf16.msrb.mxu2 %v3118_v46  ;;  %v3158_v21 = vld [vmem:[%s4037_s1 + $0x2e8] sm:$0xff]  ;;  %v3141_v24 = vld [vmem:[%s4037_s1 + $0x260] sm:$0xff]  ;;  %v3132_v26 = vld [vmem:[%s4037_s1 + $0x218] sm:$0xff] }
  0x2c   :  { %1760 = vmatpush.bf16.msrb.mxu1 %v3110_v52  ;;  %v3157_v25 = vld [vmem:[%s4037_s1 + $0x2e0] sm:$0xff]  ;;  %v3148_v27 = vld [vmem:[%s4037_s1 + $0x298] sm:$0xff]  ;;  %v3131_v30 = vld [vmem:[%s4037_s1 + $0x210] sm:$0xff] }
  0x2d   :  { %1786 = vmatpush.bf16.msrb.mxu3 %v3126_v53  ;;  %v3140_v28 = vld [vmem:[%s4037_s1 + $0x258] sm:$0xff]  ;;  %v3147_v31 = vld [vmem:[%s4037_s1 + $0x290] sm:$0xff]  ;;  %v3130_v34 = vld [vmem:[%s4037_s1 + $0x208] sm:$0xff] }
  0x2e   :  { %1748 = vmatpush.bf16.msrb.mxu0 %v3101_v54  ;;  %v3156_v29 = vld [vmem:[%s4037_s1 + $0x2d8] sm:$0xff]  ;;  %v3139_v32 = vld [vmem:[%s4037_s1 + $0x250] sm:$0xff]  ;;  %v3146_v35 = vld [vmem:[%s4037_s1 + $0x288] sm:$0xff] }
  0x2f   :  { %1774 = vmatpush.bf16.msrb.mxu2 %v3117_v55  ;;  %v3155_v33 = vld [vmem:[%s4037_s1 + $0x2d0] sm:$0xff]  ;;  %v3138_v36 = vld [vmem:[%s4037_s1 + $0x248] sm:$0xff]  ;;  %v3129_v38 = vld [vmem:[%s4037_s1 + $0x200] sm:$0xff] }
  0x30   :  { %1761 = vmatpush.bf16.msrb.mxu1 %v3109_v56  ;;  %v3154_v37 = vld [vmem:[%s4037_s1 + $0x2c8] sm:$0xff]  ;;  %v3145_v39 = vld [vmem:[%s4037_s1 + $0x280] sm:$0xff]  ;;  %v3168_v40 = vld [vmem:[%s4037_s1 + $0x338] sm:$0xff] }
  0x31   :  { %1787 = vmatpush.bf16.msrb.mxu3 %v3125_v57  ;;  %v3184_v41 = vld [vmem:[%s4037_s1 + $0x3b8] sm:$0xff]  ;;  %v3137_v42 = vld [vmem:[%s4037_s1 + $0x240] sm:$0xff]  ;;  %v3167_v50 = vld [vmem:[%s4037_s1 + $0x330] sm:$0xff] }
  0x32   :  { %1749 = vmatpush.bf16.msrb.mxu0 %v3100_v58  ;;  %v3153_v43 = vld [vmem:[%s4037_s1 + $0x2c0] sm:$0xff]  ;;  %v3176_v44 = vld [vmem:[%s4037_s1 + $0x378] sm:$0xff]  ;;  %v3175_v52 = vld [vmem:[%s4037_s1 + $0x370] sm:$0xff] }
  0x33   :  { %1775 = vmatpush.bf16.msrb.mxu2 %v3116_v59  ;;  %v447_v45 = vld [vmem:[#allocation1] sm:$0xff]  ;;  %v449_v46 = vld [vmem:[#allocation1 + $0x12] sm:$0xff]  ;;  %v3166_v54 = vld [vmem:[%s4037_s1 + $0x328] sm:$0xff] }
  0x34   :  { %1762 = vmatpush.bf16.msrb.mxu1 %v3108_v60  ;;  %v3191_v53 = vld [vmem:[%s4037_s1 + $0x3f0] sm:$0xff]  ;;  %v3182_v55 = vld [vmem:[%s4037_s1 + $0x3a8] sm:$0xff]  ;;  %v3165_v58 = vld [vmem:[%s4037_s1 + $0x320] sm:$0xff] }
  0x35   :  { %1788 = vmatpush.bf16.msrb.mxu3 %v3124_v61  ;;  %v3174_v56 = vld [vmem:[%s4037_s1 + $0x368] sm:$0xff]  ;;  %v3181_v59 = vld [vmem:[%s4037_s1 + $0x3a0] sm:$0xff] }
  0x36   :  { %1750 = vmatpush.bf16.msrb.mxu0 %v3099_v62  ;;  %v3190_v57 = vld [vmem:[%s4037_s1 + $0x3e8] sm:$0xff]  ;;  %v3173_v60 = vld [vmem:[%s4037_s1 + $0x360] sm:$0xff]  ;;  %v3164_v62 = vld [vmem:[%s4037_s1 + $0x318] sm:$0xff] }
  0x37   :  { %1776 = vmatpush.bf16.msrb.mxu2 %v3115_v63  ;;  %v3189_v61 = vld [vmem:[%s4037_s1 + $0x3e0] sm:$0xff]  ;;  %v3180_v63 = vld [vmem:[%s4037_s1 + $0x398] sm:$0xff] }
  0x38   :  { %1763 = vmatpush.bf16.msrb.mxu1 %v3107_v0  ;;  %v3172_v0 = vld [vmem:[%s4037_s1 + $0x358] sm:$0xff] }
  0x39   :  { %1789 = vmatpush.bf16.msrb.mxu3 %v3123_v1  ;;  %v3188_v1 = vld [vmem:[%s4037_s1 + $0x3d8] sm:$0xff] }
  0x3a   :  { %1751 = vmatpush.bf16.msrb.mxu0 %v3098_v2  ;;  %v3163_v2 = vld [vmem:[%s4037_s1 + $0x310] sm:$0xff] }
  0x3b   :  { %1777 = vmatpush.bf16.msrb.mxu2 %v3114_v3  ;;  %v3179_v3 = vld [vmem:[%s4037_s1 + $0x390] sm:$0xff] }
  0x3c   :  { %1764 = vmatpush.bf16.msrb.mxu1 %v3106_v4  ;;  %v3171_v4 = vld [vmem:[%s4037_s1 + $0x350] sm:$0xff] }
  0x3d   :  { %1790 = vmatpush.bf16.msrb.mxu3 %v3122_v5  ;;  %v3187_v5 = vld [vmem:[%s4037_s1 + $0x3d0] sm:$0xff] }
  0x3e   :  { %1752 = vmatpush.bf16.msrb.mxu0 %v3097_v6  ;;  %v3162_v6 = vld [vmem:[%s4037_s1 + $0x308] sm:$0xff] }
  0x3f   :  { %1778 = vmatpush.bf16.msrb.mxu2 %v3113_v7  ;;  %v3178_v7 = vld [vmem:[%s4037_s1 + $0x388] sm:$0xff] }
  0x40   :  { %1765 = vmatpush.bf16.msrb.mxu1 %v3105_v10  ;;  %v452_v10 = vld [vmem:[#allocation1 + $0x2d] sm:$0xff] }
  0x41   :  { %1791 = vmatpush.bf16.msrb.mxu3 %v3121_v11  ;;  %1753 = vmatmul.bf16.vlgmr.msrb.gmra.mxu0 %v3483_v48  ;;  %v448_v48 = vld [vmem:[#allocation1 + $0x9] sm:$0xff]  ;;  %v454_v11 = vld [vmem:[#allocation1 + $0x3f] sm:$0xff] }
  0x42   :  { %1797 = vmatpush.bf16.msra.mxu0 %v3136_v8  ;;  %1779 = vmatmul.bf16.vlgmr.msrb.gmra.mxu2 %v3481_v47  ;;  %v3192_v47 = vld [vmem:[%s4037_s1 + $0x3f8] sm:$0xff]  ;;  %v451_v8 = vld [vmem:[#allocation1 + $0x24] sm:$0xff] }
  0x43   :  { %1823 = vmatpush.bf16.msra.mxu2 %v3152_v9  ;;  %1766 = vmatmul.bf16.vlgmr.msrb.gmra.mxu1 %v3490_v51  ;;  %v3183_v51 = vld [vmem:[%s4037_s1 + $0x3b0] sm:$0xff] }
  0x44   :  { %1810 = vmatpush.bf16.msra.mxu1 %v3144_v12  ;;  %1792 = vmatmul.bf16.vlgmr.msrb.gmra.mxu3 %v3485_v49  ;;  %v450_v49 = vld [vmem:[#allocation1 + $0x1b] sm:$0xff]  ;;  %v29_v12 = vld [vmem:[%s4036_s0 + $0x10] sm:$0xff] }
  0x45   :  { %1836 = vmatpush.bf16.msra.mxu3 %v3160_v13  ;;  %v453_v9 = vld [vmem:[#allocation1 + $0x36] sm:$0xff]  ;;  %v3170_v13 = vld [vmem:[%s4037_s1 + $0x348] sm:$0xff] }
  0x46   :  { %1798 = vmatpush.bf16.msra.mxu0 %v3135_v14  ;;  %456 = vst [vmem:[#allocation1] ss:$9 sm:$0xff] %v29_v12  ;;  %v3186_v14 = vld [vmem:[%s4037_s1 + $0x3c8] sm:$0xff]  ;;  %v3244_v12 = vld [vmem:[%s4037_s1 + $0x598] sm:$0xff] }
  0x47   :  { %1824 = vmatpush.bf16.msra.mxu2 %v3151_v15  ;;  %v3161_v15 = vld [vmem:[%s4037_s1 + $0x300] sm:$0xff] }
  0x48   :  { %1811 = vmatpush.bf16.msra.mxu1 %v3143_v16  ;;  %v3177_v16 = vld [vmem:[%s4037_s1 + $0x380] sm:$0xff] }
  0x49   :  { %1837 = vmatpush.bf16.msra.mxu3 %v3159_v17  ;;  %v3200_v17 = vld [vmem:[%s4037_s1 + $0x438] sm:$0xff] }
  0x4a   :  { %1799 = vmatpush.bf16.msra.mxu0 %v3134_v18  ;;  %v3216_v18 = vld [vmem:[%s4037_s1 + $0x4b8] sm:$0xff] }
  0x4b   :  { %1825 = vmatpush.bf16.msra.mxu2 %v3150_v19  ;;  %v3169_v19 = vld [vmem:[%s4037_s1 + $0x340] sm:$0xff] }
  0x4c   :  { %1812 = vmatpush.bf16.msra.mxu1 %v3142_v20  ;;  %v3185_v20 = vld [vmem:[%s4037_s1 + $0x3c0] sm:$0xff] }
  0x4d   :  { %1838 = vmatpush.bf16.msra.mxu3 %v3158_v21  ;;  %v3208_v21 = vld [vmem:[%s4037_s1 + $0x478] sm:$0xff] }
  0x4e   :  { %1800 = vmatpush.bf16.msra.mxu0 %v3133_v22  ;;  %v3224_v22 = vld [vmem:[%s4037_s1 + $0x4f8] sm:$0xff] }
  0x4f   :  { %1826 = vmatpush.bf16.msra.mxu2 %v3149_v23  ;;  %v3199_v23 = vld [vmem:[%s4037_s1 + $0x430] sm:$0xff] }
  0x50   :  { %1813 = vmatpush.bf16.msra.mxu1 %v3141_v24  ;;  %v3215_v24 = vld [vmem:[%s4037_s1 + $0x4b0] sm:$0xff] }
  0x51   :  { %1839 = vmatpush.bf16.msra.mxu3 %v3157_v25  ;;  %v3207_v25 = vld [vmem:[%s4037_s1 + $0x470] sm:$0xff] }
  0x52   :  { %1801 = vmatpush.bf16.msra.mxu0 %v3132_v26  ;;  %v3223_v26 = vld [vmem:[%s4037_s1 + $0x4f0] sm:$0xff] }
  0x53   :  { %1827 = vmatpush.bf16.msra.mxu2 %v3148_v27  ;;  %v3198_v27 = vld [vmem:[%s4037_s1 + $0x428] sm:$0xff] }
  0x54   :  { %1814 = vmatpush.bf16.msra.mxu1 %v3140_v28  ;;  %v3214_v28 = vld [vmem:[%s4037_s1 + $0x4a8] sm:$0xff] }
  0x55   :  { %1840 = vmatpush.bf16.msra.mxu3 %v3156_v29  ;;  %v3206_v29 = vld [vmem:[%s4037_s1 + $0x468] sm:$0xff] }
  0x56   :  { %1802 = vmatpush.bf16.msra.mxu0 %v3131_v30  ;;  %v3222_v30 = vld [vmem:[%s4037_s1 + $0x4e8] sm:$0xff] }
  0x57   :  { %1828 = vmatpush.bf16.msra.mxu2 %v3147_v31  ;;  %v3197_v31 = vld [vmem:[%s4037_s1 + $0x420] sm:$0xff] }
  0x58   :  { %1815 = vmatpush.bf16.msra.mxu1 %v3139_v32  ;;  %v3213_v32 = vld [vmem:[%s4037_s1 + $0x4a0] sm:$0xff] }
  0x59   :  { %1841 = vmatpush.bf16.msra.mxu3 %v3155_v33  ;;  %v3205_v33 = vld [vmem:[%s4037_s1 + $0x460] sm:$0xff] }
  0x5a   :  { %1803 = vmatpush.bf16.msra.mxu0 %v3130_v34  ;;  %v3221_v34 = vld [vmem:[%s4037_s1 + $0x4e0] sm:$0xff] }
  0x5b   :  { %1829 = vmatpush.bf16.msra.mxu2 %v3146_v35  ;;  %v3196_v35 = vld [vmem:[%s4037_s1 + $0x418] sm:$0xff] }
  0x5c   :  { %1816 = vmatpush.bf16.msra.mxu1 %v3138_v36  ;;  %v3212_v36 = vld [vmem:[%s4037_s1 + $0x498] sm:$0xff] }
  0x5d   :  { %1842 = vmatpush.bf16.msra.mxu3 %v3154_v37  ;;  %v3204_v37 = vld [vmem:[%s4037_s1 + $0x458] sm:$0xff] }
  0x5e   :  { %1804 = vmatpush.bf16.msra.mxu0 %v3129_v38  ;;  %v3220_v38 = vld [vmem:[%s4037_s1 + $0x4d8] sm:$0xff] }
  0x5f   :  { %1830 = vmatpush.bf16.msra.mxu2 %v3145_v39  ;;  %v3195_v39 = vld [vmem:[%s4037_s1 + $0x410] sm:$0xff] }
  0x60   :  { %1817 = vmatpush.bf16.msra.mxu1 %v3137_v42  ;;  %v3219_v42 = vld [vmem:[%s4037_s1 + $0x4d0] sm:$0xff] }
  0x61   :  { %1843 = vmatpush.bf16.msra.mxu3 %v3153_v43  ;;  %1805 = vmatmul.bf16.vlgmr.msra.gmra.mxu0 %v447_v45  ;;  %v3194_v43 = vld [vmem:[%s4037_s1 + $0x408] sm:$0xff] }
  0x62   :  { %1849 = vmatpush.bf16.msrb.mxu0 %v3168_v40  ;;  %1831 = vmatmul.bf16.vlgmr.msra.gmra.mxu2 %v449_v46  ;;  %v3211_v40 = vld [vmem:[%s4037_s1 + $0x490] sm:$0xff]  ;;  %v3202_v45 = vld [vmem:[%s4037_s1 + $0x448] sm:$0xff] }
  0x63   :  { %1875 = vmatpush.bf16.msrb.mxu2 %v3184_v41  ;;  %1818 = vmatmul.bf16.vlgmr.msra.gmra.mxu1 %v448_v48  ;;  %v3203_v41 = vld [vmem:[%s4037_s1 + $0x450] sm:$0xff]  ;;  %v3218_v46 = vld [vmem:[%s4037_s1 + $0x4c8] sm:$0xff]  ;;  %v3209_v48 = vld [vmem:[%s4037_s1 + $0x480] sm:$0xff] }
  0x64   :  { %1862 = vmatpush.bf16.msrb.mxu1 %v3176_v44  ;;  %1844 = vmatmul.bf16.vlgmr.msra.gmra.mxu3 %v450_v49  ;;  %v3210_v44 = vld [vmem:[%s4037_s1 + $0x488] sm:$0xff]  ;;  %v3232_v49 = vld [vmem:[%s4037_s1 + $0x538] sm:$0xff] }
  0x65   :  { %1888 = vmatpush.bf16.msrb.mxu3 %v3192_v47  ;;  %v3193_v47 = vld [vmem:[%s4037_s1 + $0x400] sm:$0xff] }
  0x66   :  { %1850 = vmatpush.bf16.msrb.mxu0 %v3167_v50  ;;  %v3248_v50 = vld [vmem:[%s4037_s1 + $0x5b8] sm:$0xff] }
  0x67   :  { %1876 = vmatpush.bf16.msrb.mxu2 %v3183_v51  ;;  %v3201_v51 = vld [vmem:[%s4037_s1 + $0x440] sm:$0xff] }
  0x68   :  { %1863 = vmatpush.bf16.msrb.mxu1 %v3175_v52  ;;  %v3217_v52 = vld [vmem:[%s4037_s1 + $0x4c0] sm:$0xff] }
  0x69   :  { %1889 = vmatpush.bf16.msrb.mxu3 %v3191_v53  ;;  %v3240_v53 = vld [vmem:[%s4037_s1 + $0x578] sm:$0xff] }
  0x6a   :  { %1851 = vmatpush.bf16.msrb.mxu0 %v3166_v54  ;;  %v457_v54 = vld [vmem:[#allocation1] sm:$0xff] }
  0x6b   :  { %1877 = vmatpush.bf16.msrb.mxu2 %v3182_v55  ;;  %v459_v55 = vld [vmem:[#allocation1 + $0x12] sm:$0xff] }
  0x6c   :  { %1864 = vmatpush.bf16.msrb.mxu1 %v3174_v56  ;;  %v3256_v56 = vld [vmem:[%s4037_s1 + $0x5f8] sm:$0xff] }
  0x6d   :  { %1890 = vmatpush.bf16.msrb.mxu3 %v3190_v57  ;;  %v458_v57 = vld [vmem:[#allocation1 + $0x9] sm:$0xff] }
  0x6e   :  { %1852 = vmatpush.bf16.msrb.mxu0 %v3165_v58  ;;  %v460_v58 = vld [vmem:[#allocation1 + $0x1b] sm:$0xff] }
  0x6f   :  { %1878 = vmatpush.bf16.msrb.mxu2 %v3181_v59  ;;  %v3231_v59 = vld [vmem:[%s4037_s1 + $0x530] sm:$0xff] }
  0x70   :  { %1865 = vmatpush.bf16.msrb.mxu1 %v3173_v60  ;;  %v3247_v60 = vld [vmem:[%s4037_s1 + $0x5b0] sm:$0xff] }
  0x71   :  { %1891 = vmatpush.bf16.msrb.mxu3 %v3189_v61  ;;  %v3239_v61 = vld [vmem:[%s4037_s1 + $0x570] sm:$0xff] }
  0x72   :  { %1853 = vmatpush.bf16.msrb.mxu0 %v3164_v62  ;;  %v3255_v62 = vld [vmem:[%s4037_s1 + $0x5f0] sm:$0xff] }
  0x73   :  { %1879 = vmatpush.bf16.msrb.mxu2 %v3180_v63  ;;  %v3230_v63 = vld [vmem:[%s4037_s1 + $0x528] sm:$0xff] }
  0x74   :  { %1866 = vmatpush.bf16.msrb.mxu1 %v3172_v0  ;;  %v3246_v0 = vld [vmem:[%s4037_s1 + $0x5a8] sm:$0xff] }
  0x75   :  { %1892 = vmatpush.bf16.msrb.mxu3 %v3188_v1  ;;  %v3238_v1 = vld [vmem:[%s4037_s1 + $0x568] sm:$0xff] }
  0x76   :  { %1854 = vmatpush.bf16.msrb.mxu0 %v3163_v2  ;;  %v3254_v2 = vld [vmem:[%s4037_s1 + $0x5e8] sm:$0xff] }
  0x77   :  { %1880 = vmatpush.bf16.msrb.mxu2 %v3179_v3  ;;  %v3282_v3 = vld [vmem:[%s4038_s2] ss:$0 sm:$0xff] }
  0x78   :  { %1867 = vmatpush.bf16.msrb.mxu1 %v3171_v4  ;;  %v3229_v4 = vld [vmem:[%s4037_s1 + $0x520] sm:$0xff] }
  0x79   :  { %1893 = vmatpush.bf16.msrb.mxu3 %v3187_v5  ;;  %v3245_v5 = vld [vmem:[%s4037_s1 + $0x5a0] sm:$0xff] }
  0x7a   :  { %1855 = vmatpush.bf16.msrb.mxu0 %v3162_v6 }
  0x7b   :  { %1881 = vmatpush.bf16.msrb.mxu2 %v3178_v7  ;;  %v3237_v7 = vld [vmem:[%s4037_s1 + $0x560] sm:$0xff] }
  0x7c   :  { %1868 = vmatpush.bf16.msrb.mxu1 %v3170_v13 }
  0x7d   :  { %1894 = vmatpush.bf16.msrb.mxu3 %v3186_v14  ;;  %v3236_v14 = vld [vmem:[%s4037_s1 + $0x558] sm:$0xff] }
  0x7e   :  { %1856 = vmatpush.bf16.msrb.mxu0 %v3161_v15  ;;  %v3252_v15 = vld [vmem:[%s4037_s1 + $0x5d8] sm:$0xff] }
  0x7f   :  { %1882 = vmatpush.bf16.msrb.mxu2 %v3177_v16 }
  0x80   :  { %1869 = vmatpush.bf16.msrb.mxu1 %v3169_v19 }
  0x81   :  { %1895 = vmatpush.bf16.msrb.mxu3 %v3185_v20  ;;  %1857 = vmatmul.bf16.vlgmr.msrb.gmra.mxu0 %v451_v8  ;;  %v3253_v8 = vld [vmem:[%s4037_s1 + $0x5e0] sm:$0xff] }
  0x82   :  { %1901 = vmatpush.bf16.msra.mxu0 %v3200_v17  ;;  %1883 = vmatmul.bf16.vlgmr.msrb.gmra.mxu2 %v453_v9  ;;  %v3227_v17 = vld [vmem:[%s4037_s1 + $0x510] sm:$0xff] }
  0x83   :  { %1927 = vmatpush.bf16.msra.mxu2 %v3216_v18  ;;  %1870 = vmatmul.bf16.vlgmr.msrb.gmra.mxu1 %v452_v10  ;;  %v3243_v18 = vld [vmem:[%s4037_s1 + $0x590] sm:$0xff] }
  0x84   :  { %1914 = vmatpush.bf16.msra.mxu1 %v3208_v21  ;;  %1896 = vmatmul.bf16.vlgmr.msrb.gmra.mxu3 %v454_v11  ;;  %v3228_v11 = vld [vmem:[%s4037_s1 + $0x518] sm:$0xff] }
  0x85   :  { %1940 = vmatpush.bf16.msra.mxu3 %v3224_v22  ;;  %v3235_v22 = vld [vmem:[%s4037_s1 + $0x550] sm:$0xff] }
  0x86   :  { %1902 = vmatpush.bf16.msra.mxu0 %v3199_v23  ;;  %v3251_v23 = vld [vmem:[%s4037_s1 + $0x5d0] sm:$0xff] }
  0x87   :  { %1928 = vmatpush.bf16.msra.mxu2 %v3215_v24  ;;  %v3226_v24 = vld [vmem:[%s4037_s1 + $0x508] sm:$0xff] }
  0x88   :  { %1915 = vmatpush.bf16.msra.mxu1 %v3207_v25 }
  0x89   :  { %1941 = vmatpush.bf16.msra.mxu3 %v3223_v26  ;;  %v3242_v26 = vld [vmem:[%s4037_s1 + $0x588] sm:$0xff] }
  0x8a   :  { %1903 = vmatpush.bf16.msra.mxu0 %v3198_v27  ;;  %v461_v27 = vld [vmem:[#allocation1 + $0x24] sm:$0xff] }
  0x8b   :  { %1929 = vmatpush.bf16.msra.mxu2 %v3214_v28  ;;  %v463_v28 = vld [vmem:[#allocation1 + $0x36] sm:$0xff] }
  0x8c   :  { %1916 = vmatpush.bf16.msra.mxu1 %v3206_v29 }
  0x8d   :  { %1942 = vmatpush.bf16.msra.mxu3 %v3222_v30  ;;  %v462_v30 = vld [vmem:[#allocation1 + $0x2d] sm:$0xff] }
  0x8e   :  { %1904 = vmatpush.bf16.msra.mxu0 %v3197_v31  ;;  %v464_v31 = vld [vmem:[#allocation1 + $0x3f] sm:$0xff] }
  0x8f   :  { %1930 = vmatpush.bf16.msra.mxu2 %v3213_v32  ;;  %v30_v32 = vld [vmem:[%s4036_s0 + $0x18] sm:$0x1] }
  0x90   :  { %1917 = vmatpush.bf16.msra.mxu1 %v3205_v33  ;;  %466 = vst [vmem:[#allocation1] ss:$9 sm:$0xff] %v30_v32  ;;  %v3234_v33 = vld [vmem:[%s4037_s1 + $0x548] sm:$0xff] }
  0x91   :  { %1943 = vmatpush.bf16.msra.mxu3 %v3221_v34  ;;  %v3250_v34 = vld [vmem:[%s4037_s1 + $0x5c8] sm:$0xff] }
  0x92   :  { %1905 = vmatpush.bf16.msra.mxu0 %v3196_v35 }
  0x93   :  { %1931 = vmatpush.bf16.msra.mxu2 %v3212_v36  ;;  %v3225_v36 = vld [vmem:[%s4037_s1 + $0x500] sm:$0xff] }
  0x94   :  { %1918 = vmatpush.bf16.msra.mxu1 %v3204_v37  ;;  %v3241_v37 = vld [vmem:[%s4037_s1 + $0x580] sm:$0xff] }
  0x95   :  { %1944 = vmatpush.bf16.msra.mxu3 %v3220_v38  ;;  %v3264_v38 = vld [vmem:[%s4037_s1 + $0x638] sm:$0xff] }
  0x96   :  { %1906 = vmatpush.bf16.msra.mxu0 %v3195_v39 }
  0x97   :  { %1932 = vmatpush.bf16.msra.mxu2 %v3211_v40  ;;  %v3233_v40 = vld [vmem:[%s4037_s1 + $0x540] sm:$0xff] }
  0x98   :  { %1919 = vmatpush.bf16.msra.mxu1 %v3203_v41  ;;  %v3249_v41 = vld [vmem:[%s4037_s1 + $0x5c0] sm:$0xff] }
  0x99   :  { %1945 = vmatpush.bf16.msra.mxu3 %v3219_v42  ;;  %v3263_v42 = vld [vmem:[%s4037_s1 + $0x630] sm:$0xff] }
  0x9a   :  { %1907 = vmatpush.bf16.msra.mxu0 %v3194_v43  ;;  %v3262_v43 = vld [vmem:[%s4037_s1 + $0x628] sm:$0xff] }
  0x9b   :  { %1933 = vmatpush.bf16.msra.mxu2 %v3210_v44  ;;  %v3261_v44 = vld [vmem:[%s4037_s1 + $0x620] sm:$0xff] }
  0x9c   :  { %1920 = vmatpush.bf16.msra.mxu1 %v3202_v45 }
  0x9d   :  { %1946 = vmatpush.bf16.msra.mxu3 %v3218_v46 }
  0x9e   :  { %1908 = vmatpush.bf16.msra.mxu0 %v3193_v47  ;;  %v1702_v6 = vpop.f32.mrf.mxu0 }
  0x9f   :  { %1934 = vmatpush.bf16.msra.mxu2 %v3209_v48  ;;  %v1703_v9 = vadd.f32 %v3282_v3, %v1702_v6 }
  0xa0   :  { %1921 = vmatpush.bf16.msra.mxu1 %v3201_v51  ;;  %v1715_v10 = vpop.f32.mrf.mxu1 }
  0xa1   :  { %1947 = vmatpush.bf16.msra.mxu3 %v3217_v52  ;;  %1909 = vmatmul.bf16.vlgmr.msra.gmra.mxu0 %v457_v54  ;;  %v1716_v13 = vadd.f32 %v1715_v10, %v1703_v9  ;;  %v3259_v52 = vld [vmem:[%s4037_s1 + $0x610] sm:$0xff] }
  0xa2   :  { %1953 = vmatpush.bf16.msrb.mxu0 %v3232_v49  ;;  %1935 = vmatmul.bf16.vlgmr.msra.gmra.mxu2 %v459_v55  ;;  %v3260_v49 = vld [vmem:[%s4037_s1 + $0x618] sm:$0xff] }
  0xa3   :  { %1979 = vmatpush.bf16.msrb.mxu2 %v3248_v50  ;;  %1922 = vmatmul.bf16.vlgmr.msra.gmra.mxu1 %v458_v57  ;;  %v3258_v57 = vld [vmem:[%s4037_s1 + $0x608] sm:$0xff] }
  0xa4   :  { %1966 = vmatpush.bf16.msrb.mxu1 %v3240_v53  ;;  %1948 = vmatmul.bf16.vlgmr.msra.gmra.mxu3 %v460_v58 }
  0xa5   :  { %1992 = vmatpush.bf16.msrb.mxu3 %v3256_v56  ;;  %v1728_v16 = vpop.f32.mrf.mxu2 }
  0xa6   :  { %1954 = vmatpush.bf16.msrb.mxu0 %v3231_v59  ;;  %v1729_v19 = vadd.f32 %v1728_v16, %v1716_v13  ;;  %v1704_v21 = vpop.f32.mrf.mxu0  ;;  %v3257_v59 = vld [vmem:[%s4037_s1 + $0x600] sm:$0xff] }
  0xa7   :  { %1980 = vmatpush.bf16.msrb.mxu2 %v3247_v60  ;;  %v1741_v20 = vpop.f32.mrf.mxu3 }
  0xa8   :  { %1967 = vmatpush.bf16.msrb.mxu1 %v3239_v61  ;;  %v1742_v25 = vadd.f32 %v1741_v20, %v1729_v19  ;;  %v1717_v29 = vpop.f32.mrf.mxu1  ;;  %v467_v61 = vld [vmem:[#allocation1] sm:$0xff] }
  0xa9   :  { %1993 = vmatpush.bf16.msrb.mxu3 %v3255_v62  ;;  %v3270_v29 = vld [vmem:[%s4039_s3 + $0x28] sm:$0xff] }
  0xaa   :  { %1955 = vmatpush.bf16.msrb.mxu0 %v3230_v63 }
  0xab   :  { %1981 = vmatpush.bf16.msrb.mxu2 %v3246_v0 }
  0xac   :  { %1968 = vmatpush.bf16.msrb.mxu1 %v3238_v1 }
  0xad   :  { %1994 = vmatpush.bf16.msrb.mxu3 %v3254_v2  ;;  %v1730_v35 = vpop.f32.mrf.mxu2 }
  0xae   :  { %1956 = vmatpush.bf16.msrb.mxu0 %v3229_v4  ;;  %v3267_v35 = vld [vmem:[%s4039_s3 + $0x10] sm:$0xff] }
  0xaf   :  { %1982 = vmatpush.bf16.msrb.mxu2 %v3245_v5  ;;  %v1743_v39 = vpop.f32.mrf.mxu3 }
  0xb0   :  { %1969 = vmatpush.bf16.msrb.mxu1 %v3237_v7 }
  0xb1   :  { %1995 = vmatpush.bf16.msrb.mxu3 %v3253_v8 }
  0xb2   :  { %1957 = vmatpush.bf16.msrb.mxu0 %v3228_v11 }
  0xb3   :  { %1983 = vmatpush.bf16.msrb.mxu2 %v3244_v12 }
  0xb4   :  { %1970 = vmatpush.bf16.msrb.mxu1 %v3236_v14 }
  0xb5   :  { %1996 = vmatpush.bf16.msrb.mxu3 %v3252_v15 }
  0xb6   :  { %1958 = vmatpush.bf16.msrb.mxu0 %v3227_v17 }
  0xb7   :  { %1984 = vmatpush.bf16.msrb.mxu2 %v3243_v18 }
  0xb8   :  { %1971 = vmatpush.bf16.msrb.mxu1 %v3235_v22 }
  0xb9   :  { %1997 = vmatpush.bf16.msrb.mxu3 %v3251_v23  ;;  %v3272_v23 = vld [vmem:[%s4039_s3 + $0x38] sm:$0xff] }
  0xba   :  { %1959 = vmatpush.bf16.msrb.mxu0 %v3226_v24 }
  0xbb   :  { %1985 = vmatpush.bf16.msrb.mxu2 %v3242_v26  ;;  %v3271_v26 = vld [vmem:[%s4039_s3 + $0x30] sm:$0xff] }
  0xbc   :  { %1972 = vmatpush.bf16.msrb.mxu1 %v3234_v33 }
  0xbd   :  { %1998 = vmatpush.bf16.msrb.mxu3 %v3250_v34  ;;  %v3268_v34 = vld [vmem:[%s4039_s3 + $0x18] sm:$0xff] }
  0xbe   :  { %1960 = vmatpush.bf16.msrb.mxu0 %v3225_v36  ;;  %v1754_v45 = vpop.f32.mrf.mxu0  ;;  %v3266_v36 = vld [vmem:[%s4039_s3 + $0x8] sm:$0xff] }
  0xbf   :  { %1986 = vmatpush.bf16.msrb.mxu2 %v3241_v37  ;;  %v1755_v46 = vadd.f32 %v1754_v45, %v1742_v25  ;;  %v3279_v45 = vld [vmem:[%s4041_s5 + $0x30] sm:$0xff] }
  0xc0   :  { %1973 = vmatpush.bf16.msrb.mxu1 %v3233_v40  ;;  %v1767_v47 = vpop.f32.mrf.mxu1 }
  0xc1   :  { %1999 = vmatpush.bf16.msrb.mxu3 %v3249_v41  ;;  %1961 = vmatmul.bf16.vlgmr.msrb.gmra.mxu0 %v461_v27  ;;  %v1768_v48 = vadd.f32 %v1767_v47, %v1755_v46  ;;  %v3280_v41 = vld [vmem:[%s4041_s5 + $0x38] sm:$0xff] }
  0xc2   :  { %2005 = vmatpush.bf16.msra.mxu0 %v3264_v38  ;;  %1987 = vmatmul.bf16.vlgmr.msrb.gmra.mxu2 %v463_v28  ;;  %v3265_v38 = vld [vmem:[%s4039_s3] sm:$0xff] }
  0xc3   :  { %1974 = vmatmul.bf16.vlgmr.msrb.gmra.mxu1 %v462_v30  ;;  %2171 = vmatpush.bf16.msra.mxu2 %v3280_v41 }
  0xc4   :  { %2000 = vmatmul.bf16.vlgmr.msrb.gmra.mxu3 %v464_v31  ;;  %2088 = vmatpush.bf16.msra.mxu1 %v3272_v23  ;;  %v3269_v31 = vld [vmem:[%s4039_s3 + $0x20] sm:$0xff] }
  0xc5   :  { %v1780_v50 = vpop.f32.mrf.mxu2 }
  0xc6   :  { %2006 = vmatpush.bf16.msra.mxu0 %v3263_v42  ;;  %v1781_v51 = vadd.f32 %v1780_v50, %v1768_v48  ;;  %v1756_v54 = vpop.f32.mrf.mxu0  ;;  %v3278_v48 = vld [vmem:[%s4041_s5 + $0x28] sm:$0xff] }
  0xc7   :  { %v1793_v53 = vpop.f32.mrf.mxu3  ;;  %2172 = vmatpush.bf16.msra.mxu2 %v3279_v45 }
  0xc8   :  { %v1794_v55 = vadd.f32 %v1793_v53, %v1781_v51  ;;  %v1769_v56 = vpop.f32.mrf.mxu1  ;;  %2089 = vmatpush.bf16.msra.mxu1 %v3271_v26 }
  0xca   :  { %2007 = vmatpush.bf16.msra.mxu0 %v3262_v43 }
  0xcb   :  { %2173 = vmatpush.bf16.msra.mxu2 %v3278_v48 }
  0xcc   :  { %2090 = vmatpush.bf16.msra.mxu1 %v3270_v29 }
  0xcd   :  { %v1782_v58 = vpop.f32.mrf.mxu2 }
  0xce   :  { %2008 = vmatpush.bf16.msra.mxu0 %v3261_v44 }
  0xcf   :  { %v1795_v60 = vpop.f32.mrf.mxu3 }
  0xd0   :  { %2091 = vmatpush.bf16.msra.mxu1 %v3269_v31 }
  0xd2   :  { %2009 = vmatpush.bf16.msra.mxu0 %v3260_v49 }
  0xd4   :  { %2092 = vmatpush.bf16.msra.mxu1 %v3268_v34 }
  0xd6   :  { %2010 = vmatpush.bf16.msra.mxu0 %v3259_v52  ;;  %v3277_v52 = vld [vmem:[%s4041_s5 + $0x20] sm:$0xff] }
  0xd7   :  { %2174 = vmatpush.bf16.msra.mxu2 %v3277_v52 }
  0xd8   :  { %2093 = vmatpush.bf16.msra.mxu1 %v3267_v35 }
  0xda   :  { %2011 = vmatpush.bf16.msra.mxu0 %v3258_v57  ;;  %v3275_v57 = vld [vmem:[%s4041_s5 + $0x10] sm:$0xff] }
  0xdc   :  { %2094 = vmatpush.bf16.msra.mxu1 %v3266_v36 }
  0xde   :  { %2012 = vmatpush.bf16.msra.mxu0 %v3257_v59  ;;  %v1806_v62 = vpop.f32.mrf.mxu0 }
  0xdf   :  { %v1807_v63 = vadd.f32 %v1806_v62, %v1794_v55  ;;  %v3276_v55 = vld [vmem:[%s4041_s5 + $0x18] sm:$0xff] }
  0xe0   :  { %v1819_v0 = vpop.f32.mrf.mxu1  ;;  %2095 = vmatpush.bf16.msra.mxu1 %v3265_v38  ;;  %2175 = vmatpush.bf16.msra.mxu2 %v3276_v55 }
  0xe1   :  { %2013 = vmatmul.bf16.vlgmr.msra.gmra.mxu0 %v467_v61  ;;  %v1820_v1 = vadd.f32 %v1819_v0, %v1807_v63 }
  0xe4   :  { %2176 = vmatpush.bf16.msra.mxu2 %v3275_v57 }
  0xe5   :  { %v1832_v2 = vpop.f32.mrf.mxu2 }
  0xe6   :  { %v1833_v3 = vadd.f32 %v1832_v2, %v1820_v1  ;;  %v1808_v5 = vpop.f32.mrf.mxu0  ;;  %v3274_v1 = vld [vmem:[%s4041_s5 + $0x8] sm:$0xff]  ;;  %v3273_v2 = vld [vmem:[%s4041_s5] sm:$0xff]  ;;  %s2192_s5 = sshll.u32 %s4043_s7, 4  ;;  %s2193_s5 = int_to_ptr.hbm [resolvable:$true] %s2192_s5 }
  0xe7   :  { %v1845_v4 = vpop.f32.mrf.mxu3 }
  0xe8   :  { %v1846_v6 = vadd.f32 %v1845_v4, %v1833_v3  ;;  %v1821_v7 = vpop.f32.mrf.mxu1  ;;  %2177 = vmatpush.bf16.msra.mxu2 %v3274_v1  ;;  %v3283_v3 = vld [vmem:[%s4040_s4] ss:$0 sm:$0xff] }
  0xec   :  { %2178 = vmatpush.bf16.msra.mxu2 %v3273_v2 }
  0xed   :  { %v1834_v8 = vpop.f32.mrf.mxu2 }
  0xef   :  { %v1847_v9 = vpop.f32.mrf.mxu3 }
  0xf0   :  { %v3284_v9 = vld [vmem:[%s4042_s6] ss:$0 sm:$0xff] }
  0xfe   :  { %v1858_v10 = vpop.f32.mrf.mxu0 }
  0xff   :  { %v1859_v11 = vadd.f32 %v1858_v10, %v1846_v6 }
 0x100   :  { %v1871_v12 = vpop.f32.mrf.mxu1 }
 0x101   :  { %v1872_v13 = vadd.f32 %v1871_v12, %v1859_v11 }
 0x105   :  { %v1884_v14 = vpop.f32.mrf.mxu2 }
 0x106   :  { %v1885_v15 = vadd.f32 %v1884_v14, %v1872_v13  ;;  %v1860_v17 = vpop.f32.mrf.mxu0 }
 0x107   :  { %v1897_v16 = vpop.f32.mrf.mxu3 }
 0x108   :  { %v1898_v18 = vadd.f32 %v1897_v16, %v1885_v15  ;;  %v1873_v19 = vpop.f32.mrf.mxu1 }
 0x10d   :  { %v1886_v20 = vpop.f32.mrf.mxu2 }
 0x10f   :  { %v1899_v21 = vpop.f32.mrf.mxu3 }
 0x11e   :  { %v1910_v22 = vpop.f32.mrf.mxu0 }
 0x11f   :  { %v1911_v42 = vadd.f32 %v1910_v22, %v1898_v18 }
 0x120   :  { %v1923_v24 = vpop.f32.mrf.mxu1 }
 0x121   :  { %v1924_v47 = vadd.f32 %v1923_v24, %v1911_v42 }
 0x125   :  { %v1936_v25 = vpop.f32.mrf.mxu2 }
 0x126   :  { %v1912_v28 = vpop.f32.mrf.mxu0  ;;  %v1937_v49 = vadd.f32 %v1936_v25, %v1924_v47 }
 0x127   :  { %v1949_v27 = vpop.f32.mrf.mxu3 }
 0x128   :  { %v1925_v30 = vpop.f32.mrf.mxu1  ;;  %v1950_v53 = vadd.f32 %v1949_v27, %v1937_v49 }
 0x12d   :  { %v1938_v32 = vpop.f32.mrf.mxu2 }
 0x12f   :  { %v1951_v33 = vpop.f32.mrf.mxu3 }
 0x13e   :  { %v1962_v37 = vpop.f32.mrf.mxu0 }
 0x13f   :  { %v1963_v54 = vadd.f32 %v1962_v37, %v1950_v53 }
 0x140   :  { %v1975_v39 = vpop.f32.mrf.mxu1 }
 0x141   :  { %v1976_v56 = vadd.f32 %v1975_v39, %v1963_v54 }
 0x145   :  { %v1988_v40 = vpop.f32.mrf.mxu2 }
 0x146   :  { %v1964_v44 = vpop.f32.mrf.mxu0  ;;  %v1989_v58 = vadd.f32 %v1988_v40, %v1976_v56 }
 0x147   :  { %v2001_v43 = vpop.f32.mrf.mxu3 }
 0x148   :  { %v1977_v46 = vpop.f32.mrf.mxu1  ;;  %v2002_v59 = vadd.f32 %v2001_v43, %v1989_v58 }
 0x14d   :  { %v1990_v50 = vpop.f32.mrf.mxu2 }
 0x14f   :  { %v2003_v51 = vpop.f32.mrf.mxu3 }
 0x15e   :  { %v2014_v60 = vpop.f32.mrf.mxu0 }
 0x15f   :  { %v2015_v61 = vadd.f32 %v2014_v60, %v2002_v59 }
 0x161   :  { %v2018_v62 = vmax.f32 %v2015_v61, 0.0 }
 0x163   :  { %v2019_v63 = vpack.c.bf16 %v2018_v62, %v2018_v62 }
 0x165   :  { %2096 = vmatmul.bf16.vlgmr.msra.gmra.mxu1 %v2019_v63 }
 0x166   :  { %v2016_v0 = vpop.f32.mrf.mxu0 }
 0x1e2   :  { %v2097_v4 = vpop.f32.mrf.mxu1 }
 0x1e3   :  { %v2098_v5 = vadd.f32 %v3283_v3, %v2097_v4 }
 0x1e5   :  { %v2101_v6 = vmax.f32 %v2098_v5, 0.0 }
 0x1e7   :  { %v2102_v7 = vpack.c.bf16 %v2101_v6, %v2101_v6 }
 0x1e9   :  { %2179 = vmatmul.bf16.vlgmr.msra.gmra.mxu2 %v2102_v7 }
 0x1ea   :  { %v2099_v8 = vpop.f32.mrf.mxu1 }
 0x26c   :  { %v2180_v10 = vpop.f32.mrf.mxu2 }
 0x26d   :  { %v2181_v11 = vadd.f32 %v3284_v9, %v2180_v10 }
 0x26f   :  { %2184 = vst [vmem:[#allocation2] sm:$0x3] %v2181_v11 }
 0x270   :  { %2195 = dma.vmem_to_hbm [thread:$0]  %s2191_s24, 32, %s2193_s5, [#allocation3]  }
 0x274   :  { %v2182_v12 = vpop.f32.mrf.mxu2 }
 0x275   :  { %3309 = dma.done.wait [#allocation3], 32  }
 0x276   :  { %3310 = vsyncadd [#allocation3], 4294967264 }
 0x277   :  { %2200 = vsyncpa [#allocation3], 1 }

</bundles_post_ra>
